<compile_context>
chip_gen: v6e
topology: v6e:2x2x1
jax: 0.10.0
libtpu: 0.0.40
codegen_flags: <defaults>
</compile_context>

<pallas_src>
import numpy as np
import jax
import jax.numpy as jnp
from jax import lax
from jax.experimental import pallas as pl
from jax.experimental.pallas import tpu as pltpu

PAD = 128          # lane padding for every channel / feature dim
K = 5              # conv kernel size
C1, C2, F1 = 10, 20, 50


# ----------------------------------------------------------------------------
# Fused Pallas kernel
# ----------------------------------------------------------------------------
def cnn_kernel(p1_ref, w1_ref, b1_ref, sel_ref, w2_ref, b2_ref,
               wf1_ref, bf1_ref, wf2_ref, bf2_ref, o_ref):
    f32 = jnp.float32

    # ---- conv1: single im2col matmul over all 4 pool offsets, then 2x2 maxpool+bias+relu
    m1 = p1_ref.shape[0] // 4                      # pooled conv1 positions = N*8*8
    c1 = jnp.dot(p1_ref[...], w1_ref[...], preferred_element_type=f32)      # (4*m1, 128)
    a1 = jnp.maximum(jnp.maximum(c1[0:m1], c1[m1:2 * m1]),
                     jnp.maximum(c1[2 * m1:3 * m1], c1[3 * m1:4 * m1]))
    a1 = jnp.maximum(a1 + b1_ref[...], 0.0)        # (m1, 128): rows=(n,y,x), lanes=ch

    # ---- conv2: 25 taps; each tap = (constant 0/1 row-gather matmul) @ (per-tap weights)
    n_taps = sel_ref.shape[0]
    acc = jnp.dot(jnp.dot(sel_ref[0], a1, preferred_element_type=f32),
                  w2_ref[0], preferred_element_type=f32)                    # (r2, 128)
    for t in range(1, n_taps):                     # static unroll, MXU is idle anyway
        xt = jnp.dot(sel_ref[t], a1, preferred_element_type=f32)
        acc = acc + jnp.dot(xt, w2_ref[t], preferred_element_type=f32)
    r2 = sel_ref.shape[1]                          # 16 * npad prepool rows
    q = r2 // 4                                    # rows per pool-offset group
    a2 = jnp.maximum(jnp.maximum(acc[0:q], acc[q:2 * q]),
                     jnp.maximum(acc[2 * q:3 * q], acc[3 * q:4 * q]))
    a2 = jnp.maximum(a2 + b2_ref[...], 0.0)        # (4*npad, 128): rows=(s, n), lanes=ch

    # ---- fc1: torch's view(-1, 80) folded into 4 per-position weight slices
    npad = q // 4
    h = jnp.dot(a2[0:npad], wf1_ref[0], preferred_element_type=f32)
    for s in range(1, 4):
        h = h + jnp.dot(a2[s * npad:(s + 1) * npad], wf1_ref[s],
                        preferred_element_type=f32)
    h = jnp.maximum(h + bf1_ref[...], 0.0)         # (npad, 128)
    # F.dropout: identity in eval mode.

    # ---- fc2 + sigmoid (lane-dense padded output; wrapper slices [:N, :1])
    y = jnp.dot(h, wf2_ref[...], preferred_element_type=f32) + bf2_ref[...]
    o_ref[...] = pl.reciprocal(1.0 + jnp.exp(-y), approx=False)


# ----------------------------------------------------------------------------
# One-time constant / weight preprocessing (hoisted out of the per-call path)
# ----------------------------------------------------------------------------
def prepare_constants(params, n_batch):
    npad = ((n_batch + 7) // 8) * 8                # batch padded to sublane multiple
    m1 = 64 * n_batch                              # rows of pooled conv1 map (N*8*8)

    # conv1 weight (10,1,5,5) -> (25,10) -> zero-padded (128,128); bias -> (1,128)
    w1 = np.asarray(params["w1"], np.float32).reshape(C1, K * K).T
    w1col = np.zeros((PAD, PAD), np.float32); w1col[:K * K, :C1] = w1
    b1 = np.zeros((1, PAD), np.float32); b1[0, :C1] = np.asarray(params["b1"])

    # conv2 per-tap weights (25,128,128) and per-tap 0/1 row-selection matrices
    w2 = np.asarray(params["w2"], np.float32)      # (20,10,5,5) OIHW
    w2sl = np.zeros((K * K, PAD, PAD), np.float32)
    sel = np.zeros((K * K, 16 * npad, m1), np.float32)
    for ki in range(K):
        for kj in range(K):
            t = ki * K + kj
            w2sl[t, :C1, :C2] = w2[:, :, ki, kj].T
            for dh in range(2):
                for dw in range(2):
                    for ph in range(2):
                        for pw in range(2):
                            oh, ow = 2 * ph + dh, 2 * pw + dw
                            s = ph * 2 + pw
                            for b in range(n_batch):
                                qrow = (dh * 2 + dw) * (4 * npad) + s * npad + b
                                sel[t, qrow, b * 64 + (oh + ki) * 8 + (ow + kj)] = 1.0
    b2 = np.zeros((1, PAD), np.float32); b2[0, :C2] = np.asarray(params["b2"])

    # fc1 weight split per spatial position: torch flatten feature index = oc*4 + s
    wf1 = np.asarray(params["wf1"], np.float32)    # (50, 80)
    wf1sl = np.zeros((4, PAD, PAD), np.float32)
    for s in range(4):
        wf1sl[s, :C2, :F1] = wf1[:, s::4].T        # (20, 50)
    bf1 = np.zeros((1, PAD), np.float32); bf1[0, :F1] = np.asarray(params["bf1"])

    wf2 = np.zeros((PAD, PAD), np.float32)
    wf2[:F1, 0] = np.asarray(params["wf2"], np.float32)[0]
    bf2 = np.zeros((1, PAD), np.float32); bf2[0, 0] = float(np.asarray(params["bf2"])[0])

    consts = dict(w1col=w1col, b1=b1, sel=sel, w2sl=w2sl, b2=b2,
                  wf1sl=wf1sl, bf1=bf1, wf2=wf2, bf2=bf2)
    return {k: jnp.asarray(v) for k, v in consts.items()}


# ----------------------------------------------------------------------------
# Jitted forward: conv1 im2col glue + single fused pallas_call
# ----------------------------------------------------------------------------
def _full_spec(shape):
    nd = len(shape)
    return pl.BlockSpec(shape, lambda i, _nd=nd: (0,) * _nd)


def cnn_forward_pallas(x_nchw, consts):
    n = x_nchw.shape[0]
    npad = consts["sel"].shape[1] // 16

    # conv1 im2col (input-dependent glue), grouped by 2x2 pool offset, cols = (ki,kj)
    xh = x_nchw[:, 0, :, :]                         # (N, 20, 20), single input channel
    groups = []
    for dh in range(2):
        for dw in range(2):
            taps = [xh[:, dh + ki: dh + ki + 16: 2, dw + kj: dw + kj + 16: 2]
                    for ki in range(K) for kj in range(K)]
            groups.append(jnp.stack(taps, axis=-1).reshape(n * 64, K * K))
    p1 = jnp.concatenate(groups, axis=0).astype(jnp.float32)     # (4*N*64, 25)
    p1 = jnp.pad(p1, ((0, 0), (0, PAD - K * K)))                 # lane-dense (.., 128)

    args = (p1, consts["w1col"], consts["b1"], consts["sel"], consts["w2sl"],
            consts["b2"], consts["wf1sl"], consts["bf1"], consts["wf2"], consts["bf2"])

    out = pl.pallas_call(
        cnn_kernel,
        out_shape=jax.ShapeDtypeStruct((npad, PAD), jnp.float32),
        grid=(1,),                                   # tiny workload -> one program
        in_specs=[_full_spec(a.shape) for a in args],
        out_specs=_full_spec((npad, PAD)),
        compiler_params=pltpu.CompilerParams(dimension_semantics=("arbitrary",)),
    )(*args)
    return out[:n, :1]


# ----------------------------------------------------------------------------
# Pure-JAX reference (sanity check)
# ----------------------------------------------------------------------------
def cnn_forward_ref(x, p):
    dn = ("NCHW", "OIHW", "NCHW")
    y = lax.conv_general_dilated(x, p["w1"], (1, 1), "VALID", dimension_numbers=dn)
    y = y + p["b1"][None, :, None, None]
    y = lax.reduce_window(y, -jnp.inf, lax.max, (1, 1, 2, 2), (1, 1, 2, 2), "VALID")
    y = jnp.maximum(y, 0.0)
    y = lax.conv_general_dilated(y, p["w2"], (1, 1), "VALID", dimension_numbers=dn)
    y = y + p["b2"][None, :, None, None]
    y = lax.reduce_window(y, -jnp.inf, lax.max, (1, 1, 2, 2), (1, 1, 2, 2), "VALID")
    y = jnp.maximum(y, 0.0)
    y = y.reshape(y.shape[0], -1)
    h = jnp.maximum(y @ p["wf1"].T + p["bf1"], 0.0)
    return jax.nn.sigmoid(h @ p["wf2"].T + p["bf2"])


# ----------------------------------------------------------------------------
# Main
# ----------------------------------------------------------------------------
if __name__ == "__main__":
    key = jax.random.PRNGKey(0)
    ks = jax.random.split(key, 9)

    params = {
        "w1":  0.1 * jax.random.normal(ks[0], (10, 1, 5, 5), jnp.float32),
        "b1":  0.1 * jax.random.normal(ks[1], (10,), jnp.float32),
        "w2":  0.1 * jax.random.normal(ks[2], (20, 10, 5, 5), jnp.float32),
        "b2":  0.1 * jax.random.normal(ks[3], (20,), jnp.float32),
        "wf1": 0.1 * jax.random.normal(ks[4], (50, 80), jnp.float32),
        "bf1": 0.1 * jax.random.normal(ks[5], (50,), jnp.float32),
        "wf2": 0.1 * jax.random.normal(ks[6], (1, 50), jnp.float32),
        "bf2": 0.1 * jax.random.normal(ks[7], (1,), jnp.float32),
    }

    # fc1 expects 80 = 20 * 2 * 2 features -> input spatial must be 20x20.
    x = jax.random.normal(ks[8], (2, 1, 20, 20), jnp.float32)

    consts = prepare_constants(params, x.shape[0])   # one-time weight preprocessing
    fwd = jax.jit(cnn_forward_pallas)

    out = jax.block_until_ready(fwd(x, consts))
    ref = jax.block_until_ready(cnn_forward_ref(x, params))

    assert out.shape == (2, 1), out.shape
    assert jnp.allclose(out, ref, atol=2e-4, rtol=2e-4), (out, ref)

    print("KERNEL_OK")
</pallas_src>

<mosaic_0001>
module attributes {stable_mosaic.version = 11 : i64} {
  func.func @cnn_kernel(%arg0: i32, %arg1: memref<512x128xf32, #tpu.memory_space<vmem>>, %arg2: memref<128x128xf32, #tpu.memory_space<vmem>>, %arg3: memref<1x128xf32, #tpu.memory_space<vmem>>, %arg4: memref<25x128x128xf32, #tpu.memory_space<vmem>>, %arg5: memref<25x128x128xf32, #tpu.memory_space<vmem>>, %arg6: memref<1x128xf32, #tpu.memory_space<vmem>>, %arg7: memref<4x128x128xf32, #tpu.memory_space<vmem>>, %arg8: memref<1x128xf32, #tpu.memory_space<vmem>>, %arg9: memref<128x128xf32, #tpu.memory_space<vmem>>, %arg10: memref<1x128xf32, #tpu.memory_space<vmem>>, %arg11: memref<8x128xf32, #tpu.memory_space<vmem>>) attributes {dimension_semantics = [#tpu.dimension_semantics<arbitrary>], iteration_bounds = array<i64: 1>, scalar_prefetch = 0 : i64, scratch_operands = 0 : i64, tpu.core_type = #tpu.core_type<tc>, window_params = [{pipeline_mode = #tpu.pipeline_mode<synchronous>, transform_indices = @transform_0, window_bounds = array<i64: 512, 128>}, {pipeline_mode = #tpu.pipeline_mode<synchronous>, transform_indices = @transform_1, window_bounds = array<i64: 128, 128>}, {pipeline_mode = #tpu.pipeline_mode<synchronous>, transform_indices = @transform_2, window_bounds = array<i64: 1, 128>}, {pipeline_mode = #tpu.pipeline_mode<synchronous>, transform_indices = @transform_3, window_bounds = array<i64: 25, 128, 128>}, {pipeline_mode = #tpu.pipeline_mode<synchronous>, transform_indices = @transform_4, window_bounds = array<i64: 25, 128, 128>}, {pipeline_mode = #tpu.pipeline_mode<synchronous>, transform_indices = @transform_5, window_bounds = array<i64: 1, 128>}, {pipeline_mode = #tpu.pipeline_mode<synchronous>, transform_indices = @transform_6, window_bounds = array<i64: 4, 128, 128>}, {pipeline_mode = #tpu.pipeline_mode<synchronous>, transform_indices = @transform_7, window_bounds = array<i64: 1, 128>}, {pipeline_mode = #tpu.pipeline_mode<synchronous>, transform_indices = @transform_8, window_bounds = array<i64: 128, 128>}, {pipeline_mode = #tpu.pipeline_mode<synchronous>, transform_indices = @transform_9, window_bounds = array<i64: 1, 128>}, {pipeline_mode = #tpu.pipeline_mode<synchronous>, transform_indices = @transform_10, window_bounds = array<i64: 8, 128>}]} {
    %c0 = arith.constant 0 : index
    %c0_0 = arith.constant 0 : index
    %0 = vector.load %arg1[%c0, %c0_0] : memref<512x128xf32, #tpu.memory_space<vmem>>, vector<512x128xf32>
    %c0_1 = arith.constant 0 : index
    %c0_2 = arith.constant 0 : index
    %1 = vector.load %arg2[%c0_1, %c0_2] : memref<128x128xf32, #tpu.memory_space<vmem>>, vector<128x128xf32>
    %cst = arith.constant dense<0.000000e+00> : vector<512x128xf32>
    %2 = tpu.matmul %0, %1, %cst {dimension_numbers = #tpu.dot_dimension_numbers<[1], [0], [0], [1], [0, 0, 1, 1], [], []>} : vector<512x128xf32>, vector<128x128xf32>, vector<512x128xf32> -> vector<512x128xf32>
    %3 = vector.extract_strided_slice %2 {offsets = [0, 0], sizes = [128, 128], strides = [1, 1]} : vector<512x128xf32> to vector<128x128xf32>
    %4 = vector.extract_strided_slice %2 {offsets = [128, 0], sizes = [128, 128], strides = [1, 1]} : vector<512x128xf32> to vector<128x128xf32>
    %5 = arith.maximumf %3, %4 : vector<128x128xf32>
    %6 = vector.extract_strided_slice %2 {offsets = [256, 0], sizes = [128, 128], strides = [1, 1]} : vector<512x128xf32> to vector<128x128xf32>
    %7 = vector.extract_strided_slice %2 {offsets = [384, 0], sizes = [128, 128], strides = [1, 1]} : vector<512x128xf32> to vector<128x128xf32>
    %8 = arith.maximumf %6, %7 : vector<128x128xf32>
    %9 = arith.maximumf %5, %8 : vector<128x128xf32>
    %c0_3 = arith.constant 0 : index
    %c0_4 = arith.constant 0 : index
    %10 = vector.load %arg3[%c0_3, %c0_4] : memref<1x128xf32, #tpu.memory_space<vmem>>, vector<1x128xf32>
    %11 = vector.broadcast %10 : vector<1x128xf32> to vector<128x128xf32>
    %12 = arith.addf %9, %11 : vector<128x128xf32>
    %cst_5 = arith.constant 0.000000e+00 : f32
    %13 = vector.broadcast %cst_5 : f32 to vector<128x128xf32>
    %14 = arith.maximumf %12, %13 : vector<128x128xf32>
    %c0_6 = arith.constant 0 : index
    %c0_7 = arith.constant 0 : index
    %c0_8 = arith.constant 0 : index
    %15 = vector.load %arg4[%c0_6, %c0_7, %c0_8] : memref<25x128x128xf32, #tpu.memory_space<vmem>>, vector<1x128x128xf32>
    %16 = vector.shape_cast %15 : vector<1x128x128xf32> to vector<128x128xf32>
    %cst_9 = arith.constant dense<0.000000e+00> : vector<128x128xf32>
    %17 = tpu.matmul %16, %14, %cst_9 {dimension_numbers = #tpu.dot_dimension_numbers<[1], [0], [0], [1], [0, 0, 1, 1], [], []>} : vector<128x128xf32>, vector<128x128xf32>, vector<128x128xf32> -> vector<128x128xf32>
    %c0_10 = arith.constant 0 : index
    %c0_11 = arith.constant 0 : index
    %c0_12 = arith.constant 0 : index
    %18 = vector.load %arg5[%c0_10, %c0_11, %c0_12] : memref<25x128x128xf32, #tpu.memory_space<vmem>>, vector<1x128x128xf32>
    %19 = vector.shape_cast %18 : vector<1x128x128xf32> to vector<128x128xf32>
    %cst_13 = arith.constant dense<0.000000e+00> : vector<128x128xf32>
    %20 = tpu.matmul %17, %19, %cst_13 {dimension_numbers = #tpu.dot_dimension_numbers<[1], [0], [0], [1], [0, 0, 1, 1], [], []>} : vector<128x128xf32>, vector<128x128xf32>, vector<128x128xf32> -> vector<128x128xf32>
    %c1 = arith.constant 1 : index
    %c0_14 = arith.constant 0 : index
    %c0_15 = arith.constant 0 : index
    %21 = vector.load %arg4[%c1, %c0_14, %c0_15] : memref<25x128x128xf32, #tpu.memory_space<vmem>>, vector<1x128x128xf32>
    %22 = vector.shape_cast %21 : vector<1x128x128xf32> to vector<128x128xf32>
    %cst_16 = arith.constant dense<0.000000e+00> : vector<128x128xf32>
    %23 = tpu.matmul %22, %14, %cst_16 {dimension_numbers = #tpu.dot_dimension_numbers<[1], [0], [0], [1], [0, 0, 1, 1], [], []>} : vector<128x128xf32>, vector<128x128xf32>, vector<128x128xf32> -> vector<128x128xf32>
    %c1_17 = arith.constant 1 : index
    %c0_18 = arith.constant 0 : index
    %c0_19 = arith.constant 0 : index
    %24 = vector.load %arg5[%c1_17, %c0_18, %c0_19] : memref<25x128x128xf32, #tpu.memory_space<vmem>>, vector<1x128x128xf32>
    %25 = vector.shape_cast %24 : vector<1x128x128xf32> to vector<128x128xf32>
    %cst_20 = arith.constant dense<0.000000e+00> : vector<128x128xf32>
    %26 = tpu.matmul %23, %25, %cst_20 {dimension_numbers = #tpu.dot_dimension_numbers<[1], [0], [0], [1], [0, 0, 1, 1], [], []>} : vector<128x128xf32>, vector<128x128xf32>, vector<128x128xf32> -> vector<128x128xf32>
    %27 = arith.addf %20, %26 : vector<128x128xf32>
    %c2 = arith.constant 2 : index
    %c0_21 = arith.constant 0 : index
    %c0_22 = arith.constant 0 : index
    %28 = vector.load %arg4[%c2, %c0_21, %c0_22] : memref<25x128x128xf32, #tpu.memory_space<vmem>>, vector<1x128x128xf32>
    %29 = vector.shape_cast %28 : vector<1x128x128xf32> to vector<128x128xf32>
    %cst_23 = arith.constant dense<0.000000e+00> : vector<128x128xf32>
    %30 = tpu.matmul %29, %14, %cst_23 {dimension_numbers = #tpu.dot_dimension_numbers<[1], [0], [0], [1], [0, 0, 1, 1], [], []>} : vector<128x128xf32>, vector<128x128xf32>, vector<128x128xf32> -> vector<128x128xf32>
    %c2_24 = arith.constant 2 : index
    %c0_25 = arith.constant 0 : index
    %c0_26 = arith.constant 0 : index
    %31 = vector.load %arg5[%c2_24, %c0_25, %c0_26] : memref<25x128x128xf32, #tpu.memory_space<vmem>>, vector<1x128x128xf32>
    %32 = vector.shape_cast %31 : vector<1x128x128xf32> to vector<128x128xf32>
    %cst_27 = arith.constant dense<0.000000e+00> : vector<128x128xf32>
    %33 = tpu.matmul %30, %32, %cst_27 {dimension_numbers = #tpu.dot_dimension_numbers<[1], [0], [0], [1], [0, 0, 1, 1], [], []>} : vector<128x128xf32>, vector<128x128xf32>, vector<128x128xf32> -> vector<128x128xf32>
    %34 = arith.addf %27, %33 : vector<128x128xf32>
    %c3 = arith.constant 3 : index
    %c0_28 = arith.constant 0 : index
    %c0_29 = arith.constant 0 : index
    %35 = vector.load %arg4[%c3, %c0_28, %c0_29] : memref<25x128x128xf32, #tpu.memory_space<vmem>>, vector<1x128x128xf32>
    %36 = vector.shape_cast %35 : vector<1x128x128xf32> to vector<128x128xf32>
    %cst_30 = arith.constant dense<0.000000e+00> : vector<128x128xf32>
    %37 = tpu.matmul %36, %14, %cst_30 {dimension_numbers = #tpu.dot_dimension_numbers<[1], [0], [0], [1], [0, 0, 1, 1], [], []>} : vector<128x128xf32>, vector<128x128xf32>, vector<128x128xf32> -> vector<128x128xf32>
    %c3_31 = arith.constant 3 : index
    %c0_32 = arith.constant 0 : index
    %c0_33 = arith.constant 0 : index
    %38 = vector.load %arg5[%c3_31, %c0_32, %c0_33] : memref<25x128x128xf32, #tpu.memory_space<vmem>>, vector<1x128x128xf32>
    %39 = vector.shape_cast %38 : vector<1x128x128xf32> to vector<128x128xf32>
    %cst_34 = arith.constant dense<0.000000e+00> : vector<128x128xf32>
    %40 = tpu.matmul %37, %39, %cst_34 {dimension_numbers = #tpu.dot_dimension_numbers<[1], [0], [0], [1], [0, 0, 1, 1], [], []>} : vector<128x128xf32>, vector<128x128xf32>, vector<128x128xf32> -> vector<128x128xf32>
    %41 = arith.addf %34, %40 : vector<128x128xf32>
    %c4 = arith.constant 4 : index
    %c0_35 = arith.constant 0 : index
    %c0_36 = arith.constant 0 : index
    %42 = vector.load %arg4[%c4, %c0_35, %c0_36] : memref<25x128x128xf32, #tpu.memory_space<vmem>>, vector<1x128x128xf32>
    %43 = vector.shape_cast %42 : vector<1x128x128xf32> to vector<128x128xf32>
    %cst_37 = arith.constant dense<0.000000e+00> : vector<128x128xf32>
    %44 = tpu.matmul %43, %14, %cst_37 {dimension_numbers = #tpu.dot_dimension_numbers<[1], [0], [0], [1], [0, 0, 1, 1], [], []>} : vector<128x128xf32>, vector<128x128xf32>, vector<128x128xf32> -> vector<128x128xf32>
    %c4_38 = arith.constant 4 : index
    %c0_39 = arith.constant 0 : index
    %c0_40 = arith.constant 0 : index
    %45 = vector.load %arg5[%c4_38, %c0_39, %c0_40] : memref<25x128x128xf32, #tpu.memory_space<vmem>>, vector<1x128x128xf32>
    %46 = vector.shape_cast %45 : vector<1x128x128xf32> to vector<128x128xf32>
    %cst_41 = arith.constant dense<0.000000e+00> : vector<128x128xf32>
    %47 = tpu.matmul %44, %46, %cst_41 {dimension_numbers = #tpu.dot_dimension_numbers<[1], [0], [0], [1], [0, 0, 1, 1], [], []>} : vector<128x128xf32>, vector<128x128xf32>, vector<128x128xf32> -> vector<128x128xf32>
    %48 = arith.addf %41, %47 : vector<128x128xf32>
    %c5 = arith.constant 5 : index
    %c0_42 = arith.constant 0 : index
    %c0_43 = arith.constant 0 : index
    %49 = vector.load %arg4[%c5, %c0_42, %c0_43] : memref<25x128x128xf32, #tpu.memory_space<vmem>>, vector<1x128x128xf32>
    %50 = vector.shape_cast %49 : vector<1x128x128xf32> to vector<128x128xf32>
    %cst_44 = arith.constant dense<0.000000e+00> : vector<128x128xf32>
    %51 = tpu.matmul %50, %14, %cst_44 {dimension_numbers = #tpu.dot_dimension_numbers<[1], [0], [0], [1], [0, 0, 1, 1], [], []>} : vector<128x128xf32>, vector<128x128xf32>, vector<128x128xf32> -> vector<128x128xf32>
    %c5_45 = arith.constant 5 : index
    %c0_46 = arith.constant 0 : index
    %c0_47 = arith.constant 0 : index
    %52 = vector.load %arg5[%c5_45, %c0_46, %c0_47] : memref<25x128x128xf32, #tpu.memory_space<vmem>>, vector<1x128x128xf32>
    %53 = vector.shape_cast %52 : vector<1x128x128xf32> to vector<128x128xf32>
    %cst_48 = arith.constant dense<0.000000e+00> : vector<128x128xf32>
    %54 = tpu.matmul %51, %53, %cst_48 {dimension_numbers = #tpu.dot_dimension_numbers<[1], [0], [0], [1], [0, 0, 1, 1], [], []>} : vector<128x128xf32>, vector<128x128xf32>, vector<128x128xf32> -> vector<128x128xf32>
    %55 = arith.addf %48, %54 : vector<128x128xf32>
    %c6 = arith.constant 6 : index
    %c0_49 = arith.constant 0 : index
    %c0_50 = arith.constant 0 : index
    %56 = vector.load %arg4[%c6, %c0_49, %c0_50] : memref<25x128x128xf32, #tpu.memory_space<vmem>>, vector<1x128x128xf32>
    %57 = vector.shape_cast %56 : vector<1x128x128xf32> to vector<128x128xf32>
    %cst_51 = arith.constant dense<0.000000e+00> : vector<128x128xf32>
    %58 = tpu.matmul %57, %14, %cst_51 {dimension_numbers = #tpu.dot_dimension_numbers<[1], [0], [0], [1], [0, 0, 1, 1], [], []>} : vector<128x128xf32>, vector<128x128xf32>, vector<128x128xf32> -> vector<128x128xf32>
    %c6_52 = arith.constant 6 : index
    %c0_53 = arith.constant 0 : index
    %c0_54 = arith.constant 0 : index
    %59 = vector.load %arg5[%c6_52, %c0_53, %c0_54] : memref<25x128x128xf32, #tpu.memory_space<vmem>>, vector<1x128x128xf32>
    %60 = vector.shape_cast %59 : vector<1x128x128xf32> to vector<128x128xf32>
    %cst_55 = arith.constant dense<0.000000e+00> : vector<128x128xf32>
    %61 = tpu.matmul %58, %60, %cst_55 {dimension_numbers = #tpu.dot_dimension_numbers<[1], [0], [0], [1], [0, 0, 1, 1], [], []>} : vector<128x128xf32>, vector<128x128xf32>, vector<128x128xf32> -> vector<128x128xf32>
    %62 = arith.addf %55, %61 : vector<128x128xf32>
    %c7 = arith.constant 7 : index
    %c0_56 = arith.constant 0 : index
    %c0_57 = arith.constant 0 : index
    %63 = vector.load %arg4[%c7, %c0_56, %c0_57] : memref<25x128x128xf32, #tpu.memory_space<vmem>>, vector<1x128x128xf32>
    %64 = vector.shape_cast %63 : vector<1x128x128xf32> to vector<128x128xf32>
    %cst_58 = arith.constant dense<0.000000e+00> : vector<128x128xf32>
    %65 = tpu.matmul %64, %14, %cst_58 {dimension_numbers = #tpu.dot_dimension_numbers<[1], [0], [0], [1], [0, 0, 1, 1], [], []>} : vector<128x128xf32>, vector<128x128xf32>, vector<128x128xf32> -> vector<128x128xf32>
    %c7_59 = arith.constant 7 : index
    %c0_60 = arith.constant 0 : index
    %c0_61 = arith.constant 0 : index
    %66 = vector.load %arg5[%c7_59, %c0_60, %c0_61] : memref<25x128x128xf32, #tpu.memory_space<vmem>>, vector<1x128x128xf32>
    %67 = vector.shape_cast %66 : vector<1x128x128xf32> to vector<128x128xf32>
    %cst_62 = arith.constant dense<0.000000e+00> : vector<128x128xf32>
    %68 = tpu.matmul %65, %67, %cst_62 {dimension_numbers = #tpu.dot_dimension_numbers<[1], [0], [0], [1], [0, 0, 1, 1], [], []>} : vector<128x128xf32>, vector<128x128xf32>, vector<128x128xf32> -> vector<128x128xf32>
    %69 = arith.addf %62, %68 : vector<128x128xf32>
    %c8 = arith.constant 8 : index
    %c0_63 = arith.constant 0 : index
    %c0_64 = arith.constant 0 : index
    %70 = vector.load %arg4[%c8, %c0_63, %c0_64] : memref<25x128x128xf32, #tpu.memory_space<vmem>>, vector<1x128x128xf32>
    %71 = vector.shape_cast %70 : vector<1x128x128xf32> to vector<128x128xf32>
    %cst_65 = arith.constant dense<0.000000e+00> : vector<128x128xf32>
    %72 = tpu.matmul %71, %14, %cst_65 {dimension_numbers = #tpu.dot_dimension_numbers<[1], [0], [0], [1], [0, 0, 1, 1], [], []>} : vector<128x128xf32>, vector<128x128xf32>, vector<128x128xf32> -> vector<128x128xf32>
    %c8_66 = arith.constant 8 : index
    %c0_67 = arith.constant 0 : index
    %c0_68 = arith.constant 0 : index
    %73 = vector.load %arg5[%c8_66, %c0_67, %c0_68] : memref<25x128x128xf32, #tpu.memory_space<vmem>>, vector<1x128x128xf32>
    %74 = vector.shape_cast %73 : vector<1x128x128xf32> to vector<128x128xf32>
    %cst_69 = arith.constant dense<0.000000e+00> : vector<128x128xf32>
    %75 = tpu.matmul %72, %74, %cst_69 {dimension_numbers = #tpu.dot_dimension_numbers<[1], [0], [0], [1], [0, 0, 1, 1], [], []>} : vector<128x128xf32>, vector<128x128xf32>, vector<128x128xf32> -> vector<128x128xf32>
    %76 = arith.addf %69, %75 : vector<128x128xf32>
    %c9 = arith.constant 9 : index
    %c0_70 = arith.constant 0 : index
    %c0_71 = arith.constant 0 : index
    %77 = vector.load %arg4[%c9, %c0_70, %c0_71] : memref<25x128x128xf32, #tpu.memory_space<vmem>>, vector<1x128x128xf32>
    %78 = vector.shape_cast %77 : vector<1x128x128xf32> to vector<128x128xf32>
    %cst_72 = arith.constant dense<0.000000e+00> : vector<128x128xf32>
    %79 = tpu.matmul %78, %14, %cst_72 {dimension_numbers = #tpu.dot_dimension_numbers<[1], [0], [0], [1], [0, 0, 1, 1], [], []>} : vector<128x128xf32>, vector<128x128xf32>, vector<128x128xf32> -> vector<128x128xf32>
    %c9_73 = arith.constant 9 : index
    %c0_74 = arith.constant 0 : index
    %c0_75 = arith.constant 0 : index
    %80 = vector.load %arg5[%c9_73, %c0_74, %c0_75] : memref<25x128x128xf32, #tpu.memory_space<vmem>>, vector<1x128x128xf32>
    %81 = vector.shape_cast %80 : vector<1x128x128xf32> to vector<128x128xf32>
    %cst_76 = arith.constant dense<0.000000e+00> : vector<128x128xf32>
    %82 = tpu.matmul %79, %81, %cst_76 {dimension_numbers = #tpu.dot_dimension_numbers<[1], [0], [0], [1], [0, 0, 1, 1], [], []>} : vector<128x128xf32>, vector<128x128xf32>, vector<128x128xf32> -> vector<128x128xf32>
    %83 = arith.addf %76, %82 : vector<128x128xf32>
    %c10 = arith.constant 10 : index
    %c0_77 = arith.constant 0 : index
    %c0_78 = arith.constant 0 : index
    %84 = vector.load %arg4[%c10, %c0_77, %c0_78] : memref<25x128x128xf32, #tpu.memory_space<vmem>>, vector<1x128x128xf32>
    %85 = vector.shape_cast %84 : vector<1x128x128xf32> to vector<128x128xf32>
    %cst_79 = arith.constant dense<0.000000e+00> : vector<128x128xf32>
    %86 = tpu.matmul %85, %14, %cst_79 {dimension_numbers = #tpu.dot_dimension_numbers<[1], [0], [0], [1], [0, 0, 1, 1], [], []>} : vector<128x128xf32>, vector<128x128xf32>, vector<128x128xf32> -> vector<128x128xf32>
    %c10_80 = arith.constant 10 : index
    %c0_81 = arith.constant 0 : index
    %c0_82 = arith.constant 0 : index
    %87 = vector.load %arg5[%c10_80, %c0_81, %c0_82] : memref<25x128x128xf32, #tpu.memory_space<vmem>>, vector<1x128x128xf32>
    %88 = vector.shape_cast %87 : vector<1x128x128xf32> to vector<128x128xf32>
    %cst_83 = arith.constant dense<0.000000e+00> : vector<128x128xf32>
    %89 = tpu.matmul %86, %88, %cst_83 {dimension_numbers = #tpu.dot_dimension_numbers<[1], [0], [0], [1], [0, 0, 1, 1], [], []>} : vector<128x128xf32>, vector<128x128xf32>, vector<128x128xf32> -> vector<128x128xf32>
    %90 = arith.addf %83, %89 : vector<128x128xf32>
    %c11 = arith.constant 11 : index
    %c0_84 = arith.constant 0 : index
    %c0_85 = arith.constant 0 : index
    %91 = vector.load %arg4[%c11, %c0_84, %c0_85] : memref<25x128x128xf32, #tpu.memory_space<vmem>>, vector<1x128x128xf32>
    %92 = vector.shape_cast %91 : vector<1x128x128xf32> to vector<128x128xf32>
    %cst_86 = arith.constant dense<0.000000e+00> : vector<128x128xf32>
    %93 = tpu.matmul %92, %14, %cst_86 {dimension_numbers = #tpu.dot_dimension_numbers<[1], [0], [0], [1], [0, 0, 1, 1], [], []>} : vector<128x128xf32>, vector<128x128xf32>, vector<128x128xf32> -> vector<128x128xf32>
    %c11_87 = arith.constant 11 : index
    %c0_88 = arith.constant 0 : index
    %c0_89 = arith.constant 0 : index
    %94 = vector.load %arg5[%c11_87, %c0_88, %c0_89] : memref<25x128x128xf32, #tpu.memory_space<vmem>>, vector<1x128x128xf32>
    %95 = vector.shape_cast %94 : vector<1x128x128xf32> to vector<128x128xf32>
    %cst_90 = arith.constant dense<0.000000e+00> : vector<128x128xf32>
    %96 = tpu.matmul %93, %95, %cst_90 {dimension_numbers = #tpu.dot_dimension_numbers<[1], [0], [0], [1], [0, 0, 1, 1], [], []>} : vector<128x128xf32>, vector<128x128xf32>, vector<128x128xf32> -> vector<128x128xf32>
    %97 = arith.addf %90, %96 : vector<128x128xf32>
    %c12 = arith.constant 12 : index
    %c0_91 = arith.constant 0 : index
    %c0_92 = arith.constant 0 : index
    %98 = vector.load %arg4[%c12, %c0_91, %c0_92] : memref<25x128x128xf32, #tpu.memory_space<vmem>>, vector<1x128x128xf32>
    %99 = vector.shape_cast %98 : vector<1x128x128xf32> to vector<128x128xf32>
    %cst_93 = arith.constant dense<0.000000e+00> : vector<128x128xf32>
    %100 = tpu.matmul %99, %14, %cst_93 {dimension_numbers = #tpu.dot_dimension_numbers<[1], [0], [0], [1], [0, 0, 1, 1], [], []>} : vector<128x128xf32>, vector<128x128xf32>, vector<128x128xf32> -> vector<128x128xf32>
    %c12_94 = arith.constant 12 : index
    %c0_95 = arith.constant 0 : index
    %c0_96 = arith.constant 0 : index
    %101 = vector.load %arg5[%c12_94, %c0_95, %c0_96] : memref<25x128x128xf32, #tpu.memory_space<vmem>>, vector<1x128x128xf32>
    %102 = vector.shape_cast %101 : vector<1x128x128xf32> to vector<128x128xf32>
    %cst_97 = arith.constant dense<0.000000e+00> : vector<128x128xf32>
    %103 = tpu.matmul %100, %102, %cst_97 {dimension_numbers = #tpu.dot_dimension_numbers<[1], [0], [0], [1], [0, 0, 1, 1], [], []>} : vector<128x128xf32>, vector<128x128xf32>, vector<128x128xf32> -> vector<128x128xf32>
    %104 = arith.addf %97, %103 : vector<128x128xf32>
    %c13 = arith.constant 13 : index
    %c0_98 = arith.constant 0 : index
    %c0_99 = arith.constant 0 : index
    %105 = vector.load %arg4[%c13, %c0_98, %c0_99] : memref<25x128x128xf32, #tpu.memory_space<vmem>>, vector<1x128x128xf32>
    %106 = vector.shape_cast %105 : vector<1x128x128xf32> to vector<128x128xf32>
    %cst_100 = arith.constant dense<0.000000e+00> : vector<128x128xf32>
    %107 = tpu.matmul %106, %14, %cst_100 {dimension_numbers = #tpu.dot_dimension_numbers<[1], [0], [0], [1], [0, 0, 1, 1], [], []>} : vector<128x128xf32>, vector<128x128xf32>, vector<128x128xf32> -> vector<128x128xf32>
    %c13_101 = arith.constant 13 : index
    %c0_102 = arith.constant 0 : index
    %c0_103 = arith.constant 0 : index
    %108 = vector.load %arg5[%c13_101, %c0_102, %c0_103] : memref<25x128x128xf32, #tpu.memory_space<vmem>>, vector<1x128x128xf32>
    %109 = vector.shape_cast %108 : vector<1x128x128xf32> to vector<128x128xf32>
    %cst_104 = arith.constant dense<0.000000e+00> : vector<128x128xf32>
    %110 = tpu.matmul %107, %109, %cst_104 {dimension_numbers = #tpu.dot_dimension_numbers<[1], [0], [0], [1], [0, 0, 1, 1], [], []>} : vector<128x128xf32>, vector<128x128xf32>, vector<128x128xf32> -> vector<128x128xf32>
    %111 = arith.addf %104, %110 : vector<128x128xf32>
    %c14 = arith.constant 14 : index
    %c0_105 = arith.constant 0 : index
    %c0_106 = arith.constant 0 : index
    %112 = vector.load %arg4[%c14, %c0_105, %c0_106] : memref<25x128x128xf32, #tpu.memory_space<vmem>>, vector<1x128x128xf32>
    %113 = vector.shape_cast %112 : vector<1x128x128xf32> to vector<128x128xf32>
    %cst_107 = arith.constant dense<0.000000e+00> : vector<128x128xf32>
    %114 = tpu.matmul %113, %14, %cst_107 {dimension_numbers = #tpu.dot_dimension_numbers<[1], [0], [0], [1], [0, 0, 1, 1], [], []>} : vector<128x128xf32>, vector<128x128xf32>, vector<128x128xf32> -> vector<128x128xf32>
    %c14_108 = arith.constant 14 : index
    %c0_109 = arith.constant 0 : index
    %c0_110 = arith.constant 0 : index
    %115 = vector.load %arg5[%c14_108, %c0_109, %c0_110] : memref<25x128x128xf32, #tpu.memory_space<vmem>>, vector<1x128x128xf32>
    %116 = vector.shape_cast %115 : vector<1x128x128xf32> to vector<128x128xf32>
    %cst_111 = arith.constant dense<0.000000e+00> : vector<128x128xf32>
    %117 = tpu.matmul %114, %116, %cst_111 {dimension_numbers = #tpu.dot_dimension_numbers<[1], [0], [0], [1], [0, 0, 1, 1], [], []>} : vector<128x128xf32>, vector<128x128xf32>, vector<128x128xf32> -> vector<128x128xf32>
    %118 = arith.addf %111, %117 : vector<128x128xf32>
    %c15 = arith.constant 15 : index
    %c0_112 = arith.constant 0 : index
    %c0_113 = arith.constant 0 : index
    %119 = vector.load %arg4[%c15, %c0_112, %c0_113] : memref<25x128x128xf32, #tpu.memory_space<vmem>>, vector<1x128x128xf32>
    %120 = vector.shape_cast %119 : vector<1x128x128xf32> to vector<128x128xf32>
    %cst_114 = arith.constant dense<0.000000e+00> : vector<128x128xf32>
    %121 = tpu.matmul %120, %14, %cst_114 {dimension_numbers = #tpu.dot_dimension_numbers<[1], [0], [0], [1], [0, 0, 1, 1], [], []>} : vector<128x128xf32>, vector<128x128xf32>, vector<128x128xf32> -> vector<128x128xf32>
    %c15_115 = arith.constant 15 : index
    %c0_116 = arith.constant 0 : index
    %c0_117 = arith.constant 0 : index
    %122 = vector.load %arg5[%c15_115, %c0_116, %c0_117] : memref<25x128x128xf32, #tpu.memory_space<vmem>>, vector<1x128x128xf32>
    %123 = vector.shape_cast %122 : vector<1x128x128xf32> to vector<128x128xf32>
    %cst_118 = arith.constant dense<0.000000e+00> : vector<128x128xf32>
    %124 = tpu.matmul %121, %123, %cst_118 {dimension_numbers = #tpu.dot_dimension_numbers<[1], [0], [0], [1], [0, 0, 1, 1], [], []>} : vector<128x128xf32>, vector<128x128xf32>, vector<128x128xf32> -> vector<128x128xf32>
    %125 = arith.addf %118, %124 : vector<128x128xf32>
    %c16 = arith.constant 16 : index
    %c0_119 = arith.constant 0 : index
    %c0_120 = arith.constant 0 : index
    %126 = vector.load %arg4[%c16, %c0_119, %c0_120] : memref<25x128x128xf32, #tpu.memory_space<vmem>>, vector<1x128x128xf32>
    %127 = vector.shape_cast %126 : vector<1x128x128xf32> to vector<128x128xf32>
    %cst_121 = arith.constant dense<0.000000e+00> : vector<128x128xf32>
    %128 = tpu.matmul %127, %14, %cst_121 {dimension_numbers = #tpu.dot_dimension_numbers<[1], [0], [0], [1], [0, 0, 1, 1], [], []>} : vector<128x128xf32>, vector<128x128xf32>, vector<128x128xf32> -> vector<128x128xf32>
    %c16_122 = arith.constant 16 : index
    %c0_123 = arith.constant 0 : index
    %c0_124 = arith.constant 0 : index
    %129 = vector.load %arg5[%c16_122, %c0_123, %c0_124] : memref<25x128x128xf32, #tpu.memory_space<vmem>>, vector<1x128x128xf32>
    %130 = vector.shape_cast %129 : vector<1x128x128xf32> to vector<128x128xf32>
    %cst_125 = arith.constant dense<0.000000e+00> : vector<128x128xf32>
    %131 = tpu.matmul %128, %130, %cst_125 {dimension_numbers = #tpu.dot_dimension_numbers<[1], [0], [0], [1], [0, 0, 1, 1], [], []>} : vector<128x128xf32>, vector<128x128xf32>, vector<128x128xf32> -> vector<128x128xf32>
    %132 = arith.addf %125, %131 : vector<128x128xf32>
    %c17 = arith.constant 17 : index
    %c0_126 = arith.constant 0 : index
    %c0_127 = arith.constant 0 : index
    %133 = vector.load %arg4[%c17, %c0_126, %c0_127] : memref<25x128x128xf32, #tpu.memory_space<vmem>>, vector<1x128x128xf32>
    %134 = vector.shape_cast %133 : vector<1x128x128xf32> to vector<128x128xf32>
    %cst_128 = arith.constant dense<0.000000e+00> : vector<128x128xf32>
    %135 = tpu.matmul %134, %14, %cst_128 {dimension_numbers = #tpu.dot_dimension_numbers<[1], [0], [0], [1], [0, 0, 1, 1], [], []>} : vector<128x128xf32>, vector<128x128xf32>, vector<128x128xf32> -> vector<128x128xf32>
    %c17_129 = arith.constant 17 : index
    %c0_130 = arith.constant 0 : index
    %c0_131 = arith.constant 0 : index
    %136 = vector.load %arg5[%c17_129, %c0_130, %c0_131] : memref<25x128x128xf32, #tpu.memory_space<vmem>>, vector<1x128x128xf32>
    %137 = vector.shape_cast %136 : vector<1x128x128xf32> to vector<128x128xf32>
    %cst_132 = arith.constant dense<0.000000e+00> : vector<128x128xf32>
    %138 = tpu.matmul %135, %137, %cst_132 {dimension_numbers = #tpu.dot_dimension_numbers<[1], [0], [0], [1], [0, 0, 1, 1], [], []>} : vector<128x128xf32>, vector<128x128xf32>, vector<128x128xf32> -> vector<128x128xf32>
    %139 = arith.addf %132, %138 : vector<128x128xf32>
    %c18 = arith.constant 18 : index
    %c0_133 = arith.constant 0 : index
    %c0_134 = arith.constant 0 : index
    %140 = vector.load %arg4[%c18, %c0_133, %c0_134] : memref<25x128x128xf32, #tpu.memory_space<vmem>>, vector<1x128x128xf32>
    %141 = vector.shape_cast %140 : vector<1x128x128xf32> to vector<128x128xf32>
    %cst_135 = arith.constant dense<0.000000e+00> : vector<128x128xf32>
    %142 = tpu.matmul %141, %14, %cst_135 {dimension_numbers = #tpu.dot_dimension_numbers<[1], [0], [0], [1], [0, 0, 1, 1], [], []>} : vector<128x128xf32>, vector<128x128xf32>, vector<128x128xf32> -> vector<128x128xf32>
    %c18_136 = arith.constant 18 : index
    %c0_137 = arith.constant 0 : index
    %c0_138 = arith.constant 0 : index
    %143 = vector.load %arg5[%c18_136, %c0_137, %c0_138] : memref<25x128x128xf32, #tpu.memory_space<vmem>>, vector<1x128x128xf32>
    %144 = vector.shape_cast %143 : vector<1x128x128xf32> to vector<128x128xf32>
    %cst_139 = arith.constant dense<0.000000e+00> : vector<128x128xf32>
    %145 = tpu.matmul %142, %144, %cst_139 {dimension_numbers = #tpu.dot_dimension_numbers<[1], [0], [0], [1], [0, 0, 1, 1], [], []>} : vector<128x128xf32>, vector<128x128xf32>, vector<128x128xf32> -> vector<128x128xf32>
    %146 = arith.addf %139, %145 : vector<128x128xf32>
    %c19 = arith.constant 19 : index
    %c0_140 = arith.constant 0 : index
    %c0_141 = arith.constant 0 : index
    %147 = vector.load %arg4[%c19, %c0_140, %c0_141] : memref<25x128x128xf32, #tpu.memory_space<vmem>>, vector<1x128x128xf32>
    %148 = vector.shape_cast %147 : vector<1x128x128xf32> to vector<128x128xf32>
    %cst_142 = arith.constant dense<0.000000e+00> : vector<128x128xf32>
    %149 = tpu.matmul %148, %14, %cst_142 {dimension_numbers = #tpu.dot_dimension_numbers<[1], [0], [0], [1], [0, 0, 1, 1], [], []>} : vector<128x128xf32>, vector<128x128xf32>, vector<128x128xf32> -> vector<128x128xf32>
    %c19_143 = arith.constant 19 : index
    %c0_144 = arith.constant 0 : index
    %c0_145 = arith.constant 0 : index
    %150 = vector.load %arg5[%c19_143, %c0_144, %c0_145] : memref<25x128x128xf32, #tpu.memory_space<vmem>>, vector<1x128x128xf32>
    %151 = vector.shape_cast %150 : vector<1x128x128xf32> to vector<128x128xf32>
    %cst_146 = arith.constant dense<0.000000e+00> : vector<128x128xf32>
    %152 = tpu.matmul %149, %151, %cst_146 {dimension_numbers = #tpu.dot_dimension_numbers<[1], [0], [0], [1], [0, 0, 1, 1], [], []>} : vector<128x128xf32>, vector<128x128xf32>, vector<128x128xf32> -> vector<128x128xf32>
    %153 = arith.addf %146, %152 : vector<128x128xf32>
    %c20 = arith.constant 20 : index
    %c0_147 = arith.constant 0 : index
    %c0_148 = arith.constant 0 : index
    %154 = vector.load %arg4[%c20, %c0_147, %c0_148] : memref<25x128x128xf32, #tpu.memory_space<vmem>>, vector<1x128x128xf32>
    %155 = vector.shape_cast %154 : vector<1x128x128xf32> to vector<128x128xf32>
    %cst_149 = arith.constant dense<0.000000e+00> : vector<128x128xf32>
    %156 = tpu.matmul %155, %14, %cst_149 {dimension_numbers = #tpu.dot_dimension_numbers<[1], [0], [0], [1], [0, 0, 1, 1], [], []>} : vector<128x128xf32>, vector<128x128xf32>, vector<128x128xf32> -> vector<128x128xf32>
    %c20_150 = arith.constant 20 : index
    %c0_151 = arith.constant 0 : index
    %c0_152 = arith.constant 0 : index
    %157 = vector.load %arg5[%c20_150, %c0_151, %c0_152] : memref<25x128x128xf32, #tpu.memory_space<vmem>>, vector<1x128x128xf32>
    %158 = vector.shape_cast %157 : vector<1x128x128xf32> to vector<128x128xf32>
    %cst_153 = arith.constant dense<0.000000e+00> : vector<128x128xf32>
    %159 = tpu.matmul %156, %158, %cst_153 {dimension_numbers = #tpu.dot_dimension_numbers<[1], [0], [0], [1], [0, 0, 1, 1], [], []>} : vector<128x128xf32>, vector<128x128xf32>, vector<128x128xf32> -> vector<128x128xf32>
    %160 = arith.addf %153, %159 : vector<128x128xf32>
    %c21 = arith.constant 21 : index
    %c0_154 = arith.constant 0 : index
    %c0_155 = arith.constant 0 : index
    %161 = vector.load %arg4[%c21, %c0_154, %c0_155] : memref<25x128x128xf32, #tpu.memory_space<vmem>>, vector<1x128x128xf32>
    %162 = vector.shape_cast %161 : vector<1x128x128xf32> to vector<128x128xf32>
    %cst_156 = arith.constant dense<0.000000e+00> : vector<128x128xf32>
    %163 = tpu.matmul %162, %14, %cst_156 {dimension_numbers = #tpu.dot_dimension_numbers<[1], [0], [0], [1], [0, 0, 1, 1], [], []>} : vector<128x128xf32>, vector<128x128xf32>, vector<128x128xf32> -> vector<128x128xf32>
    %c21_157 = arith.constant 21 : index
    %c0_158 = arith.constant 0 : index
    %c0_159 = arith.constant 0 : index
    %164 = vector.load %arg5[%c21_157, %c0_158, %c0_159] : memref<25x128x128xf32, #tpu.memory_space<vmem>>, vector<1x128x128xf32>
    %165 = vector.shape_cast %164 : vector<1x128x128xf32> to vector<128x128xf32>
    %cst_160 = arith.constant dense<0.000000e+00> : vector<128x128xf32>
    %166 = tpu.matmul %163, %165, %cst_160 {dimension_numbers = #tpu.dot_dimension_numbers<[1], [0], [0], [1], [0, 0, 1, 1], [], []>} : vector<128x128xf32>, vector<128x128xf32>, vector<128x128xf32> -> vector<128x128xf32>
    %167 = arith.addf %160, %166 : vector<128x128xf32>
    %c22 = arith.constant 22 : index
    %c0_161 = arith.constant 0 : index
    %c0_162 = arith.constant 0 : index
    %168 = vector.load %arg4[%c22, %c0_161, %c0_162] : memref<25x128x128xf32, #tpu.memory_space<vmem>>, vector<1x128x128xf32>
    %169 = vector.shape_cast %168 : vector<1x128x128xf32> to vector<128x128xf32>
    %cst_163 = arith.constant dense<0.000000e+00> : vector<128x128xf32>
    %170 = tpu.matmul %169, %14, %cst_163 {dimension_numbers = #tpu.dot_dimension_numbers<[1], [0], [0], [1], [0, 0, 1, 1], [], []>} : vector<128x128xf32>, vector<128x128xf32>, vector<128x128xf32> -> vector<128x128xf32>
    %c22_164 = arith.constant 22 : index
    %c0_165 = arith.constant 0 : index
    %c0_166 = arith.constant 0 : index
    %171 = vector.load %arg5[%c22_164, %c0_165, %c0_166] : memref<25x128x128xf32, #tpu.memory_space<vmem>>, vector<1x128x128xf32>
    %172 = vector.shape_cast %171 : vector<1x128x128xf32> to vector<128x128xf32>
    %cst_167 = arith.constant dense<0.000000e+00> : vector<128x128xf32>
    %173 = tpu.matmul %170, %172, %cst_167 {dimension_numbers = #tpu.dot_dimension_numbers<[1], [0], [0], [1], [0, 0, 1, 1], [], []>} : vector<128x128xf32>, vector<128x128xf32>, vector<128x128xf32> -> vector<128x128xf32>
    %174 = arith.addf %167, %173 : vector<128x128xf32>
    %c23 = arith.constant 23 : index
    %c0_168 = arith.constant 0 : index
    %c0_169 = arith.constant 0 : index
    %175 = vector.load %arg4[%c23, %c0_168, %c0_169] : memref<25x128x128xf32, #tpu.memory_space<vmem>>, vector<1x128x128xf32>
    %176 = vector.shape_cast %175 : vector<1x128x128xf32> to vector<128x128xf32>
    %cst_170 = arith.constant dense<0.000000e+00> : vector<128x128xf32>
    %177 = tpu.matmul %176, %14, %cst_170 {dimension_numbers = #tpu.dot_dimension_numbers<[1], [0], [0], [1], [0, 0, 1, 1], [], []>} : vector<128x128xf32>, vector<128x128xf32>, vector<128x128xf32> -> vector<128x128xf32>
    %c23_171 = arith.constant 23 : index
    %c0_172 = arith.constant 0 : index
    %c0_173 = arith.constant 0 : index
    %178 = vector.load %arg5[%c23_171, %c0_172, %c0_173] : memref<25x128x128xf32, #tpu.memory_space<vmem>>, vector<1x128x128xf32>
    %179 = vector.shape_cast %178 : vector<1x128x128xf32> to vector<128x128xf32>
    %cst_174 = arith.constant dense<0.000000e+00> : vector<128x128xf32>
    %180 = tpu.matmul %177, %179, %cst_174 {dimension_numbers = #tpu.dot_dimension_numbers<[1], [0], [0], [1], [0, 0, 1, 1], [], []>} : vector<128x128xf32>, vector<128x128xf32>, vector<128x128xf32> -> vector<128x128xf32>
    %181 = arith.addf %174, %180 : vector<128x128xf32>
    %c24 = arith.constant 24 : index
    %c0_175 = arith.constant 0 : index
    %c0_176 = arith.constant 0 : index
    %182 = vector.load %arg4[%c24, %c0_175, %c0_176] : memref<25x128x128xf32, #tpu.memory_space<vmem>>, vector<1x128x128xf32>
    %183 = vector.shape_cast %182 : vector<1x128x128xf32> to vector<128x128xf32>
    %cst_177 = arith.constant dense<0.000000e+00> : vector<128x128xf32>
    %184 = tpu.matmul %183, %14, %cst_177 {dimension_numbers = #tpu.dot_dimension_numbers<[1], [0], [0], [1], [0, 0, 1, 1], [], []>} : vector<128x128xf32>, vector<128x128xf32>, vector<128x128xf32> -> vector<128x128xf32>
    %c24_178 = arith.constant 24 : index
    %c0_179 = arith.constant 0 : index
    %c0_180 = arith.constant 0 : index
    %185 = vector.load %arg5[%c24_178, %c0_179, %c0_180] : memref<25x128x128xf32, #tpu.memory_space<vmem>>, vector<1x128x128xf32>
    %186 = vector.shape_cast %185 : vector<1x128x128xf32> to vector<128x128xf32>
    %cst_181 = arith.constant dense<0.000000e+00> : vector<128x128xf32>
    %187 = tpu.matmul %184, %186, %cst_181 {dimension_numbers = #tpu.dot_dimension_numbers<[1], [0], [0], [1], [0, 0, 1, 1], [], []>} : vector<128x128xf32>, vector<128x128xf32>, vector<128x128xf32> -> vector<128x128xf32>
    %188 = arith.addf %181, %187 : vector<128x128xf32>
    %189 = vector.extract_strided_slice %188 {offsets = [0, 0], sizes = [32, 128], strides = [1, 1]} : vector<128x128xf32> to vector<32x128xf32>
    %190 = vector.extract_strided_slice %188 {offsets = [32, 0], sizes = [32, 128], strides = [1, 1]} : vector<128x128xf32> to vector<32x128xf32>
    %191 = arith.maximumf %189, %190 : vector<32x128xf32>
    %192 = vector.extract_strided_slice %188 {offsets = [64, 0], sizes = [32, 128], strides = [1, 1]} : vector<128x128xf32> to vector<32x128xf32>
    %193 = vector.extract_strided_slice %188 {offsets = [96, 0], sizes = [32, 128], strides = [1, 1]} : vector<128x128xf32> to vector<32x128xf32>
    %194 = arith.maximumf %192, %193 : vector<32x128xf32>
    %195 = arith.maximumf %191, %194 : vector<32x128xf32>
    %c0_182 = arith.constant 0 : index
    %c0_183 = arith.constant 0 : index
    %196 = vector.load %arg6[%c0_182, %c0_183] : memref<1x128xf32, #tpu.memory_space<vmem>>, vector<1x128xf32>
    %197 = vector.broadcast %196 : vector<1x128xf32> to vector<32x128xf32>
    %198 = arith.addf %195, %197 : vector<32x128xf32>
    %cst_184 = arith.constant 0.000000e+00 : f32
    %199 = vector.broadcast %cst_184 : f32 to vector<32x128xf32>
    %200 = arith.maximumf %198, %199 : vector<32x128xf32>
    %201 = vector.extract_strided_slice %200 {offsets = [0, 0], sizes = [8, 128], strides = [1, 1]} : vector<32x128xf32> to vector<8x128xf32>
    %c0_185 = arith.constant 0 : index
    %c0_186 = arith.constant 0 : index
    %c0_187 = arith.constant 0 : index
    %202 = vector.load %arg7[%c0_185, %c0_186, %c0_187] : memref<4x128x128xf32, #tpu.memory_space<vmem>>, vector<1x128x128xf32>
    %203 = vector.shape_cast %202 : vector<1x128x128xf32> to vector<128x128xf32>
    %cst_188 = arith.constant dense<0.000000e+00> : vector<8x128xf32>
    %204 = tpu.matmul %201, %203, %cst_188 {dimension_numbers = #tpu.dot_dimension_numbers<[1], [0], [0], [1], [0, 0, 1, 1], [], []>} : vector<8x128xf32>, vector<128x128xf32>, vector<8x128xf32> -> vector<8x128xf32>
    %205 = vector.extract_strided_slice %200 {offsets = [8, 0], sizes = [8, 128], strides = [1, 1]} : vector<32x128xf32> to vector<8x128xf32>
    %c1_189 = arith.constant 1 : index
    %c0_190 = arith.constant 0 : index
    %c0_191 = arith.constant 0 : index
    %206 = vector.load %arg7[%c1_189, %c0_190, %c0_191] : memref<4x128x128xf32, #tpu.memory_space<vmem>>, vector<1x128x128xf32>
    %207 = vector.shape_cast %206 : vector<1x128x128xf32> to vector<128x128xf32>
    %cst_192 = arith.constant dense<0.000000e+00> : vector<8x128xf32>
    %208 = tpu.matmul %205, %207, %cst_192 {dimension_numbers = #tpu.dot_dimension_numbers<[1], [0], [0], [1], [0, 0, 1, 1], [], []>} : vector<8x128xf32>, vector<128x128xf32>, vector<8x128xf32> -> vector<8x128xf32>
    %209 = arith.addf %204, %208 : vector<8x128xf32>
    %210 = vector.extract_strided_slice %200 {offsets = [16, 0], sizes = [8, 128], strides = [1, 1]} : vector<32x128xf32> to vector<8x128xf32>
    %c2_193 = arith.constant 2 : index
    %c0_194 = arith.constant 0 : index
    %c0_195 = arith.constant 0 : index
    %211 = vector.load %arg7[%c2_193, %c0_194, %c0_195] : memref<4x128x128xf32, #tpu.memory_space<vmem>>, vector<1x128x128xf32>
    %212 = vector.shape_cast %211 : vector<1x128x128xf32> to vector<128x128xf32>
    %cst_196 = arith.constant dense<0.000000e+00> : vector<8x128xf32>
    %213 = tpu.matmul %210, %212, %cst_196 {dimension_numbers = #tpu.dot_dimension_numbers<[1], [0], [0], [1], [0, 0, 1, 1], [], []>} : vector<8x128xf32>, vector<128x128xf32>, vector<8x128xf32> -> vector<8x128xf32>
    %214 = arith.addf %209, %213 : vector<8x128xf32>
    %215 = vector.extract_strided_slice %200 {offsets = [24, 0], sizes = [8, 128], strides = [1, 1]} : vector<32x128xf32> to vector<8x128xf32>
    %c3_197 = arith.constant 3 : index
    %c0_198 = arith.constant 0 : index
    %c0_199 = arith.constant 0 : index
    %216 = vector.load %arg7[%c3_197, %c0_198, %c0_199] : memref<4x128x128xf32, #tpu.memory_space<vmem>>, vector<1x128x128xf32>
    %217 = vector.shape_cast %216 : vector<1x128x128xf32> to vector<128x128xf32>
    %cst_200 = arith.constant dense<0.000000e+00> : vector<8x128xf32>
    %218 = tpu.matmul %215, %217, %cst_200 {dimension_numbers = #tpu.dot_dimension_numbers<[1], [0], [0], [1], [0, 0, 1, 1], [], []>} : vector<8x128xf32>, vector<128x128xf32>, vector<8x128xf32> -> vector<8x128xf32>
    %219 = arith.addf %214, %218 : vector<8x128xf32>
    %c0_201 = arith.constant 0 : index
    %c0_202 = arith.constant 0 : index
    %220 = vector.load %arg8[%c0_201, %c0_202] : memref<1x128xf32, #tpu.memory_space<vmem>>, vector<1x128xf32>
    %221 = vector.broadcast %220 : vector<1x128xf32> to vector<8x128xf32>
    %222 = arith.addf %219, %221 : vector<8x128xf32>
    %cst_203 = arith.constant 0.000000e+00 : f32
    %223 = vector.broadcast %cst_203 : f32 to vector<8x128xf32>
    %224 = arith.maximumf %222, %223 : vector<8x128xf32>
    %c0_204 = arith.constant 0 : index
    %c0_205 = arith.constant 0 : index
    %225 = vector.load %arg9[%c0_204, %c0_205] : memref<128x128xf32, #tpu.memory_space<vmem>>, vector<128x128xf32>
    %cst_206 = arith.constant dense<0.000000e+00> : vector<8x128xf32>
    %226 = tpu.matmul %224, %225, %cst_206 {dimension_numbers = #tpu.dot_dimension_numbers<[1], [0], [0], [1], [0, 0, 1, 1], [], []>} : vector<8x128xf32>, vector<128x128xf32>, vector<8x128xf32> -> vector<8x128xf32>
    %c0_207 = arith.constant 0 : index
    %c0_208 = arith.constant 0 : index
    %227 = vector.load %arg10[%c0_207, %c0_208] : memref<1x128xf32, #tpu.memory_space<vmem>>, vector<1x128xf32>
    %228 = vector.broadcast %227 : vector<1x128xf32> to vector<8x128xf32>
    %229 = arith.addf %226, %228 : vector<8x128xf32>
    %cst_209 = arith.constant 0.000000e+00 : f32
    %230 = vector.broadcast %cst_209 : f32 to vector<8x128xf32>
    %231 = arith.subf %230, %229 : vector<8x128xf32>
    %232 = math.exp %231 : vector<8x128xf32>
    %cst_210 = arith.constant 1.000000e+00 : f32
    %233 = vector.broadcast %cst_210 : f32 to vector<8x128xf32>
    %234 = arith.addf %233, %232 : vector<8x128xf32>
    %235 = tpu.reciprocal %234 : vector<8x128xf32> -> vector<8x128xf32>
    %c0_211 = arith.constant 0 : index
    %c0_212 = arith.constant 0 : index
    %236 = vector.load %arg11[%c0_211, %c0_212] : memref<8x128xf32, #tpu.memory_space<vmem>>, vector<8x128xf32>
    tpu.vector_store %arg11[%c0_211, %c0_212], %235 {strides = array<i32>} : memref<8x128xf32, #tpu.memory_space<vmem>>, vector<8x128xf32>,
    return
  }
  func.func @transform_0(%arg0: i32) -> (i32, i32) {
    %c0_i32 = arith.constant 0 : i32
    %c0_i32_0 = arith.constant 0 : i32
    %c0_i32_1 = arith.constant 0 : i32
    return %c0_i32, %c0_i32_0 : i32, i32
  }
  func.func @transform_1(%arg0: i32) -> (i32, i32) {
    %c0_i32 = arith.constant 0 : i32
    %c0_i32_0 = arith.constant 0 : i32
    %c0_i32_1 = arith.constant 0 : i32
    return %c0_i32, %c0_i32_0 : i32, i32
  }
  func.func @transform_2(%arg0: i32) -> (i32, i32) {
    %c0_i32 = arith.constant 0 : i32
    %c0_i32_0 = arith.constant 0 : i32
    %c0_i32_1 = arith.constant 0 : i32
    return %c0_i32, %c0_i32_0 : i32, i32
  }
  func.func @transform_3(%arg0: i32) -> (i32, i32, i32) {
    %c0_i32 = arith.constant 0 : i32
    %c0_i32_0 = arith.constant 0 : i32
    %c0_i32_1 = arith.constant 0 : i32
    %c0_i32_2 = arith.constant 0 : i32
    return %c0_i32, %c0_i32_0, %c0_i32_1 : i32, i32, i32
  }
  func.func @transform_4(%arg0: i32) -> (i32, i32, i32) {
    %c0_i32 = arith.constant 0 : i32
    %c0_i32_0 = arith.constant 0 : i32
    %c0_i32_1 = arith.constant 0 : i32
    %c0_i32_2 = arith.constant 0 : i32
    return %c0_i32, %c0_i32_0, %c0_i32_1 : i32, i32, i32
  }
  func.func @transform_5(%arg0: i32) -> (i32, i32) {
    %c0_i32 = arith.constant 0 : i32
    %c0_i32_0 = arith.constant 0 : i32
    %c0_i32_1 = arith.constant 0 : i32
    return %c0_i32, %c0_i32_0 : i32, i32
  }
  func.func @transform_6(%arg0: i32) -> (i32, i32, i32) {
    %c0_i32 = arith.constant 0 : i32
    %c0_i32_0 = arith.constant 0 : i32
    %c0_i32_1 = arith.constant 0 : i32
    %c0_i32_2 = arith.constant 0 : i32
    return %c0_i32, %c0_i32_0, %c0_i32_1 : i32, i32, i32
  }
  func.func @transform_7(%arg0: i32) -> (i32, i32) {
    %c0_i32 = arith.constant 0 : i32
    %c0_i32_0 = arith.constant 0 : i32
    %c0_i32_1 = arith.constant 0 : i32
    return %c0_i32, %c0_i32_0 : i32, i32
  }
  func.func @transform_8(%arg0: i32) -> (i32, i32) {
    %c0_i32 = arith.constant 0 : i32
    %c0_i32_0 = arith.constant 0 : i32
    %c0_i32_1 = arith.constant 0 : i32
    return %c0_i32, %c0_i32_0 : i32, i32
  }
  func.func @transform_9(%arg0: i32) -> (i32, i32) {
    %c0_i32 = arith.constant 0 : i32
    %c0_i32_0 = arith.constant 0 : i32
    %c0_i32_1 = arith.constant 0 : i32
    return %c0_i32, %c0_i32_0 : i32, i32
  }
  func.func @transform_10(%arg0: i32) -> (i32, i32) {
    %c0_i32 = arith.constant 0 : i32
    %c0_i32_0 = arith.constant 0 : i32
    %c0_i32_1 = arith.constant 0 : i32
    return %c0_i32, %c0_i32_0 : i32, i32
  }
}

</mosaic_0001>

<bundles_post_ra>
// kernel: cnn_forward_pallas.1
= control target key start
LH: loop header
LB: loop body
LE: loop exit
PB: predicated region body
PF: predicated region fallthrough
CT: control target
= control target key end

     0   :  { %15 = vsyncpa [#allocation3], 0  ;;  %s14891_s13 = smov [#allocation2]   ;;  %s19783_s0 = inlined_call_operand.vmem [shape: f32[512,128], index: 0, kind: input, shape index: {}]   ;;  %s19784_s1 = inlined_call_operand.vmem [shape: f32[128,128], index: 1, kind: input, shape index: {}]   ;;  %s19785_s2 = inlined_call_operand.vmem [shape: f32[1,128], index: 2, kind: input, shape index: {}]   ;;  %s19786_s3 = inlined_call_operand.vmem [shape: f32[25,128,128], index: 3, kind: input, shape index: {}]   ;;  %s19787_s4 = inlined_call_operand.hbm [shape: f32[25,128,128], index: 4, kind: input, shape index: {}]   ;;  %s19788_s5 = inlined_call_operand.vmem [shape: f32[1,128], index: 5, kind: input, shape index: {}]   ;;  %s19789_s6 = inlined_call_operand.vmem [shape: f32[4,128,128], index: 6, kind: input, shape index: {}]   ;;  %s19790_s7 = inlined_call_operand.vmem [shape: f32[1,128], index: 7, kind: input, shape index: {}]   ;;  %s19791_s8 = inlined_call_operand.vmem [shape: f32[128,128], index: 8, kind: input, shape index: {}]   ;;  %s19792_s9 = inlined_call_operand.vmem [shape: f32[1,128], index: 9, kind: input, shape index: {}]   ;;  %s19793_s10 = inlined_call_operand.vmem [shape: f32[8,128], index: 10, kind: output, shape index: {}]  }
   0x1   :  { %s29_s14 = sshll.u32 %s14891_s13, 4  ;;  %s30_s14 = int_to_ptr.vmem [resolvable:$true] %s29_s14 }
   0x2   :  { %s14877_s15 = scalar_lea.vmem %s30_s14, 51200  ;;  %p14882_p1 = scmp.lt.s32.totalorder %s30_s14, %s30_s14 }
   0x3   :  { %p14878_p0 = scmp.ne.s32.totalorder %s30_s14, %s14877_s15  ;;  %p14883_p2 = scmp.lt.s32.totalorder %s14877_s15, %s14877_s15 }
   0x5   :  { %p14884_p3 = por %p14883_p2, %p14882_p1 }
   0x7   :  { %p14885_p4 = pnand %p14884_p3, %p14878_p0 }
   0x9   :  { %14888 = shalt.err (!%p14885_p4)
}
   0xa   :  { %s14892_s16 = smov 128   ;;  %s14893_s17 = smov 8  }
   0xb   :  { %35 = dma.hbm_to_vmem [thread:$0]  %s19787_s4, 51200, %s30_s14, [#allocation3], %s14892_s16, %s14892_s16, %s14893_s17  }
   0xc   :  { %14889 = dma.done.wait [#allocation3], 51200  }
   0xd   :  { %14890 = vsyncadd [#allocation3], 4294916096  ;;  %v128_v0 = vld [vmem:[%s19784_s1 + $0x78] sm:$0xff]  ;;  %v127_v1 = vld [vmem:[%s19784_s1 + $0x70] sm:$0xff]  ;;  %vm14895_vm0 = vmmov 0  }
   0xe   :  { %11757 = vmatprep.subr.mxu0 %v128_v0  ;;  %v126_v2 = vld [vmem:[%s19784_s1 + $0x68] sm:$0xff]  ;;  %v125_v3 = vld [vmem:[%s19784_s1 + $0x60] sm:$0xff]  ;;  %v124_v5 = vld [vmem:[%s19784_s1 + $0x58] sm:$0xff] }
   0xf   :  { %11758 = vmatpush3.msra.mxu0 %v128_v0  ;;  %v49_v4 = vld [vmem:[%s19783_s0] sm:$0xff]  ;;  %v123_v6 = vld [vmem:[%s19784_s1 + $0x50] sm:$0xff]  ;;  %v122_v7 = vld [vmem:[%s19784_s1 + $0x48] sm:$0xff] }
  0x10   :  { %11759 = vmatprep.subr.mxu0 %v127_v1  ;;  %11789 = vmatprep.mubr.f32.mxu0 %v49_v4  ;;  %v121_v8 = vld [vmem:[%s19784_s1 + $0x40] sm:$0xff]  ;;  %v120_v9 = vld [vmem:[%s19784_s1 + $0x38] sm:$0xff]  ;;  %v119_v10 = vld [vmem:[%s19784_s1 + $0x30] sm:$0xff] }
  0x11   :  { %11760 = vmatpush3.msra.mxu0 %v127_v1  ;;  %v118_v11 = vld [vmem:[%s19784_s1 + $0x28] sm:$0xff]  ;;  %v117_v12 = vld [vmem:[%s19784_s1 + $0x20] sm:$0xff]  ;;  %v116_v13 = vld [vmem:[%s19784_s1 + $0x18] sm:$0xff] }
  0x12   :  { %11761 = vmatprep.subr.mxu0 %v126_v2  ;;  %v115_v14 = vld [vmem:[%s19784_s1 + $0x10] sm:$0xff]  ;;  %v114_v15 = vld [vmem:[%s19784_s1 + $0x8] sm:$0xff]  ;;  %v113_v16 = vld [vmem:[%s19784_s1] sm:$0xff] }
  0x13   :  { %11762 = vmatpush3.msra.mxu0 %v126_v2  ;;  %v50_v17 = vld [vmem:[%s19783_s0 + $0x8] sm:$0xff]  ;;  %v51_v18 = vld [vmem:[%s19783_s0 + $0x10] sm:$0xff]  ;;  %v52_v19 = vld [vmem:[%s19783_s0 + $0x18] sm:$0xff] }
  0x14   :  { %11763 = vmatprep.subr.mxu0 %v125_v3  ;;  %v53_v20 = vld [vmem:[%s19783_s0 + $0x20] sm:$0xff]  ;;  %v54_v21 = vld [vmem:[%s19783_s0 + $0x28] sm:$0xff]  ;;  %v55_v22 = vld [vmem:[%s19783_s0 + $0x30] sm:$0xff] }
  0x15   :  { %11764 = vmatpush3.msra.mxu0 %v125_v3  ;;  %v56_v23 = vld [vmem:[%s19783_s0 + $0x38] sm:$0xff]  ;;  %v57_v24 = vld [vmem:[%s19783_s0 + $0x40] sm:$0xff]  ;;  %v58_v25 = vld [vmem:[%s19783_s0 + $0x48] sm:$0xff] }
  0x16   :  { %11765 = vmatprep.subr.mxu0 %v124_v5  ;;  %v59_v26 = vld [vmem:[%s19783_s0 + $0x50] sm:$0xff]  ;;  %v60_v27 = vld [vmem:[%s19783_s0 + $0x58] sm:$0xff]  ;;  %v61_v28 = vld [vmem:[%s19783_s0 + $0x60] sm:$0xff] }
  0x17   :  { %11766 = vmatpush3.msra.mxu0 %v124_v5  ;;  %v62_v29 = vld [vmem:[%s19783_s0 + $0x68] sm:$0xff]  ;;  %v63_v30 = vld [vmem:[%s19783_s0 + $0x70] sm:$0xff]  ;;  %v64_v31 = vld [vmem:[%s19783_s0 + $0x78] sm:$0xff] }
  0x18   :  { %11767 = vmatprep.subr.mxu0 %v123_v6  ;;  %v65_v32 = vld [vmem:[%s19783_s0 + $0x80] sm:$0xff]  ;;  %v66_v33 = vld [vmem:[%s19783_s0 + $0x88] sm:$0xff]  ;;  %v67_v34 = vld [vmem:[%s19783_s0 + $0x90] sm:$0xff] }
  0x19   :  { %11768 = vmatpush3.msra.mxu0 %v123_v6  ;;  %v68_v35 = vld [vmem:[%s19783_s0 + $0x98] sm:$0xff]  ;;  %v69_v36 = vld [vmem:[%s19783_s0 + $0xa0] sm:$0xff]  ;;  %v70_v37 = vld [vmem:[%s19783_s0 + $0xa8] sm:$0xff] }
  0x1a   :  { %11769 = vmatprep.subr.mxu0 %v122_v7  ;;  %v71_v38 = vld [vmem:[%s19783_s0 + $0xb0] sm:$0xff]  ;;  %v72_v39 = vld [vmem:[%s19783_s0 + $0xb8] sm:$0xff]  ;;  %v73_v40 = vld [vmem:[%s19783_s0 + $0xc0] sm:$0xff] }
  0x1b   :  { %11770 = vmatpush3.msra.mxu0 %v122_v7  ;;  %v74_v41 = vld [vmem:[%s19783_s0 + $0xc8] sm:$0xff]  ;;  %v75_v42 = vld [vmem:[%s19783_s0 + $0xd0] sm:$0xff]  ;;  %v76_v43 = vld [vmem:[%s19783_s0 + $0xd8] sm:$0xff] }
  0x1c   :  { %11771 = vmatprep.subr.mxu0 %v121_v8  ;;  %v77_v44 = vld [vmem:[%s19783_s0 + $0xe0] sm:$0xff]  ;;  %v78_v45 = vld [vmem:[%s19783_s0 + $0xe8] sm:$0xff]  ;;  %v79_v46 = vld [vmem:[%s19783_s0 + $0xf0] sm:$0xff] }
  0x1d   :  { %11772 = vmatpush3.msra.mxu0 %v121_v8  ;;  %v80_v47 = vld [vmem:[%s19783_s0 + $0xf8] sm:$0xff]  ;;  %v81_v48 = vld [vmem:[%s19783_s0 + $0x100] sm:$0xff]  ;;  %v82_v49 = vld [vmem:[%s19783_s0 + $0x108] sm:$0xff] }
  0x1e   :  { %11773 = vmatprep.subr.mxu0 %v120_v9  ;;  %v83_v50 = vld [vmem:[%s19783_s0 + $0x110] sm:$0xff]  ;;  %v84_v51 = vld [vmem:[%s19783_s0 + $0x118] sm:$0xff]  ;;  %v85_v52 = vld [vmem:[%s19783_s0 + $0x120] sm:$0xff] }
  0x1f   :  { %11774 = vmatpush3.msra.mxu0 %v120_v9  ;;  %v86_v53 = vld [vmem:[%s19783_s0 + $0x128] sm:$0xff]  ;;  %v87_v54 = vld [vmem:[%s19783_s0 + $0x130] sm:$0xff]  ;;  %v88_v55 = vld [vmem:[%s19783_s0 + $0x138] sm:$0xff] }
  0x20   :  { %11775 = vmatprep.subr.mxu0 %v119_v10  ;;  %v89_v56 = vld [vmem:[%s19783_s0 + $0x140] sm:$0xff]  ;;  %v90_v57 = vld [vmem:[%s19783_s0 + $0x148] sm:$0xff]  ;;  %v91_v58 = vld [vmem:[%s19783_s0 + $0x150] sm:$0xff] }
  0x21   :  { %11776 = vmatpush3.msra.mxu0 %v119_v10  ;;  %v92_v59 = vld [vmem:[%s19783_s0 + $0x158] sm:$0xff]  ;;  %v93_v60 = vld [vmem:[%s19783_s0 + $0x160] sm:$0xff]  ;;  %v94_v61 = vld [vmem:[%s19783_s0 + $0x168] sm:$0xff] }
  0x22   :  { %11777 = vmatprep.subr.mxu0 %v118_v11  ;;  %v95_v62 = vld [vmem:[%s19783_s0 + $0x170] sm:$0xff]  ;;  %v96_v63 = vld [vmem:[%s19783_s0 + $0x178] sm:$0xff]  ;;  %v97_v0 = vld [vmem:[%s19783_s0 + $0x180] sm:$0xff] }
  0x23   :  { %11778 = vmatpush3.msra.mxu0 %v118_v11  ;;  %v98_v1 = vld [vmem:[%s19783_s0 + $0x188] sm:$0xff]  ;;  %v99_v2 = vld [vmem:[%s19783_s0 + $0x190] sm:$0xff]  ;;  %v100_v3 = vld [vmem:[%s19783_s0 + $0x198] sm:$0xff] }
  0x24   :  { %11779 = vmatprep.subr.mxu0 %v117_v12  ;;  %v101_v4 = vld [vmem:[%s19783_s0 + $0x1a0] sm:$0xff]  ;;  %v102_v5 = vld [vmem:[%s19783_s0 + $0x1a8] sm:$0xff]  ;;  %v103_v6 = vld [vmem:[%s19783_s0 + $0x1b0] sm:$0xff] }
  0x25   :  { %11780 = vmatpush3.msra.mxu0 %v117_v12  ;;  %v104_v7 = vld [vmem:[%s19783_s0 + $0x1b8] sm:$0xff]  ;;  %v105_v8 = vld [vmem:[%s19783_s0 + $0x1c0] sm:$0xff]  ;;  %v106_v9 = vld [vmem:[%s19783_s0 + $0x1c8] sm:$0xff] }
  0x26   :  { %11781 = vmatprep.subr.mxu0 %v116_v13  ;;  %v107_v10 = vld [vmem:[%s19783_s0 + $0x1d0] sm:$0xff]  ;;  %v108_v11 = vld [vmem:[%s19783_s0 + $0x1d8] sm:$0xff]  ;;  %v109_v12 = vld [vmem:[%s19783_s0 + $0x1e0] sm:$0xff] }
  0x27   :  { %11782 = vmatpush3.msra.mxu0 %v116_v13  ;;  %v110_v13 = vld [vmem:[%s19783_s0 + $0x1e8] sm:$0xff] }
  0x28   :  { %11783 = vmatprep.subr.mxu0 %v115_v14 }
  0x29   :  { %11784 = vmatpush3.msra.mxu0 %v115_v14  ;;  %v111_v14 = vld [vmem:[%s19783_s0 + $0x1f0] sm:$0xff] }
  0x2a   :  { %11785 = vmatprep.subr.mxu0 %v114_v15 }
  0x2b   :  { %11786 = vmatpush3.msra.mxu0 %v114_v15  ;;  %v112_v15 = vld [vmem:[%s19783_s0 + $0x1f8] sm:$0xff] }
  0x2c   :  { %11787 = vmatprep.subr.mxu0 %v113_v16 }
  0x2d   :  { %11788 = vmatpush3.msra.mxu0 %v113_v16 }
  0x2e   :  { %11790 = vmatmul.mubr.f32.vlgmr.msra.gmra.mxu0 %v50_v17 }
  0x2f   :  { %11792 = vmatprep.mubr.f32.mxu0 %v51_v18 }
  0x32   :  { %11793 = vmatmul.mubr.f32.gmra.mxu0 %v52_v19 }
  0x33   :  { %11795 = vmatprep.mubr.f32.mxu0 %v53_v20 }
  0x36   :  { %11796 = vmatmul.mubr.f32.gmra.mxu0 %v54_v21 }
  0x37   :  { %11798 = vmatprep.mubr.f32.mxu0 %v55_v22 }
  0x3a   :  { %11799 = vmatmul.mubr.f32.gmra.mxu0 %v56_v23 }
  0x3b   :  { %11801 = vmatprep.mubr.f32.mxu0 %v57_v24 }
  0x3e   :  { %11802 = vmatmul.mubr.f32.gmra.mxu0 %v58_v25 }
  0x3f   :  { %11804 = vmatprep.mubr.f32.mxu0 %v59_v26 }
  0x42   :  { %11805 = vmatmul.mubr.f32.gmra.mxu0 %v60_v27 }
  0x43   :  { %11807 = vmatprep.mubr.f32.mxu0 %v61_v28 }
  0x46   :  { %11808 = vmatmul.mubr.f32.gmra.mxu0 %v62_v29 }
  0x47   :  { %11810 = vmatprep.mubr.f32.mxu0 %v63_v30 }
  0x4a   :  { %11811 = vmatmul.mubr.f32.gmra.mxu0 %v64_v31 }
  0x4b   :  { %11813 = vmatprep.mubr.f32.mxu0 %v65_v32 }
  0x4e   :  { %11814 = vmatmul.mubr.f32.gmra.mxu0 %v66_v33 }
  0x4f   :  { %11816 = vmatprep.mubr.f32.mxu0 %v67_v34 }
  0x52   :  { %11817 = vmatmul.mubr.f32.gmra.mxu0 %v68_v35  ;;  %v601_v35 = vld [vmem:[%s19786_s3] sm:$0xff] }
  0x53   :  { %11819 = vmatprep.mubr.f32.mxu0 %v69_v36  ;;  %11917 = vmatprep.mubr.f32.mxu1 %v601_v35 }
  0x56   :  { %11820 = vmatmul.mubr.f32.gmra.mxu0 %v70_v37  ;;  %v9573_v37 = vld [vmem:[%s19786_s3 + $0x100] sm:$0xff] }
  0x57   :  { %11822 = vmatprep.mubr.f32.mxu0 %v71_v38 }
  0x5a   :  { %11823 = vmatmul.mubr.f32.gmra.mxu0 %v72_v39 }
  0x5b   :  { %11825 = vmatprep.mubr.f32.mxu0 %v73_v40 }
  0x5e   :  { %11826 = vmatmul.mubr.f32.gmra.mxu0 %v74_v41 }
  0x5f   :  { %11828 = vmatprep.mubr.f32.mxu0 %v75_v42 }
  0x62   :  { %11829 = vmatmul.mubr.f32.gmra.mxu0 %v76_v43 }
  0x63   :  { %11831 = vmatprep.mubr.f32.mxu0 %v77_v44 }
  0x66   :  { %11832 = vmatmul.mubr.f32.gmra.mxu0 %v78_v45 }
  0x67   :  { %11834 = vmatprep.mubr.f32.mxu0 %v79_v46 }
  0x6a   :  { %11835 = vmatmul.mubr.f32.gmra.mxu0 %v80_v47 }
  0x6b   :  { %11837 = vmatprep.mubr.f32.mxu0 %v81_v48 }
  0x6e   :  { %11838 = vmatmul.mubr.f32.gmra.mxu0 %v82_v49 }
  0x6f   :  { %11840 = vmatprep.mubr.f32.mxu0 %v83_v50 }
  0x72   :  { %11841 = vmatmul.mubr.f32.gmra.mxu0 %v84_v51 }
  0x73   :  { %11843 = vmatprep.mubr.f32.mxu0 %v85_v52 }
  0x76   :  { %11844 = vmatmul.mubr.f32.gmra.mxu0 %v86_v53 }
  0x77   :  { %11846 = vmatprep.mubr.f32.mxu0 %v87_v54 }
  0x7a   :  { %11847 = vmatmul.mubr.f32.gmra.mxu0 %v88_v55 }
  0x7b   :  { %11849 = vmatprep.mubr.f32.mxu0 %v89_v56 }
  0x7e   :  { %11850 = vmatmul.mubr.f32.gmra.mxu0 %v90_v57 }
  0x7f   :  { %11852 = vmatprep.mubr.f32.mxu0 %v91_v58 }
  0x82   :  { %11853 = vmatmul.mubr.f32.gmra.mxu0 %v92_v59 }
  0x83   :  { %11855 = vmatprep.mubr.f32.mxu0 %v93_v60 }
  0x86   :  { %11856 = vmatmul.mubr.f32.gmra.mxu0 %v94_v61 }
  0x87   :  { %11858 = vmatprep.mubr.f32.mxu0 %v95_v62 }
  0x8a   :  { %11859 = vmatmul.mubr.f32.gmra.mxu0 %v96_v63 }
  0x8b   :  { %11861 = vmatprep.mubr.f32.mxu0 %v97_v0 }
  0x8e   :  { %11862 = vmatmul.mubr.f32.gmra.mxu0 %v98_v1 }
  0x8f   :  { %11864 = vmatprep.mubr.f32.mxu0 %v99_v2 }
  0x92   :  { %11865 = vmatmul.mubr.f32.gmra.mxu0 %v100_v3 }
  0x93   :  { %11867 = vmatprep.mubr.f32.mxu0 %v101_v4 }
  0x96   :  { %11868 = vmatmul.mubr.f32.gmra.mxu0 %v102_v5 }
  0x97   :  { %11870 = vmatprep.mubr.f32.mxu0 %v103_v6 }
  0x9a   :  { %11871 = vmatmul.mubr.f32.gmra.mxu0 %v104_v7 }
  0x9b   :  { %11873 = vmatprep.mubr.f32.mxu0 %v105_v8 }
  0x9e   :  { %11874 = vmatmul.mubr.f32.gmra.mxu0 %v106_v9 }
  0x9f   :  { %11876 = vmatprep.mubr.f32.mxu0 %v107_v10 }
  0xa2   :  { %11877 = vmatmul.mubr.f32.gmra.mxu0 %v108_v11 }
  0xa3   :  { %11879 = vmatprep.mubr.f32.mxu0 %v109_v12 }
  0xa6   :  { %11880 = vmatmul.mubr.f32.gmra.mxu0 %v110_v13 }
  0xa7   :  { %11882 = vmatprep.mubr.f32.mxu0 %v111_v14 }
  0xaa   :  { %11883 = vmatmul.mubr.f32.gmra.mxu0 %v112_v15 }
  0xab   :  { %12141 = vmatprep.mubr.f32.mxu0 %v9573_v37 }
  0xee   :  { %v15194_v16 = vpop.f32.mrf.mxu0 }
  0xf0   :  { %v15196_v17 = vpop.f32.mrf.mxu0 }
  0xf2   :  { %v15198_v18 = vpop.f32.mrf.mxu0 }
  0xf4   :  { %v15200_v19 = vpop.f32.mrf.mxu0 }
  0xf6   :  { %v15202_v20 = vpop.f32.mrf.mxu0 }
  0xf8   :  { %v15204_v21 = vpop.f32.mrf.mxu0 }
  0xfa   :  { %v15206_v22 = vpop.f32.mrf.mxu0 }
  0xfc   :  { %v15208_v23 = vpop.f32.mrf.mxu0 }
  0xfe   :  { %v15210_v24 = vpop.f32.mrf.mxu0 }
 0x100   :  { %v15212_v25 = vpop.f32.mrf.mxu0 }
 0x102   :  { %v15214_v26 = vpop.f32.mrf.mxu0 }
 0x104   :  { %v15216_v27 = vpop.f32.mrf.mxu0 }
 0x106   :  { %v15218_v28 = vpop.f32.mrf.mxu0 }
 0x108   :  { %v15220_v29 = vpop.f32.mrf.mxu0 }
 0x10a   :  { %v15222_v30 = vpop.f32.mrf.mxu0 }
 0x10c   :  { %v15224_v31 = vpop.f32.mrf.mxu0 }
 0x10e   :  { %v11815_v32 = vpop.f32.mrf.mxu0 }
 0x10f   :  { %v515_v33 = vmax.f32 %v15194_v16, %v11815_v32 }
 0x110   :  { %v15227_v34 = vpop.f32.mrf.mxu0 }
 0x112   :  { %v11818_v36 = vpop.f32.mrf.mxu0 }
 0x113   :  { %v517_v38 = vmax.f32 %v15198_v18, %v11818_v36 }
 0x114   :  { %v15236_v39 = vpop.f32.mrf.mxu0 }
 0x116   :  { %v11821_v40 = vpop.f32.mrf.mxu0 }
 0x117   :  { %v519_v41 = vmax.f32 %v15202_v20, %v11821_v40 }
 0x118   :  { %v15239_v42 = vpop.f32.mrf.mxu0 }
 0x11a   :  { %v11824_v43 = vpop.f32.mrf.mxu0 }
 0x11b   :  { %v521_v44 = vmax.f32 %v15206_v22, %v11824_v43 }
 0x11c   :  { %v15242_v45 = vpop.f32.mrf.mxu0 }
 0x11e   :  { %v15244_v46 = vpop.f32.mrf.mxu0 }
 0x11f   :  { %v523_v47 = vmax.f32 %v15210_v24, %v15244_v46  ;;  %v520_v46 = vmax.f32 %v15208_v23, %v15242_v45  ;;  %v518_v23 = vmax.f32 %v15204_v21, %v15239_v42  ;;  %v516_v42 = vmax.f32 %v15200_v19, %v15236_v39 }
 0x120   :  { %v15248_v48 = vpop.f32.mrf.mxu0  ;;  %v514_v39 = vmax.f32 %v15196_v17, %v15227_v34 }
 0x122   :  { %v15250_v49 = vpop.f32.mrf.mxu0 }
 0x123   :  { %v525_v50 = vmax.f32 %v15214_v26, %v15250_v49  ;;  %v522_v26 = vmax.f32 %v15212_v25, %v15248_v48 }
 0x124   :  { %v15254_v51 = vpop.f32.mrf.mxu0 }
 0x126   :  { %v11833_v52 = vpop.f32.mrf.mxu0 }
 0x127   :  { %v527_v53 = vmax.f32 %v15218_v28, %v11833_v52 }
 0x128   :  { %v335_v54 = vpop.f32.mrf.mxu0 }
 0x12a   :  { %v11836_v55 = vpop.f32.mrf.mxu0 }
 0x12b   :  { %v529_v56 = vmax.f32 %v15222_v30, %v11836_v55 }
 0x12c   :  { %v345_v57 = vpop.f32.mrf.mxu0 }
 0x12e   :  { %v11839_v58 = vpop.f32.mrf.mxu0 }
 0x130   :  { %v15258_v59 = vpop.f32.mrf.mxu0 }
 0x132   :  { %v11842_v60 = vpop.f32.mrf.mxu0 }
 0x134   :  { %v15260_v61 = vpop.f32.mrf.mxu0 }
 0x136   :  { %v11845_v62 = vpop.f32.mrf.mxu0 }
 0x138   :  { %v15262_v63 = vpop.f32.mrf.mxu0 }
 0x13a   :  { %v11848_v0 = vpop.f32.mrf.mxu0 }
 0x13c   :  { %v15264_v1 = vpop.f32.mrf.mxu0 }
 0x13e   :  { %v11851_v2 = vpop.f32.mrf.mxu0 }
 0x140   :  { %v15266_v3 = vpop.f32.mrf.mxu0 }
 0x142   :  { %v11854_v4 = vpop.f32.mrf.mxu0 }
 0x144   :  { %v405_v5 = vpop.f32.mrf.mxu0 }
 0x146   :  { %v11857_v6 = vpop.f32.mrf.mxu0 }
 0x148   :  { %v415_v7 = vpop.f32.mrf.mxu0 }
 0x14a   :  { %v11860_v8 = vpop.f32.mrf.mxu0 }
 0x14c   :  { %v425_v9 = vpop.f32.mrf.mxu0 }
 0x14e   :  { %v11863_v10 = vpop.f32.mrf.mxu0 }
 0x14f   :  { %v531_v11 = vmax.f32 %v11839_v58, %v11863_v10 }
 0x150   :  { %v15268_v12 = vpop.f32.mrf.mxu0 }
 0x151   :  { %v15270_v13 = vmax.f32 %v515_v33, %v531_v11  ;;  %v526_v11 = vmax.f32 %v15220_v29, %v335_v54  ;;  %v524_v29 = vmax.f32 %v15216_v27, %v15254_v51 }
 0x152   :  { %v11866_v14 = vpop.f32.mrf.mxu0 }
 0x153   :  { %v533_v15 = vmax.f32 %v11842_v60, %v11866_v14 }
 0x154   :  { %v15272_v16 = vpop.f32.mrf.mxu0 }
 0x155   :  { %v15274_v18 = vmax.f32 %v517_v38, %v533_v15 }
 0x156   :  { %v11869_v20 = vpop.f32.mrf.mxu0 }
 0x157   :  { %v535_v22 = vmax.f32 %v11845_v62, %v11869_v20 }
 0x158   :  { %v15276_v28 = vpop.f32.mrf.mxu0 }
 0x159   :  { %v15278_v30 = vmax.f32 %v519_v41, %v535_v22  ;;  %v528_v41 = vmax.f32 %v15224_v31, %v345_v57  ;;  %v15289_v22 = vld [vmem:[%s19785_s2] ss:$0 sm:$0xff] }
 0x15a   :  { %v11872_v32 = vpop.f32.mrf.mxu0  ;;  %v570_v17 = vadd.f32 %v15289_v22, %v15270_v13 }
 0x15b   :  { %v537_v35 = vmax.f32 %v11848_v0, %v11872_v32 }
 0x15c   :  { %v15280_v36 = vpop.f32.mrf.mxu0  ;;  %v15418_v13 = vmax.f32 %v570_v17, 0.0  ;;  %v9596_v17 = vld [vmem:[%s19786_s3 + $0x1b8] sm:$0xff] }
 0x15d   :  { %v15282_v37 = vmax.f32 %v521_v44, %v537_v35  ;;  %v536_v51 = vmax.f32 %v15264_v1, %v15280_v36  ;;  %v534_v1 = vmax.f32 %v15262_v63, %v15276_v28  ;;  %v532_v28 = vmax.f32 %v15260_v61, %v15272_v16 }
 0x15e   :  { %v11875_v33 = vpop.f32.mrf.mxu0  ;;  %v530_v16 = vmax.f32 %v15258_v59, %v15268_v12 }
 0x15f   :  { %v539_v54 = vmax.f32 %v11851_v2, %v11875_v33  ;;  %v576_v45 = vadd.f32 %v15289_v22, %v15282_v37  ;;  %v574_v37 = vadd.f32 %v15289_v22, %v15278_v30  ;;  %v572_v30 = vadd.f32 %v15289_v22, %v15274_v18 }
 0x160   :  { %v475_v40 = vpop.f32.mrf.mxu0  ;;  %v546_v12 = vmax.f32 %v514_v39, %v530_v16  ;;  %v9593_v16 = vld [vmem:[%s19786_s3 + $0x1a0] sm:$0xff]  ;;  %v9594_v39 = vld [vmem:[%s19786_s3 + $0x1a8] sm:$0xff] }
 0x161   :  { %v555_v27 = vmax.f32 %v523_v47, %v539_v54  ;;  %v15371_v61 = vmax.f32 %v576_v45, 0.0  ;;  %v15390_v59 = vmax.f32 %v574_v37, 0.0  ;;  %v15405_v34 = vmax.f32 %v572_v30, 0.0  ;;  %v609_v54 = vld [vmem:[%s19786_s3 + $0x40] sm:$0xff]  ;;  %v9590_v45 = vld [vmem:[%s19786_s3 + $0x188] sm:$0xff]  ;;  %v9592_v37 = vld [vmem:[%s19786_s3 + $0x198] sm:$0xff] }
 0x162   :  { %v11878_v43 = vpop.f32.mrf.mxu0  ;;  %v569_v18 = vadd.f32 %v15289_v22, %v546_v12  ;;  %v9595_v30 = vld [vmem:[%s19786_s3 + $0x1b0] sm:$0xff]  ;;  %v9564_v12 = vld [vmem:[%s19786_s3 + $0xb8] sm:$0xff] }
 0x163   :  { %v541_v0 = vmax.f32 %v11854_v4, %v11878_v43  ;;  %v538_v4 = vmax.f32 %v15266_v3, %v475_v40  ;;  %v578_v47 = vadd.f32 %v15289_v22, %v555_v27  ;;  %v552_v3 = vmax.f32 %v520_v46, %v536_v51  ;;  %v613_v27 = vld [vmem:[%s19786_s3 + $0x60] sm:$0xff]  ;;  %v616_v46 = vld [vmem:[%s19786_s3 + $0x78] sm:$0xff] }
 0x164   :  { %v485_v52 = vpop.f32.mrf.mxu0  ;;  %v550_v40 = vmax.f32 %v518_v23, %v534_v1  ;;  %v9585_v51 = vld [vmem:[%s19786_s3 + $0x160] sm:$0xff]  ;;  %v9588_v1 = vld [vmem:[%s19786_s3 + $0x178] sm:$0xff] }
 0x165   :  { %v540_v32 = vmax.f32 %v405_v5, %v485_v52  ;;  %v557_v31 = vmax.f32 %v525_v50, %v541_v0  ;;  %v554_v25 = vmax.f32 %v522_v26, %v538_v4  ;;  %v15352_v63 = vmax.f32 %v578_v47, 0.0  ;;  %v9575_v0 = vld [vmem:[%s19786_s3 + $0x110] sm:$0xff]  ;;  %v9584_v26 = vld [vmem:[%s19786_s3 + $0x158] sm:$0xff]  ;;  %v9589_v23 = vld [vmem:[%s19786_s3 + $0x180] sm:$0xff] }
 0x166   :  { %v11881_v55 = vpop.f32.mrf.mxu0  ;;  %v575_v43 = vadd.f32 %v15289_v22, %v552_v3  ;;  %v548_v52 = vmax.f32 %v516_v42, %v532_v28  ;;  %v611_v4 = vld [vmem:[%s19786_s3 + $0x50] sm:$0xff]  ;;  %v9557_v3 = vld [vmem:[%s19786_s3 + $0x80] sm:$0xff] }
 0x167   :  { %v543_v38 = vmax.f32 %v11857_v6, %v11881_v55  ;;  %v556_v5 = vmax.f32 %v524_v29, %v540_v32  ;;  %v580_v49 = vadd.f32 %v15289_v22, %v557_v31  ;;  %v577_v36 = vadd.f32 %v15289_v22, %v554_v25  ;;  %v9578_v32 = vld [vmem:[%s19786_s3 + $0x128] sm:$0xff]  ;;  %v9580_v29 = vld [vmem:[%s19786_s3 + $0x138] sm:$0xff]  ;;  %v9587_v47 = vld [vmem:[%s19786_s3 + $0x170] sm:$0xff] }
 0x168   :  { %v495_v58 = vpop.f32.mrf.mxu0  ;;  %v573_v55 = vadd.f32 %v15289_v22, %v550_v40  ;;  %v15380_v19 = vmax.f32 %v575_v43, 0.0  ;;  %v610_v31 = vld [vmem:[%s19786_s3 + $0x48] sm:$0xff]  ;;  %v9559_v28 = vld [vmem:[%s19786_s3 + $0x90] sm:$0xff]  ;;  %v9560_v43 = vld [vmem:[%s19786_s3 + $0x98] sm:$0xff] }
 0x169   :  { %v542_v10 = vmax.f32 %v415_v7, %v495_v58  ;;  %v559_v15 = vmax.f32 %v527_v53, %v543_v38  ;;  %v579_v48 = vadd.f32 %v15289_v22, %v556_v5  ;;  %v15333_v2 = vmax.f32 %v580_v49, 0.0  ;;  %v612_v5 = vld [vmem:[%s19786_s3 + $0x58] sm:$0xff]  ;;  %v614_v49 = vld [vmem:[%s19786_s3 + $0x68] sm:$0xff]  ;;  %v9591_v40 = vld [vmem:[%s19786_s3 + $0x190] sm:$0xff] }
 0x16a   :  { %v11884_v60 = vpop.f32.mrf.mxu0  ;;  %v15361_v21 = vmax.f32 %v577_v36, 0.0  ;;  %v571_v58 = vadd.f32 %v15289_v22, %v548_v52  ;;  %v15397_v38 = vmax.f32 %v573_v55, 0.0  ;;  %v9586_v25 = vld [vmem:[%s19786_s3 + $0x168] sm:$0xff]  ;;  %v9561_v42 = vld [vmem:[%s19786_s3 + $0xa0] sm:$0xff]  ;;  %v9563_v55 = vld [vmem:[%s19786_s3 + $0xb0] sm:$0xff] }
 0x16b   :  { %v545_v62 = vmax.f32 %v11860_v8, %v11884_v60  ;;  %v558_v35 = vmax.f32 %v526_v11, %v542_v10  ;;  %v582_v53 = vadd.f32 %v15289_v22, %v559_v15  ;;  %v15342_v33 = vmax.f32 %v579_v48, 0.0  ;;  %v9574_v11 = vld [vmem:[%s19786_s3 + $0x108] sm:$0xff]  ;;  %v9576_v15 = vld [vmem:[%s19786_s3 + $0x118] sm:$0xff]  ;;  %v615_v48 = vld [vmem:[%s19786_s3 + $0x70] sm:$0xff] }
 0x16c   :  { %v505_v14 = vpop.f32.mrf.mxu0  ;;  %v15412_v60 = vmax.f32 %v571_v58, 0.0  ;;  %v15424_v10 = vmax.f32 %v569_v18, 0.0  ;;  %v9558_v36 = vld [vmem:[%s19786_s3 + $0x88] sm:$0xff]  ;;  %v9565_v58 = vld [vmem:[%s19786_s3 + $0xc0] sm:$0xff] }
 0x16d   :  { %v561_v20 = vmax.f32 %v529_v56, %v545_v62  ;;  %v544_v44 = vmax.f32 %v425_v9, %v505_v14  ;;  %v581_v8 = vadd.f32 %v15289_v22, %v558_v35  ;;  %v15315_v50 = vmax.f32 %v582_v53, 0.0  ;;  %v602_v62 = vld [vmem:[%s19786_s3 + $0x8] sm:$0xff]  ;;  %v604_v14 = vld [vmem:[%s19786_s3 + $0x18] sm:$0xff]  ;;  %v607_v35 = vld [vmem:[%s19786_s3 + $0x30] sm:$0xff] }
 0x16e   :  { %v9581_v53 = vld [vmem:[%s19786_s3 + $0x140] sm:$0xff]  ;;  %v9562_v52 = vld [vmem:[%s19786_s3 + $0xa8] sm:$0xff] }
 0x16f   :  { %v584_v6 = vadd.f32 %v15289_v22, %v561_v20  ;;  %v560_v7 = vmax.f32 %v528_v41, %v544_v44  ;;  %v15324_v24 = vmax.f32 %v581_v8, 0.0  ;;  %v603_v41 = vld [vmem:[%s19786_s3 + $0x10] sm:$0xff]  ;;  %v605_v20 = vld [vmem:[%s19786_s3 + $0x20] sm:$0xff]  ;;  %v606_v44 = vld [vmem:[%s19786_s3 + $0x28] sm:$0xff] }
 0x170   :  { %v9583_v8 = vld [vmem:[%s19786_s3 + $0x150] sm:$0xff]  ;;  %v9597_v18 = vld [vmem:[%s19786_s3 + $0x1c0] sm:$0xff] }
 0x171   :  { %v15298_v56 = vmax.f32 %v584_v6, 0.0  ;;  %v583_v57 = vadd.f32 %v15289_v22, %v560_v7  ;;  %v9577_v22 = vld [vmem:[%s19786_s3 + $0x120] sm:$0xff]  ;;  %v608_v6 = vld [vmem:[%s19786_s3 + $0x38] sm:$0xff]  ;;  %v9579_v7 = vld [vmem:[%s19786_s3 + $0x130] sm:$0xff] }
 0x173   :  { %v15303_v9 = vmax.f32 %v583_v57, 0.0  ;;  %11885 = vmatprep.subr.mxu1 %v15298_v56  ;;  %12109 = vmatprep.subr.mxu0 %v15298_v56  ;;  %v9582_v57 = vld [vmem:[%s19786_s3 + $0x148] sm:$0xff] }
 0x174   :  { %11886 = vmatpush3.msra.mxu1 %v15298_v56  ;;  %12110 = vmatpush3.msra.mxu0 %v15298_v56 }
 0x175   :  { %11887 = vmatprep.subr.mxu1 %v15303_v9  ;;  %12111 = vmatprep.subr.mxu0 %v15303_v9 }
 0x176   :  { %11888 = vmatpush3.msra.mxu1 %v15303_v9  ;;  %12112 = vmatpush3.msra.mxu0 %v15303_v9 }
 0x177   :  { %11889 = vmatprep.subr.mxu1 %v15315_v50  ;;  %12113 = vmatprep.subr.mxu0 %v15315_v50 }
 0x178   :  { %11890 = vmatpush3.msra.mxu1 %v15315_v50  ;;  %12114 = vmatpush3.msra.mxu0 %v15315_v50 }
 0x179   :  { %11891 = vmatprep.subr.mxu1 %v15324_v24  ;;  %12115 = vmatprep.subr.mxu0 %v15324_v24 }
 0x17a   :  { %11892 = vmatpush3.msra.mxu1 %v15324_v24  ;;  %12116 = vmatpush3.msra.mxu0 %v15324_v24 }
 0x17b   :  { %11893 = vmatprep.subr.mxu1 %v15333_v2  ;;  %12117 = vmatprep.subr.mxu0 %v15333_v2 }
 0x17c   :  { %11894 = vmatpush3.msra.mxu1 %v15333_v2  ;;  %12118 = vmatpush3.msra.mxu0 %v15333_v2 }
 0x17d   :  { %11895 = vmatprep.subr.mxu1 %v15342_v33  ;;  %12119 = vmatprep.subr.mxu0 %v15342_v33 }
 0x17e   :  { %11896 = vmatpush3.msra.mxu1 %v15342_v33  ;;  %12120 = vmatpush3.msra.mxu0 %v15342_v33 }
 0x17f   :  { %11897 = vmatprep.subr.mxu1 %v15352_v63  ;;  %12121 = vmatprep.subr.mxu0 %v15352_v63 }
 0x180   :  { %11898 = vmatpush3.msra.mxu1 %v15352_v63  ;;  %12122 = vmatpush3.msra.mxu0 %v15352_v63 }
 0x181   :  { %11899 = vmatprep.subr.mxu1 %v15361_v21  ;;  %12123 = vmatprep.subr.mxu0 %v15361_v21 }
 0x182   :  { %11900 = vmatpush3.msra.mxu1 %v15361_v21  ;;  %12124 = vmatpush3.msra.mxu0 %v15361_v21 }
 0x183   :  { %11901 = vmatprep.subr.mxu1 %v15371_v61  ;;  %12125 = vmatprep.subr.mxu0 %v15371_v61 }
 0x184   :  { %11902 = vmatpush3.msra.mxu1 %v15371_v61  ;;  %12126 = vmatpush3.msra.mxu0 %v15371_v61 }
 0x185   :  { %11903 = vmatprep.subr.mxu1 %v15380_v19  ;;  %12127 = vmatprep.subr.mxu0 %v15380_v19 }
 0x186   :  { %11904 = vmatpush3.msra.mxu1 %v15380_v19  ;;  %12128 = vmatpush3.msra.mxu0 %v15380_v19 }
 0x187   :  { %11905 = vmatprep.subr.mxu1 %v15390_v59  ;;  %12129 = vmatprep.subr.mxu0 %v15390_v59 }
 0x188   :  { %11906 = vmatpush3.msra.mxu1 %v15390_v59  ;;  %12130 = vmatpush3.msra.mxu0 %v15390_v59 }
 0x189   :  { %11907 = vmatprep.subr.mxu1 %v15397_v38  ;;  %12131 = vmatprep.subr.mxu0 %v15397_v38 }
 0x18a   :  { %11908 = vmatpush3.msra.mxu1 %v15397_v38  ;;  %12132 = vmatpush3.msra.mxu0 %v15397_v38 }
 0x18b   :  { %11909 = vmatprep.subr.mxu1 %v15405_v34  ;;  %12133 = vmatprep.subr.mxu0 %v15405_v34 }
 0x18c   :  { %11910 = vmatpush3.msra.mxu1 %v15405_v34  ;;  %12134 = vmatpush3.msra.mxu0 %v15405_v34 }
 0x18d   :  { %11911 = vmatprep.subr.mxu1 %v15412_v60  ;;  %12135 = vmatprep.subr.mxu0 %v15412_v60 }
 0x18e   :  { %11912 = vmatpush3.msra.mxu1 %v15412_v60  ;;  %12136 = vmatpush3.msra.mxu0 %v15412_v60 }
 0x18f   :  { %11913 = vmatprep.subr.mxu1 %v15418_v13  ;;  %12137 = vmatprep.subr.mxu0 %v15418_v13 }
 0x190   :  { %11914 = vmatpush3.msra.mxu1 %v15418_v13  ;;  %12138 = vmatpush3.msra.mxu0 %v15418_v13 }
 0x191   :  { %11915 = vmatprep.subr.mxu1 %v15424_v10  ;;  %12139 = vmatprep.subr.mxu0 %v15424_v10 }
 0x192   :  { %11916 = vmatpush3.msra.mxu1 %v15424_v10  ;;  %12140 = vmatpush3.msra.mxu0 %v15424_v10 }
 0x193   :  { %11918 = vmatmul.mubr.f32.vlgmr.msra.gmra.mxu1 %v602_v62  ;;  %11941 = vmatprep.subr.mxu1 %v15298_v56  ;;  %v9566_v62 = vld [vmem:[%s19786_s3 + $0xc8] sm:$0xff] }
 0x194   :  { %12221 = vmatprep.subr.mxu0 %v15298_v56  ;;  %11942 = vmatpush3.msra.mxu1 %v15298_v56 }
 0x195   :  { %12142 = vmatmul.mubr.f32.vlgmr.msra.gmra.mxu0 %v9574_v11  ;;  %11943 = vmatprep.subr.mxu1 %v15303_v9  ;;  %v9567_v11 = vld [vmem:[%s19786_s3 + $0xd0] sm:$0xff] }
 0x196   :  { %12222 = vmatpush3.msra.mxu0 %v15298_v56  ;;  %11920 = vmatprep.mubr.f32.mxu1 %v603_v41  ;;  %v9598_v41 = vld [vmem:[%s19786_s3 + $0x1c8] sm:$0xff] }
 0x197   :  { %12223 = vmatprep.subr.mxu0 %v15303_v9  ;;  %11944 = vmatpush3.msra.mxu1 %v15303_v9 }
 0x198   :  { %12224 = vmatpush3.msra.mxu0 %v15303_v9  ;;  %11921 = vmatmul.mubr.f32.gmra.mxu1 %v604_v14  ;;  %v9599_v14 = vld [vmem:[%s19786_s3 + $0x1d0] sm:$0xff] }
 0x199   :  { %11945 = vmatprep.subr.mxu1 %v15315_v50  ;;  %12144 = vmatprep.mubr.f32.mxu0 %v9575_v0  ;;  %v9568_v0 = vld [vmem:[%s19786_s3 + $0xd8] sm:$0xff] }
 0x19a   :  { %12225 = vmatprep.subr.mxu0 %v15315_v50  ;;  %11946 = vmatpush3.msra.mxu1 %v15315_v50 }
 0x19b   :  { %12145 = vmatmul.mubr.f32.gmra.mxu0 %v9576_v15  ;;  %11947 = vmatprep.subr.mxu1 %v15324_v24  ;;  %v9569_v15 = vld [vmem:[%s19786_s3 + $0xe0] sm:$0xff] }
 0x19c   :  { %12226 = vmatpush3.msra.mxu0 %v15315_v50  ;;  %11923 = vmatprep.mubr.f32.mxu1 %v605_v20  ;;  %v9600_v20 = vld [vmem:[%s19786_s3 + $0x1d8] sm:$0xff] }
 0x19d   :  { %12227 = vmatprep.subr.mxu0 %v15324_v24  ;;  %11948 = vmatpush3.msra.mxu1 %v15324_v24 }
 0x19e   :  { %12228 = vmatpush3.msra.mxu0 %v15324_v24  ;;  %11924 = vmatmul.mubr.f32.gmra.mxu1 %v606_v44  ;;  %v9601_v44 = vld [vmem:[%s19786_s3 + $0x1e0] sm:$0xff] }
 0x19f   :  { %11949 = vmatprep.subr.mxu1 %v15333_v2  ;;  %12147 = vmatprep.mubr.f32.mxu0 %v9577_v22  ;;  %v9570_v22 = vld [vmem:[%s19786_s3 + $0xe8] sm:$0xff] }
 0x1a0   :  { %12229 = vmatprep.subr.mxu0 %v15333_v2  ;;  %11950 = vmatpush3.msra.mxu1 %v15333_v2 }
 0x1a1   :  { %12148 = vmatmul.mubr.f32.gmra.mxu0 %v9578_v32  ;;  %11951 = vmatprep.subr.mxu1 %v15342_v33  ;;  %v9571_v32 = vld [vmem:[%s19786_s3 + $0xf0] sm:$0xff] }
 0x1a2   :  { %12230 = vmatpush3.msra.mxu0 %v15333_v2  ;;  %11926 = vmatprep.mubr.f32.mxu1 %v607_v35  ;;  %v9602_v35 = vld [vmem:[%s19786_s3 + $0x1e8] sm:$0xff] }
 0x1a3   :  { %12231 = vmatprep.subr.mxu0 %v15342_v33  ;;  %11952 = vmatpush3.msra.mxu1 %v15342_v33 }
 0x1a4   :  { %12232 = vmatpush3.msra.mxu0 %v15342_v33  ;;  %11927 = vmatmul.mubr.f32.gmra.mxu1 %v608_v6  ;;  %v9603_v6 = vld [vmem:[%s19786_s3 + $0x1f0] sm:$0xff] }
 0x1a5   :  { %11953 = vmatprep.subr.mxu1 %v15352_v63  ;;  %12150 = vmatprep.mubr.f32.mxu0 %v9579_v7  ;;  %v9572_v7 = vld [vmem:[%s19786_s3 + $0xf8] sm:$0xff] }
 0x1a6   :  { %12233 = vmatprep.subr.mxu0 %v15352_v63  ;;  %11954 = vmatpush3.msra.mxu1 %v15352_v63 }
 0x1a7   :  { %12151 = vmatmul.mubr.f32.gmra.mxu0 %v9580_v29  ;;  %11955 = vmatprep.subr.mxu1 %v15361_v21  ;;  %v9604_v29 = vld [vmem:[%s19786_s3 + $0x1f8] sm:$0xff] }
 0x1a8   :  { %12234 = vmatpush3.msra.mxu0 %v15352_v63  ;;  %11929 = vmatprep.mubr.f32.mxu1 %v609_v54  ;;  %v9605_v54 = vld [vmem:[%s19786_s3 + $0x200] sm:$0xff] }
 0x1a9   :  { %12235 = vmatprep.subr.mxu0 %v15361_v21  ;;  %11956 = vmatpush3.msra.mxu1 %v15361_v21 }
 0x1aa   :  { %12236 = vmatpush3.msra.mxu0 %v15361_v21  ;;  %11930 = vmatmul.mubr.f32.gmra.mxu1 %v610_v31  ;;  %v9606_v31 = vld [vmem:[%s19786_s3 + $0x208] sm:$0xff] }
 0x1ab   :  { %11957 = vmatprep.subr.mxu1 %v15371_v61  ;;  %12153 = vmatprep.mubr.f32.mxu0 %v9581_v53  ;;  %v9607_v53 = vld [vmem:[%s19786_s3 + $0x210] sm:$0xff] }
 0x1ac   :  { %12237 = vmatprep.subr.mxu0 %v15371_v61  ;;  %11958 = vmatpush3.msra.mxu1 %v15371_v61 }
 0x1ad   :  { %12154 = vmatmul.mubr.f32.gmra.mxu0 %v9582_v57  ;;  %11959 = vmatprep.subr.mxu1 %v15380_v19  ;;  %v9608_v57 = vld [vmem:[%s19786_s3 + $0x218] sm:$0xff] }
 0x1ae   :  { %12238 = vmatpush3.msra.mxu0 %v15371_v61  ;;  %11932 = vmatprep.mubr.f32.mxu1 %v611_v4  ;;  %v9609_v4 = vld [vmem:[%s19786_s3 + $0x220] sm:$0xff] }
 0x1af   :  { %12239 = vmatprep.subr.mxu0 %v15380_v19  ;;  %11960 = vmatpush3.msra.mxu1 %v15380_v19 }
 0x1b0   :  { %12240 = vmatpush3.msra.mxu0 %v15380_v19  ;;  %11933 = vmatmul.mubr.f32.gmra.mxu1 %v612_v5  ;;  %v956_v5 = vld [vmem:[#allocation2 + $0xf8] sm:$0xff] }
 0x1b1   :  { %11961 = vmatprep.subr.mxu1 %v15390_v59  ;;  %12156 = vmatprep.mubr.f32.mxu0 %v9583_v8  ;;  %v9610_v8 = vld [vmem:[%s19786_s3 + $0x228] sm:$0xff] }
 0x1b2   :  { %12241 = vmatprep.subr.mxu0 %v15390_v59  ;;  %11962 = vmatpush3.msra.mxu1 %v15390_v59 }
 0x1b3   :  { %12157 = vmatmul.mubr.f32.gmra.mxu0 %v9584_v26  ;;  %11963 = vmatprep.subr.mxu1 %v15397_v38  ;;  %v9611_v26 = vld [vmem:[%s19786_s3 + $0x230] sm:$0xff] }
 0x1b4   :  { %12242 = vmatpush3.msra.mxu0 %v15390_v59  ;;  %11935 = vmatprep.mubr.f32.mxu1 %v613_v27  ;;  %v955_v27 = vld [vmem:[#allocation2 + $0xf0] sm:$0xff] }
 0x1b5   :  { %12243 = vmatprep.subr.mxu0 %v15397_v38  ;;  %11964 = vmatpush3.msra.mxu1 %v15397_v38 }
 0x1b6   :  { %12244 = vmatpush3.msra.mxu0 %v15397_v38  ;;  %11936 = vmatmul.mubr.f32.gmra.mxu1 %v614_v49  ;;  %v9612_v49 = vld [vmem:[%s19786_s3 + $0x238] sm:$0xff] }
 0x1b7   :  { %11965 = vmatprep.subr.mxu1 %v15405_v34  ;;  %12159 = vmatprep.mubr.f32.mxu0 %v9585_v51  ;;  %v9613_v51 = vld [vmem:[%s19786_s3 + $0x240] sm:$0xff] }
 0x1b8   :  { %12245 = vmatprep.subr.mxu0 %v15405_v34  ;;  %11966 = vmatpush3.msra.mxu1 %v15405_v34 }
 0x1b9   :  { %12160 = vmatmul.mubr.f32.gmra.mxu0 %v9586_v25  ;;  %11967 = vmatprep.subr.mxu1 %v15412_v60  ;;  %v954_v25 = vld [vmem:[#allocation2 + $0xe8] sm:$0xff] }
 0x1ba   :  { %12246 = vmatpush3.msra.mxu0 %v15405_v34  ;;  %11938 = vmatprep.mubr.f32.mxu1 %v615_v48  ;;  %v9614_v48 = vld [vmem:[%s19786_s3 + $0x248] sm:$0xff] }
 0x1bb   :  { %12247 = vmatprep.subr.mxu0 %v15412_v60  ;;  %11968 = vmatpush3.msra.mxu1 %v15412_v60 }
 0x1bc   :  { %12248 = vmatpush3.msra.mxu0 %v15412_v60  ;;  %11939 = vmatmul.mubr.f32.gmra.mxu1 %v616_v46  ;;  %v9615_v46 = vld [vmem:[%s19786_s3 + $0x250] sm:$0xff] }
 0x1bd   :  { %11969 = vmatprep.subr.mxu1 %v15418_v13  ;;  %12162 = vmatprep.mubr.f32.mxu0 %v9587_v47  ;;  %v953_v47 = vld [vmem:[#allocation2 + $0xe0] sm:$0xff] }
 0x1be   :  { %12249 = vmatprep.subr.mxu0 %v15418_v13  ;;  %11970 = vmatpush3.msra.mxu1 %v15418_v13 }
 0x1bf   :  { %12163 = vmatmul.mubr.f32.gmra.mxu0 %v9588_v1  ;;  %11971 = vmatprep.subr.mxu1 %v15424_v10  ;;  %v9616_v1 = vld [vmem:[%s19786_s3 + $0x258] sm:$0xff] }
 0x1c0   :  { %12250 = vmatpush3.msra.mxu0 %v15418_v13  ;;  %11972 = vmatpush3.msra.mxu1 %v15424_v10 }
 0x1c1   :  { %12251 = vmatprep.subr.mxu0 %v15424_v10  ;;  %11973 = vmatprep.mubr.f32.mxu1 %v9557_v3  ;;  %v9617_v3 = vld [vmem:[%s19786_s3 + $0x260] sm:$0xff] }
 0x1c2   :  { %12252 = vmatpush3.msra.mxu0 %v15424_v10  ;;  %11974 = vmatmul.mubr.f32.vlgmr.msra.gmra.mxu1 %v9558_v36  ;;  %v952_v36 = vld [vmem:[#allocation2 + $0xd8] sm:$0xff] }
 0x1c3   :  { %12253 = vmatprep.mubr.f32.mxu0 %v9589_v23  ;;  %12333 = vmatprep.subr.mxu0 %v15298_v56  ;;  %v9618_v23 = vld [vmem:[%s19786_s3 + $0x268] sm:$0xff] }
 0x1c4   :  { %12254 = vmatmul.mubr.f32.vlgmr.msra.gmra.mxu0 %v9590_v45  ;;  %11976 = vmatprep.mubr.f32.mxu1 %v9559_v28  ;;  %v9619_v45 = vld [vmem:[%s19786_s3 + $0x270] sm:$0xff] }
 0x1c5   :  { %12334 = vmatpush3.msra.mxu0 %v15298_v56  ;;  %12256 = vmatprep.mubr.f32.mxu0 %v9591_v40  ;;  %v951_v28 = vld [vmem:[#allocation2 + $0xd0] sm:$0xff]  ;;  %v9620_v40 = vld [vmem:[%s19786_s3 + $0x278] sm:$0xff] }
 0x1c6   :  { %12335 = vmatprep.subr.mxu0 %v15303_v9  ;;  %11977 = vmatmul.mubr.f32.gmra.mxu1 %v9560_v43  ;;  %v9621_v43 = vld [vmem:[%s19786_s3 + $0x280] sm:$0xff] }
 0x1c7   :  { %12336 = vmatpush3.msra.mxu0 %v15303_v9  ;;  %11979 = vmatprep.mubr.f32.mxu1 %v9561_v42  ;;  %v950_v42 = vld [vmem:[#allocation2 + $0xc8] sm:$0xff] }
 0x1c8   :  { %12337 = vmatprep.subr.mxu0 %v15315_v50  ;;  %12257 = vmatmul.mubr.f32.gmra.mxu0 %v9592_v37  ;;  %v9622_v37 = vld [vmem:[%s19786_s3 + $0x288] sm:$0xff] }
 0x1c9   :  { %12338 = vmatpush3.msra.mxu0 %v15315_v50  ;;  %12259 = vmatprep.mubr.f32.mxu0 %v9593_v16  ;;  %v9623_v16 = vld [vmem:[%s19786_s3 + $0x290] sm:$0xff] }
 0x1ca   :  { %12339 = vmatprep.subr.mxu0 %v15324_v24  ;;  %11980 = vmatmul.mubr.f32.gmra.mxu1 %v9562_v52  ;;  %v949_v52 = vld [vmem:[#allocation2 + $0xc0] sm:$0xff] }
 0x1cb   :  { %12340 = vmatpush3.msra.mxu0 %v15324_v24  ;;  %11982 = vmatprep.mubr.f32.mxu1 %v9563_v55  ;;  %v9624_v55 = vld [vmem:[%s19786_s3 + $0x298] sm:$0xff] }
 0x1cc   :  { %12341 = vmatprep.subr.mxu0 %v15333_v2  ;;  %12260 = vmatmul.mubr.f32.gmra.mxu0 %v9594_v39  ;;  %v9625_v39 = vld [vmem:[%s19786_s3 + $0x2a0] sm:$0xff] }
 0x1cd   :  { %12342 = vmatpush3.msra.mxu0 %v15333_v2  ;;  %12262 = vmatprep.mubr.f32.mxu0 %v9595_v30  ;;  %v948_v30 = vld [vmem:[#allocation2 + $0xb8] sm:$0xff] }
 0x1ce   :  { %12343 = vmatprep.subr.mxu0 %v15342_v33  ;;  %11983 = vmatmul.mubr.f32.gmra.mxu1 %v9564_v12  ;;  %v9626_v12 = vld [vmem:[%s19786_s3 + $0x2a8] sm:$0xff] }
 0x1cf   :  { %12344 = vmatpush3.msra.mxu0 %v15342_v33  ;;  %11985 = vmatprep.mubr.f32.mxu1 %v9565_v58  ;;  %v9627_v58 = vld [vmem:[%s19786_s3 + $0x2b0] sm:$0xff] }
 0x1d0   :  { %12345 = vmatprep.subr.mxu0 %v15352_v63  ;;  %12263 = vmatmul.mubr.f32.gmra.mxu0 %v9596_v17  ;;  %v947_v17 = vld [vmem:[#allocation2 + $0xb0] sm:$0xff] }
 0x1d1   :  { %12346 = vmatpush3.msra.mxu0 %v15352_v63  ;;  %12265 = vmatprep.mubr.f32.mxu0 %v9597_v18  ;;  %v9628_v18 = vld [vmem:[%s19786_s3 + $0x2b8] sm:$0xff] }
 0x1d2   :  { %12347 = vmatprep.subr.mxu0 %v15361_v21  ;;  %11986 = vmatmul.mubr.f32.gmra.mxu1 %v9566_v62  ;;  %v9629_v62 = vld [vmem:[%s19786_s3 + $0x2c0] sm:$0xff] }
 0x1d3   :  { %12348 = vmatpush3.msra.mxu0 %v15361_v21  ;;  %11988 = vmatprep.mubr.f32.mxu1 %v9567_v11  ;;  %v946_v11 = vld [vmem:[#allocation2 + $0xa8] sm:$0xff] }
 0x1d4   :  { %12349 = vmatprep.subr.mxu0 %v15371_v61  ;;  %12266 = vmatmul.mubr.f32.gmra.mxu0 %v9598_v41  ;;  %v9630_v41 = vld [vmem:[%s19786_s3 + $0x2c8] sm:$0xff] }
 0x1d5   :  { %12350 = vmatpush3.msra.mxu0 %v15371_v61  ;;  %12268 = vmatprep.mubr.f32.mxu0 %v9599_v14  ;;  %v9631_v14 = vld [vmem:[%s19786_s3 + $0x2d0] sm:$0xff] }
 0x1d6   :  { %12351 = vmatprep.subr.mxu0 %v15380_v19  ;;  %11989 = vmatmul.mubr.f32.gmra.mxu1 %v9568_v0  ;;  %v945_v0 = vld [vmem:[#allocation2 + $0xa0] sm:$0xff] }
 0x1d7   :  { %12352 = vmatpush3.msra.mxu0 %v15380_v19  ;;  %11991 = vmatprep.mubr.f32.mxu1 %v9569_v15  ;;  %v9632_v15 = vld [vmem:[%s19786_s3 + $0x2d8] sm:$0xff] }
 0x1d8   :  { %12353 = vmatprep.subr.mxu0 %v15390_v59  ;;  %12269 = vmatmul.mubr.f32.gmra.mxu0 %v9600_v20  ;;  %v9633_v20 = vld [vmem:[%s19786_s3 + $0x2e0] sm:$0xff] }
 0x1d9   :  { %12354 = vmatpush3.msra.mxu0 %v15390_v59  ;;  %12271 = vmatprep.mubr.f32.mxu0 %v9601_v44  ;;  %v944_v44 = vld [vmem:[#allocation2 + $0x98] sm:$0xff] }
 0x1da   :  { %12355 = vmatprep.subr.mxu0 %v15397_v38  ;;  %11992 = vmatmul.mubr.f32.gmra.mxu1 %v9570_v22  ;;  %v9634_v22 = vld [vmem:[%s19786_s3 + $0x2e8] sm:$0xff] }
 0x1db   :  { %12356 = vmatpush3.msra.mxu0 %v15397_v38  ;;  %11994 = vmatprep.mubr.f32.mxu1 %v9571_v32  ;;  %v9635_v32 = vld [vmem:[%s19786_s3 + $0x2f0] sm:$0xff] }
 0x1dc   :  { %12357 = vmatprep.subr.mxu0 %v15405_v34  ;;  %12272 = vmatmul.mubr.f32.gmra.mxu0 %v9602_v35  ;;  %v943_v35 = vld [vmem:[#allocation2 + $0x90] sm:$0xff] }
 0x1dd   :  { %12358 = vmatpush3.msra.mxu0 %v15405_v34  ;;  %12274 = vmatprep.mubr.f32.mxu0 %v9603_v6  ;;  %v9636_v6 = vld [vmem:[%s19786_s3 + $0x2f8] sm:$0xff] }
 0x1de   :  { %12359 = vmatprep.subr.mxu0 %v15412_v60  ;;  %11995 = vmatmul.mubr.f32.gmra.mxu1 %v9572_v7  ;;  %v9637_v7 = vld [vmem:[%s19786_s3 + $0x300] sm:$0xff] }
 0x1df   :  { %12360 = vmatpush3.msra.mxu0 %v15412_v60  ;;  %11997 = vmatprep.subr.mxu1 %v956_v5 }
 0x1e0   :  { %12361 = vmatprep.subr.mxu0 %v15418_v13  ;;  %12275 = vmatmul.mubr.f32.gmra.mxu0 %v9604_v29  ;;  %v942_v29 = vld [vmem:[#allocation2 + $0x88] sm:$0xff] }
 0x1e1   :  { %12362 = vmatpush3.msra.mxu0 %v15418_v13  ;;  %12365 = vmatprep.mubr.f32.mxu0 %v9605_v54  ;;  %v9638_v54 = vld [vmem:[%s19786_s3 + $0x308] sm:$0xff] }
 0x1e2   :  { %12363 = vmatprep.subr.mxu0 %v15424_v10  ;;  %11998 = vmatpush3.msra.mxu1 %v956_v5  ;;  %v15895_v5 = vld [vmem:[#allocation2 + $0x78] sm:$0xff] }
 0x1e3   :  { %12364 = vmatpush3.msra.mxu0 %v15424_v10  ;;  %11999 = vmatprep.subr.mxu1 %v955_v27 }
 0x1e4   :  { %12445 = vmatprep.subr.mxu0 %v15298_v56  ;;  %12366 = vmatmul.mubr.f32.vlgmr.msra.gmra.mxu0 %v9606_v31  ;;  %v9639_v31 = vld [vmem:[%s19786_s3 + $0x310] sm:$0xff] }
 0x1e5   :  { %12446 = vmatpush3.msra.mxu0 %v15298_v56  ;;  %12368 = vmatprep.mubr.f32.mxu0 %v9607_v53  ;;  %v941_v53 = vld [vmem:[#allocation2 + $0x80] sm:$0xff] }
 0x1e6   :  { %12447 = vmatprep.subr.mxu0 %v15303_v9  ;;  %12000 = vmatpush3.msra.mxu1 %v955_v27  ;;  %v9644_v27 = vld [vmem:[%s19786_s3 + $0x338] sm:$0xff] }
 0x1e7   :  { %12448 = vmatpush3.msra.mxu0 %v15303_v9  ;;  %12001 = vmatprep.subr.mxu1 %v954_v25 }
 0x1e8   :  { %12449 = vmatprep.subr.mxu0 %v15315_v50  ;;  %12369 = vmatmul.mubr.f32.gmra.mxu0 %v9608_v57  ;;  %v9640_v57 = vld [vmem:[%s19786_s3 + $0x318] sm:$0xff] }
 0x1e9   :  { %12450 = vmatpush3.msra.mxu0 %v15315_v50  ;;  %12371 = vmatprep.mubr.f32.mxu0 %v9609_v4  ;;  %v9641_v4 = vld [vmem:[%s19786_s3 + $0x320] sm:$0xff] }
 0x1ea   :  { %12451 = vmatprep.subr.mxu0 %v15324_v24  ;;  %12002 = vmatpush3.msra.mxu1 %v954_v25  ;;  %v9647_v25 = vld [vmem:[%s19786_s3 + $0x350] sm:$0xff] }
 0x1eb   :  { %12452 = vmatpush3.msra.mxu0 %v15324_v24  ;;  %12003 = vmatprep.subr.mxu1 %v953_v47 }
 0x1ec   :  { %12453 = vmatprep.subr.mxu0 %v15333_v2  ;;  %12372 = vmatmul.mubr.f32.gmra.mxu0 %v9610_v8  ;;  %v9642_v8 = vld [vmem:[%s19786_s3 + $0x328] sm:$0xff] }
 0x1ed   :  { %12454 = vmatpush3.msra.mxu0 %v15333_v2  ;;  %12374 = vmatprep.mubr.f32.mxu0 %v9611_v26  ;;  %v9643_v26 = vld [vmem:[%s19786_s3 + $0x330] sm:$0xff] }
 0x1ee   :  { %12455 = vmatprep.subr.mxu0 %v15342_v33  ;;  %12004 = vmatpush3.msra.mxu1 %v953_v47  ;;  %v9650_v47 = vld [vmem:[%s19786_s3 + $0x368] sm:$0xff] }
 0x1ef   :  { %12456 = vmatpush3.msra.mxu0 %v15342_v33  ;;  %12005 = vmatprep.subr.mxu1 %v952_v36 }
 0x1f0   :  { %12457 = vmatprep.subr.mxu0 %v15352_v63  ;;  %12375 = vmatmul.mubr.f32.gmra.mxu0 %v9612_v49  ;;  %v9645_v49 = vld [vmem:[%s19786_s3 + $0x340] sm:$0xff] }
 0x1f1   :  { %12458 = vmatpush3.msra.mxu0 %v15352_v63  ;;  %12377 = vmatprep.mubr.f32.mxu0 %v9613_v51  ;;  %v9646_v51 = vld [vmem:[%s19786_s3 + $0x348] sm:$0xff] }
 0x1f2   :  { %12459 = vmatprep.subr.mxu0 %v15361_v21  ;;  %12006 = vmatpush3.msra.mxu1 %v952_v36  ;;  %v9653_v36 = vld [vmem:[%s19786_s3 + $0x380] sm:$0xff] }
 0x1f3   :  { %12460 = vmatpush3.msra.mxu0 %v15361_v21  ;;  %12007 = vmatprep.subr.mxu1 %v951_v28 }
 0x1f4   :  { %12461 = vmatprep.subr.mxu0 %v15371_v61  ;;  %12378 = vmatmul.mubr.f32.gmra.mxu0 %v9614_v48  ;;  %v9648_v48 = vld [vmem:[%s19786_s3 + $0x358] sm:$0xff] }
 0x1f5   :  { %12462 = vmatpush3.msra.mxu0 %v15371_v61  ;;  %12380 = vmatprep.mubr.f32.mxu0 %v9615_v46  ;;  %v9649_v46 = vld [vmem:[%s19786_s3 + $0x360] sm:$0xff] }
 0x1f6   :  { %12463 = vmatprep.subr.mxu0 %v15380_v19  ;;  %12008 = vmatpush3.msra.mxu1 %v951_v28  ;;  %v9656_v28 = vld [vmem:[%s19786_s3 + $0x398] sm:$0xff] }
 0x1f7   :  { %12464 = vmatpush3.msra.mxu0 %v15380_v19  ;;  %12009 = vmatprep.subr.mxu1 %v950_v42 }
 0x1f8   :  { %12465 = vmatprep.subr.mxu0 %v15390_v59  ;;  %12381 = vmatmul.mubr.f32.gmra.mxu0 %v9616_v1  ;;  %v9651_v1 = vld [vmem:[%s19786_s3 + $0x370] sm:$0xff] }
 0x1f9   :  { %12466 = vmatpush3.msra.mxu0 %v15390_v59  ;;  %12383 = vmatprep.mubr.f32.mxu0 %v9617_v3  ;;  %v9652_v3 = vld [vmem:[%s19786_s3 + $0x378] sm:$0xff] }
 0x1fa   :  { %12467 = vmatprep.subr.mxu0 %v15397_v38  ;;  %12010 = vmatpush3.msra.mxu1 %v950_v42  ;;  %v9659_v42 = vld [vmem:[%s19786_s3 + $0x3b0] sm:$0xff] }
 0x1fb   :  { %12468 = vmatpush3.msra.mxu0 %v15397_v38  ;;  %12011 = vmatprep.subr.mxu1 %v949_v52 }
 0x1fc   :  { %12469 = vmatprep.subr.mxu0 %v15405_v34  ;;  %12384 = vmatmul.mubr.f32.gmra.mxu0 %v9618_v23  ;;  %v9654_v23 = vld [vmem:[%s19786_s3 + $0x388] sm:$0xff] }
 0x1fd   :  { %12470 = vmatpush3.msra.mxu0 %v15405_v34  ;;  %12386 = vmatprep.mubr.f32.mxu0 %v9619_v45  ;;  %v9655_v45 = vld [vmem:[%s19786_s3 + $0x390] sm:$0xff] }
 0x1fe   :  { %12471 = vmatprep.subr.mxu0 %v15412_v60  ;;  %12012 = vmatpush3.msra.mxu1 %v949_v52  ;;  %v9662_v52 = vld [vmem:[%s19786_s3 + $0x3c8] sm:$0xff] }
 0x1ff   :  { %12472 = vmatpush3.msra.mxu0 %v15412_v60  ;;  %12013 = vmatprep.subr.mxu1 %v948_v30 }
 0x200   :  { %12473 = vmatprep.subr.mxu0 %v15418_v13  ;;  %12387 = vmatmul.mubr.f32.gmra.mxu0 %v9620_v40  ;;  %v9657_v40 = vld [vmem:[%s19786_s3 + $0x3a0] sm:$0xff] }
 0x201   :  { %12474 = vmatpush3.msra.mxu0 %v15418_v13  ;;  %12477 = vmatprep.mubr.f32.mxu0 %v9621_v43  ;;  %v9658_v43 = vld [vmem:[%s19786_s3 + $0x3a8] sm:$0xff] }
 0x202   :  { %12475 = vmatprep.subr.mxu0 %v15424_v10  ;;  %12014 = vmatpush3.msra.mxu1 %v948_v30  ;;  %v9664_v30 = vld [vmem:[%s19786_s3 + $0x3d8] sm:$0xff] }
 0x203   :  { %12476 = vmatpush3.msra.mxu0 %v15424_v10  ;;  %12015 = vmatprep.subr.mxu1 %v947_v17 }
 0x204   :  { %12557 = vmatprep.subr.mxu0 %v15298_v56  ;;  %12478 = vmatmul.mubr.f32.vlgmr.msra.gmra.mxu0 %v9622_v37  ;;  %v9660_v37 = vld [vmem:[%s19786_s3 + $0x3b8] sm:$0xff] }
 0x205   :  { %12558 = vmatpush3.msra.mxu0 %v15298_v56  ;;  %12480 = vmatprep.mubr.f32.mxu0 %v9623_v16  ;;  %v9661_v16 = vld [vmem:[%s19786_s3 + $0x3c0] sm:$0xff] }
 0x206   :  { %12559 = vmatprep.subr.mxu0 %v15303_v9  ;;  %12016 = vmatpush3.msra.mxu1 %v947_v17  ;;  %v9665_v17 = vld [vmem:[%s19786_s3 + $0x3e0] sm:$0xff] }
 0x207   :  { %12560 = vmatpush3.msra.mxu0 %v15303_v9  ;;  %12017 = vmatprep.subr.mxu1 %v946_v11 }
 0x208   :  { %12561 = vmatprep.subr.mxu0 %v15315_v50  ;;  %12481 = vmatmul.mubr.f32.gmra.mxu0 %v9624_v55  ;;  %v9663_v55 = vld [vmem:[%s19786_s3 + $0x3d0] sm:$0xff] }
 0x209   :  { %12562 = vmatpush3.msra.mxu0 %v15315_v50  ;;  %12483 = vmatprep.mubr.f32.mxu0 %v9625_v39 }
 0x20a   :  { %12563 = vmatprep.subr.mxu0 %v15324_v24  ;;  %12018 = vmatpush3.msra.mxu1 %v946_v11  ;;  %v9666_v11 = vld [vmem:[%s19786_s3 + $0x3e8] sm:$0xff] }
 0x20b   :  { %12564 = vmatpush3.msra.mxu0 %v15324_v24  ;;  %12019 = vmatprep.subr.mxu1 %v945_v0 }
 0x20c   :  { %12565 = vmatprep.subr.mxu0 %v15333_v2  ;;  %12484 = vmatmul.mubr.f32.gmra.mxu0 %v9626_v12 }
 0x20d   :  { %12566 = vmatpush3.msra.mxu0 %v15333_v2  ;;  %12486 = vmatprep.mubr.f32.mxu0 %v9627_v58 }
 0x20e   :  { %12567 = vmatprep.subr.mxu0 %v15342_v33  ;;  %12020 = vmatpush3.msra.mxu1 %v945_v0 }
 0x20f   :  { %12568 = vmatpush3.msra.mxu0 %v15342_v33  ;;  %12021 = vmatprep.subr.mxu1 %v944_v44 }
 0x210   :  { %12569 = vmatprep.subr.mxu0 %v15352_v63  ;;  %12487 = vmatmul.mubr.f32.gmra.mxu0 %v9628_v18 }
 0x211   :  { %12570 = vmatpush3.msra.mxu0 %v15352_v63  ;;  %12489 = vmatprep.mubr.f32.mxu0 %v9629_v62 }
 0x212   :  { %12571 = vmatprep.subr.mxu0 %v15361_v21  ;;  %12022 = vmatpush3.msra.mxu1 %v944_v44  ;;  %v9669_v44 = vld [vmem:[%s19786_s3 + $0x400] sm:$0xff] }
 0x213   :  { %12572 = vmatpush3.msra.mxu0 %v15361_v21  ;;  %12023 = vmatprep.subr.mxu1 %v943_v35 }
 0x214   :  { %12573 = vmatprep.subr.mxu0 %v15371_v61  ;;  %12490 = vmatmul.mubr.f32.gmra.mxu0 %v9630_v41  ;;  %v9667_v41 = vld [vmem:[%s19786_s3 + $0x3f0] sm:$0xff] }
 0x215   :  { %12574 = vmatpush3.msra.mxu0 %v15371_v61  ;;  %12492 = vmatprep.mubr.f32.mxu0 %v9631_v14 }
 0x216   :  { %12575 = vmatprep.subr.mxu0 %v15380_v19  ;;  %12024 = vmatpush3.msra.mxu1 %v943_v35  ;;  %v9670_v35 = vld [vmem:[%s19786_s3 + $0x408] sm:$0xff] }
 0x217   :  { %12576 = vmatpush3.msra.mxu0 %v15380_v19  ;;  %12025 = vmatprep.subr.mxu1 %v942_v29 }
 0x218   :  { %12577 = vmatprep.subr.mxu0 %v15390_v59  ;;  %12493 = vmatmul.mubr.f32.gmra.mxu0 %v9632_v15  ;;  %v9668_v15 = vld [vmem:[%s19786_s3 + $0x3f8] sm:$0xff] }
 0x219   :  { %12578 = vmatpush3.msra.mxu0 %v15390_v59  ;;  %12495 = vmatprep.mubr.f32.mxu0 %v9633_v20 }
 0x21a   :  { %12579 = vmatprep.subr.mxu0 %v15397_v38  ;;  %12026 = vmatpush3.msra.mxu1 %v942_v29 }
 0x21b   :  { %12580 = vmatpush3.msra.mxu0 %v15397_v38  ;;  %12027 = vmatprep.subr.mxu1 %v941_v53 }
 0x21c   :  { %12581 = vmatprep.subr.mxu0 %v15405_v34  ;;  %12496 = vmatmul.mubr.f32.gmra.mxu0 %v9634_v22 }
 0x21d   :  { %12582 = vmatpush3.msra.mxu0 %v15405_v34  ;;  %12498 = vmatprep.mubr.f32.mxu0 %v9635_v32 }
 0x21e   :  { %12583 = vmatprep.subr.mxu0 %v15412_v60  ;;  %12028 = vmatpush3.msra.mxu1 %v941_v53  ;;  %v9673_v53 = vld [vmem:[%s19786_s3 + $0x420] sm:$0xff] }
 0x21f   :  { %12584 = vmatpush3.msra.mxu0 %v15412_v60  ;;  %12053 = vmatprep.subr.mxu1 %v15895_v5 }
 0x220   :  { %12585 = vmatprep.subr.mxu0 %v15418_v13  ;;  %12499 = vmatmul.mubr.f32.gmra.mxu0 %v9636_v6 }
 0x221   :  { %12586 = vmatpush3.msra.mxu0 %v15418_v13  ;;  %12589 = vmatprep.mubr.f32.mxu0 %v9637_v7  ;;  %v9671_v7 = vld [vmem:[%s19786_s3 + $0x410] sm:$0xff] }
 0x222   :  { %12587 = vmatprep.subr.mxu0 %v15424_v10 }
 0x223   :  { %12588 = vmatpush3.msra.mxu0 %v15424_v10 }
 0x224   :  { %12669 = vmatprep.subr.mxu0 %v15298_v56  ;;  %12590 = vmatmul.mubr.f32.vlgmr.msra.gmra.mxu0 %v9638_v54 }
 0x225   :  { %12670 = vmatpush3.msra.mxu0 %v15298_v56  ;;  %12592 = vmatprep.mubr.f32.mxu0 %v9639_v31  ;;  %v9672_v31 = vld [vmem:[%s19786_s3 + $0x418] sm:$0xff] }
 0x226   :  { %12671 = vmatprep.subr.mxu0 %v15303_v9 }
 0x227   :  { %12672 = vmatpush3.msra.mxu0 %v15303_v9 }
 0x228   :  { %12673 = vmatprep.subr.mxu0 %v15315_v50  ;;  %12593 = vmatmul.mubr.f32.gmra.mxu0 %v9640_v57 }
 0x229   :  { %12674 = vmatpush3.msra.mxu0 %v15315_v50  ;;  %12595 = vmatprep.mubr.f32.mxu0 %v9641_v4 }
 0x22a   :  { %12675 = vmatprep.subr.mxu0 %v15324_v24 }
 0x22b   :  { %12676 = vmatpush3.msra.mxu0 %v15324_v24 }
 0x22c   :  { %12677 = vmatprep.subr.mxu0 %v15333_v2  ;;  %12596 = vmatmul.mubr.f32.gmra.mxu0 %v9642_v8  ;;  %v9674_v8 = vld [vmem:[%s19786_s3 + $0x428] sm:$0xff] }
 0x22d   :  { %12678 = vmatpush3.msra.mxu0 %v15333_v2  ;;  %12598 = vmatprep.mubr.f32.mxu0 %v9643_v26 }
 0x22e   :  { %12679 = vmatprep.subr.mxu0 %v15342_v33 }
 0x22f   :  { %12680 = vmatpush3.msra.mxu0 %v15342_v33 }
 0x230   :  { %12681 = vmatprep.subr.mxu0 %v15352_v63  ;;  %12599 = vmatmul.mubr.f32.gmra.mxu0 %v9644_v27  ;;  %v9675_v27 = vld [vmem:[%s19786_s3 + $0x430] sm:$0xff] }
 0x231   :  { %12682 = vmatpush3.msra.mxu0 %v15352_v63  ;;  %12601 = vmatprep.mubr.f32.mxu0 %v9645_v49 }
 0x232   :  { %12683 = vmatprep.subr.mxu0 %v15361_v21 }
 0x233   :  { %12684 = vmatpush3.msra.mxu0 %v15361_v21 }
 0x234   :  { %12685 = vmatprep.subr.mxu0 %v15371_v61  ;;  %12602 = vmatmul.mubr.f32.gmra.mxu0 %v9646_v51 }
 0x235   :  { %12686 = vmatpush3.msra.mxu0 %v15371_v61  ;;  %12604 = vmatprep.mubr.f32.mxu0 %v9647_v25  ;;  %v9676_v25 = vld [vmem:[%s19786_s3 + $0x438] sm:$0xff] }
 0x236   :  { %12687 = vmatprep.subr.mxu0 %v15380_v19 }
 0x237   :  { %12688 = vmatpush3.msra.mxu0 %v15380_v19 }
 0x238   :  { %12689 = vmatprep.subr.mxu0 %v15390_v59  ;;  %12605 = vmatmul.mubr.f32.gmra.mxu0 %v9648_v48 }
 0x239   :  { %12690 = vmatpush3.msra.mxu0 %v15390_v59  ;;  %12607 = vmatprep.mubr.f32.mxu0 %v9649_v46  ;;  %v9677_v46 = vld [vmem:[%s19786_s3 + $0x440] sm:$0xff] }
 0x23a   :  { %12691 = vmatprep.subr.mxu0 %v15397_v38 }
 0x23b   :  { %12692 = vmatpush3.msra.mxu0 %v15397_v38 }
 0x23c   :  { %12693 = vmatprep.subr.mxu0 %v15405_v34  ;;  %12608 = vmatmul.mubr.f32.gmra.mxu0 %v9650_v47 }
 0x23d   :  { %12694 = vmatpush3.msra.mxu0 %v15405_v34  ;;  %12610 = vmatprep.mubr.f32.mxu0 %v9651_v1 }
 0x23e   :  { %12695 = vmatprep.subr.mxu0 %v15412_v60 }
 0x23f   :  { %12696 = vmatpush3.msra.mxu0 %v15412_v60 }
 0x240   :  { %12697 = vmatprep.subr.mxu0 %v15418_v13  ;;  %12611 = vmatmul.mubr.f32.gmra.mxu0 %v9652_v3  ;;  %v9678_v3 = vld [vmem:[%s19786_s3 + $0x448] sm:$0xff] }
 0x241   :  { %12698 = vmatpush3.msra.mxu0 %v15418_v13  ;;  %12701 = vmatprep.mubr.f32.mxu0 %v9653_v36  ;;  %v9679_v36 = vld [vmem:[%s19786_s3 + $0x450] sm:$0xff] }
 0x242   :  { %12699 = vmatprep.subr.mxu0 %v15424_v10 }
 0x243   :  { %12700 = vmatpush3.msra.mxu0 %v15424_v10 }
 0x244   :  { %12781 = vmatprep.subr.mxu0 %v15298_v56  ;;  %12702 = vmatmul.mubr.f32.vlgmr.msra.gmra.mxu0 %v9654_v23 }
 0x245   :  { %12782 = vmatpush3.msra.mxu0 %v15298_v56  ;;  %12704 = vmatprep.mubr.f32.mxu0 %v9655_v45 }
 0x246   :  { %12783 = vmatprep.subr.mxu0 %v15303_v9 }
 0x247   :  { %12784 = vmatpush3.msra.mxu0 %v15303_v9 }
 0x248   :  { %12785 = vmatprep.subr.mxu0 %v15315_v50  ;;  %12705 = vmatmul.mubr.f32.gmra.mxu0 %v9656_v28  ;;  %v9680_v28 = vld [vmem:[%s19786_s3 + $0x458] sm:$0xff] }
 0x249   :  { %12786 = vmatpush3.msra.mxu0 %v15315_v50  ;;  %12707 = vmatprep.mubr.f32.mxu0 %v9657_v40 }
 0x24a   :  { %12787 = vmatprep.subr.mxu0 %v15324_v24 }
 0x24b   :  { %12788 = vmatpush3.msra.mxu0 %v15324_v24 }
 0x24c   :  { %12789 = vmatprep.subr.mxu0 %v15333_v2  ;;  %12708 = vmatmul.mubr.f32.gmra.mxu0 %v9658_v43 }
 0x24d   :  { %12790 = vmatpush3.msra.mxu0 %v15333_v2  ;;  %12710 = vmatprep.mubr.f32.mxu0 %v9659_v42  ;;  %v9681_v42 = vld [vmem:[%s19786_s3 + $0x460] sm:$0xff] }
 0x24e   :  { %12791 = vmatprep.subr.mxu0 %v15342_v33 }
 0x24f   :  { %12792 = vmatpush3.msra.mxu0 %v15342_v33 }
 0x250   :  { %12793 = vmatprep.subr.mxu0 %v15352_v63  ;;  %12711 = vmatmul.mubr.f32.gmra.mxu0 %v9660_v37 }
 0x251   :  { %12794 = vmatpush3.msra.mxu0 %v15352_v63  ;;  %12713 = vmatprep.mubr.f32.mxu0 %v9661_v16  ;;  %v9682_v16 = vld [vmem:[%s19786_s3 + $0x468] sm:$0xff] }
 0x252   :  { %12795 = vmatprep.subr.mxu0 %v15361_v21 }
 0x253   :  { %12796 = vmatpush3.msra.mxu0 %v15361_v21  ;;  %v16008_v39 = vpop.f32.mrf.mxu1 }
 0x254   :  { %12797 = vmatprep.subr.mxu0 %v15371_v61  ;;  %12714 = vmatmul.mubr.f32.gmra.mxu0 %v9662_v52 }
 0x255   :  { %12798 = vmatpush3.msra.mxu0 %v15371_v61  ;;  %12716 = vmatprep.mubr.f32.mxu0 %v9663_v55  ;;  %v16015_v12 = vpop.f32.mrf.mxu1  ;;  %v16017_v58 = vpop.f32.mrf.mxu0  ;;  %v9683_v55 = vld [vmem:[%s19786_s3 + $0x470] sm:$0xff] }
 0x256   :  { %12799 = vmatprep.subr.mxu0 %v15380_v19 }
 0x257   :  { %12800 = vmatpush3.msra.mxu0 %v15380_v19  ;;  %v16024_v18 = vpop.f32.mrf.mxu0 }
 0x258   :  { %12801 = vmatprep.subr.mxu0 %v15390_v59  ;;  %12717 = vmatmul.mubr.f32.gmra.mxu0 %v9664_v30  ;;  %v16027_v62 = vpop.f32.mrf.mxu1 }
 0x259   :  { %12802 = vmatpush3.msra.mxu0 %v15390_v59  ;;  %12719 = vmatprep.mubr.f32.mxu0 %v9665_v17 }
 0x25a   :  { %12803 = vmatprep.subr.mxu0 %v15397_v38  ;;  %v16037_v14 = vpop.f32.mrf.mxu1 }
 0x25b   :  { %12804 = vmatpush3.msra.mxu0 %v15397_v38  ;;  %v16040_v0 = vpop.f32.mrf.mxu0 }
 0x25c   :  { %12805 = vmatprep.subr.mxu0 %v15405_v34  ;;  %12720 = vmatmul.mubr.f32.gmra.mxu0 %v9666_v11  ;;  %v9684_v11 = vld [vmem:[%s19786_s3 + $0x478] sm:$0xff] }
 0x25d   :  { %12806 = vmatpush3.msra.mxu0 %v15405_v34  ;;  %12722 = vmatprep.mubr.f32.mxu0 %v9667_v41  ;;  %v16047_v20 = vpop.f32.mrf.mxu0 }
 0x25e   :  { %12807 = vmatprep.subr.mxu0 %v15412_v60  ;;  %v16053_v22 = vpop.f32.mrf.mxu1 }
 0x25f   :  { %12808 = vmatpush3.msra.mxu0 %v15412_v60 }
 0x260   :  { %12809 = vmatprep.subr.mxu0 %v15418_v13  ;;  %12723 = vmatmul.mubr.f32.gmra.mxu0 %v9668_v15  ;;  %v16057_v32 = vpop.f32.mrf.mxu1  ;;  %v9685_v15 = vld [vmem:[%s19786_s3 + $0x480] sm:$0xff] }
 0x261   :  { %12810 = vmatpush3.msra.mxu0 %v15418_v13  ;;  %12813 = vmatprep.mubr.f32.mxu0 %v9669_v44  ;;  %v16063_v6 = vpop.f32.mrf.mxu0 }
 0x262   :  { %12811 = vmatprep.subr.mxu0 %v15424_v10 }
 0x263   :  { %12812 = vmatpush3.msra.mxu0 %v15424_v10  ;;  %v16070_v29 = vpop.f32.mrf.mxu0 }
 0x264   :  { %12893 = vmatprep.subr.mxu0 %v15298_v56  ;;  %12814 = vmatmul.mubr.f32.vlgmr.msra.gmra.mxu0 %v9670_v35  ;;  %v16073_v54 = vpop.f32.mrf.mxu1  ;;  %v9686_v35 = vld [vmem:[%s19786_s3 + $0x488] sm:$0xff] }
 0x265   :  { %12894 = vmatpush3.msra.mxu0 %v15298_v56  ;;  %12816 = vmatprep.mubr.f32.mxu0 %v9671_v7 }
 0x266   :  { %12895 = vmatprep.subr.mxu0 %v15303_v9  ;;  %v16083_v57 = vpop.f32.mrf.mxu1 }
 0x267   :  { %12896 = vmatpush3.msra.mxu0 %v15303_v9  ;;  %v16086_v4 = vpop.f32.mrf.mxu0 }
 0x268   :  { %12897 = vmatprep.subr.mxu0 %v15315_v50  ;;  %12817 = vmatmul.mubr.f32.gmra.mxu0 %v9672_v31 }
 0x269   :  { %12898 = vmatpush3.msra.mxu0 %v15315_v50  ;;  %12819 = vmatprep.mubr.f32.mxu0 %v9673_v53  ;;  %v16093_v26 = vpop.f32.mrf.mxu0 }
 0x26a   :  { %12899 = vmatprep.subr.mxu0 %v15324_v24  ;;  %v16099_v49 = vpop.f32.mrf.mxu1 }
 0x26b   :  { %12900 = vmatpush3.msra.mxu0 %v15324_v24 }
 0x26c   :  { %12901 = vmatprep.subr.mxu0 %v15333_v2  ;;  %12820 = vmatmul.mubr.f32.gmra.mxu0 %v9674_v8  ;;  %v16103_v51 = vpop.f32.mrf.mxu1  ;;  %v9687_v8 = vld [vmem:[%s19786_s3 + $0x490] sm:$0xff] }
 0x26d   :  { %12902 = vmatpush3.msra.mxu0 %v15333_v2  ;;  %12822 = vmatprep.mubr.f32.mxu0 %v9675_v27  ;;  %v16109_v48 = vpop.f32.mrf.mxu0 }
 0x26e   :  { %12903 = vmatprep.subr.mxu0 %v15342_v33 }
 0x26f   :  { %12904 = vmatpush3.msra.mxu0 %v15342_v33  ;;  %v16116_v47 = vpop.f32.mrf.mxu0 }
 0x270   :  { %12905 = vmatprep.subr.mxu0 %v15352_v63  ;;  %12823 = vmatmul.mubr.f32.gmra.mxu0 %v9676_v25  ;;  %v16119_v1 = vpop.f32.mrf.mxu1 }
 0x271   :  { %12906 = vmatpush3.msra.mxu0 %v15352_v63  ;;  %12825 = vmatprep.mubr.f32.mxu0 %v9677_v46  ;;  %v9688_v46 = vld [vmem:[%s19786_s3 + $0x498] sm:$0xff] }
 0x272   :  { %12907 = vmatprep.subr.mxu0 %v15361_v21  ;;  %v16129_v23 = vpop.f32.mrf.mxu1 }
 0x273   :  { %12908 = vmatpush3.msra.mxu0 %v15361_v21  ;;  %v16132_v45 = vpop.f32.mrf.mxu0 }
 0x274   :  { %12909 = vmatprep.subr.mxu0 %v15371_v61  ;;  %12826 = vmatmul.mubr.f32.gmra.mxu0 %v9678_v3  ;;  %v776_v3 = vld [vmem:[#allocation2 + $0x70] sm:$0xff] }
 0x275   :  { %12910 = vmatpush3.msra.mxu0 %v15371_v61  ;;  %12828 = vmatprep.mubr.f32.mxu0 %v9679_v36  ;;  %v16139_v40 = vpop.f32.mrf.mxu0 }
 0x276   :  { %12911 = vmatprep.subr.mxu0 %v15380_v19  ;;  %v16142_v43 = vpop.f32.mrf.mxu1 }
 0x277   :  { %12912 = vmatpush3.msra.mxu0 %v15380_v19 }
 0x278   :  { %12913 = vmatprep.subr.mxu0 %v15390_v59  ;;  %12829 = vmatmul.mubr.f32.gmra.mxu0 %v9680_v28  ;;  %v16149_v37 = vpop.f32.mrf.mxu1 }
 0x279   :  { %12914 = vmatpush3.msra.mxu0 %v15390_v59  ;;  %12831 = vmatprep.mubr.f32.mxu0 %v9681_v42  ;;  %v16155_v52 = vpop.f32.mrf.mxu0 }
 0x27a   :  { %12915 = vmatprep.subr.mxu0 %v15397_v38 }
 0x27b   :  { %12916 = vmatpush3.msra.mxu0 %v15397_v38  ;;  %v16162_v30 = vpop.f32.mrf.mxu0 }
 0x27c   :  { %12917 = vmatprep.subr.mxu0 %v15405_v34  ;;  %12832 = vmatmul.mubr.f32.gmra.mxu0 %v9682_v16  ;;  %v16165_v17 = vpop.f32.mrf.mxu1 }
 0x27d   :  { %12918 = vmatpush3.msra.mxu0 %v15405_v34  ;;  %12834 = vmatprep.mubr.f32.mxu0 %v9683_v55  ;;  %v775_v55 = vld [vmem:[#allocation2 + $0x68] sm:$0xff] }
 0x27e   :  { %12919 = vmatprep.subr.mxu0 %v15412_v60  ;;  %v16172_v41 = vpop.f32.mrf.mxu1 }
 0x27f   :  { %12920 = vmatpush3.msra.mxu0 %v15412_v60  ;;  %v16178_v44 = vpop.f32.mrf.mxu0 }
 0x280   :  { %12921 = vmatprep.subr.mxu0 %v15418_v13  ;;  %12835 = vmatmul.mubr.f32.gmra.mxu0 %v9684_v11  ;;  %v9689_v11 = vld [vmem:[%s19786_s3 + $0x4a0] sm:$0xff] }
 0x281   :  { %12922 = vmatpush3.msra.mxu0 %v15418_v13  ;;  %12925 = vmatprep.mubr.f32.mxu0 %v9685_v15  ;;  %v16185_v7 = vpop.f32.mrf.mxu0 }
 0x282   :  { %12923 = vmatprep.subr.mxu0 %v15424_v10  ;;  %v11975_v31 = vpop.f32.mrf.mxu1 }
 0x283   :  { %12924 = vmatpush3.msra.mxu0 %v15424_v10 }
 0x284   :  { %13005 = vmatprep.subr.mxu0 %v15298_v56  ;;  %12926 = vmatmul.mubr.f32.vlgmr.msra.gmra.mxu0 %v9686_v35  ;;  %v861_v53 = vpop.f32.mrf.mxu1  ;;  %v16193_v27 = vpop.f32.mrf.mxu0 }
 0x285   :  { %13006 = vmatpush3.msra.mxu0 %v15298_v56  ;;  %12029 = vmatprep.mubr.f32.mxu1 %v861_v53 }
 0x286   :  { %13007 = vmatprep.subr.mxu0 %v15303_v9  ;;  %v11978_v25 = vpop.f32.mrf.mxu1  ;;  %12030 = vmatmul.mubr.f32.vlgmr.msra.gmra.mxu1 %v11975_v31  ;;  %v16200_v36 = vpop.f32.mrf.mxu0  ;;  %v774_v31 = vld [vmem:[#allocation2 + $0x60] sm:$0xff] }
 0x287   :  { %13008 = vmatpush3.msra.mxu0 %v15303_v9  ;;  %12928 = vmatprep.mubr.f32.mxu0 %v9687_v8 }
 0x288   :  { %13009 = vmatprep.subr.mxu0 %v15315_v50  ;;  %12054 = vmatpush3.msra.mxu1 %v15895_v5  ;;  %v871_v28 = vpop.f32.mrf.mxu1  ;;  %v16205_v42 = vpop.f32.mrf.mxu0  ;;  %v9690_v5 = vld [vmem:[%s19786_s3 + $0x4a8] sm:$0xff] }
 0x289   :  { %19794 = vst [vmem:[#allocation5_spill] sm:$0xff] %v16205_v42  ;;  %12929 = vmatmul.mubr.f32.gmra.mxu0 %v9688_v46  ;;  %12055 = vmatprep.subr.mxu1 %v776_v3 }
 0x28a   :  { %13010 = vmatpush3.msra.mxu0 %v15315_v50  ;;  %12032 = vmatprep.mubr.f32.mxu1 %v871_v28  ;;  %v11981_v16 = vpop.f32.mrf.mxu1  ;;  %v16211_v15 = vpop.f32.mrf.mxu0 }
 0x28b   :  { %13011 = vmatprep.subr.mxu0 %v15324_v24  ;;  %12056 = vmatpush3.msra.mxu1 %v776_v3  ;;  %v9691_v3 = vld [vmem:[%s19786_s3 + $0x4b0] sm:$0xff] }
 0x28c   :  { %13012 = vmatpush3.msra.mxu0 %v15324_v24  ;;  %12033 = vmatmul.mubr.f32.gmra.mxu1 %v11978_v25  ;;  %v881_v35 = vpop.f32.mrf.mxu1  ;;  %v16218_v53 = vpop.f32.mrf.mxu0  ;;  %v773_v25 = vld [vmem:[#allocation2 + $0x58] sm:$0xff] }
 0x28d   :  { %19795 = vst [vmem:[#allocation6_spill] sm:$0xff] %v16218_v53  ;;  %12057 = vmatprep.subr.mxu1 %v775_v55  ;;  %12931 = vmatprep.mubr.f32.mxu0 %v9689_v11  ;;  %v772_v11 = vld [vmem:[#allocation2 + $0x50] sm:$0xff] }
 0x28e   :  { %13013 = vmatprep.subr.mxu0 %v15333_v2  ;;  %12058 = vmatpush3.msra.mxu1 %v775_v55  ;;  %v11984_v8 = vpop.f32.mrf.mxu1  ;;  %v16221_v46 = vpop.f32.mrf.mxu0  ;;  %v9692_v55 = vld [vmem:[%s19786_s3 + $0x4b8] sm:$0xff] }
 0x28f   :  { %19796 = vst [vmem:[#allocation7_spill] sm:$0xff] %v16221_v46  ;;  %12932 = vmatmul.mubr.f32.gmra.mxu0 %v9690_v5  ;;  %12059 = vmatprep.subr.mxu1 %v774_v31 }
 0x290   :  { %13014 = vmatpush3.msra.mxu0 %v15333_v2  ;;  %12035 = vmatprep.mubr.f32.mxu1 %v881_v35  ;;  %v891_v28 = vpop.f32.mrf.mxu1  ;;  %v16227_v53 = vpop.f32.mrf.mxu0 }
 0x291   :  { %19797 = vst [vmem:[#allocation8_spill] sm:$0xff] %v16227_v53  ;;  %13015 = vmatprep.subr.mxu0 %v15342_v33  ;;  %12060 = vmatpush3.msra.mxu1 %v774_v31  ;;  %v9693_v31 = vld [vmem:[%s19786_s3 + $0x4c0] sm:$0xff] }
 0x292   :  { %13016 = vmatpush3.msra.mxu0 %v15342_v33  ;;  %12036 = vmatmul.mubr.f32.gmra.mxu1 %v11981_v16  ;;  %v11987_v5 = vpop.f32.mrf.mxu1  ;;  %v16234_v35 = vpop.f32.mrf.mxu0  ;;  %v771_v16 = vld [vmem:[#allocation2 + $0x48] sm:$0xff] }
 0x293   :  { %19798 = vst [vmem:[#allocation9_spill] sm:$0xff] %v16234_v35  ;;  %12061 = vmatprep.subr.mxu1 %v773_v25  ;;  %12934 = vmatprep.mubr.f32.mxu0 %v9691_v3 }
 0x294   :  { %13017 = vmatprep.subr.mxu0 %v15352_v63  ;;  %12062 = vmatpush3.msra.mxu1 %v773_v25  ;;  %v901_v53 = vpop.f32.mrf.mxu1  ;;  %v16237_v46 = vpop.f32.mrf.mxu0  ;;  %v9694_v25 = vld [vmem:[%s19786_s3 + $0x4c8] sm:$0xff] }
 0x295   :  { %19799 = vst [vmem:[#allocation10_spill] sm:$0xff] %v16237_v46  ;;  %12935 = vmatmul.mubr.f32.gmra.mxu0 %v9692_v55  ;;  %12063 = vmatprep.subr.mxu1 %v772_v11  ;;  %v770_v55 = vld [vmem:[#allocation2 + $0x40] sm:$0xff] }
 0x296   :  { %13018 = vmatpush3.msra.mxu0 %v15352_v63  ;;  %12038 = vmatprep.mubr.f32.mxu1 %v891_v28  ;;  %v16243_v42 = vpop.f32.mrf.mxu0  ;;  %v11990_v3 = vpop.f32.mrf.mxu1 }
 0x297   :  { %19800 = vst [vmem:[#allocation11_spill] sm:$0xff] %v16243_v42  ;;  %13019 = vmatprep.subr.mxu0 %v15361_v21  ;;  %12064 = vmatpush3.msra.mxu1 %v772_v11  ;;  %v9695_v42 = vld [vmem:[%s19786_s3 + $0x4d0] sm:$0xff] }
 0x298   :  { %13020 = vmatpush3.msra.mxu0 %v15361_v21  ;;  %12039 = vmatmul.mubr.f32.gmra.mxu1 %v11984_v8  ;;  %v16250_v28 = vpop.f32.mrf.mxu0  ;;  %v911_v11 = vpop.f32.mrf.mxu1  ;;  %v769_v8 = vld [vmem:[#allocation2 + $0x38] sm:$0xff] }
 0x299   :  { %19801 = vst [vmem:[#allocation12_spill] sm:$0xff] %v16250_v28  ;;  %12065 = vmatprep.subr.mxu1 %v771_v16  ;;  %12937 = vmatprep.mubr.f32.mxu0 %v9693_v31  ;;  %v768_v31 = vld [vmem:[#allocation2 + $0x30] sm:$0xff] }
 0x29a   :  { %13021 = vmatprep.subr.mxu0 %v15371_v61  ;;  %12066 = vmatpush3.msra.mxu1 %v771_v16  ;;  %v16253_v46 = vpop.f32.mrf.mxu0  ;;  %v9696_v16 = vld [vmem:[%s19786_s3 + $0x4d8] sm:$0xff] }
 0x29b   :  { %12938 = vmatmul.mubr.f32.gmra.mxu0 %v9694_v25  ;;  %12067 = vmatprep.subr.mxu1 %v770_v55 }
 0x29c   :  { %13022 = vmatpush3.msra.mxu0 %v15371_v61  ;;  %12041 = vmatprep.mubr.f32.mxu1 %v901_v53  ;;  %v16259_v35 = vpop.f32.mrf.mxu0  ;;  %v11993_v53 = vpop.f32.mrf.mxu1 }
 0x29d   :  { %19802 = vst [vmem:[#allocation13_spill] sm:$0xff] %v16259_v35  ;;  %13023 = vmatprep.subr.mxu0 %v15380_v19  ;;  %12068 = vmatpush3.msra.mxu1 %v770_v55  ;;  %v9697_v55 = vld [vmem:[%s19786_s3 + $0x4e0] sm:$0xff] }
 0x29e   :  { %13024 = vmatpush3.msra.mxu0 %v15380_v19  ;;  %12042 = vmatmul.mubr.f32.gmra.mxu1 %v11987_v5  ;;  %v16266_v25 = vpop.f32.mrf.mxu0  ;;  %v767_v5 = vld [vmem:[#allocation2 + $0x28] sm:$0xff] }
 0x29f   :  { %19803 = vst [vmem:[#allocation14_spill] sm:$0xff] %v16266_v25  ;;  %12069 = vmatprep.subr.mxu1 %v769_v8  ;;  %12940 = vmatprep.mubr.f32.mxu0 %v9695_v42  ;;  %v921_v42 = vpop.f32.mrf.mxu1 }
 0x2a0   :  { %13025 = vmatprep.subr.mxu0 %v15390_v59  ;;  %12070 = vmatpush3.msra.mxu1 %v769_v8  ;;  %v16269_v35 = vpop.f32.mrf.mxu0  ;;  %v9698_v8 = vld [vmem:[%s19786_s3 + $0x4e8] sm:$0xff] }
 0x2a1   :  { %19804 = vst [vmem:[#allocation15_spill] sm:$0xff] %v16269_v35  ;;  %12941 = vmatmul.mubr.f32.gmra.mxu0 %v9696_v16  ;;  %12071 = vmatprep.subr.mxu1 %v768_v31  ;;  %v766_v16 = vld [vmem:[#allocation2 + $0x20] sm:$0xff] }
 0x2a2   :  { %13026 = vmatpush3.msra.mxu0 %v15390_v59  ;;  %12044 = vmatprep.mubr.f32.mxu1 %v911_v11  ;;  %v16275_v28 = vpop.f32.mrf.mxu0 }
 0x2a3   :  { %19805 = vst [vmem:[#allocation16_spill] sm:$0xff] %v16275_v28  ;;  %13027 = vmatprep.subr.mxu0 %v15397_v38  ;;  %12072 = vmatpush3.msra.mxu1 %v768_v31  ;;  %v11996_v31 = vpop.f32.mrf.mxu1  ;;  %v9699_v28 = vld [vmem:[%s19786_s3 + $0x4f0] sm:$0xff] }
 0x2a4   :  { %13028 = vmatpush3.msra.mxu0 %v15397_v38  ;;  %12045 = vmatmul.mubr.f32.gmra.mxu1 %v11990_v3  ;;  %v16282_v11 = vpop.f32.mrf.mxu0  ;;  %v765_v3 = vld [vmem:[#allocation2 + $0x18] sm:$0xff] }
 0x2a5   :  { %19806 = vst [vmem:[#allocation17_spill] sm:$0xff] %v16282_v11  ;;  %12073 = vmatprep.subr.mxu1 %v767_v5  ;;  %12943 = vmatprep.mubr.f32.mxu0 %v9697_v55  ;;  %v764_v55 = vld [vmem:[#allocation2 + $0x10] sm:$0xff] }
 0x2a6   :  { %13029 = vmatprep.subr.mxu0 %v15405_v34  ;;  %12074 = vmatpush3.msra.mxu1 %v767_v5  ;;  %v16285_v35 = vpop.f32.mrf.mxu0  ;;  %v9700_v5 = vld [vmem:[%s19786_s3 + $0x4f8] sm:$0xff] }
 0x2a7   :  { %12944 = vmatmul.mubr.f32.gmra.mxu0 %v9698_v8  ;;  %12075 = vmatprep.subr.mxu1 %v766_v16 }
 0x2a8   :  { %13030 = vmatpush3.msra.mxu0 %v15405_v34  ;;  %12047 = vmatprep.mubr.f32.mxu1 %v921_v42  ;;  %v16291_v25 = vpop.f32.mrf.mxu0  ;;  %v931_v42 = vpop.f32.mrf.mxu1 }
 0x2a9   :  { %19807 = vst [vmem:[#allocation18_spill] sm:$0xff] %v16291_v25  ;;  %13031 = vmatprep.subr.mxu0 %v15412_v60  ;;  %12076 = vmatpush3.msra.mxu1 %v766_v16  ;;  %v9701_v16 = vld [vmem:[%s19786_s3 + $0x500] sm:$0xff] }
 0x2aa   :  { %13032 = vmatpush3.msra.mxu0 %v15412_v60  ;;  %12048 = vmatmul.mubr.f32.gmra.mxu1 %v11993_v53  ;;  %v16298_v8 = vpop.f32.mrf.mxu0  ;;  %v763_v53 = vld [vmem:[#allocation2 + $0x8] sm:$0xff] }
 0x2ab   :  { %12077 = vmatprep.subr.mxu1 %v765_v3  ;;  %12946 = vmatprep.mubr.f32.mxu0 %v9699_v28  ;;  %v9702_v28 = vld [vmem:[%s19786_s3 + $0x508] sm:$0xff] }
 0x2ac   :  { %13033 = vmatprep.subr.mxu0 %v15418_v13  ;;  %12078 = vmatpush3.msra.mxu1 %v765_v3  ;;  %v16301_v25 = vpop.f32.mrf.mxu0 }
 0x2ad   :  { %12947 = vmatmul.mubr.f32.gmra.mxu0 %v9700_v5  ;;  %12079 = vmatprep.subr.mxu1 %v764_v55  ;;  %v762_v5 = vld [vmem:[#allocation2] sm:$0xff] }
 0x2ae   :  { %13034 = vmatpush3.msra.mxu0 %v15418_v13  ;;  %12050 = vmatprep.mubr.f32.mxu1 %v931_v42  ;;  %v16307_v11 = vpop.f32.mrf.mxu0 }
 0x2af   :  { %13035 = vmatprep.subr.mxu0 %v15424_v10  ;;  %12080 = vmatpush3.msra.mxu1 %v764_v55  ;;  %v9703_v55 = vld [vmem:[%s19786_s3 + $0x510] sm:$0xff] }
 0x2b0   :  { %13036 = vmatpush3.msra.mxu0 %v15424_v10  ;;  %12051 = vmatmul.mubr.f32.gmra.mxu1 %v11996_v31  ;;  %v16314_v3 = vpop.f32.mrf.mxu0  ;;  %v1425_v31 = vld [vmem:[#allocation2 + $0x178] sm:$0xff] }
 0x2b1   :  { %19808 = vst [vmem:[#allocation19_spill] sm:$0xff] %v16314_v3  ;;  %12081 = vmatprep.subr.mxu1 %v763_v53  ;;  %13037 = vmatprep.mubr.f32.mxu0 %v9701_v16  ;;  %v1424_v16 = vld [vmem:[#allocation2 + $0x170] sm:$0xff] }
 0x2b2   :  { %13117 = vmatprep.subr.mxu0 %v15298_v56  ;;  %12082 = vmatpush3.msra.mxu1 %v763_v53  ;;  %v16317_v42 = vpop.f32.mrf.mxu0 }
 0x2b3   :  { %12085 = vmatprep.mubr.f32.mxu1 %v16015_v12  ;;  %13038 = vmatmul.mubr.f32.vlgmr.msra.gmra.mxu0 %v9702_v28  ;;  %v9704_v12 = vld [vmem:[%s19786_s3 + $0x518] sm:$0xff] }
 0x2b4   :  { %13118 = vmatpush3.msra.mxu0 %v15298_v56  ;;  %12083 = vmatprep.subr.mxu1 %v762_v5  ;;  %v16324_v3 = vpop.f32.mrf.mxu0 }
 0x2b5   :  { %19809 = vst [vmem:[#allocation20_spill] sm:$0xff] %v16324_v3  ;;  %13119 = vmatprep.subr.mxu0 %v15303_v9  ;;  %12084 = vmatpush3.msra.mxu1 %v762_v5  ;;  %v9705_v5 = vld [vmem:[%s19786_s3 + $0x520] sm:$0xff] }
 0x2b6   :  { %13120 = vmatpush3.msra.mxu0 %v15303_v9  ;;  %12086 = vmatmul.mubr.f32.vlgmr.msra.gmra.mxu1 %v16008_v39  ;;  %v16332_v53 = vpop.f32.mrf.mxu0  ;;  %v1423_v39 = vld [vmem:[#allocation2 + $0x168] sm:$0xff] }
 0x2b7   :  { %12165 = vmatprep.subr.mxu1 %v1425_v31  ;;  %13040 = vmatprep.mubr.f32.mxu0 %v9703_v55  ;;  %v1422_v55 = vld [vmem:[#allocation2 + $0x160] sm:$0xff] }
 0x2b8   :  { %13121 = vmatprep.subr.mxu0 %v15315_v50  ;;  %12088 = vmatprep.mubr.f32.mxu1 %v16037_v14  ;;  %v16336_v28 = vpop.f32.mrf.mxu0  ;;  %v9706_v14 = vld [vmem:[%s19786_s3 + $0x528] sm:$0xff] }
 0x2b9   :  { %12166 = vmatpush3.msra.mxu1 %v1425_v31  ;;  %13041 = vmatmul.mubr.f32.gmra.mxu0 %v9704_v12 }
 0x2ba   :  { %13122 = vmatpush3.msra.mxu0 %v15315_v50  ;;  %12167 = vmatprep.subr.mxu1 %v1424_v16  ;;  %v16342_v3 = vpop.f32.mrf.mxu0 }
 0x2bb   :  { %13123 = vmatprep.subr.mxu0 %v15324_v24  ;;  %12168 = vmatpush3.msra.mxu1 %v1424_v16  ;;  %v9707_v16 = vld [vmem:[%s19786_s3 + $0x530] sm:$0xff] }
 0x2bc   :  { %13124 = vmatpush3.msra.mxu0 %v15324_v24  ;;  %12089 = vmatmul.mubr.f32.gmra.mxu1 %v16027_v62  ;;  %v16350_v31 = vpop.f32.mrf.mxu0  ;;  %v1421_v62 = vld [vmem:[#allocation2 + $0x158] sm:$0xff] }
 0x2bd   :  { %19810 = vst [vmem:[#allocation21_spill] sm:$0xff] %v16350_v31  ;;  %12169 = vmatprep.subr.mxu1 %v1423_v39  ;;  %13043 = vmatprep.mubr.f32.mxu0 %v9705_v5  ;;  %v1420_v5 = vld [vmem:[#allocation2 + $0x150] sm:$0xff] }
 0x2be   :  { %13125 = vmatprep.subr.mxu0 %v15333_v2  ;;  %12091 = vmatprep.mubr.f32.mxu1 %v16057_v32  ;;  %v16354_v12 = vpop.f32.mrf.mxu0  ;;  %v9708_v32 = vld [vmem:[%s19786_s3 + $0x538] sm:$0xff] }
 0x2bf   :  { %12170 = vmatpush3.msra.mxu1 %v1423_v39  ;;  %13044 = vmatmul.mubr.f32.gmra.mxu0 %v9706_v14 }
 0x2c0   :  { %13126 = vmatpush3.msra.mxu0 %v15333_v2  ;;  %12171 = vmatprep.subr.mxu1 %v1422_v55  ;;  %v16360_v31 = vpop.f32.mrf.mxu0 }
 0x2c1   :  { %19811 = vst [vmem:[#allocation22_spill] sm:$0xff] %v16360_v31  ;;  %13127 = vmatprep.subr.mxu0 %v15342_v33  ;;  %12172 = vmatpush3.msra.mxu1 %v1422_v55  ;;  %v9709_v55 = vld [vmem:[%s19786_s3 + $0x540] sm:$0xff] }
 0x2c2   :  { %13128 = vmatpush3.msra.mxu0 %v15342_v33  ;;  %12092 = vmatmul.mubr.f32.gmra.mxu1 %v16053_v22  ;;  %v16368_v39 = vpop.f32.mrf.mxu0  ;;  %v1419_v22 = vld [vmem:[#allocation2 + $0x148] sm:$0xff] }
 0x2c3   :  { %12173 = vmatprep.subr.mxu1 %v1421_v62  ;;  %13046 = vmatprep.mubr.f32.mxu0 %v9707_v16  ;;  %v1418_v16 = vld [vmem:[#allocation2 + $0x140] sm:$0xff] }
 0x2c4   :  { %13129 = vmatprep.subr.mxu0 %v15352_v63  ;;  %12094 = vmatprep.mubr.f32.mxu1 %v16083_v57  ;;  %v16372_v14 = vpop.f32.mrf.mxu0  ;;  %v9710_v57 = vld [vmem:[%s19786_s3 + $0x548] sm:$0xff] }
 0x2c5   :  { %12174 = vmatpush3.msra.mxu1 %v1421_v62  ;;  %13047 = vmatmul.mubr.f32.gmra.mxu0 %v9708_v32 }
 0x2c6   :  { %13130 = vmatpush3.msra.mxu0 %v15352_v63  ;;  %12175 = vmatprep.subr.mxu1 %v1420_v5  ;;  %v16378_v31 = vpop.f32.mrf.mxu0 }
 0x2c7   :  { %13131 = vmatprep.subr.mxu0 %v15361_v21  ;;  %12176 = vmatpush3.msra.mxu1 %v1420_v5  ;;  %v9711_v5 = vld [vmem:[%s19786_s3 + $0x550] sm:$0xff] }
 0x2c8   :  { %13132 = vmatpush3.msra.mxu0 %v15361_v21  ;;  %12095 = vmatmul.mubr.f32.gmra.mxu1 %v16073_v54  ;;  %v16386_v62 = vpop.f32.mrf.mxu0  ;;  %v1417_v54 = vld [vmem:[#allocation2 + $0x138] sm:$0xff] }
 0x2c9   :  { %19812 = vst [vmem:[#allocation23_spill] sm:$0xff] %v16386_v62  ;;  %12177 = vmatprep.subr.mxu1 %v1419_v22  ;;  %13049 = vmatprep.mubr.f32.mxu0 %v9709_v55  ;;  %v1416_v55 = vld [vmem:[#allocation2 + $0x130] sm:$0xff] }
 0x2ca   :  { %13133 = vmatprep.subr.mxu0 %v15371_v61  ;;  %12097 = vmatprep.mubr.f32.mxu1 %v16103_v51  ;;  %v16390_v32 = vpop.f32.mrf.mxu0  ;;  %v9712_v51 = vld [vmem:[%s19786_s3 + $0x558] sm:$0xff] }
 0x2cb   :  { %12178 = vmatpush3.msra.mxu1 %v1419_v22  ;;  %13050 = vmatmul.mubr.f32.gmra.mxu0 %v9710_v57 }
 0x2cc   :  { %13134 = vmatpush3.msra.mxu0 %v15371_v61  ;;  %12179 = vmatprep.subr.mxu1 %v1418_v16  ;;  %v16396_v62 = vpop.f32.mrf.mxu0 }
 0x2cd   :  { %19813 = vst [vmem:[#allocation24_spill] sm:$0xff] %v16396_v62  ;;  %13135 = vmatprep.subr.mxu0 %v15380_v19  ;;  %12180 = vmatpush3.msra.mxu1 %v1418_v16  ;;  %v9713_v16 = vld [vmem:[%s19786_s3 + $0x560] sm:$0xff] }
 0x2ce   :  { %13136 = vmatpush3.msra.mxu0 %v15380_v19  ;;  %12098 = vmatmul.mubr.f32.gmra.mxu1 %v16099_v49  ;;  %v16404_v22 = vpop.f32.mrf.mxu0  ;;  %v1415_v49 = vld [vmem:[#allocation2 + $0x128] sm:$0xff] }
 0x2cf   :  { %12181 = vmatprep.subr.mxu1 %v1417_v54  ;;  %13052 = vmatprep.mubr.f32.mxu0 %v9711_v5  ;;  %v1414_v5 = vld [vmem:[#allocation2 + $0x120] sm:$0xff] }
 0x2d0   :  { %13137 = vmatprep.subr.mxu0 %v15390_v59  ;;  %12100 = vmatprep.mubr.f32.mxu1 %v16129_v23  ;;  %v16408_v57 = vpop.f32.mrf.mxu0  ;;  %v9714_v23 = vld [vmem:[%s19786_s3 + $0x568] sm:$0xff] }
 0x2d1   :  { %12182 = vmatpush3.msra.mxu1 %v1417_v54  ;;  %13053 = vmatmul.mubr.f32.gmra.mxu0 %v9712_v51 }
 0x2d2   :  { %13138 = vmatpush3.msra.mxu0 %v15390_v59  ;;  %12183 = vmatprep.subr.mxu1 %v1416_v55  ;;  %v16414_v62 = vpop.f32.mrf.mxu0 }
 0x2d3   :  { %13139 = vmatprep.subr.mxu0 %v15397_v38  ;;  %12184 = vmatpush3.msra.mxu1 %v1416_v55  ;;  %v9715_v55 = vld [vmem:[%s19786_s3 + $0x570] sm:$0xff] }
 0x2d4   :  { %13140 = vmatpush3.msra.mxu0 %v15397_v38  ;;  %12101 = vmatmul.mubr.f32.gmra.mxu1 %v16119_v1  ;;  %v16422_v54 = vpop.f32.mrf.mxu0  ;;  %v1413_v1 = vld [vmem:[#allocation2 + $0x118] sm:$0xff] }
 0x2d5   :  { %19814 = vst [vmem:[#allocation25_spill] sm:$0xff] %v16422_v54  ;;  %12185 = vmatprep.subr.mxu1 %v1415_v49  ;;  %13055 = vmatprep.mubr.f32.mxu0 %v9713_v16  ;;  %v1412_v16 = vld [vmem:[#allocation2 + $0x110] sm:$0xff] }
 0x2d6   :  { %13141 = vmatprep.subr.mxu0 %v15405_v34  ;;  %12103 = vmatprep.mubr.f32.mxu1 %v16149_v37  ;;  %v16426_v51 = vpop.f32.mrf.mxu0  ;;  %v9716_v37 = vld [vmem:[%s19786_s3 + $0x578] sm:$0xff] }
 0x2d7   :  { %12186 = vmatpush3.msra.mxu1 %v1415_v49  ;;  %13056 = vmatmul.mubr.f32.gmra.mxu0 %v9714_v23 }
 0x2d8   :  { %13142 = vmatpush3.msra.mxu0 %v15405_v34  ;;  %12187 = vmatprep.subr.mxu1 %v1414_v5  ;;  %v16432_v54 = vpop.f32.mrf.mxu0 }
 0x2d9   :  { %19815 = vst [vmem:[#allocation26_spill] sm:$0xff] %v16432_v54  ;;  %13143 = vmatprep.subr.mxu0 %v15412_v60  ;;  %12188 = vmatpush3.msra.mxu1 %v1414_v5  ;;  %v9717_v5 = vld [vmem:[%s19786_s3 + $0x580] sm:$0xff] }
 0x2da   :  { %13144 = vmatpush3.msra.mxu0 %v15412_v60  ;;  %12104 = vmatmul.mubr.f32.gmra.mxu1 %v16142_v43  ;;  %v16440_v49 = vpop.f32.mrf.mxu0  ;;  %v1411_v43 = vld [vmem:[#allocation2 + $0x108] sm:$0xff] }
 0x2db   :  { %12189 = vmatprep.subr.mxu1 %v1413_v1  ;;  %13058 = vmatprep.mubr.f32.mxu0 %v9715_v55 }
 0x2dc   :  { %13145 = vmatprep.subr.mxu0 %v15418_v13  ;;  %12106 = vmatprep.mubr.f32.mxu1 %v16172_v41  ;;  %v16444_v23 = vpop.f32.mrf.mxu0  ;;  %v9718_v41 = vld [vmem:[%s19786_s3 + $0x588] sm:$0xff] }
 0x2dd   :  { %19816 = vst [vmem:[#allocation27_spill] sm:$0xff] %v16444_v23  ;;  %12190 = vmatpush3.msra.mxu1 %v1413_v1  ;;  %13059 = vmatmul.mubr.f32.gmra.mxu0 %v9716_v37  ;;  %v1410_v1 = vld [vmem:[#allocation2 + $0x100] sm:$0xff] }
 0x2de   :  { %13146 = vmatpush3.msra.mxu0 %v15418_v13  ;;  %12191 = vmatprep.subr.mxu1 %v1412_v16  ;;  %v16450_v54 = vpop.f32.mrf.mxu0 }
 0x2df   :  { %13147 = vmatprep.subr.mxu0 %v15424_v10  ;;  %12192 = vmatpush3.msra.mxu1 %v1412_v16  ;;  %v9719_v16 = vld [vmem:[%s19786_s3 + $0x590] sm:$0xff] }
 0x2e0   :  { %13148 = vmatpush3.msra.mxu0 %v15424_v10  ;;  %12107 = vmatmul.mubr.f32.gmra.mxu1 %v16165_v17  ;;  %v16458_v55 = vpop.f32.mrf.mxu0  ;;  %v1765_v17 = vld [vmem:[#allocation2 + $0x1f8] sm:$0xff] }
 0x2e1   :  { %12193 = vmatprep.subr.mxu1 %v1411_v43  ;;  %13149 = vmatprep.mubr.f32.mxu0 %v9717_v5 }
 0x2e2   :  { %13229 = vmatprep.subr.mxu0 %v15298_v56  ;;  %12194 = vmatpush3.msra.mxu1 %v1411_v43  ;;  %v16461_v37 = vpop.f32.mrf.mxu0  ;;  %v9720_v43 = vld [vmem:[%s19786_s3 + $0x598] sm:$0xff] }
 0x2e3   :  { %13150 = vmatmul.mubr.f32.vlgmr.msra.gmra.mxu0 %v9718_v41  ;;  %12195 = vmatprep.subr.mxu1 %v1410_v1 }
 0x2e4   :  { %13230 = vmatpush3.msra.mxu0 %v15298_v56  ;;  %12197 = vmatprep.mubr.f32.mxu1 %v16024_v18  ;;  %v16468_v23 = vpop.f32.mrf.mxu0  ;;  %v1764_v18 = vld [vmem:[#allocation2 + $0x1f0] sm:$0xff] }
 0x2e5   :  { %19817 = vst [vmem:[#allocation28_spill] sm:$0xff] %v16468_v23  ;;  %13231 = vmatprep.subr.mxu0 %v15303_v9  ;;  %12196 = vmatpush3.msra.mxu1 %v1410_v1  ;;  %v9721_v1 = vld [vmem:[%s19786_s3 + $0x5a0] sm:$0xff] }
 0x2e6   :  { %13232 = vmatpush3.msra.mxu0 %v15303_v9  ;;  %12198 = vmatmul.mubr.f32.vlgmr.msra.gmra.mxu1 %v16017_v58  ;;  %v16476_v5 = vpop.f32.mrf.mxu0  ;;  %v1763_v58 = vld [vmem:[#allocation2 + $0x1e8] sm:$0xff] }
 0x2e7   :  { %12277 = vmatprep.subr.mxu1 %v1765_v17  ;;  %13152 = vmatprep.mubr.f32.mxu0 %v9719_v16  ;;  %v1762_v16 = vld [vmem:[#allocation2 + $0x1e0] sm:$0xff] }
 0x2e8   :  { %13233 = vmatprep.subr.mxu0 %v15315_v50  ;;  %12278 = vmatpush3.msra.mxu1 %v1765_v17  ;;  %v16479_v41 = vpop.f32.mrf.mxu0 }
 0x2e9   :  { %13153 = vmatmul.mubr.f32.gmra.mxu0 %v9720_v43  ;;  %12200 = vmatprep.mubr.f32.mxu1 %v16047_v20  ;;  %v9722_v20 = vld [vmem:[%s19786_s3 + $0x5a8] sm:$0xff] }
 0x2ea   :  { %13234 = vmatpush3.msra.mxu0 %v15315_v50  ;;  %12279 = vmatprep.subr.mxu1 %v1764_v18  ;;  %v16486_v23 = vpop.f32.mrf.mxu0 }
 0x2eb   :  { %13235 = vmatprep.subr.mxu0 %v15324_v24  ;;  %12280 = vmatpush3.msra.mxu1 %v1764_v18  ;;  %v9723_v18 = vld [vmem:[%s19786_s3 + $0x5b0] sm:$0xff] }
 0x2ec   :  { %13236 = vmatpush3.msra.mxu0 %v15324_v24  ;;  %12201 = vmatmul.mubr.f32.gmra.mxu1 %v16040_v0  ;;  %v16494_v17 = vpop.f32.mrf.mxu0  ;;  %v1761_v0 = vld [vmem:[#allocation2 + $0x1d8] sm:$0xff] }
 0x2ed   :  { %19818 = vst [vmem:[#allocation29_spill] sm:$0xff] %v16494_v17  ;;  %12281 = vmatprep.subr.mxu1 %v1763_v58  ;;  %13155 = vmatprep.mubr.f32.mxu0 %v9721_v1  ;;  %v1760_v1 = vld [vmem:[#allocation2 + $0x1d0] sm:$0xff] }
 0x2ee   :  { %13237 = vmatprep.subr.mxu0 %v15333_v2  ;;  %12282 = vmatpush3.msra.mxu1 %v1763_v58  ;;  %v16497_v43 = vpop.f32.mrf.mxu0 }
 0x2ef   :  { %13156 = vmatmul.mubr.f32.gmra.mxu0 %v9722_v20  ;;  %12203 = vmatprep.mubr.f32.mxu1 %v16070_v29  ;;  %v9724_v29 = vld [vmem:[%s19786_s3 + $0x5b8] sm:$0xff] }
 0x2f0   :  { %13238 = vmatpush3.msra.mxu0 %v15333_v2  ;;  %12283 = vmatprep.subr.mxu1 %v1762_v16  ;;  %v16504_v17 = vpop.f32.mrf.mxu0 }
 0x2f1   :  { %19819 = vst [vmem:[#allocation30_spill] sm:$0xff] %v16504_v17  ;;  %13239 = vmatprep.subr.mxu0 %v15342_v33  ;;  %12284 = vmatpush3.msra.mxu1 %v1762_v16  ;;  %v9725_v16 = vld [vmem:[%s19786_s3 + $0x5c0] sm:$0xff] }
 0x2f2   :  { %13240 = vmatpush3.msra.mxu0 %v15342_v33  ;;  %12204 = vmatmul.mubr.f32.gmra.mxu1 %v16063_v6  ;;  %v16512_v58 = vpop.f32.mrf.mxu0  ;;  %v1759_v6 = vld [vmem:[#allocation2 + $0x1c8] sm:$0xff] }
 0x2f3   :  { %12285 = vmatprep.subr.mxu1 %v1761_v0  ;;  %13158 = vmatprep.mubr.f32.mxu0 %v9723_v18  ;;  %v1758_v18 = vld [vmem:[#allocation2 + $0x1c0] sm:$0xff] }
 0x2f4   :  { %13241 = vmatprep.subr.mxu0 %v15352_v63  ;;  %12286 = vmatpush3.msra.mxu1 %v1761_v0  ;;  %v16515_v20 = vpop.f32.mrf.mxu0 }
 0x2f5   :  { %13159 = vmatmul.mubr.f32.gmra.mxu0 %v9724_v29  ;;  %12206 = vmatprep.mubr.f32.mxu1 %v16093_v26  ;;  %v9726_v26 = vld [vmem:[%s19786_s3 + $0x5c8] sm:$0xff] }
 0x2f6   :  { %13242 = vmatpush3.msra.mxu0 %v15352_v63  ;;  %12287 = vmatprep.subr.mxu1 %v1760_v1  ;;  %v16522_v17 = vpop.f32.mrf.mxu0 }
 0x2f7   :  { %13243 = vmatprep.subr.mxu0 %v15361_v21  ;;  %12288 = vmatpush3.msra.mxu1 %v1760_v1  ;;  %v9727_v1 = vld [vmem:[%s19786_s3 + $0x5d0] sm:$0xff] }
 0x2f8   :  { %13244 = vmatpush3.msra.mxu0 %v15361_v21  ;;  %12207 = vmatmul.mubr.f32.gmra.mxu1 %v16086_v4  ;;  %v16530_v0 = vpop.f32.mrf.mxu0  ;;  %v1757_v4 = vld [vmem:[#allocation2 + $0x1b8] sm:$0xff] }
 0x2f9   :  { %19820 = vst [vmem:[#allocation31_spill] sm:$0xff] %v16530_v0  ;;  %12289 = vmatprep.subr.mxu1 %v1759_v6  ;;  %13161 = vmatprep.mubr.f32.mxu0 %v9725_v16  ;;  %v1756_v16 = vld [vmem:[#allocation2 + $0x1b0] sm:$0xff] }
 0x2fa   :  { %13245 = vmatprep.subr.mxu0 %v15371_v61  ;;  %12290 = vmatpush3.msra.mxu1 %v1759_v6  ;;  %v16533_v29 = vpop.f32.mrf.mxu0 }
 0x2fb   :  { %13162 = vmatmul.mubr.f32.gmra.mxu0 %v9726_v26  ;;  %12209 = vmatprep.mubr.f32.mxu1 %v16116_v47  ;;  %v9728_v47 = vld [vmem:[%s19786_s3 + $0x5d8] sm:$0xff] }
 0x2fc   :  { %13246 = vmatpush3.msra.mxu0 %v15371_v61  ;;  %12291 = vmatprep.subr.mxu1 %v1758_v18  ;;  %v16540_v0 = vpop.f32.mrf.mxu0 }
 0x2fd   :  { %19821 = vst [vmem:[#allocation32_spill] sm:$0xff] %v16540_v0  ;;  %13247 = vmatprep.subr.mxu0 %v15380_v19  ;;  %12292 = vmatpush3.msra.mxu1 %v1758_v18  ;;  %v9729_v18 = vld [vmem:[%s19786_s3 + $0x5e0] sm:$0xff] }
 0x2fe   :  { %13248 = vmatpush3.msra.mxu0 %v15380_v19  ;;  %12210 = vmatmul.mubr.f32.gmra.mxu1 %v16109_v48  ;;  %v16548_v6 = vpop.f32.mrf.mxu0  ;;  %v1755_v48 = vld [vmem:[#allocation2 + $0x1a8] sm:$0xff] }
 0x2ff   :  { %12293 = vmatprep.subr.mxu1 %v1757_v4  ;;  %13164 = vmatprep.mubr.f32.mxu0 %v9727_v1  ;;  %v1754_v1 = vld [vmem:[#allocation2 + $0x1a0] sm:$0xff] }
 0x300   :  { %13249 = vmatprep.subr.mxu0 %v15390_v59  ;;  %12294 = vmatpush3.msra.mxu1 %v1757_v4  ;;  %v16551_v26 = vpop.f32.mrf.mxu0 }
 0x301   :  { %13165 = vmatmul.mubr.f32.gmra.mxu0 %v9728_v47  ;;  %12212 = vmatprep.mubr.f32.mxu1 %v16139_v40  ;;  %v9730_v40 = vld [vmem:[%s19786_s3 + $0x5e8] sm:$0xff] }
 0x302   :  { %13250 = vmatpush3.msra.mxu0 %v15390_v59  ;;  %12295 = vmatprep.subr.mxu1 %v1756_v16  ;;  %v16558_v0 = vpop.f32.mrf.mxu0 }
 0x303   :  { %13251 = vmatprep.subr.mxu0 %v15397_v38  ;;  %12296 = vmatpush3.msra.mxu1 %v1756_v16  ;;  %v9731_v16 = vld [vmem:[%s19786_s3 + $0x5f0] sm:$0xff] }
 0x304   :  { %13252 = vmatpush3.msra.mxu0 %v15397_v38  ;;  %12213 = vmatmul.mubr.f32.gmra.mxu1 %v16132_v45  ;;  %v16566_v4 = vpop.f32.mrf.mxu0  ;;  %v1753_v45 = vld [vmem:[#allocation2 + $0x198] sm:$0xff] }
 0x305   :  { %19822 = vst [vmem:[#allocation33_spill] sm:$0xff] %v16566_v4  ;;  %12297 = vmatprep.subr.mxu1 %v1755_v48  ;;  %13167 = vmatprep.mubr.f32.mxu0 %v9729_v18  ;;  %v1752_v18 = vld [vmem:[#allocation2 + $0x190] sm:$0xff] }
 0x306   :  { %13253 = vmatprep.subr.mxu0 %v15405_v34  ;;  %12298 = vmatpush3.msra.mxu1 %v1755_v48  ;;  %v16569_v47 = vpop.f32.mrf.mxu0 }
 0x307   :  { %13168 = vmatmul.mubr.f32.gmra.mxu0 %v9730_v40  ;;  %12215 = vmatprep.mubr.f32.mxu1 %v16162_v30  ;;  %v9732_v30 = vld [vmem:[%s19786_s3 + $0x5f8] sm:$0xff] }
 0x308   :  { %13254 = vmatpush3.msra.mxu0 %v15405_v34  ;;  %12299 = vmatprep.subr.mxu1 %v1754_v1  ;;  %v16576_v4 = vpop.f32.mrf.mxu0 }
 0x309   :  { %19823 = vst [vmem:[#allocation34_spill] sm:$0xff] %v16576_v4  ;;  %13255 = vmatprep.subr.mxu0 %v15412_v60  ;;  %12300 = vmatpush3.msra.mxu1 %v1754_v1  ;;  %v9733_v1 = vld [vmem:[%s19786_s3 + $0x600] sm:$0xff] }
 0x30a   :  { %13256 = vmatpush3.msra.mxu0 %v15412_v60  ;;  %12216 = vmatmul.mubr.f32.gmra.mxu1 %v16155_v52  ;;  %v16584_v48 = vpop.f32.mrf.mxu0  ;;  %v1751_v52 = vld [vmem:[#allocation2 + $0x188] sm:$0xff] }
 0x30b   :  { %12301 = vmatprep.subr.mxu1 %v1753_v45  ;;  %13170 = vmatprep.mubr.f32.mxu0 %v9731_v16 }
 0x30c   :  { %13257 = vmatprep.subr.mxu0 %v15418_v13  ;;  %12302 = vmatpush3.msra.mxu1 %v1753_v45  ;;  %v16587_v40 = vpop.f32.mrf.mxu0  ;;  %v1750_v45 = vld [vmem:[#allocation2 + $0x180] sm:$0xff] }
 0x30d   :  { %19824 = vst [vmem:[#allocation35_spill] sm:$0xff] %v16587_v40  ;;  %13171 = vmatmul.mubr.f32.gmra.mxu0 %v9732_v30  ;;  %12218 = vmatprep.mubr.f32.mxu1 %v16185_v7  ;;  %v9734_v7 = vld [vmem:[%s19786_s3 + $0x608] sm:$0xff] }
 0x30e   :  { %13258 = vmatpush3.msra.mxu0 %v15418_v13  ;;  %12303 = vmatprep.subr.mxu1 %v1752_v18  ;;  %v16594_v4 = vpop.f32.mrf.mxu0 }
 0x30f   :  { %13259 = vmatprep.subr.mxu0 %v15424_v10  ;;  %12304 = vmatpush3.msra.mxu1 %v1752_v18  ;;  %v9735_v18 = vld [vmem:[%s19786_s3 + $0x610] sm:$0xff] }
 0x310   :  { %13260 = vmatpush3.msra.mxu0 %v15424_v10  ;;  %12219 = vmatmul.mubr.f32.gmra.mxu1 %v16178_v44  ;;  %v16602_v16 = vpop.f32.mrf.mxu0  ;;  %v2105_v44 = vld [vmem:[#allocation2 + $0x278] sm:$0xff] }
 0x311   :  { %12305 = vmatprep.subr.mxu1 %v1751_v52  ;;  %13261 = vmatprep.mubr.f32.mxu0 %v9733_v1 }
 0x312   :  { %13341 = vmatprep.subr.mxu0 %v15298_v56  ;;  %12306 = vmatpush3.msra.mxu1 %v1751_v52  ;;  %v16605_v30 = vpop.f32.mrf.mxu0  ;;  %v9736_v52 = vld [vmem:[%s19786_s3 + $0x618] sm:$0xff] }
 0x313   :  { %13262 = vmatmul.mubr.f32.vlgmr.msra.gmra.mxu0 %v9734_v7  ;;  %12307 = vmatprep.subr.mxu1 %v1750_v45 }
 0x314   :  { %13342 = vmatpush3.msra.mxu0 %v15298_v56  ;;  %12309 = vmatprep.mubr.f32.mxu1 %v16200_v36  ;;  %v16612_v40 = vpop.f32.mrf.mxu0  ;;  %v2104_v36 = vld [vmem:[#allocation2 + $0x270] sm:$0xff] }
 0x315   :  { %19825 = vst [vmem:[#allocation36_spill] sm:$0xff] %v16612_v40  ;;  %13343 = vmatprep.subr.mxu0 %v15303_v9  ;;  %12308 = vmatpush3.msra.mxu1 %v1750_v45  ;;  %v9737_v45 = vld [vmem:[%s19786_s3 + $0x620] sm:$0xff] }
 0x316   :  { %13344 = vmatpush3.msra.mxu0 %v15303_v9  ;;  %12310 = vmatmul.mubr.f32.vlgmr.msra.gmra.mxu1 %v16193_v27  ;;  %v16620_v1 = vpop.f32.mrf.mxu0  ;;  %v2103_v27 = vld [vmem:[#allocation2 + $0x268] sm:$0xff] }
 0x317   :  { %12389 = vmatprep.subr.mxu1 %v2105_v44  ;;  %13264 = vmatprep.mubr.f32.mxu0 %v9735_v18 }
 0x318   :  { %13345 = vmatprep.subr.mxu0 %v15315_v50  ;;  %12390 = vmatpush3.msra.mxu1 %v2105_v44  ;;  %v16623_v7 = vpop.f32.mrf.mxu0  ;;  %v19828_v44 = vld [vmem:[#allocation5_spill] sm:$0xff] }
 0x319   :  { %19826 = vst [vmem:[#allocation37_spill] sm:$0xff] %v16623_v7  ;;  %13265 = vmatmul.mubr.f32.gmra.mxu0 %v9736_v52  ;;  %12312 = vmatprep.mubr.f32.mxu1 %v16211_v15  ;;  %v9738_v15 = vld [vmem:[%s19786_s3 + $0x628] sm:$0xff]  ;;  %v2102_v52 = vld [vmem:[#allocation2 + $0x260] sm:$0xff] }
 0x31a   :  { %13346 = vmatpush3.msra.mxu0 %v15315_v50  ;;  %12391 = vmatprep.subr.mxu1 %v2104_v36  ;;  %v16630_v40 = vpop.f32.mrf.mxu0 }
 0x31b   :  { %19827 = vst [vmem:[#allocation38_spill] sm:$0xff] %v16630_v40  ;;  %13347 = vmatprep.subr.mxu0 %v15324_v24  ;;  %12392 = vmatpush3.msra.mxu1 %v2104_v36  ;;  %v19831_v36 = vld [vmem:[#allocation7_spill] sm:$0xff] }
 0x31c   :  { %13348 = vmatpush3.msra.mxu0 %v15324_v24  ;;  %12313 = vmatmul.mubr.f32.gmra.mxu1 %v19828_v44  ;;  %v16638_v18 = vpop.f32.mrf.mxu0  ;;  %v2101_v44 = vld [vmem:[#allocation2 + $0x258] sm:$0xff]  ;;  %v9739_v40 = vld [vmem:[%s19786_s3 + $0x630] sm:$0xff] }
 0x31d   :  { %19829 = vst [vmem:[#allocation5_spill] sm:$0xff] %v16638_v18  ;;  %12393 = vmatprep.subr.mxu1 %v2103_v27  ;;  %13267 = vmatprep.mubr.f32.mxu0 %v9737_v45  ;;  %v9740_v45 = vld [vmem:[%s19786_s3 + $0x638] sm:$0xff] }
 0x31e   :  { %13349 = vmatprep.subr.mxu0 %v15333_v2  ;;  %12394 = vmatpush3.msra.mxu1 %v2103_v27  ;;  %v16641_v7 = vpop.f32.mrf.mxu0  ;;  %v19833_v27 = vld [vmem:[#allocation6_spill] sm:$0xff] }
 0x31f   :  { %19830 = vst [vmem:[#allocation39_spill] sm:$0xff] %v16641_v7  ;;  %13268 = vmatmul.mubr.f32.gmra.mxu0 %v9738_v15  ;;  %12315 = vmatprep.mubr.f32.mxu1 %v19831_v36  ;;  %v2100_v36 = vld [vmem:[#allocation2 + $0x250] sm:$0xff]  ;;  %v9741_v7 = vld [vmem:[%s19786_s3 + $0x640] sm:$0xff] }
 0x320   :  { %13350 = vmatpush3.msra.mxu0 %v15333_v2  ;;  %12395 = vmatprep.subr.mxu1 %v2102_v52  ;;  %v16648_v18 = vpop.f32.mrf.mxu0 }
 0x321   :  { %19832 = vst [vmem:[#allocation7_spill] sm:$0xff] %v16648_v18  ;;  %13351 = vmatprep.subr.mxu0 %v15342_v33  ;;  %12396 = vmatpush3.msra.mxu1 %v2102_v52  ;;  %v19836_v52 = vld [vmem:[#allocation9_spill] sm:$0xff] }
 0x322   :  { %13352 = vmatpush3.msra.mxu0 %v15342_v33  ;;  %12316 = vmatmul.mubr.f32.gmra.mxu1 %v19833_v27  ;;  %v16656_v15 = vpop.f32.mrf.mxu0  ;;  %v2099_v27 = vld [vmem:[#allocation2 + $0x248] sm:$0xff] }
 0x323   :  { %19834 = vst [vmem:[#allocation6_spill] sm:$0xff] %v16656_v15  ;;  %12397 = vmatprep.subr.mxu1 %v2101_v44  ;;  %13270 = vmatprep.mubr.f32.mxu0 %v9739_v40  ;;  %v19838_v40 = vld [vmem:[#allocation8_spill] sm:$0xff] }
 0x324   :  { %13353 = vmatprep.subr.mxu0 %v15352_v63  ;;  %12398 = vmatpush3.msra.mxu1 %v2101_v44  ;;  %v16659_v18 = vpop.f32.mrf.mxu0  ;;  %v9742_v44 = vld [vmem:[%s19786_s3 + $0x648] sm:$0xff] }
 0x325   :  { %19835 = vst [vmem:[#allocation40_spill] sm:$0xff] %v16659_v18  ;;  %13271 = vmatmul.mubr.f32.gmra.mxu0 %v9740_v45  ;;  %12318 = vmatprep.mubr.f32.mxu1 %v19836_v52  ;;  %v2098_v52 = vld [vmem:[#allocation2 + $0x240] sm:$0xff] }
 0x326   :  { %13354 = vmatpush3.msra.mxu0 %v15352_v63  ;;  %12399 = vmatprep.subr.mxu1 %v2100_v36  ;;  %v16666_v15 = vpop.f32.mrf.mxu0 }
 0x327   :  { %19837 = vst [vmem:[#allocation9_spill] sm:$0xff] %v16666_v15  ;;  %13355 = vmatprep.subr.mxu0 %v15361_v21  ;;  %12400 = vmatpush3.msra.mxu1 %v2100_v36  ;;  %v19840_v36 = vld [vmem:[#allocation11_spill] sm:$0xff] }
 0x328   :  { %13356 = vmatpush3.msra.mxu0 %v15361_v21  ;;  %12319 = vmatmul.mubr.f32.gmra.mxu1 %v19838_v40  ;;  %v16674_v45 = vpop.f32.mrf.mxu0  ;;  %v2097_v40 = vld [vmem:[#allocation2 + $0x238] sm:$0xff]  ;;  %v9743_v15 = vld [vmem:[%s19786_s3 + $0x650] sm:$0xff] }
 0x329   :  { %19839 = vst [vmem:[#allocation8_spill] sm:$0xff] %v16674_v45  ;;  %12401 = vmatprep.subr.mxu1 %v2099_v27  ;;  %13273 = vmatprep.mubr.f32.mxu0 %v9741_v7  ;;  %v19842_v7 = vld [vmem:[#allocation10_spill] sm:$0xff] }
 0x32a   :  { %13357 = vmatprep.subr.mxu0 %v15371_v61  ;;  %12402 = vmatpush3.msra.mxu1 %v2099_v27  ;;  %v16677_v18 = vpop.f32.mrf.mxu0  ;;  %v9744_v27 = vld [vmem:[%s19786_s3 + $0x658] sm:$0xff] }
 0x32b   :  { %13274 = vmatmul.mubr.f32.gmra.mxu0 %v9742_v44  ;;  %12321 = vmatprep.mubr.f32.mxu1 %v19840_v36  ;;  %v2096_v36 = vld [vmem:[#allocation2 + $0x230] sm:$0xff] }
 0x32c   :  { %13358 = vmatpush3.msra.mxu0 %v15371_v61  ;;  %12403 = vmatprep.subr.mxu1 %v2098_v52  ;;  %v16684_v45 = vpop.f32.mrf.mxu0 }
 0x32d   :  { %19841 = vst [vmem:[#allocation11_spill] sm:$0xff] %v16684_v45  ;;  %13359 = vmatprep.subr.mxu0 %v15380_v19  ;;  %12404 = vmatpush3.msra.mxu1 %v2098_v52  ;;  %v9745_v45 = vld [vmem:[%s19786_s3 + $0x660] sm:$0xff] }
 0x32e   :  { %13360 = vmatpush3.msra.mxu0 %v15380_v19  ;;  %12322 = vmatmul.mubr.f32.gmra.mxu1 %v19842_v7  ;;  %v16692_v44 = vpop.f32.mrf.mxu0  ;;  %v2095_v7 = vld [vmem:[#allocation2 + $0x228] sm:$0xff] }
 0x32f   :  { %19843 = vst [vmem:[#allocation10_spill] sm:$0xff] %v16692_v44  ;;  %12405 = vmatprep.subr.mxu1 %v2097_v40  ;;  %13276 = vmatprep.mubr.f32.mxu0 %v9743_v15  ;;  %v19845_v15 = vld [vmem:[#allocation12_spill] sm:$0xff]  ;;  %v9747_v44 = vld [vmem:[%s19786_s3 + $0x670] sm:$0xff] }
 0x330   :  { %13361 = vmatprep.subr.mxu0 %v15390_v59  ;;  %12406 = vmatpush3.msra.mxu1 %v2097_v40  ;;  %v16696_v52 = vpop.f32.mrf.mxu0 }
 0x331   :  { %13277 = vmatmul.mubr.f32.gmra.mxu0 %v9744_v27  ;;  %12324 = vmatprep.mubr.f32.mxu1 %v16253_v46  ;;  %19844 = vst [vmem:[#allocation41_spill] sm:$0xff] %v16696_v52  ;;  %v9746_v46 = vld [vmem:[%s19786_s3 + $0x668] sm:$0xff]  ;;  %v2094_v27 = vld [vmem:[#allocation2 + $0x220] sm:$0xff] }
 0x332   :  { %13362 = vmatpush3.msra.mxu0 %v15390_v59  ;;  %12407 = vmatprep.subr.mxu1 %v2096_v36  ;;  %v16708_v40 = vpop.f32.mrf.mxu0  ;;  %v19847_v52 = vld [vmem:[#allocation14_spill] sm:$0xff] }
 0x333   :  { %13363 = vmatprep.subr.mxu0 %v15397_v38  ;;  %12408 = vmatpush3.msra.mxu1 %v2096_v36  ;;  %19846 = vst [vmem:[#allocation12_spill] sm:$0xff] %v16708_v40  ;;  %v9749_v40 = vld [vmem:[%s19786_s3 + $0x680] sm:$0xff] }
 0x334   :  { %13364 = vmatpush3.msra.mxu0 %v15397_v38  ;;  %12325 = vmatmul.mubr.f32.gmra.mxu1 %v19845_v15  ;;  %v16712_v36 = vpop.f32.mrf.mxu0  ;;  %v2093_v15 = vld [vmem:[#allocation2 + $0x218] sm:$0xff] }
 0x335   :  { %12409 = vmatprep.subr.mxu1 %v2095_v7  ;;  %13279 = vmatprep.mubr.f32.mxu0 %v9745_v45  ;;  %19848 = vst [vmem:[#allocation14_spill] sm:$0xff] %v16712_v36  ;;  %v19849_v45 = vld [vmem:[#allocation13_spill] sm:$0xff]  ;;  %v19850_v36 = vld [vmem:[#allocation16_spill] sm:$0xff] }
 0x336   :  { %13365 = vmatprep.subr.mxu0 %v15405_v34  ;;  %12410 = vmatpush3.msra.mxu1 %v2095_v7  ;;  %v16724_v7 = vpop.f32.mrf.mxu0 }
 0x337   :  { %13280 = vmatmul.mubr.f32.gmra.mxu0 %v9746_v46  ;;  %12327 = vmatprep.mubr.f32.mxu1 %v19847_v52  ;;  %v9748_v52 = vld [vmem:[%s19786_s3 + $0x678] sm:$0xff]  ;;  %v2092_v46 = vld [vmem:[#allocation2 + $0x210] sm:$0xff] }
 0x338   :  { %13366 = vmatpush3.msra.mxu0 %v15405_v34  ;;  %12411 = vmatprep.subr.mxu1 %v2094_v27 }
 0x339   :  { %13367 = vmatprep.subr.mxu0 %v15412_v60  ;;  %12412 = vmatpush3.msra.mxu1 %v2094_v27  ;;  %v16728_v27 = vpop.f32.mrf.mxu0 }
 0x33a   :  { %13368 = vmatpush3.msra.mxu0 %v15412_v60  ;;  %12328 = vmatmul.mubr.f32.gmra.mxu1 %v19849_v45  ;;  %19851 = vst [vmem:[#allocation13_spill] sm:$0xff] %v16728_v27  ;;  %v2091_v45 = vld [vmem:[#allocation2 + $0x208] sm:$0xff] }
 0x33b   :  { %12413 = vmatprep.subr.mxu1 %v2093_v15  ;;  %13282 = vmatprep.mubr.f32.mxu0 %v9747_v44  ;;  %v19852_v44 = vld [vmem:[#allocation15_spill] sm:$0xff] }
 0x33c   :  { %13369 = vmatprep.subr.mxu0 %v15418_v13  ;;  %12414 = vmatpush3.msra.mxu1 %v2093_v15  ;;  %v2090_v15 = vld [vmem:[#allocation2 + $0x200] sm:$0xff] }
 0x33d   :  { %13283 = vmatmul.mubr.f32.gmra.mxu0 %v9748_v52  ;;  %12330 = vmatprep.mubr.f32.mxu1 %v19850_v36  ;;  %v9750_v36 = vld [vmem:[%s19786_s3 + $0x688] sm:$0xff]  ;;  %v16740_v52 = vpop.f32.mrf.mxu0 }
 0x33e   :  { %13370 = vmatpush3.msra.mxu0 %v15418_v13  ;;  %12415 = vmatprep.subr.mxu1 %v2092_v46  ;;  %19853 = vst [vmem:[#allocation16_spill] sm:$0xff] %v16740_v52 }
 0x33f   :  { %13371 = vmatprep.subr.mxu0 %v15424_v10  ;;  %12416 = vmatpush3.msra.mxu1 %v2092_v46  ;;  %v16743_v27 = vpop.f32.mrf.mxu0  ;;  %v2445_v46 = vld [vmem:[#allocation2 + $0x2f8] sm:$0xff] }
 0x340   :  { %13372 = vmatpush3.msra.mxu0 %v15424_v10  ;;  %12331 = vmatmul.mubr.f32.gmra.mxu1 %v19852_v44  ;;  %19854 = vst [vmem:[#allocation15_spill] sm:$0xff] %v16743_v27  ;;  %v9751_v44 = vld [vmem:[%s19786_s3 + $0x690] sm:$0xff] }
 0x341   :  { %12417 = vmatprep.subr.mxu1 %v2091_v45  ;;  %13373 = vmatprep.mubr.f32.mxu0 %v9749_v40  ;;  %v19855_v40 = vld [vmem:[#allocation17_spill] sm:$0xff]  ;;  %v16758_v27 = vpop.f32.mrf.mxu0 }
 0x342   :  { %13453 = vmatprep.subr.mxu0 %v15298_v56  ;;  %12418 = vmatpush3.msra.mxu1 %v2091_v45  ;;  %v9752_v45 = vld [vmem:[%s19786_s3 + $0x698] sm:$0xff]  ;;  %19856 = vst [vmem:[#allocation17_spill] sm:$0xff] %v16758_v27  ;;  %v9753_v27 = vld [vmem:[%s19786_s3 + $0x6a0] sm:$0xff] }
 0x343   :  { %13374 = vmatmul.mubr.f32.vlgmr.msra.gmra.mxu0 %v9750_v36  ;;  %12419 = vmatprep.subr.mxu1 %v2090_v15 }
 0x344   :  { %13454 = vmatpush3.msra.mxu0 %v15298_v56  ;;  %12421 = vmatprep.mubr.f32.mxu1 %v16285_v35  ;;  %v2444_v35 = vld [vmem:[#allocation2 + $0x2f0] sm:$0xff] }
 0x345   :  { %13455 = vmatprep.subr.mxu0 %v15303_v9  ;;  %12420 = vmatpush3.msra.mxu1 %v2090_v15  ;;  %v16764_v15 = vpop.f32.mrf.mxu0 }
 0x346   :  { %13456 = vmatpush3.msra.mxu0 %v15303_v9  ;;  %12422 = vmatmul.mubr.f32.vlgmr.msra.gmra.mxu1 %v19855_v40  ;;  %v16756_v36 = vpop.f32.mrf.mxu1  ;;  %19858 = vst [vmem:[#allocation43_spill] sm:$0xff] %v16764_v15  ;;  %v2443_v40 = vld [vmem:[#allocation2 + $0x2e8] sm:$0xff] }
 0x347   :  { %12501 = vmatprep.subr.mxu1 %v2445_v46  ;;  %13376 = vmatprep.mubr.f32.mxu0 %v9751_v44 }
 0x348   :  { %13457 = vmatprep.subr.mxu0 %v15315_v50  ;;  %12502 = vmatpush3.msra.mxu1 %v2445_v46  ;;  %v16761_v52 = vpop.f32.mrf.mxu1  ;;  %v19859_v46 = vld [vmem:[#allocation18_spill] sm:$0xff] }
 0x349   :  { %19857 = vst [vmem:[#allocation42_spill] sm:$0xff] %v16761_v52  ;;  %13377 = vmatmul.mubr.f32.gmra.mxu0 %v9752_v45  ;;  %12424 = vmatprep.mubr.f32.mxu1 %v16298_v8  ;;  %v9754_v8 = vld [vmem:[%s19786_s3 + $0x6a8] sm:$0xff]  ;;  %v16778_v45 = vpop.f32.mrf.mxu0  ;;  %v2442_v52 = vld [vmem:[#allocation2 + $0x2e0] sm:$0xff] }
 0x34a   :  { %13458 = vmatpush3.msra.mxu0 %v15315_v50  ;;  %12503 = vmatprep.subr.mxu1 %v2444_v35  ;;  %19860 = vst [vmem:[#allocation18_spill] sm:$0xff] %v16778_v45  ;;  %v9755_v45 = vld [vmem:[%s19786_s3 + $0x6b0] sm:$0xff] }
 0x34b   :  { %13459 = vmatprep.subr.mxu0 %v15324_v24  ;;  %12504 = vmatpush3.msra.mxu1 %v2444_v35  ;;  %v16784_v35 = vpop.f32.mrf.mxu0 }
 0x34c   :  { %13460 = vmatpush3.msra.mxu0 %v15324_v24  ;;  %12425 = vmatmul.mubr.f32.gmra.mxu1 %v19859_v46  ;;  %v16776_v44 = vpop.f32.mrf.mxu1  ;;  %19862 = vst [vmem:[#allocation45_spill] sm:$0xff] %v16784_v35  ;;  %v2441_v46 = vld [vmem:[#allocation2 + $0x2d8] sm:$0xff]  ;;  %v9757_v35 = vld [vmem:[%s19786_s3 + $0x6c0] sm:$0xff] }
 0x34d   :  { %12505 = vmatprep.subr.mxu1 %v2443_v40  ;;  %13379 = vmatprep.mubr.f32.mxu0 %v9753_v27 }
 0x34e   :  { %13461 = vmatprep.subr.mxu0 %v15333_v2  ;;  %12506 = vmatpush3.msra.mxu1 %v2443_v40  ;;  %v16781_v15 = vpop.f32.mrf.mxu1  ;;  %v16798_v40 = vpop.f32.mrf.mxu0 }
 0x34f   :  { %19861 = vst [vmem:[#allocation44_spill] sm:$0xff] %v16781_v15  ;;  %13380 = vmatmul.mubr.f32.gmra.mxu0 %v9754_v8  ;;  %12427 = vmatprep.mubr.f32.mxu1 %v16307_v11  ;;  %v9756_v11 = vld [vmem:[%s19786_s3 + $0x6b8] sm:$0xff]  ;;  %v2440_v8 = vld [vmem:[#allocation2 + $0x2d0] sm:$0xff] }
 0x350   :  { %13462 = vmatpush3.msra.mxu0 %v15333_v2  ;;  %12507 = vmatprep.subr.mxu1 %v2442_v52 }
 0x351   :  { %13463 = vmatprep.subr.mxu0 %v15342_v33  ;;  %12508 = vmatpush3.msra.mxu1 %v2442_v52  ;;  %v2439_v52 = vld [vmem:[#allocation2 + $0x2c8] sm:$0xff] }
 0x352   :  { %13464 = vmatpush3.msra.mxu0 %v15342_v33  ;;  %12428 = vmatmul.mubr.f32.gmra.mxu1 %v16301_v25  ;;  %v16796_v27 = vpop.f32.mrf.mxu1  ;;  %v16804_v25 = vpop.f32.mrf.mxu0 }
 0x353   :  { %12509 = vmatprep.subr.mxu1 %v2441_v46  ;;  %13382 = vmatprep.mubr.f32.mxu0 %v9755_v45  ;;  %19864 = vst [vmem:[#allocation47_spill] sm:$0xff] %v16804_v25  ;;  %v19865_v45 = vld [vmem:[#allocation19_spill] sm:$0xff] }
 0x354   :  { %13465 = vmatprep.subr.mxu0 %v15352_v63  ;;  %12510 = vmatpush3.msra.mxu1 %v2441_v46  ;;  %v16801_v15 = vpop.f32.mrf.mxu1 }
 0x355   :  { %19863 = vst [vmem:[#allocation46_spill] sm:$0xff] %v16801_v15  ;;  %13383 = vmatmul.mubr.f32.gmra.mxu0 %v9756_v11  ;;  %12430 = vmatprep.mubr.f32.mxu1 %v16317_v42  ;;  %v9758_v42 = vld [vmem:[%s19786_s3 + $0x6c8] sm:$0xff]  ;;  %v16818_v11 = vpop.f32.mrf.mxu0  ;;  %v2438_v15 = vld [vmem:[#allocation2 + $0x2c0] sm:$0xff] }
 0x356   :  { %13466 = vmatpush3.msra.mxu0 %v15352_v63  ;;  %12511 = vmatprep.subr.mxu1 %v2440_v8  ;;  %19866 = vst [vmem:[#allocation19_spill] sm:$0xff] %v16818_v11  ;;  %v9759_v11 = vld [vmem:[%s19786_s3 + $0x6d0] sm:$0xff] }
 0x357   :  { %13467 = vmatprep.subr.mxu0 %v15361_v21  ;;  %12512 = vmatpush3.msra.mxu1 %v2440_v8  ;;  %v16824_v8 = vpop.f32.mrf.mxu0 }
 0x358   :  { %13468 = vmatpush3.msra.mxu0 %v15361_v21  ;;  %12431 = vmatmul.mubr.f32.gmra.mxu1 %v19865_v45  ;;  %v16816_v46 = vpop.f32.mrf.mxu1  ;;  %19868 = vst [vmem:[#allocation49_spill] sm:$0xff] %v16824_v8  ;;  %v2437_v45 = vld [vmem:[#allocation2 + $0x2b8] sm:$0xff] }
 0x359   :  { %12513 = vmatprep.subr.mxu1 %v2439_v52  ;;  %13385 = vmatprep.mubr.f32.mxu0 %v9757_v35  ;;  %v19869_v35 = vld [vmem:[#allocation20_spill] sm:$0xff] }
 0x35a   :  { %13469 = vmatprep.subr.mxu0 %v15371_v61  ;;  %12514 = vmatpush3.msra.mxu1 %v2439_v52  ;;  %v16821_v25 = vpop.f32.mrf.mxu1 }
 0x35b   :  { %19867 = vst [vmem:[#allocation48_spill] sm:$0xff] %v16821_v25  ;;  %13386 = vmatmul.mubr.f32.gmra.mxu0 %v9758_v42  ;;  %12433 = vmatprep.mubr.f32.mxu1 %v16332_v53  ;;  %v9760_v53 = vld [vmem:[%s19786_s3 + $0x6d8] sm:$0xff]  ;;  %v16838_v42 = vpop.f32.mrf.mxu0  ;;  %v2436_v25 = vld [vmem:[#allocation2 + $0x2b0] sm:$0xff] }
 0x35c   :  { %13470 = vmatpush3.msra.mxu0 %v15371_v61  ;;  %12515 = vmatprep.subr.mxu1 %v2438_v15  ;;  %19870 = vst [vmem:[#allocation20_spill] sm:$0xff] %v16838_v42  ;;  %v9761_v42 = vld [vmem:[%s19786_s3 + $0x6e0] sm:$0xff] }
 0x35d   :  { %13471 = vmatprep.subr.mxu0 %v15380_v19  ;;  %12516 = vmatpush3.msra.mxu1 %v2438_v15  ;;  %v16844_v15 = vpop.f32.mrf.mxu0 }
 0x35e   :  { %13472 = vmatpush3.msra.mxu0 %v15380_v19  ;;  %12434 = vmatmul.mubr.f32.gmra.mxu1 %v19869_v35  ;;  %v16836_v52 = vpop.f32.mrf.mxu1  ;;  %19872 = vst [vmem:[#allocation51_spill] sm:$0xff] %v16844_v15  ;;  %v2435_v35 = vld [vmem:[#allocation2 + $0x2a8] sm:$0xff]  ;;  %v9763_v15 = vld [vmem:[%s19786_s3 + $0x6f0] sm:$0xff] }
 0x35f   :  { %12517 = vmatprep.subr.mxu1 %v2437_v45  ;;  %13388 = vmatprep.mubr.f32.mxu0 %v9759_v11 }
 0x360   :  { %13473 = vmatprep.subr.mxu0 %v15390_v59  ;;  %12518 = vmatpush3.msra.mxu1 %v2437_v45  ;;  %v16841_v8 = vpop.f32.mrf.mxu1  ;;  %v16858_v45 = vpop.f32.mrf.mxu0 }
 0x361   :  { %19871 = vst [vmem:[#allocation50_spill] sm:$0xff] %v16841_v8  ;;  %13389 = vmatmul.mubr.f32.gmra.mxu0 %v9760_v53  ;;  %12436 = vmatprep.mubr.f32.mxu1 %v16342_v3  ;;  %v9762_v3 = vld [vmem:[%s19786_s3 + $0x6e8] sm:$0xff]  ;;  %v2434_v53 = vld [vmem:[#allocation2 + $0x2a0] sm:$0xff] }
 0x362   :  { %13474 = vmatpush3.msra.mxu0 %v15390_v59  ;;  %12519 = vmatprep.subr.mxu1 %v2436_v25 }
 0x363   :  { %13475 = vmatprep.subr.mxu0 %v15397_v38  ;;  %12520 = vmatpush3.msra.mxu1 %v2436_v25  ;;  %v2433_v25 = vld [vmem:[#allocation2 + $0x298] sm:$0xff] }
 0x364   :  { %13476 = vmatpush3.msra.mxu0 %v15397_v38  ;;  %12437 = vmatmul.mubr.f32.gmra.mxu1 %v16336_v28  ;;  %v16856_v11 = vpop.f32.mrf.mxu1  ;;  %v16864_v28 = vpop.f32.mrf.mxu0 }
 0x365   :  { %12521 = vmatprep.subr.mxu1 %v2435_v35  ;;  %13391 = vmatprep.mubr.f32.mxu0 %v9761_v42  ;;  %19874 = vst [vmem:[#allocation53_spill] sm:$0xff] %v16864_v28  ;;  %v19875_v42 = vld [vmem:[#allocation21_spill] sm:$0xff] }
 0x366   :  { %13477 = vmatprep.subr.mxu0 %v15405_v34  ;;  %12522 = vmatpush3.msra.mxu1 %v2435_v35  ;;  %v16861_v8 = vpop.f32.mrf.mxu1 }
 0x367   :  { %19873 = vst [vmem:[#allocation52_spill] sm:$0xff] %v16861_v8  ;;  %13392 = vmatmul.mubr.f32.gmra.mxu0 %v9762_v3  ;;  %12439 = vmatprep.mubr.f32.mxu1 %v16354_v12  ;;  %v9764_v12 = vld [vmem:[%s19786_s3 + $0x6f8] sm:$0xff]  ;;  %v16878_v3 = vpop.f32.mrf.mxu0  ;;  %v2432_v8 = vld [vmem:[#allocation2 + $0x290] sm:$0xff] }
 0x368   :  { %13478 = vmatpush3.msra.mxu0 %v15405_v34  ;;  %12523 = vmatprep.subr.mxu1 %v2434_v53  ;;  %19876 = vst [vmem:[#allocation21_spill] sm:$0xff] %v16878_v3  ;;  %v9765_v3 = vld [vmem:[%s19786_s3 + $0x700] sm:$0xff] }
 0x369   :  { %13479 = vmatprep.subr.mxu0 %v15412_v60  ;;  %12524 = vmatpush3.msra.mxu1 %v2434_v53  ;;  %v16884_v53 = vpop.f32.mrf.mxu0 }
 0x36a   :  { %13480 = vmatpush3.msra.mxu0 %v15412_v60  ;;  %12440 = vmatmul.mubr.f32.gmra.mxu1 %v19875_v42  ;;  %v16876_v35 = vpop.f32.mrf.mxu1  ;;  %19878 = vst [vmem:[#allocation55_spill] sm:$0xff] %v16884_v53  ;;  %v2431_v42 = vld [vmem:[#allocation2 + $0x288] sm:$0xff] }
 0x36b   :  { %12525 = vmatprep.subr.mxu1 %v2433_v25  ;;  %13394 = vmatprep.mubr.f32.mxu0 %v9763_v15  ;;  %v19879_v15 = vld [vmem:[#allocation22_spill] sm:$0xff] }
 0x36c   :  { %13481 = vmatprep.subr.mxu0 %v15418_v13  ;;  %12526 = vmatpush3.msra.mxu1 %v2433_v25  ;;  %v16881_v28 = vpop.f32.mrf.mxu1  ;;  %v2430_v25 = vld [vmem:[#allocation2 + $0x280] sm:$0xff] }
 0x36d   :  { %19877 = vst [vmem:[#allocation54_spill] sm:$0xff] %v16881_v28  ;;  %13395 = vmatmul.mubr.f32.gmra.mxu0 %v9764_v12  ;;  %12442 = vmatprep.mubr.f32.mxu1 %v16368_v39  ;;  %v9766_v39 = vld [vmem:[%s19786_s3 + $0x708] sm:$0xff]  ;;  %v16898_v28 = vpop.f32.mrf.mxu0 }
 0x36e   :  { %13482 = vmatpush3.msra.mxu0 %v15418_v13  ;;  %12527 = vmatprep.subr.mxu1 %v2432_v8  ;;  %19880 = vst [vmem:[#allocation22_spill] sm:$0xff] %v16898_v28  ;;  %v9767_v28 = vld [vmem:[%s19786_s3 + $0x710] sm:$0xff] }
 0x36f   :  { %13483 = vmatprep.subr.mxu0 %v15424_v10  ;;  %12528 = vmatpush3.msra.mxu1 %v2432_v8  ;;  %v16903_v8 = vpop.f32.mrf.mxu0 }
 0x370   :  { %13484 = vmatpush3.msra.mxu0 %v15424_v10  ;;  %12443 = vmatmul.mubr.f32.gmra.mxu1 %v19879_v15  ;;  %v16896_v12 = vpop.f32.mrf.mxu1  ;;  %19882 = vst [vmem:[#allocation57_spill] sm:$0xff] %v16903_v8  ;;  %v2785_v15 = vld [vmem:[#allocation2 + $0x378] sm:$0xff]  ;;  %v2783_v8 = vld [vmem:[#allocation2 + $0x368] sm:$0xff] }
 0x371   :  { %12529 = vmatprep.subr.mxu1 %v2431_v42  ;;  %13485 = vmatprep.mubr.f32.mxu0 %v9765_v3  ;;  %v9768_v3 = vld [vmem:[%s19786_s3 + $0x718] sm:$0xff] }
 0x372   :  { %13565 = vmatprep.subr.mxu0 %v15298_v56  ;;  %12530 = vmatpush3.msra.mxu1 %v2431_v42  ;;  %v16901_v53 = vpop.f32.mrf.mxu1 }
 0x373   :  { %19881 = vst [vmem:[#allocation56_spill] sm:$0xff] %v16901_v53  ;;  %13486 = vmatmul.mubr.f32.vlgmr.msra.gmra.mxu0 %v9766_v39  ;;  %12531 = vmatprep.subr.mxu1 %v2430_v25  ;;  %v16916_v39 = vpop.f32.mrf.mxu0 }
 0x374   :  { %13566 = vmatpush3.msra.mxu0 %v15298_v56  ;;  %12533 = vmatprep.mubr.f32.mxu1 %v16378_v31  ;;  %v2784_v31 = vld [vmem:[#allocation2 + $0x370] sm:$0xff] }
 0x375   :  { %13567 = vmatprep.subr.mxu0 %v15303_v9  ;;  %12532 = vmatpush3.msra.mxu1 %v2430_v25 }
 0x376   :  { %13568 = vmatpush3.msra.mxu0 %v15303_v9  ;;  %12534 = vmatmul.mubr.f32.vlgmr.msra.gmra.mxu1 %v16372_v14  ;;  %v12087_v42 = vpop.f32.mrf.mxu1  ;;  %v16925_v14 = vpop.f32.mrf.mxu0 }
 0x377   :  { %12613 = vmatprep.subr.mxu1 %v2785_v15  ;;  %13488 = vmatprep.mubr.f32.mxu0 %v9767_v28  ;;  %v16919_v53 = vadd.f32 %v12087_v42, %v16756_v36  ;;  %19884 = vst [vmem:[#allocation59_spill] sm:$0xff] %v16925_v14  ;;  %v9769_v28 = vld [vmem:[%s19786_s3 + $0x720] sm:$0xff]  ;;  %v19885_v36 = vld [vmem:[#allocation23_spill] sm:$0xff]  ;;  %v2781_v14 = vld [vmem:[#allocation2 + $0x358] sm:$0xff] }
 0x378   :  { %13569 = vmatprep.subr.mxu0 %v15315_v50  ;;  %12614 = vmatpush3.msra.mxu1 %v2785_v15  ;;  %v16922_v25 = vpop.f32.mrf.mxu1  ;;  %v2782_v42 = vld [vmem:[#allocation2 + $0x360] sm:$0xff] }
 0x379   :  { %19883 = vst [vmem:[#allocation58_spill] sm:$0xff] %v16922_v25  ;;  %13489 = vmatmul.mubr.f32.gmra.mxu0 %v9768_v3  ;;  %12536 = vmatprep.mubr.f32.mxu1 %v16390_v32  ;;  %v9770_v32 = vld [vmem:[%s19786_s3 + $0x728] sm:$0xff]  ;;  %v16937_v3 = vpop.f32.mrf.mxu0 }
 0x37a   :  { %13570 = vmatpush3.msra.mxu0 %v15315_v50  ;;  %12615 = vmatprep.subr.mxu1 %v2784_v31 }
 0x37b   :  { %13571 = vmatprep.subr.mxu0 %v15324_v24  ;;  %12616 = vmatpush3.msra.mxu1 %v2784_v31 }
 0x37c   :  { %13572 = vmatpush3.msra.mxu0 %v15324_v24  ;;  %12537 = vmatmul.mubr.f32.gmra.mxu1 %v19885_v36  ;;  %v12090_v15 = vpop.f32.mrf.mxu1  ;;  %v16946_v36 = vpop.f32.mrf.mxu0 }
 0x37d   :  { %12617 = vmatprep.subr.mxu1 %v2783_v8  ;;  %13491 = vmatprep.mubr.f32.mxu0 %v9769_v28  ;;  %v16940_v25 = vadd.f32 %v12090_v15, %v16776_v44  ;;  %19887 = vst [vmem:[#allocation60_spill] sm:$0xff] %v16946_v36  ;;  %v9771_v28 = vld [vmem:[%s19786_s3 + $0x730] sm:$0xff]  ;;  %v19888_v44 = vld [vmem:[#allocation24_spill] sm:$0xff]  ;;  %v2779_v36 = vld [vmem:[#allocation2 + $0x348] sm:$0xff] }
 0x37e   :  { %13573 = vmatprep.subr.mxu0 %v15333_v2  ;;  %12618 = vmatpush3.msra.mxu1 %v2783_v8  ;;  %v16943_v31 = vpop.f32.mrf.mxu1  ;;  %v2780_v15 = vld [vmem:[#allocation2 + $0x350] sm:$0xff] }
 0x37f   :  { %19886 = vst [vmem:[#allocation23_spill] sm:$0xff] %v16943_v31  ;;  %13492 = vmatmul.mubr.f32.gmra.mxu0 %v9770_v32  ;;  %12539 = vmatprep.mubr.f32.mxu1 %v16404_v22  ;;  %v9772_v22 = vld [vmem:[%s19786_s3 + $0x738] sm:$0xff]  ;;  %v16958_v32 = vpop.f32.mrf.mxu0 }
 0x380   :  { %13574 = vmatpush3.msra.mxu0 %v15333_v2  ;;  %12619 = vmatprep.subr.mxu1 %v2782_v42 }
 0x381   :  { %13575 = vmatprep.subr.mxu0 %v15342_v33  ;;  %12620 = vmatpush3.msra.mxu1 %v2782_v42 }
 0x382   :  { %13576 = vmatpush3.msra.mxu0 %v15342_v33  ;;  %12540 = vmatmul.mubr.f32.gmra.mxu1 %v19888_v44  ;;  %v12093_v8 = vpop.f32.mrf.mxu1  ;;  %v16967_v44 = vpop.f32.mrf.mxu0 }
 0x383   :  { %12621 = vmatprep.subr.mxu1 %v2781_v14  ;;  %13494 = vmatprep.mubr.f32.mxu0 %v9771_v28  ;;  %v16961_v31 = vadd.f32 %v12093_v8, %v16796_v27  ;;  %v9773_v28 = vld [vmem:[%s19786_s3 + $0x740] sm:$0xff] }
 0x384   :  { %13577 = vmatprep.subr.mxu0 %v15352_v63  ;;  %12622 = vmatpush3.msra.mxu1 %v2781_v14  ;;  %v16964_v42 = vpop.f32.mrf.mxu1  ;;  %v16979_v14 = vpop.f32.mrf.mxu0 }
 0x385   :  { %19889 = vst [vmem:[#allocation24_spill] sm:$0xff] %v16964_v42  ;;  %13495 = vmatmul.mubr.f32.gmra.mxu0 %v9772_v22  ;;  %12542 = vmatprep.mubr.f32.mxu1 %v16414_v62  ;;  %v9774_v62 = vld [vmem:[%s19786_s3 + $0x748] sm:$0xff]  ;;  %v2778_v22 = vld [vmem:[#allocation2 + $0x340] sm:$0xff]  ;;  %v2777_v42 = vld [vmem:[#allocation2 + $0x338] sm:$0xff] }
 0x386   :  { %13578 = vmatpush3.msra.mxu0 %v15352_v63  ;;  %12623 = vmatprep.subr.mxu1 %v2780_v15 }
 0x387   :  { %13579 = vmatprep.subr.mxu0 %v15361_v21  ;;  %12624 = vmatpush3.msra.mxu1 %v2780_v15 }
 0x388   :  { %13580 = vmatpush3.msra.mxu0 %v15361_v21  ;;  %12543 = vmatmul.mubr.f32.gmra.mxu1 %v16408_v57  ;;  %v12096_v27 = vpop.f32.mrf.mxu1  ;;  %v16988_v57 = vpop.f32.mrf.mxu0 }
 0x389   :  { %12625 = vmatprep.subr.mxu1 %v2779_v36  ;;  %13497 = vmatprep.mubr.f32.mxu0 %v9773_v28  ;;  %v16982_v8 = vadd.f32 %v12096_v27, %v16816_v46  ;;  %19891 = vst [vmem:[#allocation62_spill] sm:$0xff] %v16988_v57  ;;  %v9775_v28 = vld [vmem:[%s19786_s3 + $0x750] sm:$0xff]  ;;  %v19892_v46 = vld [vmem:[#allocation25_spill] sm:$0xff]  ;;  %v2775_v57 = vld [vmem:[#allocation2 + $0x328] sm:$0xff] }
 0x38a   :  { %13581 = vmatprep.subr.mxu0 %v15371_v61  ;;  %12626 = vmatpush3.msra.mxu1 %v2779_v36  ;;  %v16985_v15 = vpop.f32.mrf.mxu1  ;;  %v2776_v27 = vld [vmem:[#allocation2 + $0x330] sm:$0xff] }
 0x38b   :  { %19890 = vst [vmem:[#allocation61_spill] sm:$0xff] %v16985_v15  ;;  %13498 = vmatmul.mubr.f32.gmra.mxu0 %v9774_v62  ;;  %12545 = vmatprep.mubr.f32.mxu1 %v16426_v51  ;;  %v9776_v51 = vld [vmem:[%s19786_s3 + $0x758] sm:$0xff]  ;;  %v17000_v62 = vpop.f32.mrf.mxu0 }
 0x38c   :  { %13582 = vmatpush3.msra.mxu0 %v15371_v61  ;;  %12627 = vmatprep.subr.mxu1 %v2778_v22 }
 0x38d   :  { %13583 = vmatprep.subr.mxu0 %v15380_v19  ;;  %12628 = vmatpush3.msra.mxu1 %v2778_v22 }
 0x38e   :  { %13584 = vmatpush3.msra.mxu0 %v15380_v19  ;;  %12546 = vmatmul.mubr.f32.gmra.mxu1 %v19892_v46  ;;  %v12099_v36 = vpop.f32.mrf.mxu1  ;;  %v17009_v46 = vpop.f32.mrf.mxu0 }
 0x38f   :  { %12629 = vmatprep.subr.mxu1 %v2777_v42  ;;  %13500 = vmatprep.mubr.f32.mxu0 %v9775_v28  ;;  %v17003_v15 = vadd.f32 %v12099_v36, %v16836_v52  ;;  %19894 = vst [vmem:[#allocation63_spill] sm:$0xff] %v17009_v46  ;;  %v9777_v28 = vld [vmem:[%s19786_s3 + $0x760] sm:$0xff]  ;;  %v19895_v52 = vld [vmem:[#allocation26_spill] sm:$0xff]  ;;  %v2773_v46 = vld [vmem:[#allocation2 + $0x318] sm:$0xff] }
 0x390   :  { %13585 = vmatprep.subr.mxu0 %v15390_v59  ;;  %12630 = vmatpush3.msra.mxu1 %v2777_v42  ;;  %v17006_v22 = vpop.f32.mrf.mxu1  ;;  %v2774_v36 = vld [vmem:[#allocation2 + $0x320] sm:$0xff] }
 0x391   :  { %19893 = vst [vmem:[#allocation25_spill] sm:$0xff] %v17006_v22  ;;  %13501 = vmatmul.mubr.f32.gmra.mxu0 %v9776_v51  ;;  %12548 = vmatprep.mubr.f32.mxu1 %v16440_v49  ;;  %v9778_v49 = vld [vmem:[%s19786_s3 + $0x768] sm:$0xff]  ;;  %v17021_v51 = vpop.f32.mrf.mxu0 }
 0x392   :  { %13586 = vmatpush3.msra.mxu0 %v15390_v59  ;;  %12631 = vmatprep.subr.mxu1 %v2776_v27 }
 0x393   :  { %13587 = vmatprep.subr.mxu0 %v15397_v38  ;;  %12632 = vmatpush3.msra.mxu1 %v2776_v27 }
 0x394   :  { %13588 = vmatpush3.msra.mxu0 %v15397_v38  ;;  %12549 = vmatmul.mubr.f32.gmra.mxu1 %v19895_v52  ;;  %v12102_v42 = vpop.f32.mrf.mxu1  ;;  %v17030_v52 = vpop.f32.mrf.mxu0 }
 0x395   :  { %12633 = vmatprep.subr.mxu1 %v2775_v57  ;;  %13503 = vmatprep.mubr.f32.mxu0 %v9777_v28  ;;  %v17024_v22 = vadd.f32 %v12102_v42, %v16856_v11  ;;  %19897 = vst [vmem:[#allocation64_spill] sm:$0xff] %v17030_v52  ;;  %v9779_v28 = vld [vmem:[%s19786_s3 + $0x770] sm:$0xff]  ;;  %v2771_v52 = vld [vmem:[#allocation2 + $0x308] sm:$0xff] }
 0x396   :  { %13589 = vmatprep.subr.mxu0 %v15405_v34  ;;  %12634 = vmatpush3.msra.mxu1 %v2775_v57  ;;  %v17027_v27 = vpop.f32.mrf.mxu1  ;;  %v19898_v11 = vld [vmem:[#allocation27_spill] sm:$0xff] }
 0x397   :  { %19896 = vst [vmem:[#allocation26_spill] sm:$0xff] %v17027_v27  ;;  %13504 = vmatmul.mubr.f32.gmra.mxu0 %v9778_v49  ;;  %12551 = vmatprep.mubr.f32.mxu1 %v16450_v54  ;;  %v9780_v54 = vld [vmem:[%s19786_s3 + $0x778] sm:$0xff]  ;;  %v17042_v49 = vpop.f32.mrf.mxu0  ;;  %v2772_v42 = vld [vmem:[#allocation2 + $0x310] sm:$0xff] }
 0x398   :  { %13590 = vmatpush3.msra.mxu0 %v15405_v34  ;;  %12635 = vmatprep.subr.mxu1 %v2774_v36 }
 0x399   :  { %13591 = vmatprep.subr.mxu0 %v15412_v60  ;;  %12636 = vmatpush3.msra.mxu1 %v2774_v36 }
 0x39a   :  { %13592 = vmatpush3.msra.mxu0 %v15412_v60  ;;  %12552 = vmatmul.mubr.f32.gmra.mxu1 %v19898_v11  ;;  %v12105_v57 = vpop.f32.mrf.mxu1  ;;  %v17051_v11 = vpop.f32.mrf.mxu0 }
 0x39b   :  { %12637 = vmatprep.subr.mxu1 %v2773_v46  ;;  %13506 = vmatprep.mubr.f32.mxu0 %v9779_v28  ;;  %v17045_v27 = vadd.f32 %v12105_v57, %v16876_v35  ;;  %v9781_v28 = vld [vmem:[%s19786_s3 + $0x780] sm:$0xff] }
 0x39c   :  { %13593 = vmatprep.subr.mxu0 %v15418_v13  ;;  %12638 = vmatpush3.msra.mxu1 %v2773_v46  ;;  %v17048_v36 = vpop.f32.mrf.mxu1  ;;  %v2770_v35 = vld [vmem:[#allocation2 + $0x300] sm:$0xff] }
 0x39d   :  { %19899 = vst [vmem:[#allocation27_spill] sm:$0xff] %v17048_v36  ;;  %13507 = vmatmul.mubr.f32.gmra.mxu0 %v9780_v54  ;;  %12554 = vmatprep.mubr.f32.mxu1 %v16461_v37  ;;  %v9782_v37 = vld [vmem:[%s19786_s3 + $0x788] sm:$0xff]  ;;  %v17063_v54 = vpop.f32.mrf.mxu0  ;;  %v3125_v36 = vld [vmem:[#allocation2 + $0x3f8] sm:$0xff] }
 0x39e   :  { %13594 = vmatpush3.msra.mxu0 %v15418_v13  ;;  %12639 = vmatprep.subr.mxu1 %v2772_v42 }
 0x39f   :  { %13595 = vmatprep.subr.mxu0 %v15424_v10  ;;  %12640 = vmatpush3.msra.mxu1 %v2772_v42 }
 0x3a0   :  { %13596 = vmatpush3.msra.mxu0 %v15424_v10  ;;  %12555 = vmatmul.mubr.f32.gmra.mxu1 %v16458_v55  ;;  %v12108_v46 = vpop.f32.mrf.mxu1  ;;  %v17071_v55 = vpop.f32.mrf.mxu0 }
 0x3a1   :  { %12641 = vmatprep.subr.mxu1 %v2771_v52  ;;  %13597 = vmatprep.mubr.f32.mxu0 %v9781_v28  ;;  %v17066_v57 = vadd.f32 %v12108_v46, %v16896_v12  ;;  %19901 = vst [vmem:[#allocation66_spill] sm:$0xff] %v17071_v55  ;;  %v9783_v28 = vld [vmem:[%s19786_s3 + $0x790] sm:$0xff]  ;;  %v19902_v12 = vld [vmem:[#allocation28_spill] sm:$0xff]  ;;  %v3123_v55 = vld [vmem:[#allocation2 + $0x3e8] sm:$0xff] }
 0x3a2   :  { %13677 = vmatprep.subr.mxu0 %v15298_v56  ;;  %12642 = vmatpush3.msra.mxu1 %v2771_v52  ;;  %v17069_v42 = vpop.f32.mrf.mxu1  ;;  %v9784_v52 = vld [vmem:[%s19786_s3 + $0x798] sm:$0xff]  ;;  %v17084_v46 = vpop.f32.mrf.mxu0 }
 0x3a3   :  { %19900 = vst [vmem:[#allocation65_spill] sm:$0xff] %v17069_v42  ;;  %13598 = vmatmul.mubr.f32.vlgmr.msra.gmra.mxu0 %v9782_v37  ;;  %12643 = vmatprep.subr.mxu1 %v2770_v35 }
 0x3a4   :  { %13678 = vmatpush3.msra.mxu0 %v15298_v56  ;;  %12645 = vmatprep.mubr.f32.mxu1 %v16476_v5  ;;  %v3124_v5 = vld [vmem:[#allocation2 + $0x3f0] sm:$0xff] }
 0x3a5   :  { %13679 = vmatprep.subr.mxu0 %v15303_v9  ;;  %12644 = vmatpush3.msra.mxu1 %v2770_v35 }
 0x3a6   :  { %13680 = vmatpush3.msra.mxu0 %v15303_v9  ;;  %12646 = vmatmul.mubr.f32.vlgmr.msra.gmra.mxu1 %v19902_v12  ;;  %v12199_v37 = vpop.f32.mrf.mxu1  ;;  %v17093_v12 = vpop.f32.mrf.mxu0 }
 0x3a7   :  { %12725 = vmatprep.subr.mxu1 %v3125_v36  ;;  %13600 = vmatprep.mubr.f32.mxu0 %v9783_v28  ;;  %v17087_v42 = vadd.f32 %v12199_v37, %v16919_v53  ;;  %v9785_v28 = vld [vmem:[%s19786_s3 + $0x7a0] sm:$0xff] }
 0x3a8   :  { %13681 = vmatprep.subr.mxu0 %v15315_v50  ;;  %12726 = vmatpush3.msra.mxu1 %v3125_v36  ;;  %v17090_v35 = vpop.f32.mrf.mxu1  ;;  %v17105_v36 = vpop.f32.mrf.mxu0 }
 0x3a9   :  { %19903 = vst [vmem:[#allocation28_spill] sm:$0xff] %v17090_v35  ;;  %13601 = vmatmul.mubr.f32.gmra.mxu0 %v9784_v52  ;;  %12648 = vmatprep.mubr.f32.mxu1 %v16486_v23  ;;  %v9786_v23 = vld [vmem:[%s19786_s3 + $0x7a8] sm:$0xff]  ;;  %v3122_v52 = vld [vmem:[#allocation2 + $0x3e0] sm:$0xff]  ;;  %v3121_v35 = vld [vmem:[#allocation2 + $0x3d8] sm:$0xff] }
 0x3aa   :  { %13682 = vmatpush3.msra.mxu0 %v15315_v50  ;;  %12727 = vmatprep.subr.mxu1 %v3124_v5 }
 0x3ab   :  { %13683 = vmatprep.subr.mxu0 %v15324_v24  ;;  %12728 = vmatpush3.msra.mxu1 %v3124_v5 }
 0x3ac   :  { %13684 = vmatpush3.msra.mxu0 %v15324_v24  ;;  %12649 = vmatmul.mubr.f32.gmra.mxu1 %v16479_v41  ;;  %v12202_v53 = vpop.f32.mrf.mxu1  ;;  %v17114_v41 = vpop.f32.mrf.mxu0 }
 0x3ad   :  { %12729 = vmatprep.subr.mxu1 %v3123_v55  ;;  %13603 = vmatprep.mubr.f32.mxu0 %v9785_v28  ;;  %v17108_v37 = vadd.f32 %v12202_v53, %v16940_v25  ;;  %19905 = vst [vmem:[#allocation68_spill] sm:$0xff] %v17114_v41  ;;  %v9787_v28 = vld [vmem:[%s19786_s3 + $0x7b0] sm:$0xff]  ;;  %v19906_v25 = vld [vmem:[#allocation29_spill] sm:$0xff]  ;;  %v3119_v41 = vld [vmem:[#allocation2 + $0x3c8] sm:$0xff] }
 0x3ae   :  { %13685 = vmatprep.subr.mxu0 %v15333_v2  ;;  %12730 = vmatpush3.msra.mxu1 %v3123_v55  ;;  %v17111_v5 = vpop.f32.mrf.mxu1  ;;  %v3120_v53 = vld [vmem:[#allocation2 + $0x3d0] sm:$0xff] }
 0x3af   :  { %19904 = vst [vmem:[#allocation67_spill] sm:$0xff] %v17111_v5  ;;  %13604 = vmatmul.mubr.f32.gmra.mxu0 %v9786_v23  ;;  %12651 = vmatprep.mubr.f32.mxu1 %v16497_v43  ;;  %v9788_v43 = vld [vmem:[%s19786_s3 + $0x7b8] sm:$0xff]  ;;  %v17126_v23 = vpop.f32.mrf.mxu0 }
 0x3b0   :  { %13686 = vmatpush3.msra.mxu0 %v15333_v2  ;;  %12731 = vmatprep.subr.mxu1 %v3122_v52 }
 0x3b1   :  { %13687 = vmatprep.subr.mxu0 %v15342_v33  ;;  %12732 = vmatpush3.msra.mxu1 %v3122_v52 }
 0x3b2   :  { %13688 = vmatpush3.msra.mxu0 %v15342_v33  ;;  %12652 = vmatmul.mubr.f32.gmra.mxu1 %v19906_v25  ;;  %v12205_v55 = vpop.f32.mrf.mxu1  ;;  %v17135_v25 = vpop.f32.mrf.mxu0 }
 0x3b3   :  { %12733 = vmatprep.subr.mxu1 %v3121_v35  ;;  %13606 = vmatprep.mubr.f32.mxu0 %v9787_v28  ;;  %v17129_v5 = vadd.f32 %v12205_v55, %v16961_v31  ;;  %19908 = vst [vmem:[#allocation69_spill] sm:$0xff] %v17135_v25  ;;  %v9789_v28 = vld [vmem:[%s19786_s3 + $0x7c0] sm:$0xff]  ;;  %v19909_v31 = vld [vmem:[#allocation30_spill] sm:$0xff]  ;;  %v3117_v25 = vld [vmem:[#allocation2 + $0x3b8] sm:$0xff] }
 0x3b4   :  { %13689 = vmatprep.subr.mxu0 %v15352_v63  ;;  %12734 = vmatpush3.msra.mxu1 %v3121_v35  ;;  %v17132_v52 = vpop.f32.mrf.mxu1  ;;  %v3118_v55 = vld [vmem:[#allocation2 + $0x3c0] sm:$0xff] }
 0x3b5   :  { %19907 = vst [vmem:[#allocation29_spill] sm:$0xff] %v17132_v52  ;;  %13607 = vmatmul.mubr.f32.gmra.mxu0 %v9788_v43  ;;  %12654 = vmatprep.mubr.f32.mxu1 %v16512_v58  ;;  %v9790_v58 = vld [vmem:[%s19786_s3 + $0x7c8] sm:$0xff]  ;;  %v17147_v43 = vpop.f32.mrf.mxu0 }
 0x3b6   :  { %13690 = vmatpush3.msra.mxu0 %v15352_v63  ;;  %12735 = vmatprep.subr.mxu1 %v3120_v53 }
 0x3b7   :  { %13691 = vmatprep.subr.mxu0 %v15361_v21  ;;  %12736 = vmatpush3.msra.mxu1 %v3120_v53 }
 0x3b8   :  { %13692 = vmatpush3.msra.mxu0 %v15361_v21  ;;  %12655 = vmatmul.mubr.f32.gmra.mxu1 %v19909_v31  ;;  %v12208_v35 = vpop.f32.mrf.mxu1  ;;  %v17156_v31 = vpop.f32.mrf.mxu0 }
 0x3b9   :  { %12737 = vmatprep.subr.mxu1 %v3119_v41  ;;  %13609 = vmatprep.mubr.f32.mxu0 %v9789_v28  ;;  %v17150_v52 = vadd.f32 %v12208_v35, %v16982_v8  ;;  %v9791_v28 = vld [vmem:[%s19786_s3 + $0x7d0] sm:$0xff] }
 0x3ba   :  { %13693 = vmatprep.subr.mxu0 %v15371_v61  ;;  %12738 = vmatpush3.msra.mxu1 %v3119_v41  ;;  %v17153_v53 = vpop.f32.mrf.mxu1  ;;  %v17168_v41 = vpop.f32.mrf.mxu0 }
 0x3bb   :  { %19910 = vst [vmem:[#allocation30_spill] sm:$0xff] %v17153_v53  ;;  %13610 = vmatmul.mubr.f32.gmra.mxu0 %v9790_v58  ;;  %12657 = vmatprep.mubr.f32.mxu1 %v16522_v17  ;;  %v9792_v17 = vld [vmem:[%s19786_s3 + $0x7d8] sm:$0xff]  ;;  %v3116_v58 = vld [vmem:[#allocation2 + $0x3b0] sm:$0xff]  ;;  %v3115_v53 = vld [vmem:[#allocation2 + $0x3a8] sm:$0xff] }
 0x3bc   :  { %13694 = vmatpush3.msra.mxu0 %v15371_v61  ;;  %12739 = vmatprep.subr.mxu1 %v3118_v55 }
 0x3bd   :  { %13695 = vmatprep.subr.mxu0 %v15380_v19  ;;  %12740 = vmatpush3.msra.mxu1 %v3118_v55 }
 0x3be   :  { %13696 = vmatpush3.msra.mxu0 %v15380_v19  ;;  %12658 = vmatmul.mubr.f32.gmra.mxu1 %v16515_v20  ;;  %v12211_v8 = vpop.f32.mrf.mxu1  ;;  %v17177_v20 = vpop.f32.mrf.mxu0 }
 0x3bf   :  { %12741 = vmatprep.subr.mxu1 %v3117_v25  ;;  %13612 = vmatprep.mubr.f32.mxu0 %v9791_v28  ;;  %v17171_v35 = vadd.f32 %v12211_v8, %v17003_v15  ;;  %19912 = vst [vmem:[#allocation71_spill] sm:$0xff] %v17177_v20  ;;  %v9793_v28 = vld [vmem:[%s19786_s3 + $0x7e0] sm:$0xff]  ;;  %v19913_v15 = vld [vmem:[#allocation31_spill] sm:$0xff]  ;;  %v3113_v20 = vld [vmem:[#allocation2 + $0x398] sm:$0xff] }
 0x3c0   :  { %13697 = vmatprep.subr.mxu0 %v15390_v59  ;;  %12742 = vmatpush3.msra.mxu1 %v3117_v25  ;;  %v17174_v55 = vpop.f32.mrf.mxu1  ;;  %v3114_v8 = vld [vmem:[#allocation2 + $0x3a0] sm:$0xff] }
 0x3c1   :  { %19911 = vst [vmem:[#allocation70_spill] sm:$0xff] %v17174_v55  ;;  %13613 = vmatmul.mubr.f32.gmra.mxu0 %v9792_v17  ;;  %12660 = vmatprep.mubr.f32.mxu1 %v16533_v29  ;;  %v9794_v29 = vld [vmem:[%s19786_s3 + $0x7e8] sm:$0xff]  ;;  %v17189_v17 = vpop.f32.mrf.mxu0 }
 0x3c2   :  { %13698 = vmatpush3.msra.mxu0 %v15390_v59  ;;  %12743 = vmatprep.subr.mxu1 %v3116_v58 }
 0x3c3   :  { %13699 = vmatprep.subr.mxu0 %v15397_v38  ;;  %12744 = vmatpush3.msra.mxu1 %v3116_v58 }
 0x3c4   :  { %13700 = vmatpush3.msra.mxu0 %v15397_v38  ;;  %12661 = vmatmul.mubr.f32.gmra.mxu1 %v19913_v15  ;;  %v12214_v25 = vpop.f32.mrf.mxu1  ;;  %v17198_v15 = vpop.f32.mrf.mxu0 }
 0x3c5   :  { %12745 = vmatprep.subr.mxu1 %v3115_v53  ;;  %13615 = vmatprep.mubr.f32.mxu0 %v9793_v28  ;;  %v17192_v55 = vadd.f32 %v12214_v25, %v17024_v22  ;;  %19915 = vst [vmem:[#allocation72_spill] sm:$0xff] %v17198_v15  ;;  %v9795_v28 = vld [vmem:[%s19786_s3 + $0x7f0] sm:$0xff]  ;;  %v19916_v22 = vld [vmem:[#allocation32_spill] sm:$0xff] }
 0x3c6   :  { %13701 = vmatprep.subr.mxu0 %v15405_v34  ;;  %12746 = vmatpush3.msra.mxu1 %v3115_v53  ;;  %v17195_v58 = vpop.f32.mrf.mxu1  ;;  %v3112_v25 = vld [vmem:[#allocation2 + $0x390] sm:$0xff] }
 0x3c7   :  { %19914 = vst [vmem:[#allocation31_spill] sm:$0xff] %v17195_v58  ;;  %13616 = vmatmul.mubr.f32.gmra.mxu0 %v9794_v29  ;;  %12663 = vmatprep.mubr.f32.mxu1 %v16548_v6  ;;  %v9796_v6 = vld [vmem:[%s19786_s3 + $0x7f8] sm:$0xff]  ;;  %v17210_v29 = vpop.f32.mrf.mxu0 }
 0x3c8   :  { %13702 = vmatpush3.msra.mxu0 %v15405_v34  ;;  %12747 = vmatprep.subr.mxu1 %v3114_v8 }
 0x3c9   :  { %13703 = vmatprep.subr.mxu0 %v15412_v60  ;;  %12748 = vmatpush3.msra.mxu1 %v3114_v8  ;;  %v17223_v15 = vpop.f32.mrf.mxu0 }
 0x3ca   :  { %13704 = vmatpush3.msra.mxu0 %v15412_v60  ;;  %12664 = vmatmul.mubr.f32.gmra.mxu1 %v19916_v22  ;;  %v12217_v53 = vpop.f32.mrf.mxu1  ;;  %v3111_v22 = vld [vmem:[#allocation2 + $0x388] sm:$0xff] }
 0x3cb   :  { %12749 = vmatprep.subr.mxu1 %v3113_v20  ;;  %13618 = vmatprep.mubr.f32.mxu0 %v9795_v28  ;;  %v17213_v58 = vadd.f32 %v12217_v53, %v17045_v27  ;;  %v9797_v28 = vld [vmem:[%s19786_s3 + $0x800] sm:$0xff] }
 0x3cc   :  { %13705 = vmatprep.subr.mxu0 %v15418_v13  ;;  %12750 = vmatpush3.msra.mxu1 %v3113_v20  ;;  %v17216_v8 = vpop.f32.mrf.mxu1  ;;  %v3110_v27 = vld [vmem:[#allocation2 + $0x380] sm:$0xff] }
 0x3cd   :  { %19917 = vst [vmem:[#allocation32_spill] sm:$0xff] %v17216_v8  ;;  %13619 = vmatmul.mubr.f32.gmra.mxu0 %v9796_v6  ;;  %12666 = vmatprep.mubr.f32.mxu1 %v16558_v0  ;;  %v9798_v0 = vld [vmem:[%s19786_s3 + $0x808] sm:$0xff] }
 0x3ce   :  { %13706 = vmatpush3.msra.mxu0 %v15418_v13  ;;  %12751 = vmatprep.subr.mxu1 %v3112_v25 }
 0x3cf   :  { %13707 = vmatprep.subr.mxu0 %v15424_v10  ;;  %12752 = vmatpush3.msra.mxu1 %v3112_v25  ;;  %v17237_v25 = vpop.f32.mrf.mxu0 }
 0x3d0   :  { %13708 = vmatpush3.msra.mxu0 %v15424_v10  ;;  %12667 = vmatmul.mubr.f32.gmra.mxu1 %v16551_v26  ;;  %v12220_v20 = vpop.f32.mrf.mxu1  ;;  %v3465_v26 = vld [vmem:[#allocation2 + $0x478] sm:$0xff] }
 0x3d1   :  { %12753 = vmatprep.subr.mxu1 %v3111_v22  ;;  %13709 = vmatprep.mubr.f32.mxu0 %v9797_v28  ;;  %v17232_v6 = vadd.f32 %v12220_v20, %v17066_v57  ;;  %v9799_v28 = vld [vmem:[%s19786_s3 + $0x810] sm:$0xff]  ;;  %v19919_v57 = vld [vmem:[#allocation33_spill] sm:$0xff]  ;;  %v17250_v20 = vpop.f32.mrf.mxu0 }
 0x3d2   :  { %13789 = vmatprep.subr.mxu0 %v15298_v56  ;;  %12754 = vmatpush3.msra.mxu1 %v3111_v22  ;;  %v17235_v53 = vpop.f32.mrf.mxu1  ;;  %v9800_v22 = vld [vmem:[%s19786_s3 + $0x818] sm:$0xff] }
 0x3d3   :  { %19918 = vst [vmem:[#allocation73_spill] sm:$0xff] %v17235_v53  ;;  %13710 = vmatmul.mubr.f32.vlgmr.msra.gmra.mxu0 %v9798_v0  ;;  %12755 = vmatprep.subr.mxu1 %v3110_v27  ;;  %v17263_v8 = vpop.f32.mrf.mxu0 }
 0x3d4   :  { %13790 = vmatpush3.msra.mxu0 %v15298_v56  ;;  %12757 = vmatprep.mubr.f32.mxu1 %v16569_v47  ;;  %v3464_v47 = vld [vmem:[#allocation2 + $0x470] sm:$0xff] }
 0x3d5   :  { %13791 = vmatprep.subr.mxu0 %v15303_v9  ;;  %12756 = vmatpush3.msra.mxu1 %v3110_v27 }
 0x3d6   :  { %13792 = vmatpush3.msra.mxu0 %v15303_v9  ;;  %12758 = vmatmul.mubr.f32.vlgmr.msra.gmra.mxu1 %v19919_v57  ;;  %v12311_v0 = vpop.f32.mrf.mxu1  ;;  %v3463_v57 = vld [vmem:[#allocation2 + $0x468] sm:$0xff] }
 0x3d7   :  { %12837 = vmatprep.subr.mxu1 %v3465_v26  ;;  %13712 = vmatprep.mubr.f32.mxu0 %v9799_v28  ;;  %v17253_v53 = vadd.f32 %v12311_v0, %v17087_v42  ;;  %v9801_v28 = vld [vmem:[%s19786_s3 + $0x820] sm:$0xff]  ;;  %v19921_v42 = vld [vmem:[#allocation34_spill] sm:$0xff] }
 0x3d8   :  { %13793 = vmatprep.subr.mxu0 %v15315_v50  ;;  %12838 = vmatpush3.msra.mxu1 %v3465_v26  ;;  %v17256_v27 = vpop.f32.mrf.mxu1 }
 0x3d9   :  { %19920 = vst [vmem:[#allocation33_spill] sm:$0xff] %v17256_v27  ;;  %13713 = vmatmul.mubr.f32.gmra.mxu0 %v9800_v22  ;;  %12760 = vmatprep.mubr.f32.mxu1 %v16584_v48  ;;  %v9802_v48 = vld [vmem:[%s19786_s3 + $0x828] sm:$0xff]  ;;  %v3462_v22 = vld [vmem:[#allocation2 + $0x460] sm:$0xff] }
 0x3da   :  { %13794 = vmatpush3.msra.mxu0 %v15315_v50  ;;  %12839 = vmatprep.subr.mxu1 %v3464_v47 }
 0x3db   :  { %13795 = vmatprep.subr.mxu0 %v15324_v24  ;;  %12840 = vmatpush3.msra.mxu1 %v3464_v47  ;;  %v17277_v47 = vpop.f32.mrf.mxu0 }
 0x3dc   :  { %13796 = vmatpush3.msra.mxu0 %v15324_v24  ;;  %12761 = vmatmul.mubr.f32.gmra.mxu1 %v19921_v42  ;;  %v12314_v26 = vpop.f32.mrf.mxu1  ;;  %19923 = vst [vmem:[#allocation74_spill] sm:$0xff] %v17277_v47  ;;  %v3461_v42 = vld [vmem:[#allocation2 + $0x458] sm:$0xff] }
 0x3dd   :  { %12841 = vmatprep.subr.mxu1 %v3463_v57  ;;  %13715 = vmatprep.mubr.f32.mxu0 %v9801_v28  ;;  %v17272_v0 = vadd.f32 %v12314_v26, %v17108_v37  ;;  %v9803_v28 = vld [vmem:[%s19786_s3 + $0x830] sm:$0xff] }
 0x3de   :  { %13797 = vmatprep.subr.mxu0 %v15333_v2  ;;  %12842 = vmatpush3.msra.mxu1 %v3463_v57  ;;  %v17275_v27 = vpop.f32.mrf.mxu1  ;;  %v19924_v37 = vld [vmem:[#allocation35_spill] sm:$0xff]  ;;  %v9804_v57 = vld [vmem:[%s19786_s3 + $0x838] sm:$0xff] }
 0x3df   :  { %19922 = vst [vmem:[#allocation34_spill] sm:$0xff] %v17275_v27  ;;  %13716 = vmatmul.mubr.f32.gmra.mxu0 %v9802_v48  ;;  %12763 = vmatprep.mubr.f32.mxu1 %v16594_v4  ;;  %v17290_v48 = vpop.f32.mrf.mxu0  ;;  %v3460_v26 = vld [vmem:[#allocation2 + $0x450] sm:$0xff] }
 0x3e0   :  { %13798 = vmatpush3.msra.mxu0 %v15333_v2  ;;  %12843 = vmatprep.subr.mxu1 %v3462_v22 }
 0x3e1   :  { %13799 = vmatprep.subr.mxu0 %v15342_v33  ;;  %12844 = vmatpush3.msra.mxu1 %v3462_v22  ;;  %v17303_v47 = vpop.f32.mrf.mxu0 }
 0x3e2   :  { %13800 = vmatpush3.msra.mxu0 %v15342_v33  ;;  %12764 = vmatmul.mubr.f32.gmra.mxu1 %v19924_v37  ;;  %v12317_v4 = vpop.f32.mrf.mxu1  ;;  %v3459_v37 = vld [vmem:[#allocation2 + $0x448] sm:$0xff] }
 0x3e3   :  { %12845 = vmatprep.subr.mxu1 %v3461_v42  ;;  %13718 = vmatprep.mubr.f32.mxu0 %v9803_v28  ;;  %v17293_v27 = vadd.f32 %v12317_v4, %v17129_v5  ;;  %v9805_v28 = vld [vmem:[%s19786_s3 + $0x840] sm:$0xff] }
 0x3e4   :  { %13801 = vmatprep.subr.mxu0 %v15352_v63  ;;  %12846 = vmatpush3.msra.mxu1 %v3461_v42  ;;  %v17296_v22 = vpop.f32.mrf.mxu1  ;;  %v3458_v42 = vld [vmem:[#allocation2 + $0x440] sm:$0xff] }
 0x3e5   :  { %19925 = vst [vmem:[#allocation35_spill] sm:$0xff] %v17296_v22  ;;  %13719 = vmatmul.mubr.f32.gmra.mxu0 %v9804_v57  ;;  %12766 = vmatprep.mubr.f32.mxu1 %v16605_v30  ;;  %v9806_v30 = vld [vmem:[%s19786_s3 + $0x848] sm:$0xff] }
 0x3e6   :  { %13802 = vmatpush3.msra.mxu0 %v15352_v63  ;;  %12847 = vmatprep.subr.mxu1 %v3460_v26 }
 0x3e7   :  { %13803 = vmatprep.subr.mxu0 %v15361_v21  ;;  %12848 = vmatpush3.msra.mxu1 %v3460_v26  ;;  %v17317_v26 = vpop.f32.mrf.mxu0 }
 0x3e8   :  { %13804 = vmatpush3.msra.mxu0 %v15361_v21  ;;  %12767 = vmatmul.mubr.f32.gmra.mxu1 %v16602_v16  ;;  %v12320_v5 = vpop.f32.mrf.mxu1  ;;  %v3457_v16 = vld [vmem:[#allocation2 + $0x438] sm:$0xff] }
 0x3e9   :  { %12849 = vmatprep.subr.mxu1 %v3459_v37  ;;  %13721 = vmatprep.mubr.f32.mxu0 %v9805_v28  ;;  %v17312_v57 = vadd.f32 %v12320_v5, %v17150_v52  ;;  %v9807_v28 = vld [vmem:[%s19786_s3 + $0x850] sm:$0xff]  ;;  %v19927_v52 = vld [vmem:[#allocation36_spill] sm:$0xff] }
 0x3ea   :  { %13805 = vmatprep.subr.mxu0 %v15371_v61  ;;  %12850 = vmatpush3.msra.mxu1 %v3459_v37  ;;  %v17315_v4 = vpop.f32.mrf.mxu1  ;;  %v9808_v37 = vld [vmem:[%s19786_s3 + $0x858] sm:$0xff]  ;;  %v3456_v5 = vld [vmem:[#allocation2 + $0x430] sm:$0xff] }
 0x3eb   :  { %19926 = vst [vmem:[#allocation75_spill] sm:$0xff] %v17315_v4  ;;  %13722 = vmatmul.mubr.f32.gmra.mxu0 %v9806_v30  ;;  %12769 = vmatprep.mubr.f32.mxu1 %v16620_v1  ;;  %v17330_v30 = vpop.f32.mrf.mxu0  ;;  %v3455_v4 = vld [vmem:[#allocation2 + $0x428] sm:$0xff] }
 0x3ec   :  { %13806 = vmatpush3.msra.mxu0 %v15371_v61  ;;  %12851 = vmatprep.subr.mxu1 %v3458_v42  ;;  %19928 = vst [vmem:[#allocation36_spill] sm:$0xff] %v17330_v30 }
 0x3ed   :  { %13807 = vmatprep.subr.mxu0 %v15380_v19  ;;  %12852 = vmatpush3.msra.mxu1 %v3458_v42  ;;  %v17343_v30 = vpop.f32.mrf.mxu0 }
 0x3ee   :  { %13808 = vmatpush3.msra.mxu0 %v15380_v19  ;;  %12770 = vmatmul.mubr.f32.gmra.mxu1 %v19927_v52  ;;  %v12323_v1 = vpop.f32.mrf.mxu1  ;;  %v19930_v52 = vld [vmem:[#allocation38_spill] sm:$0xff] }
 0x3ef   :  { %12853 = vmatprep.subr.mxu1 %v3457_v16  ;;  %13724 = vmatprep.mubr.f32.mxu0 %v9807_v28  ;;  %v17333_v22 = vadd.f32 %v12323_v1, %v17171_v35  ;;  %v9809_v28 = vld [vmem:[%s19786_s3 + $0x860] sm:$0xff]  ;;  %19931 = vst [vmem:[#allocation38_spill] sm:$0xff] %v17343_v30  ;;  %v3453_v30 = vld [vmem:[#allocation2 + $0x418] sm:$0xff] }
 0x3f0   :  { %13809 = vmatprep.subr.mxu0 %v15390_v59  ;;  %12854 = vmatpush3.msra.mxu1 %v3457_v16  ;;  %v17336_v42 = vpop.f32.mrf.mxu1  ;;  %v19932_v35 = vld [vmem:[#allocation37_spill] sm:$0xff]  ;;  %v9810_v16 = vld [vmem:[%s19786_s3 + $0x868] sm:$0xff] }
 0x3f1   :  { %19929 = vst [vmem:[#allocation76_spill] sm:$0xff] %v17336_v42  ;;  %13725 = vmatmul.mubr.f32.gmra.mxu0 %v9808_v37  ;;  %12772 = vmatprep.mubr.f32.mxu1 %v19930_v52  ;;  %v3454_v1 = vld [vmem:[#allocation2 + $0x420] sm:$0xff] }
 0x3f2   :  { %13810 = vmatpush3.msra.mxu0 %v15390_v59  ;;  %12855 = vmatprep.subr.mxu1 %v3456_v5 }
 0x3f3   :  { %13811 = vmatprep.subr.mxu0 %v15397_v38  ;;  %12856 = vmatpush3.msra.mxu1 %v3456_v5  ;;  %v17357_v5 = vpop.f32.mrf.mxu0 }
 0x3f4   :  { %13812 = vmatpush3.msra.mxu0 %v15397_v38  ;;  %12773 = vmatmul.mubr.f32.gmra.mxu1 %v19932_v35  ;;  %v12326_v37 = vpop.f32.mrf.mxu1  ;;  %19934 = vst [vmem:[#allocation77_spill] sm:$0xff] %v17357_v5  ;;  %v19935_v35 = vld [vmem:[#allocation39_spill] sm:$0xff]  ;;  %v3451_v5 = vld [vmem:[#allocation2 + $0x408] sm:$0xff] }
 0x3f5   :  { %12857 = vmatprep.subr.mxu1 %v3455_v4  ;;  %13727 = vmatprep.mubr.f32.mxu0 %v9809_v28  ;;  %v17352_v52 = vadd.f32 %v12326_v37, %v17192_v55  ;;  %v9811_v28 = vld [vmem:[%s19786_s3 + $0x870] sm:$0xff]  ;;  %v19936_v55 = vld [vmem:[#allocation5_spill] sm:$0xff]  ;;  %v17370_v37 = vpop.f32.mrf.mxu0 }
 0x3f6   :  { %13813 = vmatprep.subr.mxu0 %v15405_v34  ;;  %12858 = vmatpush3.msra.mxu1 %v3455_v4  ;;  %v17355_v42 = vpop.f32.mrf.mxu1  ;;  %v9812_v4 = vld [vmem:[%s19786_s3 + $0x878] sm:$0xff]  ;;  %19937 = vst [vmem:[#allocation39_spill] sm:$0xff] %v17370_v37 }
 0x3f7   :  { %19933 = vst [vmem:[#allocation37_spill] sm:$0xff] %v17355_v42  ;;  %13728 = vmatmul.mubr.f32.gmra.mxu0 %v9810_v16  ;;  %12775 = vmatprep.mubr.f32.mxu1 %v19935_v35  ;;  %v3452_v35 = vld [vmem:[#allocation2 + $0x410] sm:$0xff]  ;;  %v17383_v37 = vpop.f32.mrf.mxu0 }
 0x3f8   :  { %13814 = vmatpush3.msra.mxu0 %v15405_v34  ;;  %12859 = vmatprep.subr.mxu1 %v3454_v1 }
 0x3f9   :  { %13815 = vmatprep.subr.mxu0 %v15412_v60  ;;  %12860 = vmatpush3.msra.mxu1 %v3454_v1 }
 0x3fa   :  { %13816 = vmatpush3.msra.mxu0 %v15412_v60  ;;  %12776 = vmatmul.mubr.f32.gmra.mxu1 %v19936_v55  ;;  %v12329_v16 = vpop.f32.mrf.mxu1  ;;  %v19939_v55 = vld [vmem:[#allocation6_spill] sm:$0xff] }
 0x3fb   :  { %12861 = vmatprep.subr.mxu1 %v3453_v30  ;;  %13730 = vmatprep.mubr.f32.mxu0 %v9811_v28  ;;  %v17373_v42 = vadd.f32 %v12329_v16, %v17213_v58  ;;  %v9813_v28 = vld [vmem:[%s19786_s3 + $0x880] sm:$0xff]  ;;  %19940 = vst [vmem:[#allocation6_spill] sm:$0xff] %v17383_v37  ;;  %v19941_v58 = vld [vmem:[#allocation7_spill] sm:$0xff]  ;;  %v3805_v37 = vld [vmem:[#allocation2 + $0x4f8] sm:$0xff] }
 0x3fc   :  { %13817 = vmatprep.subr.mxu0 %v15418_v13  ;;  %12862 = vmatpush3.msra.mxu1 %v3453_v30  ;;  %v17376_v1 = vpop.f32.mrf.mxu1  ;;  %v9814_v30 = vld [vmem:[%s19786_s3 + $0x888] sm:$0xff] }
 0x3fd   :  { %19938 = vst [vmem:[#allocation5_spill] sm:$0xff] %v17376_v1  ;;  %13731 = vmatmul.mubr.f32.gmra.mxu0 %v9812_v4  ;;  %12778 = vmatprep.mubr.f32.mxu1 %v19939_v55  ;;  %v3450_v4 = vld [vmem:[#allocation2 + $0x400] sm:$0xff] }
 0x3fe   :  { %13818 = vmatpush3.msra.mxu0 %v15418_v13  ;;  %12863 = vmatprep.subr.mxu1 %v3452_v35 }
 0x3ff   :  { %13819 = vmatprep.subr.mxu0 %v15424_v10  ;;  %12864 = vmatpush3.msra.mxu1 %v3452_v35  ;;  %v17397_v35 = vpop.f32.mrf.mxu0 }
 0x400   :  { %13820 = vmatpush3.msra.mxu0 %v15424_v10  ;;  %12779 = vmatmul.mubr.f32.gmra.mxu1 %v19941_v58  ;;  %v12332_v16 = vpop.f32.mrf.mxu1  ;;  %v19943_v58 = vld [vmem:[#allocation9_spill] sm:$0xff] }
 0x401   :  { %12865 = vmatprep.subr.mxu1 %v3451_v5  ;;  %13821 = vmatprep.mubr.f32.mxu0 %v9813_v28  ;;  %v17392_v55 = vadd.f32 %v12332_v16, %v17232_v6  ;;  %v9815_v28 = vld [vmem:[%s19786_s3 + $0x890] sm:$0xff]  ;;  %v19944_v6 = vld [vmem:[#allocation40_spill] sm:$0xff]  ;;  %v17410_v16 = vpop.f32.mrf.mxu0 }
 0x402   :  { %13901 = vmatprep.subr.mxu0 %v15298_v56  ;;  %12866 = vmatpush3.msra.mxu1 %v3451_v5  ;;  %v17395_v1 = vpop.f32.mrf.mxu1  ;;  %v9816_v5 = vld [vmem:[%s19786_s3 + $0x898] sm:$0xff]  ;;  %19945 = vst [vmem:[#allocation9_spill] sm:$0xff] %v17410_v16 }
 0x403   :  { %19942 = vst [vmem:[#allocation7_spill] sm:$0xff] %v17395_v1  ;;  %13822 = vmatmul.mubr.f32.vlgmr.msra.gmra.mxu0 %v9814_v30  ;;  %12867 = vmatprep.subr.mxu1 %v3450_v4  ;;  %v17423_v16 = vpop.f32.mrf.mxu0 }
 0x404   :  { %13902 = vmatpush3.msra.mxu0 %v15298_v56  ;;  %12869 = vmatprep.mubr.f32.mxu1 %v19943_v58  ;;  %v3804_v58 = vld [vmem:[#allocation2 + $0x4f0] sm:$0xff]  ;;  %19947 = vst [vmem:[#allocation78_spill] sm:$0xff] %v17423_v16  ;;  %v3801_v16 = vld [vmem:[#allocation2 + $0x4d8] sm:$0xff] }
 0x405   :  { %13903 = vmatprep.subr.mxu0 %v15303_v9  ;;  %12868 = vmatpush3.msra.mxu1 %v3450_v4 }
 0x406   :  { %13904 = vmatpush3.msra.mxu0 %v15303_v9  ;;  %12870 = vmatmul.mubr.f32.vlgmr.msra.gmra.mxu1 %v19944_v6  ;;  %v12423_v30 = vpop.f32.mrf.mxu1  ;;  %v3803_v6 = vld [vmem:[#allocation2 + $0x4e8] sm:$0xff] }
 0x407   :  { %12949 = vmatprep.subr.mxu1 %v3805_v37  ;;  %13824 = vmatprep.mubr.f32.mxu0 %v9815_v28  ;;  %v17413_v1 = vadd.f32 %v12423_v30, %v17253_v53  ;;  %v9817_v28 = vld [vmem:[%s19786_s3 + $0x8a0] sm:$0xff]  ;;  %v19948_v53 = vld [vmem:[#allocation8_spill] sm:$0xff] }
 0x408   :  { %13905 = vmatprep.subr.mxu0 %v15315_v50  ;;  %12950 = vmatpush3.msra.mxu1 %v3805_v37  ;;  %v17416_v4 = vpop.f32.mrf.mxu1 }
 0x409   :  { %19946 = vst [vmem:[#allocation40_spill] sm:$0xff] %v17416_v4  ;;  %13825 = vmatmul.mubr.f32.gmra.mxu0 %v9816_v5  ;;  %12872 = vmatprep.mubr.f32.mxu1 %v16677_v18  ;;  %v9818_v18 = vld [vmem:[%s19786_s3 + $0x8a8] sm:$0xff]  ;;  %v3802_v5 = vld [vmem:[#allocation2 + $0x4e0] sm:$0xff] }
 0x40a   :  { %13906 = vmatpush3.msra.mxu0 %v15315_v50  ;;  %12951 = vmatprep.subr.mxu1 %v3804_v58 }
 0x40b   :  { %13907 = vmatprep.subr.mxu0 %v15324_v24  ;;  %12952 = vmatpush3.msra.mxu1 %v3804_v58  ;;  %v17437_v58 = vpop.f32.mrf.mxu0 }
 0x40c   :  { %13908 = vmatpush3.msra.mxu0 %v15324_v24  ;;  %12873 = vmatmul.mubr.f32.gmra.mxu1 %v19948_v53  ;;  %v12426_v37 = vpop.f32.mrf.mxu1  ;;  %19950 = vst [vmem:[#allocation79_spill] sm:$0xff] %v17437_v58  ;;  %v19951_v53 = vld [vmem:[#allocation10_spill] sm:$0xff] }
 0x40d   :  { %12953 = vmatprep.subr.mxu1 %v3803_v6  ;;  %13827 = vmatprep.mubr.f32.mxu0 %v9817_v28  ;;  %v17432_v30 = vadd.f32 %v12426_v37, %v17272_v0  ;;  %v9819_v28 = vld [vmem:[%s19786_s3 + $0x8b0] sm:$0xff]  ;;  %v17450_v37 = vpop.f32.mrf.mxu0  ;;  %v3799_v58 = vld [vmem:[#allocation2 + $0x4c8] sm:$0xff] }
 0x40e   :  { %13909 = vmatprep.subr.mxu0 %v15333_v2  ;;  %12954 = vmatpush3.msra.mxu1 %v3803_v6  ;;  %v17435_v4 = vpop.f32.mrf.mxu1  ;;  %v19952_v0 = vld [vmem:[#allocation11_spill] sm:$0xff]  ;;  %v9820_v6 = vld [vmem:[%s19786_s3 + $0x8b8] sm:$0xff]  ;;  %19953 = vst [vmem:[#allocation10_spill] sm:$0xff] %v17450_v37 }
 0x40f   :  { %19949 = vst [vmem:[#allocation8_spill] sm:$0xff] %v17435_v4  ;;  %13828 = vmatmul.mubr.f32.gmra.mxu0 %v9818_v18  ;;  %12875 = vmatprep.mubr.f32.mxu1 %v19951_v53  ;;  %v3800_v53 = vld [vmem:[#allocation2 + $0x4d0] sm:$0xff]  ;;  %v17463_v37 = vpop.f32.mrf.mxu0 }
 0x410   :  { %13910 = vmatpush3.msra.mxu0 %v15333_v2  ;;  %12955 = vmatprep.subr.mxu1 %v3802_v5 }
 0x411   :  { %13911 = vmatprep.subr.mxu0 %v15342_v33  ;;  %12956 = vmatpush3.msra.mxu1 %v3802_v5 }
 0x412   :  { %13912 = vmatpush3.msra.mxu0 %v15342_v33  ;;  %12876 = vmatmul.mubr.f32.gmra.mxu1 %v19952_v0  ;;  %v12429_v18 = vpop.f32.mrf.mxu1  ;;  %v19955_v0 = vld [vmem:[#allocation12_spill] sm:$0xff] }
 0x413   :  { %12957 = vmatprep.subr.mxu1 %v3801_v16  ;;  %13830 = vmatprep.mubr.f32.mxu0 %v9819_v28  ;;  %v17453_v4 = vadd.f32 %v12429_v18, %v17293_v27  ;;  %v9821_v28 = vld [vmem:[%s19786_s3 + $0x8c0] sm:$0xff]  ;;  %19956 = vst [vmem:[#allocation12_spill] sm:$0xff] %v17463_v37  ;;  %v3795_v37 = vld [vmem:[#allocation2 + $0x4a8] sm:$0xff] }
 0x414   :  { %13913 = vmatprep.subr.mxu0 %v15352_v63  ;;  %12958 = vmatpush3.msra.mxu1 %v3801_v16  ;;  %v17456_v5 = vpop.f32.mrf.mxu1  ;;  %v19957_v27 = vld [vmem:[#allocation41_spill] sm:$0xff]  ;;  %v9822_v16 = vld [vmem:[%s19786_s3 + $0x8c8] sm:$0xff] }
 0x415   :  { %19954 = vst [vmem:[#allocation11_spill] sm:$0xff] %v17456_v5  ;;  %13831 = vmatmul.mubr.f32.gmra.mxu0 %v9820_v6  ;;  %12878 = vmatprep.mubr.f32.mxu1 %v19955_v0  ;;  %v3798_v18 = vld [vmem:[#allocation2 + $0x4c0] sm:$0xff] }
 0x416   :  { %13914 = vmatpush3.msra.mxu0 %v15352_v63  ;;  %12959 = vmatprep.subr.mxu1 %v3800_v53 }
 0x417   :  { %13915 = vmatprep.subr.mxu0 %v15361_v21  ;;  %12960 = vmatpush3.msra.mxu1 %v3800_v53  ;;  %v17477_v53 = vpop.f32.mrf.mxu0 }
 0x418   :  { %13916 = vmatpush3.msra.mxu0 %v15361_v21  ;;  %12879 = vmatmul.mubr.f32.gmra.mxu1 %v19957_v27  ;;  %v12432_v6 = vpop.f32.mrf.mxu1  ;;  %v3797_v27 = vld [vmem:[#allocation2 + $0x4b8] sm:$0xff] }
 0x419   :  { %12961 = vmatprep.subr.mxu1 %v3799_v58  ;;  %13833 = vmatprep.mubr.f32.mxu0 %v9821_v28  ;;  %v17472_v0 = vadd.f32 %v12432_v6, %v17312_v57  ;;  %v9823_v28 = vld [vmem:[%s19786_s3 + $0x8d0] sm:$0xff]  ;;  %v19959_v57 = vld [vmem:[#allocation14_spill] sm:$0xff] }
 0x41a   :  { %13917 = vmatprep.subr.mxu0 %v15371_v61  ;;  %12962 = vmatpush3.msra.mxu1 %v3799_v58  ;;  %v17475_v5 = vpop.f32.mrf.mxu1  ;;  %v9824_v58 = vld [vmem:[%s19786_s3 + $0x8d8] sm:$0xff]  ;;  %v3796_v6 = vld [vmem:[#allocation2 + $0x4b0] sm:$0xff] }
 0x41b   :  { %19958 = vst [vmem:[#allocation41_spill] sm:$0xff] %v17475_v5  ;;  %13834 = vmatmul.mubr.f32.gmra.mxu0 %v9822_v16  ;;  %12881 = vmatprep.mubr.f32.mxu1 %v16724_v7  ;;  %v17490_v16 = vpop.f32.mrf.mxu0 }
 0x41c   :  { %13918 = vmatpush3.msra.mxu0 %v15371_v61  ;;  %12963 = vmatprep.subr.mxu1 %v3798_v18  ;;  %19960 = vst [vmem:[#allocation14_spill] sm:$0xff] %v17490_v16 }
 0x41d   :  { %13919 = vmatprep.subr.mxu0 %v15380_v19  ;;  %12964 = vmatpush3.msra.mxu1 %v3798_v18  ;;  %v17503_v16 = vpop.f32.mrf.mxu0 }
 0x41e   :  { %13920 = vmatpush3.msra.mxu0 %v15380_v19  ;;  %12882 = vmatmul.mubr.f32.gmra.mxu1 %v19959_v57  ;;  %v12435_v7 = vpop.f32.mrf.mxu1  ;;  %v19962_v57 = vld [vmem:[#allocation16_spill] sm:$0xff] }
 0x41f   :  { %12965 = vmatprep.subr.mxu1 %v3797_v27  ;;  %13836 = vmatprep.mubr.f32.mxu0 %v9823_v28  ;;  %v17493_v5 = vadd.f32 %v12435_v7, %v17333_v22  ;;  %v9825_v28 = vld [vmem:[%s19786_s3 + $0x8e0] sm:$0xff]  ;;  %19963 = vst [vmem:[#allocation16_spill] sm:$0xff] %v17503_v16  ;;  %v3793_v16 = vld [vmem:[#allocation2 + $0x498] sm:$0xff] }
 0x420   :  { %13921 = vmatprep.subr.mxu0 %v15390_v59  ;;  %12966 = vmatpush3.msra.mxu1 %v3797_v27  ;;  %v17496_v18 = vpop.f32.mrf.mxu1  ;;  %v19964_v22 = vld [vmem:[#allocation13_spill] sm:$0xff]  ;;  %v9826_v27 = vld [vmem:[%s19786_s3 + $0x8e8] sm:$0xff] }
 0x421   :  { %19961 = vst [vmem:[#allocation80_spill] sm:$0xff] %v17496_v18  ;;  %13837 = vmatmul.mubr.f32.gmra.mxu0 %v9824_v58  ;;  %12884 = vmatprep.mubr.f32.mxu1 %v19962_v57  ;;  %v3794_v7 = vld [vmem:[#allocation2 + $0x4a0] sm:$0xff] }
 0x422   :  { %13922 = vmatpush3.msra.mxu0 %v15390_v59  ;;  %12967 = vmatprep.subr.mxu1 %v3796_v6 }
 0x423   :  { %13923 = vmatprep.subr.mxu0 %v15397_v38  ;;  %12968 = vmatpush3.msra.mxu1 %v3796_v6  ;;  %v17517_v6 = vpop.f32.mrf.mxu0 }
 0x424   :  { %13924 = vmatpush3.msra.mxu0 %v15397_v38  ;;  %12885 = vmatmul.mubr.f32.gmra.mxu1 %v19964_v22  ;;  %v12438_v58 = vpop.f32.mrf.mxu1  ;;  %19966 = vst [vmem:[#allocation81_spill] sm:$0xff] %v17517_v6  ;;  %v19967_v22 = vld [vmem:[#allocation17_spill] sm:$0xff]  ;;  %v3791_v6 = vld [vmem:[#allocation2 + $0x488] sm:$0xff] }
 0x425   :  { %12969 = vmatprep.subr.mxu1 %v3795_v37  ;;  %13839 = vmatprep.mubr.f32.mxu0 %v9825_v28  ;;  %v17512_v57 = vadd.f32 %v12438_v58, %v17352_v52  ;;  %v9827_v28 = vld [vmem:[%s19786_s3 + $0x8f0] sm:$0xff]  ;;  %v17530_v58 = vpop.f32.mrf.mxu0 }
 0x426   :  { %13925 = vmatprep.subr.mxu0 %v15405_v34  ;;  %12970 = vmatpush3.msra.mxu1 %v3795_v37  ;;  %v17515_v18 = vpop.f32.mrf.mxu1  ;;  %v19968_v52 = vld [vmem:[#allocation15_spill] sm:$0xff]  ;;  %v9828_v37 = vld [vmem:[%s19786_s3 + $0x8f8] sm:$0xff]  ;;  %19969 = vst [vmem:[#allocation17_spill] sm:$0xff] %v17530_v58 }
 0x427   :  { %19965 = vst [vmem:[#allocation13_spill] sm:$0xff] %v17515_v18  ;;  %13840 = vmatmul.mubr.f32.gmra.mxu0 %v9826_v27  ;;  %12887 = vmatprep.mubr.f32.mxu1 %v19967_v22  ;;  %v3792_v22 = vld [vmem:[#allocation2 + $0x490] sm:$0xff]  ;;  %v17543_v58 = vpop.f32.mrf.mxu0 }
 0x428   :  { %13926 = vmatpush3.msra.mxu0 %v15405_v34  ;;  %12971 = vmatprep.subr.mxu1 %v3794_v7 }
 0x429   :  { %13927 = vmatprep.subr.mxu0 %v15412_v60  ;;  %12972 = vmatpush3.msra.mxu1 %v3794_v7 }
 0x42a   :  { %13928 = vmatpush3.msra.mxu0 %v15412_v60  ;;  %12888 = vmatmul.mubr.f32.gmra.mxu1 %v19968_v52  ;;  %v12441_v27 = vpop.f32.mrf.mxu1  ;;  %v19971_v52 = vld [vmem:[#allocation18_spill] sm:$0xff] }
 0x42b   :  { %12973 = vmatprep.subr.mxu1 %v3793_v16  ;;  %13842 = vmatprep.mubr.f32.mxu0 %v9827_v28  ;;  %v17533_v18 = vadd.f32 %v12441_v27, %v17373_v42  ;;  %v9829_v28 = vld [vmem:[%s19786_s3 + $0x900] sm:$0xff]  ;;  %19972 = vst [vmem:[#allocation18_spill] sm:$0xff] %v17543_v58  ;;  %v19973_v42 = vld [vmem:[#allocation43_spill] sm:$0xff]  ;;  %v4143_v58 = vld [vmem:[#allocation2 + $0x568] sm:$0xff] }
 0x42c   :  { %13929 = vmatprep.subr.mxu0 %v15418_v13  ;;  %12974 = vmatpush3.msra.mxu1 %v3793_v16  ;;  %v17536_v7 = vpop.f32.mrf.mxu1  ;;  %v9830_v16 = vld [vmem:[%s19786_s3 + $0x908] sm:$0xff] }
 0x42d   :  { %19970 = vst [vmem:[#allocation15_spill] sm:$0xff] %v17536_v7  ;;  %13843 = vmatmul.mubr.f32.gmra.mxu0 %v9828_v37  ;;  %12890 = vmatprep.mubr.f32.mxu1 %v19971_v52  ;;  %v3790_v37 = vld [vmem:[#allocation2 + $0x480] sm:$0xff] }
 0x42e   :  { %13930 = vmatpush3.msra.mxu0 %v15418_v13  ;;  %12975 = vmatprep.subr.mxu1 %v3792_v22 }
 0x42f   :  { %13931 = vmatprep.subr.mxu0 %v15424_v10  ;;  %12976 = vmatpush3.msra.mxu1 %v3792_v22  ;;  %v17557_v22 = vpop.f32.mrf.mxu0 }
 0x430   :  { %13932 = vmatpush3.msra.mxu0 %v15424_v10  ;;  %12891 = vmatmul.mubr.f32.gmra.mxu1 %v19973_v42  ;;  %v12444_v27 = vpop.f32.mrf.mxu1  ;;  %v4145_v42 = vld [vmem:[#allocation2 + $0x578] sm:$0xff] }
 0x431   :  { %12977 = vmatprep.subr.mxu1 %v3791_v6  ;;  %13933 = vmatprep.mubr.f32.mxu0 %v9829_v28  ;;  %v17552_v52 = vadd.f32 %v12444_v27, %v17392_v55  ;;  %v9831_v28 = vld [vmem:[%s19786_s3 + $0x910] sm:$0xff]  ;;  %v19975_v55 = vld [vmem:[#allocation45_spill] sm:$0xff]  ;;  %v17570_v27 = vpop.f32.mrf.mxu0 }
 0x432   :  { %14013 = vmatprep.subr.mxu0 %v15298_v56  ;;  %12978 = vmatpush3.msra.mxu1 %v3791_v6  ;;  %v17555_v7 = vpop.f32.mrf.mxu1  ;;  %v9832_v6 = vld [vmem:[%s19786_s3 + $0x918] sm:$0xff]  ;;  %19976 = vst [vmem:[#allocation45_spill] sm:$0xff] %v17570_v27 }
 0x433   :  { %19974 = vst [vmem:[#allocation43_spill] sm:$0xff] %v17555_v7  ;;  %13934 = vmatmul.mubr.f32.vlgmr.msra.gmra.mxu0 %v9830_v16  ;;  %12979 = vmatprep.subr.mxu1 %v3790_v37  ;;  %v17583_v27 = vpop.f32.mrf.mxu0 }
 0x434   :  { %14014 = vmatpush3.msra.mxu0 %v15298_v56  ;;  %12981 = vmatprep.mubr.f32.mxu1 %v16798_v40  ;;  %v4144_v40 = vld [vmem:[#allocation2 + $0x570] sm:$0xff] }
 0x435   :  { %14015 = vmatprep.subr.mxu0 %v15303_v9  ;;  %12980 = vmatpush3.msra.mxu1 %v3790_v37 }
 0x436   :  { %14016 = vmatpush3.msra.mxu0 %v15303_v9  ;;  %12982 = vmatmul.mubr.f32.vlgmr.msra.gmra.mxu1 %v19975_v55  ;;  %v12535_v16 = vpop.f32.mrf.mxu1  ;;  %v19978_v55 = vld [vmem:[#allocation19_spill] sm:$0xff] }
 0x437   :  { %13061 = vmatprep.subr.mxu1 %v4145_v42  ;;  %13936 = vmatprep.mubr.f32.mxu0 %v9831_v28  ;;  %v17573_v7 = vadd.f32 %v12535_v16, %v17413_v1  ;;  %v9833_v28 = vld [vmem:[%s19786_s3 + $0x920] sm:$0xff]  ;;  %19979 = vst [vmem:[#allocation19_spill] sm:$0xff] %v17583_v27  ;;  %v19980_v1 = vld [vmem:[#allocation47_spill] sm:$0xff]  ;;  %v4141_v27 = vld [vmem:[#allocation2 + $0x558] sm:$0xff] }
 0x438   :  { %14017 = vmatprep.subr.mxu0 %v15315_v50  ;;  %13062 = vmatpush3.msra.mxu1 %v4145_v42  ;;  %v17576_v37 = vpop.f32.mrf.mxu1  ;;  %v9834_v42 = vld [vmem:[%s19786_s3 + $0x928] sm:$0xff]  ;;  %v4142_v16 = vld [vmem:[#allocation2 + $0x560] sm:$0xff] }
 0x439   :  { %19977 = vst [vmem:[#allocation82_spill] sm:$0xff] %v17576_v37  ;;  %13937 = vmatmul.mubr.f32.gmra.mxu0 %v9832_v6  ;;  %12984 = vmatprep.mubr.f32.mxu1 %v19978_v55 }
 0x43a   :  { %14018 = vmatpush3.msra.mxu0 %v15315_v50  ;;  %13063 = vmatprep.subr.mxu1 %v4144_v40 }
 0x43b   :  { %14019 = vmatprep.subr.mxu0 %v15324_v24  ;;  %13064 = vmatpush3.msra.mxu1 %v4144_v40  ;;  %v17597_v40 = vpop.f32.mrf.mxu0 }
 0x43c   :  { %14020 = vmatpush3.msra.mxu0 %v15324_v24  ;;  %12985 = vmatmul.mubr.f32.gmra.mxu1 %v19980_v1  ;;  %v12538_v6 = vpop.f32.mrf.mxu1  ;;  %19982 = vst [vmem:[#allocation83_spill] sm:$0xff] %v17597_v40  ;;  %v19983_v1 = vld [vmem:[#allocation20_spill] sm:$0xff] }
 0x43d   :  { %13065 = vmatprep.subr.mxu1 %v4143_v58  ;;  %13939 = vmatprep.mubr.f32.mxu0 %v9833_v28  ;;  %v17592_v55 = vadd.f32 %v12538_v6, %v17432_v30  ;;  %v9835_v28 = vld [vmem:[%s19786_s3 + $0x930] sm:$0xff]  ;;  %v19984_v30 = vld [vmem:[#allocation49_spill] sm:$0xff]  ;;  %v17610_v6 = vpop.f32.mrf.mxu0 }
 0x43e   :  { %14021 = vmatprep.subr.mxu0 %v15333_v2  ;;  %13066 = vmatpush3.msra.mxu1 %v4143_v58  ;;  %v17595_v37 = vpop.f32.mrf.mxu1  ;;  %v9836_v58 = vld [vmem:[%s19786_s3 + $0x938] sm:$0xff] }
 0x43f   :  { %19981 = vst [vmem:[#allocation47_spill] sm:$0xff] %v17595_v37  ;;  %13940 = vmatmul.mubr.f32.gmra.mxu0 %v9834_v42  ;;  %12987 = vmatprep.mubr.f32.mxu1 %v19983_v1  ;;  %v4140_v1 = vld [vmem:[#allocation2 + $0x550] sm:$0xff]  ;;  %v17623_v40 = vpop.f32.mrf.mxu0 }
 0x440   :  { %14022 = vmatpush3.msra.mxu0 %v15333_v2  ;;  %13067 = vmatprep.subr.mxu1 %v4142_v16  ;;  %19986 = vst [vmem:[#allocation49_spill] sm:$0xff] %v17623_v40  ;;  %v4137_v40 = vld [vmem:[#allocation2 + $0x538] sm:$0xff] }
 0x441   :  { %14023 = vmatprep.subr.mxu0 %v15342_v33  ;;  %13068 = vmatpush3.msra.mxu1 %v4142_v16 }
 0x442   :  { %14024 = vmatpush3.msra.mxu0 %v15342_v33  ;;  %12988 = vmatmul.mubr.f32.gmra.mxu1 %v19984_v30  ;;  %v12541_v42 = vpop.f32.mrf.mxu1  ;;  %v4139_v30 = vld [vmem:[#allocation2 + $0x548] sm:$0xff] }
 0x443   :  { %13069 = vmatprep.subr.mxu1 %v4141_v27  ;;  %13942 = vmatprep.mubr.f32.mxu0 %v9835_v28  ;;  %v17613_v37 = vadd.f32 %v12541_v42, %v17453_v4  ;;  %v9837_v28 = vld [vmem:[%s19786_s3 + $0x940] sm:$0xff]  ;;  %v19987_v4 = vld [vmem:[#allocation51_spill] sm:$0xff] }
 0x444   :  { %14025 = vmatprep.subr.mxu0 %v15352_v63  ;;  %13070 = vmatpush3.msra.mxu1 %v4141_v27  ;;  %v17616_v16 = vpop.f32.mrf.mxu1 }
 0x445   :  { %19985 = vst [vmem:[#allocation20_spill] sm:$0xff] %v17616_v16  ;;  %13943 = vmatmul.mubr.f32.gmra.mxu0 %v9836_v58  ;;  %12990 = vmatprep.mubr.f32.mxu1 %v16858_v45  ;;  %v9838_v45 = vld [vmem:[%s19786_s3 + $0x948] sm:$0xff]  ;;  %v4138_v58 = vld [vmem:[#allocation2 + $0x540] sm:$0xff]  ;;  %v17635_v16 = vpop.f32.mrf.mxu0 }
 0x446   :  { %14026 = vmatpush3.msra.mxu0 %v15352_v63  ;;  %13071 = vmatprep.subr.mxu1 %v4140_v1  ;;  %19988 = vst [vmem:[#allocation51_spill] sm:$0xff] %v17635_v16  ;;  %v4135_v16 = vld [vmem:[#allocation2 + $0x528] sm:$0xff] }
 0x447   :  { %14027 = vmatprep.subr.mxu0 %v15361_v21  ;;  %13072 = vmatpush3.msra.mxu1 %v4140_v1 }
 0x448   :  { %14028 = vmatpush3.msra.mxu0 %v15361_v21  ;;  %12991 = vmatmul.mubr.f32.gmra.mxu1 %v19987_v4  ;;  %v12544_v27 = vpop.f32.mrf.mxu1  ;;  %v19990_v4 = vld [vmem:[#allocation21_spill] sm:$0xff] }
 0x449   :  { %13073 = vmatprep.subr.mxu1 %v4139_v30  ;;  %13945 = vmatprep.mubr.f32.mxu0 %v9837_v28  ;;  %v17632_v42 = vadd.f32 %v12544_v27, %v17472_v0  ;;  %v9839_v28 = vld [vmem:[%s19786_s3 + $0x950] sm:$0xff]  ;;  %v19991_v0 = vld [vmem:[#allocation53_spill] sm:$0xff] }
 0x44a   :  { %14029 = vmatprep.subr.mxu0 %v15371_v61  ;;  %13074 = vmatpush3.msra.mxu1 %v4139_v30  ;;  %v17637_v1 = vpop.f32.mrf.mxu1  ;;  %v9840_v30 = vld [vmem:[%s19786_s3 + $0x958] sm:$0xff] }
 0x44b   :  { %19989 = vst [vmem:[#allocation84_spill] sm:$0xff] %v17637_v1  ;;  %13946 = vmatmul.mubr.f32.gmra.mxu0 %v9838_v45  ;;  %12993 = vmatprep.mubr.f32.mxu1 %v19990_v4  ;;  %v17650_v45 = vpop.f32.mrf.mxu0  ;;  %v4136_v4 = vld [vmem:[#allocation2 + $0x530] sm:$0xff] }
 0x44c   :  { %14030 = vmatpush3.msra.mxu0 %v15371_v61  ;;  %13075 = vmatprep.subr.mxu1 %v4138_v58  ;;  %19992 = vst [vmem:[#allocation21_spill] sm:$0xff] %v17650_v45 }
 0x44d   :  { %14031 = vmatprep.subr.mxu0 %v15380_v19  ;;  %13076 = vmatpush3.msra.mxu1 %v4138_v58  ;;  %v17663_v45 = vpop.f32.mrf.mxu0 }
 0x44e   :  { %14032 = vmatpush3.msra.mxu0 %v15380_v19  ;;  %12994 = vmatmul.mubr.f32.gmra.mxu1 %v19991_v0  ;;  %v12547_v27 = vpop.f32.mrf.mxu1  ;;  %v19994_v0 = vld [vmem:[#allocation22_spill] sm:$0xff] }
 0x44f   :  { %13077 = vmatprep.subr.mxu1 %v4137_v40  ;;  %13948 = vmatprep.mubr.f32.mxu0 %v9839_v28  ;;  %v17653_v1 = vadd.f32 %v12547_v27, %v17493_v5  ;;  %v9841_v28 = vld [vmem:[%s19786_s3 + $0x960] sm:$0xff]  ;;  %v19995_v5 = vld [vmem:[#allocation55_spill] sm:$0xff] }
 0x450   :  { %14033 = vmatprep.subr.mxu0 %v15390_v59  ;;  %13078 = vmatpush3.msra.mxu1 %v4137_v40  ;;  %v17656_v58 = vpop.f32.mrf.mxu1  ;;  %v9842_v40 = vld [vmem:[%s19786_s3 + $0x968] sm:$0xff]  ;;  %v4134_v27 = vld [vmem:[#allocation2 + $0x520] sm:$0xff] }
 0x451   :  { %19993 = vst [vmem:[#allocation53_spill] sm:$0xff] %v17656_v58  ;;  %13949 = vmatmul.mubr.f32.gmra.mxu0 %v9840_v30  ;;  %12996 = vmatprep.mubr.f32.mxu1 %v19994_v0  ;;  %v17675_v58 = vpop.f32.mrf.mxu0 }
 0x452   :  { %14034 = vmatpush3.msra.mxu0 %v15390_v59  ;;  %13079 = vmatprep.subr.mxu1 %v4136_v4  ;;  %19996 = vst [vmem:[#allocation22_spill] sm:$0xff] %v17675_v58 }
 0x453   :  { %14035 = vmatprep.subr.mxu0 %v15397_v38  ;;  %13080 = vmatpush3.msra.mxu1 %v4136_v4 }
 0x454   :  { %14036 = vmatpush3.msra.mxu0 %v15397_v38  ;;  %12997 = vmatmul.mubr.f32.gmra.mxu1 %v19995_v5  ;;  %v12550_v30 = vpop.f32.mrf.mxu1  ;;  %v4133_v5 = vld [vmem:[#allocation2 + $0x518] sm:$0xff] }
 0x455   :  { %13081 = vmatprep.subr.mxu1 %v4135_v16  ;;  %13951 = vmatprep.mubr.f32.mxu0 %v9841_v28  ;;  %v17672_v0 = vadd.f32 %v12550_v30, %v17512_v57  ;;  %v9843_v28 = vld [vmem:[%s19786_s3 + $0x970] sm:$0xff]  ;;  %v19998_v57 = vld [vmem:[#allocation57_spill] sm:$0xff] }
 0x456   :  { %14037 = vmatprep.subr.mxu0 %v15405_v34  ;;  %13082 = vmatpush3.msra.mxu1 %v4135_v16  ;;  %v17677_v4 = vpop.f32.mrf.mxu1  ;;  %v9844_v16 = vld [vmem:[%s19786_s3 + $0x978] sm:$0xff]  ;;  %v4132_v30 = vld [vmem:[#allocation2 + $0x510] sm:$0xff] }
 0x457   :  { %19997 = vst [vmem:[#allocation55_spill] sm:$0xff] %v17677_v4  ;;  %13952 = vmatmul.mubr.f32.gmra.mxu0 %v9842_v40  ;;  %12999 = vmatprep.mubr.f32.mxu1 %v16916_v39  ;;  %v17690_v39 = vpop.f32.mrf.mxu0 }
 0x458   :  { %14038 = vmatpush3.msra.mxu0 %v15405_v34  ;;  %13083 = vmatprep.subr.mxu1 %v4134_v27 }
 0x459   :  { %14039 = vmatprep.subr.mxu0 %v15412_v60  ;;  %13084 = vmatpush3.msra.mxu1 %v4134_v27  ;;  %v17703_v58 = vpop.f32.mrf.mxu0 }
 0x45a   :  { %14040 = vmatpush3.msra.mxu0 %v15412_v60  ;;  %13000 = vmatmul.mubr.f32.gmra.mxu1 %v19998_v57  ;;  %v12553_v40 = vpop.f32.mrf.mxu1  ;;  %v4131_v57 = vld [vmem:[#allocation2 + $0x508] sm:$0xff] }
 0x45b   :  { %13085 = vmatprep.subr.mxu1 %v4133_v5  ;;  %13954 = vmatprep.mubr.f32.mxu0 %v9843_v28  ;;  %v17693_v4 = vadd.f32 %v12553_v40, %v17533_v18  ;;  %v9845_v28 = vld [vmem:[%s19786_s3 + $0x980] sm:$0xff]  ;;  %v20000_v18 = vld [vmem:[#allocation59_spill] sm:$0xff] }
 0x45c   :  { %14041 = vmatprep.subr.mxu0 %v15418_v13  ;;  %13086 = vmatpush3.msra.mxu1 %v4133_v5  ;;  %v17696_v27 = vpop.f32.mrf.mxu1  ;;  %v4130_v5 = vld [vmem:[#allocation2 + $0x500] sm:$0xff] }
 0x45d   :  { %19999 = vst [vmem:[#allocation57_spill] sm:$0xff] %v17696_v27  ;;  %13955 = vmatmul.mubr.f32.gmra.mxu0 %v9844_v16  ;;  %13002 = vmatprep.mubr.f32.mxu1 %v16937_v3  ;;  %v9846_v3 = vld [vmem:[%s19786_s3 + $0x988] sm:$0xff]  ;;  %v17715_v27 = vpop.f32.mrf.mxu0 }
 0x45e   :  { %14042 = vmatpush3.msra.mxu0 %v15418_v13  ;;  %13087 = vmatprep.subr.mxu1 %v4132_v30 }
 0x45f   :  { %14043 = vmatprep.subr.mxu0 %v15424_v10  ;;  %13088 = vmatpush3.msra.mxu1 %v4132_v30 }
 0x460   :  { %14044 = vmatpush3.msra.mxu0 %v15424_v10  ;;  %13003 = vmatmul.mubr.f32.gmra.mxu1 %v20000_v18  ;;  %v12556_v16 = vpop.f32.mrf.mxu1  ;;  %v4485_v18 = vld [vmem:[#allocation2 + $0x5f8] sm:$0xff] }
 0x461   :  { %13089 = vmatprep.subr.mxu1 %v4131_v57  ;;  %14045 = vmatprep.mubr.f32.mxu0 %v9845_v28  ;;  %v17712_v40 = vadd.f32 %v12556_v16, %v17552_v52  ;;  %v9847_v28 = vld [vmem:[%s19786_s3 + $0x990] sm:$0xff]  ;;  %v20002_v52 = vld [vmem:[#allocation60_spill] sm:$0xff] }
 0x462   :  { %14125 = vmatprep.subr.mxu0 %v15298_v56  ;;  %13090 = vmatpush3.msra.mxu1 %v4131_v57  ;;  %v17717_v30 = vpop.f32.mrf.mxu1  ;;  %v9848_v57 = vld [vmem:[%s19786_s3 + $0x998] sm:$0xff] }
 0x463   :  { %20001 = vst [vmem:[#allocation59_spill] sm:$0xff] %v17717_v30  ;;  %14046 = vmatmul.mubr.f32.vlgmr.msra.gmra.mxu0 %v9846_v3  ;;  %13091 = vmatprep.subr.mxu1 %v4130_v5  ;;  %v17730_v3 = vpop.f32.mrf.mxu0 }
 0x464   :  { %14126 = vmatpush3.msra.mxu0 %v15298_v56  ;;  %13093 = vmatprep.mubr.f32.mxu1 %v16958_v32  ;;  %20003 = vst [vmem:[#allocation60_spill] sm:$0xff] %v17730_v3  ;;  %v4484_v32 = vld [vmem:[#allocation2 + $0x5f0] sm:$0xff] }
 0x465   :  { %14127 = vmatprep.subr.mxu0 %v15303_v9  ;;  %13092 = vmatpush3.msra.mxu1 %v4130_v5  ;;  %v17743_v3 = vpop.f32.mrf.mxu0 }
 0x466   :  { %14128 = vmatpush3.msra.mxu0 %v15303_v9  ;;  %13094 = vmatmul.mubr.f32.vlgmr.msra.gmra.mxu1 %v20002_v52  ;;  %v12647_v16 = vpop.f32.mrf.mxu1  ;;  %v4483_v52 = vld [vmem:[#allocation2 + $0x5e8] sm:$0xff] }
 0x467   :  { %13173 = vmatprep.subr.mxu1 %v4485_v18  ;;  %14048 = vmatprep.mubr.f32.mxu0 %v9847_v28  ;;  %v17733_v30 = vadd.f32 %v12647_v16, %v17573_v7  ;;  %v9849_v28 = vld [vmem:[%s19786_s3 + $0x9a0] sm:$0xff]  ;;  %v17755_v16 = vpop.f32.mrf.mxu0 }
 0x468   :  { %14129 = vmatprep.subr.mxu0 %v15315_v50  ;;  %13174 = vmatpush3.msra.mxu1 %v4485_v18  ;;  %v17736_v5 = vpop.f32.mrf.mxu1  ;;  %v4482_v18 = vld [vmem:[#allocation2 + $0x5e0] sm:$0xff] }
 0x469   :  { %20004 = vst [vmem:[#allocation85_spill] sm:$0xff] %v17736_v5  ;;  %14049 = vmatmul.mubr.f32.gmra.mxu0 %v9848_v57  ;;  %13096 = vmatprep.mubr.f32.mxu1 %v16979_v14  ;;  %v9850_v14 = vld [vmem:[%s19786_s3 + $0x9a8] sm:$0xff] }
 0x46a   :  { %14130 = vmatpush3.msra.mxu0 %v15315_v50  ;;  %13175 = vmatprep.subr.mxu1 %v4484_v32 }
 0x46b   :  { %14131 = vmatprep.subr.mxu0 %v15324_v24  ;;  %13176 = vmatpush3.msra.mxu1 %v4484_v32 }
 0x46c   :  { %14132 = vmatpush3.msra.mxu0 %v15324_v24  ;;  %13097 = vmatmul.mubr.f32.gmra.mxu1 %v16967_v44  ;;  %v12650_v7 = vpop.f32.mrf.mxu1  ;;  %v4481_v44 = vld [vmem:[#allocation2 + $0x5d8] sm:$0xff] }
 0x46d   :  { %13177 = vmatprep.subr.mxu1 %v4483_v52  ;;  %14051 = vmatprep.mubr.f32.mxu0 %v9849_v28  ;;  %v17752_v57 = vadd.f32 %v12650_v7, %v17592_v55  ;;  %v9851_v28 = vld [vmem:[%s19786_s3 + $0x9b0] sm:$0xff]  ;;  %v20006_v55 = vld [vmem:[#allocation62_spill] sm:$0xff] }
 0x46e   :  { %14133 = vmatprep.subr.mxu0 %v15333_v2  ;;  %13178 = vmatpush3.msra.mxu1 %v4483_v52  ;;  %v17757_v32 = vpop.f32.mrf.mxu1  ;;  %v9852_v52 = vld [vmem:[%s19786_s3 + $0x9b8] sm:$0xff]  ;;  %v4480_v7 = vld [vmem:[#allocation2 + $0x5d0] sm:$0xff] }
 0x46f   :  { %20005 = vst [vmem:[#allocation86_spill] sm:$0xff] %v17757_v32  ;;  %14052 = vmatmul.mubr.f32.gmra.mxu0 %v9850_v14  ;;  %13099 = vmatprep.mubr.f32.mxu1 %v17000_v62  ;;  %v17770_v62 = vpop.f32.mrf.mxu0 }
 0x470   :  { %14134 = vmatpush3.msra.mxu0 %v15333_v2  ;;  %13179 = vmatprep.subr.mxu1 %v4482_v18 }
 0x471   :  { %14135 = vmatprep.subr.mxu0 %v15342_v33  ;;  %13180 = vmatpush3.msra.mxu1 %v4482_v18  ;;  %v17783_v5 = vpop.f32.mrf.mxu0 }
 0x472   :  { %14136 = vmatpush3.msra.mxu0 %v15342_v33  ;;  %13100 = vmatmul.mubr.f32.gmra.mxu1 %v20006_v55  ;;  %v12653_v14 = vpop.f32.mrf.mxu1  ;;  %v4479_v55 = vld [vmem:[#allocation2 + $0x5c8] sm:$0xff] }
 0x473   :  { %13181 = vmatprep.subr.mxu1 %v4481_v44  ;;  %14054 = vmatprep.mubr.f32.mxu0 %v9851_v28  ;;  %v17773_v32 = vadd.f32 %v12653_v14, %v17613_v37  ;;  %v9853_v28 = vld [vmem:[%s19786_s3 + $0x9c0] sm:$0xff]  ;;  %v20008_v37 = vld [vmem:[#allocation63_spill] sm:$0xff] }
 0x474   :  { %14137 = vmatprep.subr.mxu0 %v15352_v63  ;;  %13182 = vmatpush3.msra.mxu1 %v4481_v44  ;;  %v17776_v18 = vpop.f32.mrf.mxu1 }
 0x475   :  { %20007 = vst [vmem:[#allocation62_spill] sm:$0xff] %v17776_v18  ;;  %14055 = vmatmul.mubr.f32.gmra.mxu0 %v9852_v52  ;;  %13102 = vmatprep.mubr.f32.mxu1 %v17021_v51  ;;  %v9854_v51 = vld [vmem:[%s19786_s3 + $0x9c8] sm:$0xff]  ;;  %v4478_v52 = vld [vmem:[#allocation2 + $0x5c0] sm:$0xff]  ;;  %v17795_v18 = vpop.f32.mrf.mxu0 }
 0x476   :  { %14138 = vmatpush3.msra.mxu0 %v15352_v63  ;;  %13183 = vmatprep.subr.mxu1 %v4480_v7 }
 0x477   :  { %14139 = vmatprep.subr.mxu0 %v15361_v21  ;;  %13184 = vmatpush3.msra.mxu1 %v4480_v7 }
 0x478   :  { %14140 = vmatpush3.msra.mxu0 %v15361_v21  ;;  %13103 = vmatmul.mubr.f32.gmra.mxu1 %v20008_v37  ;;  %v12656_v44 = vpop.f32.mrf.mxu1  ;;  %v4477_v37 = vld [vmem:[#allocation2 + $0x5b8] sm:$0xff] }
 0x479   :  { %13185 = vmatprep.subr.mxu1 %v4479_v55  ;;  %14057 = vmatprep.mubr.f32.mxu0 %v9853_v28  ;;  %v17792_v14 = vadd.f32 %v12656_v44, %v17632_v42  ;;  %v9855_v28 = vld [vmem:[%s19786_s3 + $0x9d0] sm:$0xff]  ;;  %v20010_v42 = vld [vmem:[#allocation64_spill] sm:$0xff] }
 0x47a   :  { %14141 = vmatprep.subr.mxu0 %v15371_v61  ;;  %13186 = vmatpush3.msra.mxu1 %v4479_v55  ;;  %v17797_v7 = vpop.f32.mrf.mxu1  ;;  %v9856_v55 = vld [vmem:[%s19786_s3 + $0x9d8] sm:$0xff]  ;;  %v4476_v44 = vld [vmem:[#allocation2 + $0x5b0] sm:$0xff] }
 0x47b   :  { %20009 = vst [vmem:[#allocation63_spill] sm:$0xff] %v17797_v7  ;;  %14058 = vmatmul.mubr.f32.gmra.mxu0 %v9854_v51  ;;  %13105 = vmatprep.mubr.f32.mxu1 %v17042_v49  ;;  %v17810_v49 = vpop.f32.mrf.mxu0 }
 0x47c   :  { %14142 = vmatpush3.msra.mxu0 %v15371_v61  ;;  %13187 = vmatprep.subr.mxu1 %v4478_v52  ;;  %20011 = vst [vmem:[#allocation64_spill] sm:$0xff] %v17810_v49 }
 0x47d   :  { %14143 = vmatprep.subr.mxu0 %v15380_v19  ;;  %13188 = vmatpush3.msra.mxu1 %v4478_v52  ;;  %v17823_v49 = vpop.f32.mrf.mxu0 }
 0x47e   :  { %14144 = vmatpush3.msra.mxu0 %v15380_v19  ;;  %13106 = vmatmul.mubr.f32.gmra.mxu1 %v20010_v42  ;;  %v12659_v51 = vpop.f32.mrf.mxu1  ;;  %v4475_v42 = vld [vmem:[#allocation2 + $0x5a8] sm:$0xff] }
 0x47f   :  { %13189 = vmatprep.subr.mxu1 %v4477_v37  ;;  %14060 = vmatprep.mubr.f32.mxu0 %v9855_v28  ;;  %v17813_v7 = vadd.f32 %v12659_v51, %v17653_v1  ;;  %v9857_v28 = vld [vmem:[%s19786_s3 + $0x9e0] sm:$0xff]  ;;  %v17835_v51 = vpop.f32.mrf.mxu0 }
 0x480   :  { %14145 = vmatprep.subr.mxu0 %v15390_v59  ;;  %13190 = vmatpush3.msra.mxu1 %v4477_v37  ;;  %v17816_v52 = vpop.f32.mrf.mxu1  ;;  %v4474_v37 = vld [vmem:[#allocation2 + $0x5a0] sm:$0xff] }
 0x481   :  { %20012 = vst [vmem:[#allocation87_spill] sm:$0xff] %v17816_v52  ;;  %14061 = vmatmul.mubr.f32.gmra.mxu0 %v9856_v55  ;;  %13108 = vmatprep.mubr.f32.mxu1 %v17063_v54  ;;  %v9858_v54 = vld [vmem:[%s19786_s3 + $0x9e8] sm:$0xff] }
 0x482   :  { %14146 = vmatpush3.msra.mxu0 %v15390_v59  ;;  %13191 = vmatprep.subr.mxu1 %v4476_v44 }
 0x483   :  { %14147 = vmatprep.subr.mxu0 %v15397_v38  ;;  %13192 = vmatpush3.msra.mxu1 %v4476_v44 }
 0x484   :  { %14148 = vmatpush3.msra.mxu0 %v15397_v38  ;;  %13109 = vmatmul.mubr.f32.gmra.mxu1 %v17051_v11  ;;  %v12662_v1 = vpop.f32.mrf.mxu1  ;;  %v4473_v11 = vld [vmem:[#allocation2 + $0x598] sm:$0xff] }
 0x485   :  { %13193 = vmatprep.subr.mxu1 %v4475_v42  ;;  %14063 = vmatprep.mubr.f32.mxu0 %v9857_v28  ;;  %v17832_v55 = vadd.f32 %v12662_v1, %v17672_v0  ;;  %v9859_v28 = vld [vmem:[%s19786_s3 + $0x9f0] sm:$0xff]  ;;  %v20014_v0 = vld [vmem:[#allocation66_spill] sm:$0xff] }
 0x486   :  { %14149 = vmatprep.subr.mxu0 %v15405_v34  ;;  %13194 = vmatpush3.msra.mxu1 %v4475_v42  ;;  %v17837_v44 = vpop.f32.mrf.mxu1  ;;  %v9860_v42 = vld [vmem:[%s19786_s3 + $0x9f8] sm:$0xff]  ;;  %v4472_v1 = vld [vmem:[#allocation2 + $0x590] sm:$0xff] }
 0x487   :  { %20013 = vst [vmem:[#allocation88_spill] sm:$0xff] %v17837_v44  ;;  %14064 = vmatmul.mubr.f32.gmra.mxu0 %v9858_v54  ;;  %13111 = vmatprep.mubr.f32.mxu1 %v17084_v46  ;;  %v17850_v46 = vpop.f32.mrf.mxu0 }
 0x488   :  { %14150 = vmatpush3.msra.mxu0 %v15405_v34  ;;  %13195 = vmatprep.subr.mxu1 %v4474_v37 }
 0x489   :  { %14151 = vmatprep.subr.mxu0 %v15412_v60  ;;  %13196 = vmatpush3.msra.mxu1 %v4474_v37  ;;  %v17863_v52 = vpop.f32.mrf.mxu0 }
 0x48a   :  { %14152 = vmatpush3.msra.mxu0 %v15412_v60  ;;  %13112 = vmatmul.mubr.f32.gmra.mxu1 %v20014_v0  ;;  %v12665_v54 = vpop.f32.mrf.mxu1  ;;  %v4471_v0 = vld [vmem:[#allocation2 + $0x588] sm:$0xff] }
 0x48b   :  { %13197 = vmatprep.subr.mxu1 %v4473_v11  ;;  %14066 = vmatprep.mubr.f32.mxu0 %v9859_v28  ;;  %v17853_v44 = vadd.f32 %v12665_v54, %v17693_v4  ;;  %v9861_v28 = vld [vmem:[%s19786_s3 + $0xa00] sm:$0xff]  ;;  %v17875_v54 = vpop.f32.mrf.mxu0 }
 0x48c   :  { %14153 = vmatprep.subr.mxu0 %v15418_v13  ;;  %13198 = vmatpush3.msra.mxu1 %v4473_v11  ;;  %v17856_v37 = vpop.f32.mrf.mxu1  ;;  %v4470_v4 = vld [vmem:[#allocation2 + $0x580] sm:$0xff] }
 0x48d   :  { %20015 = vst [vmem:[#allocation66_spill] sm:$0xff] %v17856_v37  ;;  %14067 = vmatmul.mubr.f32.gmra.mxu0 %v9860_v42  ;;  %13114 = vmatprep.mubr.f32.mxu1 %v17105_v36  ;;  %v9862_v36 = vld [vmem:[%s19786_s3 + $0xa08] sm:$0xff] }
 0x48e   :  { %14154 = vmatpush3.msra.mxu0 %v15418_v13  ;;  %13199 = vmatprep.subr.mxu1 %v4472_v1 }
 0x48f   :  { %14155 = vmatprep.subr.mxu0 %v15424_v10  ;;  %13200 = vmatpush3.msra.mxu1 %v4472_v1 }
 0x490   :  { %14156 = vmatpush3.msra.mxu0 %v15424_v10  ;;  %13115 = vmatmul.mubr.f32.gmra.mxu1 %v17093_v12  ;;  %v12668_v11 = vpop.f32.mrf.mxu1  ;;  %v4825_v12 = vld [vmem:[#allocation2 + $0x678] sm:$0xff] }
 0x491   :  { %13201 = vmatprep.subr.mxu1 %v4471_v0  ;;  %14157 = vmatprep.mubr.f32.mxu0 %v9861_v28  ;;  %v17872_v42 = vadd.f32 %v12668_v11, %v17712_v40  ;;  %v9863_v28 = vld [vmem:[%s19786_s3 + $0xa10] sm:$0xff]  ;;  %v20017_v40 = vld [vmem:[#allocation68_spill] sm:$0xff] }
 0x492   :  { %14237 = vmatprep.subr.mxu0 %v15298_v56  ;;  %13202 = vmatpush3.msra.mxu1 %v4471_v0  ;;  %v17877_v1 = vpop.f32.mrf.mxu1  ;;  %v9864_v0 = vld [vmem:[%s19786_s3 + $0xa18] sm:$0xff] }
 0x493   :  { %20016 = vst [vmem:[#allocation89_spill] sm:$0xff] %v17877_v1  ;;  %14158 = vmatmul.mubr.f32.vlgmr.msra.gmra.mxu0 %v9862_v36  ;;  %13203 = vmatprep.subr.mxu1 %v4470_v4  ;;  %v17890_v36 = vpop.f32.mrf.mxu0 }
 0x494   :  { %14238 = vmatpush3.msra.mxu0 %v15298_v56  ;;  %13205 = vmatprep.mubr.f32.mxu1 %v17126_v23  ;;  %v4824_v23 = vld [vmem:[#allocation2 + $0x670] sm:$0xff] }
 0x495   :  { %14239 = vmatprep.subr.mxu0 %v15303_v9  ;;  %13204 = vmatpush3.msra.mxu1 %v4470_v4  ;;  %v17903_v37 = vpop.f32.mrf.mxu0 }
 0x496   :  { %14240 = vmatpush3.msra.mxu0 %v15303_v9  ;;  %13206 = vmatmul.mubr.f32.vlgmr.msra.gmra.mxu1 %v20017_v40  ;;  %v12759_v11 = vpop.f32.mrf.mxu1  ;;  %v4823_v40 = vld [vmem:[#allocation2 + $0x668] sm:$0xff] }
 0x497   :  { %13285 = vmatprep.subr.mxu1 %v4825_v12  ;;  %14160 = vmatprep.mubr.f32.mxu0 %v9863_v28  ;;  %v17893_v1 = vadd.f32 %v12759_v11, %v17733_v30  ;;  %v9865_v28 = vld [vmem:[%s19786_s3 + $0xa20] sm:$0xff] }
 0x498   :  { %14241 = vmatprep.subr.mxu0 %v15315_v50  ;;  %13286 = vmatpush3.msra.mxu1 %v4825_v12  ;;  %v17896_v4 = vpop.f32.mrf.mxu1  ;;  %v20019_v30 = vld [vmem:[#allocation69_spill] sm:$0xff] }
 0x499   :  { %20018 = vst [vmem:[#allocation68_spill] sm:$0xff] %v17896_v4  ;;  %14161 = vmatmul.mubr.f32.gmra.mxu0 %v9864_v0  ;;  %13208 = vmatprep.mubr.f32.mxu1 %v17147_v43  ;;  %v9866_v43 = vld [vmem:[%s19786_s3 + $0xa28] sm:$0xff]  ;;  %v4822_v0 = vld [vmem:[#allocation2 + $0x660] sm:$0xff]  ;;  %v17915_v4 = vpop.f32.mrf.mxu0 }
 0x49a   :  { %14242 = vmatpush3.msra.mxu0 %v15315_v50  ;;  %13287 = vmatprep.subr.mxu1 %v4824_v23 }
 0x49b   :  { %14243 = vmatprep.subr.mxu0 %v15324_v24  ;;  %13288 = vmatpush3.msra.mxu1 %v4824_v23 }
 0x49c   :  { %14244 = vmatpush3.msra.mxu0 %v15324_v24  ;;  %13209 = vmatmul.mubr.f32.gmra.mxu1 %v20019_v30  ;;  %v12762_v12 = vpop.f32.mrf.mxu1  ;;  %v4821_v30 = vld [vmem:[#allocation2 + $0x658] sm:$0xff] }
 0x49d   :  { %13289 = vmatprep.subr.mxu1 %v4823_v40  ;;  %14163 = vmatprep.mubr.f32.mxu0 %v9865_v28  ;;  %v17912_v11 = vadd.f32 %v12762_v12, %v17752_v57  ;;  %v9867_v28 = vld [vmem:[%s19786_s3 + $0xa30] sm:$0xff]  ;;  %v9868_v57 = vld [vmem:[%s19786_s3 + $0xa38] sm:$0xff] }
 0x49e   :  { %14245 = vmatprep.subr.mxu0 %v15333_v2  ;;  %13290 = vmatpush3.msra.mxu1 %v4823_v40  ;;  %v17917_v23 = vpop.f32.mrf.mxu1 }
 0x49f   :  { %20020 = vst [vmem:[#allocation69_spill] sm:$0xff] %v17917_v23  ;;  %14164 = vmatmul.mubr.f32.gmra.mxu0 %v9866_v43  ;;  %13211 = vmatprep.mubr.f32.mxu1 %v17168_v41  ;;  %v17930_v41 = vpop.f32.mrf.mxu0  ;;  %v4820_v43 = vld [vmem:[#allocation2 + $0x650] sm:$0xff] }
 0x4a0   :  { %14246 = vmatpush3.msra.mxu0 %v15333_v2  ;;  %13291 = vmatprep.subr.mxu1 %v4822_v0 }
 0x4a1   :  { %14247 = vmatprep.subr.mxu0 %v15342_v33  ;;  %13292 = vmatpush3.msra.mxu1 %v4822_v0  ;;  %v17943_v23 = vpop.f32.mrf.mxu0 }
 0x4a2   :  { %14248 = vmatpush3.msra.mxu0 %v15342_v33  ;;  %13212 = vmatmul.mubr.f32.gmra.mxu1 %v17156_v31  ;;  %v12765_v40 = vpop.f32.mrf.mxu1  ;;  %v4819_v31 = vld [vmem:[#allocation2 + $0x648] sm:$0xff] }
 0x4a3   :  { %13293 = vmatprep.subr.mxu1 %v4821_v30  ;;  %14166 = vmatprep.mubr.f32.mxu0 %v9867_v28  ;;  %v17933_v12 = vadd.f32 %v12765_v40, %v17773_v32  ;;  %v9869_v28 = vld [vmem:[%s19786_s3 + $0xa40] sm:$0xff]  ;;  %v20022_v32 = vld [vmem:[#allocation71_spill] sm:$0xff] }
 0x4a4   :  { %14249 = vmatprep.subr.mxu0 %v15352_v63  ;;  %13294 = vmatpush3.msra.mxu1 %v4821_v30  ;;  %v17936_v0 = vpop.f32.mrf.mxu1 }
 0x4a5   :  { %20021 = vst [vmem:[#allocation90_spill] sm:$0xff] %v17936_v0  ;;  %14167 = vmatmul.mubr.f32.gmra.mxu0 %v9868_v57  ;;  %13214 = vmatprep.mubr.f32.mxu1 %v17189_v17  ;;  %v9870_v17 = vld [vmem:[%s19786_s3 + $0xa48] sm:$0xff]  ;;  %v4818_v57 = vld [vmem:[#allocation2 + $0x640] sm:$0xff]  ;;  %v17955_v0 = vpop.f32.mrf.mxu0 }
 0x4a6   :  { %14250 = vmatpush3.msra.mxu0 %v15352_v63  ;;  %13295 = vmatprep.subr.mxu1 %v4820_v43 }
 0x4a7   :  { %14251 = vmatprep.subr.mxu0 %v15361_v21  ;;  %13296 = vmatpush3.msra.mxu1 %v4820_v43 }
 0x4a8   :  { %14252 = vmatpush3.msra.mxu0 %v15361_v21  ;;  %13215 = vmatmul.mubr.f32.gmra.mxu1 %v20022_v32  ;;  %v12768_v30 = vpop.f32.mrf.mxu1  ;;  %v4817_v32 = vld [vmem:[#allocation2 + $0x638] sm:$0xff] }
 0x4a9   :  { %13297 = vmatprep.subr.mxu1 %v4819_v31  ;;  %14169 = vmatprep.mubr.f32.mxu0 %v9869_v28  ;;  %v17952_v40 = vadd.f32 %v12768_v30, %v17792_v14  ;;  %v9871_v28 = vld [vmem:[%s19786_s3 + $0xa50] sm:$0xff]  ;;  %v20024_v14 = vld [vmem:[#allocation72_spill] sm:$0xff] }
 0x4aa   :  { %14253 = vmatprep.subr.mxu0 %v15371_v61  ;;  %13298 = vmatpush3.msra.mxu1 %v4819_v31  ;;  %v17957_v43 = vpop.f32.mrf.mxu1  ;;  %v9872_v31 = vld [vmem:[%s19786_s3 + $0xa58] sm:$0xff]  ;;  %v4816_v30 = vld [vmem:[#allocation2 + $0x630] sm:$0xff] }
 0x4ab   :  { %20023 = vst [vmem:[#allocation71_spill] sm:$0xff] %v17957_v43  ;;  %14170 = vmatmul.mubr.f32.gmra.mxu0 %v9870_v17  ;;  %13217 = vmatprep.mubr.f32.mxu1 %v17210_v29  ;;  %v17970_v29 = vpop.f32.mrf.mxu0 }
 0x4ac   :  { %14254 = vmatpush3.msra.mxu0 %v15371_v61  ;;  %13299 = vmatprep.subr.mxu1 %v4818_v57  ;;  %20025 = vst [vmem:[#allocation72_spill] sm:$0xff] %v17970_v29 }
 0x4ad   :  { %14255 = vmatprep.subr.mxu0 %v15380_v19  ;;  %13300 = vmatpush3.msra.mxu1 %v4818_v57  ;;  %v17983_v29 = vpop.f32.mrf.mxu0 }
 0x4ae   :  { %14256 = vmatpush3.msra.mxu0 %v15380_v19  ;;  %13218 = vmatmul.mubr.f32.gmra.mxu1 %v20024_v14  ;;  %v12771_v17 = vpop.f32.mrf.mxu1  ;;  %v4815_v14 = vld [vmem:[#allocation2 + $0x628] sm:$0xff] }
 0x4af   :  { %13301 = vmatprep.subr.mxu1 %v4817_v32  ;;  %14172 = vmatprep.mubr.f32.mxu0 %v9871_v28  ;;  %v17973_v43 = vadd.f32 %v12771_v17, %v17813_v7  ;;  %v9873_v28 = vld [vmem:[%s19786_s3 + $0xa60] sm:$0xff]  ;;  %v17995_v17 = vpop.f32.mrf.mxu0 }
 0x4b0   :  { %14257 = vmatprep.subr.mxu0 %v15390_v59  ;;  %13302 = vmatpush3.msra.mxu1 %v4817_v32  ;;  %v17976_v57 = vpop.f32.mrf.mxu1  ;;  %v4814_v32 = vld [vmem:[#allocation2 + $0x620] sm:$0xff] }
 0x4b1   :  { %20026 = vst [vmem:[#allocation91_spill] sm:$0xff] %v17976_v57  ;;  %14173 = vmatmul.mubr.f32.gmra.mxu0 %v9872_v31  ;;  %13220 = vmatprep.mubr.f32.mxu1 %v17237_v25  ;;  %v9874_v25 = vld [vmem:[%s19786_s3 + $0xa68] sm:$0xff] }
 0x4b2   :  { %14258 = vmatpush3.msra.mxu0 %v15390_v59  ;;  %13303 = vmatprep.subr.mxu1 %v4816_v30 }
 0x4b3   :  { %14259 = vmatprep.subr.mxu0 %v15397_v38  ;;  %13304 = vmatpush3.msra.mxu1 %v4816_v30 }
 0x4b4   :  { %14260 = vmatpush3.msra.mxu0 %v15397_v38  ;;  %13221 = vmatmul.mubr.f32.gmra.mxu1 %v17223_v15  ;;  %v12774_v7 = vpop.f32.mrf.mxu1  ;;  %v4813_v15 = vld [vmem:[#allocation2 + $0x618] sm:$0xff] }
 0x4b5   :  { %13305 = vmatprep.subr.mxu1 %v4815_v14  ;;  %14175 = vmatprep.mubr.f32.mxu0 %v9873_v28  ;;  %v17992_v31 = vadd.f32 %v12774_v7, %v17832_v55  ;;  %v9875_v28 = vld [vmem:[%s19786_s3 + $0xa70] sm:$0xff]  ;;  %v9876_v55 = vld [vmem:[%s19786_s3 + $0xa78] sm:$0xff] }
 0x4b6   :  { %14261 = vmatprep.subr.mxu0 %v15405_v34  ;;  %13306 = vmatpush3.msra.mxu1 %v4815_v14  ;;  %v17997_v30 = vpop.f32.mrf.mxu1 }
 0x4b7   :  { %20027 = vst [vmem:[#allocation92_spill] sm:$0xff] %v17997_v30  ;;  %14176 = vmatmul.mubr.f32.gmra.mxu0 %v9874_v25  ;;  %13223 = vmatprep.mubr.f32.mxu1 %v17263_v8  ;;  %v18010_v8 = vpop.f32.mrf.mxu0  ;;  %v4812_v25 = vld [vmem:[#allocation2 + $0x610] sm:$0xff] }
 0x4b8   :  { %14262 = vmatpush3.msra.mxu0 %v15405_v34  ;;  %13307 = vmatprep.subr.mxu1 %v4814_v32 }
 0x4b9   :  { %14263 = vmatprep.subr.mxu0 %v15412_v60  ;;  %13308 = vmatpush3.msra.mxu1 %v4814_v32  ;;  %v18023_v30 = vpop.f32.mrf.mxu0 }
 0x4ba   :  { %14264 = vmatpush3.msra.mxu0 %v15412_v60  ;;  %13224 = vmatmul.mubr.f32.gmra.mxu1 %v17250_v20  ;;  %v12777_v14 = vpop.f32.mrf.mxu1  ;;  %v4811_v20 = vld [vmem:[#allocation2 + $0x608] sm:$0xff] }
 0x4bb   :  { %13309 = vmatprep.subr.mxu1 %v4813_v15  ;;  %14178 = vmatprep.mubr.f32.mxu0 %v9875_v28  ;;  %v18013_v7 = vadd.f32 %v12777_v14, %v17853_v44  ;;  %v9877_v28 = vld [vmem:[%s19786_s3 + $0xa80] sm:$0xff]  ;;  %v20029_v44 = vld [vmem:[#allocation74_spill] sm:$0xff] }
 0x4bc   :  { %14265 = vmatprep.subr.mxu0 %v15418_v13  ;;  %13310 = vmatpush3.msra.mxu1 %v4813_v15  ;;  %v18016_v32 = vpop.f32.mrf.mxu1  ;;  %v4810_v15 = vld [vmem:[#allocation2 + $0x600] sm:$0xff] }
 0x4bd   :  { %20028 = vst [vmem:[#allocation93_spill] sm:$0xff] %v18016_v32  ;;  %14179 = vmatmul.mubr.f32.gmra.mxu0 %v9876_v55  ;;  %13226 = vmatprep.mubr.f32.mxu1 %v17290_v48  ;;  %v9878_v48 = vld [vmem:[%s19786_s3 + $0xa88] sm:$0xff]  ;;  %v18035_v32 = vpop.f32.mrf.mxu0 }
 0x4be   :  { %14266 = vmatpush3.msra.mxu0 %v15418_v13  ;;  %13311 = vmatprep.subr.mxu1 %v4812_v25 }
 0x4bf   :  { %14267 = vmatprep.subr.mxu0 %v15424_v10  ;;  %13312 = vmatpush3.msra.mxu1 %v4812_v25 }
 0x4c0   :  { %14268 = vmatpush3.msra.mxu0 %v15424_v10  ;;  %13227 = vmatmul.mubr.f32.gmra.mxu1 %v20029_v44  ;;  %v12780_v55 = vpop.f32.mrf.mxu1  ;;  %v5165_v44 = vld [vmem:[#allocation2 + $0x6f8] sm:$0xff] }
 0x4c1   :  { %13313 = vmatprep.subr.mxu1 %v4811_v20  ;;  %14269 = vmatprep.mubr.f32.mxu0 %v9877_v28  ;;  %v18032_v14 = vadd.f32 %v12780_v55, %v17872_v42  ;;  %v9879_v28 = vld [vmem:[%s19786_s3 + $0xa90] sm:$0xff]  ;;  %v9880_v42 = vld [vmem:[%s19786_s3 + $0xa98] sm:$0xff] }
 0x4c2   :  { %14349 = vmatprep.subr.mxu0 %v15298_v56  ;;  %13314 = vmatpush3.msra.mxu1 %v4811_v20  ;;  %v18037_v25 = vpop.f32.mrf.mxu1  ;;  %v18050_v20 = vpop.f32.mrf.mxu0 }
 0x4c3   :  { %20030 = vst [vmem:[#allocation74_spill] sm:$0xff] %v18037_v25  ;;  %14270 = vmatmul.mubr.f32.vlgmr.msra.gmra.mxu0 %v9878_v48  ;;  %13315 = vmatprep.subr.mxu1 %v4810_v15  ;;  %20031 = vst [vmem:[#allocation94_spill] sm:$0xff] %v18050_v20  ;;  %v5163_v25 = vld [vmem:[#allocation2 + $0x6e8] sm:$0xff]  ;;  %v5161_v20 = vld [vmem:[#allocation2 + $0x6d8] sm:$0xff] }
 0x4c4   :  { %14350 = vmatpush3.msra.mxu0 %v15298_v56  ;;  %13317 = vmatprep.mubr.f32.mxu1 %v17317_v26  ;;  %v5164_v26 = vld [vmem:[#allocation2 + $0x6f0] sm:$0xff]  ;;  %v18063_v57 = vpop.f32.mrf.mxu0 }
 0x4c5   :  { %14351 = vmatprep.subr.mxu0 %v15303_v9  ;;  %13316 = vmatpush3.msra.mxu1 %v4810_v15 }
 0x4c6   :  { %14352 = vmatpush3.msra.mxu0 %v15303_v9  ;;  %13318 = vmatmul.mubr.f32.vlgmr.msra.gmra.mxu1 %v17303_v47  ;;  %v12871_v48 = vpop.f32.mrf.mxu1  ;;  %v20033_v47 = vld [vmem:[#allocation38_spill] sm:$0xff] }
 0x4c7   :  { %13397 = vmatprep.subr.mxu1 %v5165_v44  ;;  %14272 = vmatprep.mubr.f32.mxu0 %v9879_v28  ;;  %v18053_v55 = vadd.f32 %v12871_v48, %v17893_v1  ;;  %v9881_v28 = vld [vmem:[%s19786_s3 + $0xaa0] sm:$0xff]  ;;  %v20034_v1 = vld [vmem:[#allocation36_spill] sm:$0xff] }
 0x4c8   :  { %14353 = vmatprep.subr.mxu0 %v15315_v50  ;;  %13398 = vmatpush3.msra.mxu1 %v5165_v44  ;;  %v18056_v15 = vpop.f32.mrf.mxu1  ;;  %v9882_v44 = vld [vmem:[%s19786_s3 + $0xaa8] sm:$0xff]  ;;  %v5162_v48 = vld [vmem:[#allocation2 + $0x6e0] sm:$0xff] }
 0x4c9   :  { %20032 = vst [vmem:[#allocation95_spill] sm:$0xff] %v18056_v15  ;;  %14273 = vmatmul.mubr.f32.gmra.mxu0 %v9880_v42  ;;  %13320 = vmatprep.mubr.f32.mxu1 %v20033_v47  ;;  %v18075_v15 = vpop.f32.mrf.mxu0 }
 0x4ca   :  { %14354 = vmatpush3.msra.mxu0 %v15315_v50  ;;  %13399 = vmatprep.subr.mxu1 %v5164_v26  ;;  %20035 = vst [vmem:[#allocation38_spill] sm:$0xff] %v18075_v15 }
 0x4cb   :  { %14355 = vmatprep.subr.mxu0 %v15324_v24  ;;  %13400 = vmatpush3.msra.mxu1 %v5164_v26 }
 0x4cc   :  { %14356 = vmatpush3.msra.mxu0 %v15324_v24  ;;  %13321 = vmatmul.mubr.f32.gmra.mxu1 %v20034_v1  ;;  %v12874_v42 = vpop.f32.mrf.mxu1  ;;  %v20037_v1 = vld [vmem:[#allocation39_spill] sm:$0xff] }
 0x4cd   :  { %13401 = vmatprep.subr.mxu1 %v5163_v25  ;;  %14275 = vmatprep.mubr.f32.mxu0 %v9881_v28  ;;  %v18072_v47 = vadd.f32 %v12874_v42, %v17912_v11  ;;  %v9883_v28 = vld [vmem:[%s19786_s3 + $0xab0] sm:$0xff]  ;;  %v20038_v11 = vld [vmem:[#allocation77_spill] sm:$0xff] }
 0x4ce   :  { %14357 = vmatprep.subr.mxu0 %v15333_v2  ;;  %13402 = vmatpush3.msra.mxu1 %v5163_v25  ;;  %v18077_v26 = vpop.f32.mrf.mxu1  ;;  %v9884_v25 = vld [vmem:[%s19786_s3 + $0xab8] sm:$0xff] }
 0x4cf   :  { %20036 = vst [vmem:[#allocation36_spill] sm:$0xff] %v18077_v26  ;;  %14276 = vmatmul.mubr.f32.gmra.mxu0 %v9882_v44  ;;  %13323 = vmatprep.mubr.f32.mxu1 %v20037_v1  ;;  %v18090_v44 = vpop.f32.mrf.mxu0  ;;  %v5160_v1 = vld [vmem:[#allocation2 + $0x6d0] sm:$0xff] }
 0x4d0   :  { %14358 = vmatpush3.msra.mxu0 %v15333_v2  ;;  %13403 = vmatprep.subr.mxu1 %v5162_v48 }
 0x4d1   :  { %14359 = vmatprep.subr.mxu0 %v15342_v33  ;;  %13404 = vmatpush3.msra.mxu1 %v5162_v48  ;;  %v18103_v15 = vpop.f32.mrf.mxu0 }
 0x4d2   :  { %14360 = vmatpush3.msra.mxu0 %v15342_v33  ;;  %13324 = vmatmul.mubr.f32.gmra.mxu1 %v20038_v11  ;;  %v12877_v42 = vpop.f32.mrf.mxu1  ;;  %v5159_v11 = vld [vmem:[#allocation2 + $0x6c8] sm:$0xff]  ;;  %20040 = vst [vmem:[#allocation77_spill] sm:$0xff] %v18103_v15  ;;  %v5157_v15 = vld [vmem:[#allocation2 + $0x6b8] sm:$0xff] }
 0x4d3   :  { %13405 = vmatprep.subr.mxu1 %v5161_v20  ;;  %14278 = vmatprep.mubr.f32.mxu0 %v9883_v28  ;;  %v18093_v26 = vadd.f32 %v12877_v42, %v17933_v12  ;;  %v9885_v28 = vld [vmem:[%s19786_s3 + $0xac0] sm:$0xff]  ;;  %v20041_v12 = vld [vmem:[#allocation6_spill] sm:$0xff] }
 0x4d4   :  { %14361 = vmatprep.subr.mxu0 %v15352_v63  ;;  %13406 = vmatpush3.msra.mxu1 %v5161_v20  ;;  %v18096_v48 = vpop.f32.mrf.mxu1 }
 0x4d5   :  { %20039 = vst [vmem:[#allocation39_spill] sm:$0xff] %v18096_v48  ;;  %14279 = vmatmul.mubr.f32.gmra.mxu0 %v9884_v25  ;;  %13326 = vmatprep.mubr.f32.mxu1 %v17397_v35  ;;  %v9886_v35 = vld [vmem:[%s19786_s3 + $0xac8] sm:$0xff]  ;;  %v5158_v25 = vld [vmem:[#allocation2 + $0x6c0] sm:$0xff]  ;;  %v18115_v48 = vpop.f32.mrf.mxu0 }
 0x4d6   :  { %14362 = vmatpush3.msra.mxu0 %v15352_v63  ;;  %13407 = vmatprep.subr.mxu1 %v5160_v1  ;;  %20042 = vst [vmem:[#allocation6_spill] sm:$0xff] %v18115_v48  ;;  %v5155_v48 = vld [vmem:[#allocation2 + $0x6a8] sm:$0xff] }
 0x4d7   :  { %14363 = vmatprep.subr.mxu0 %v15361_v21  ;;  %13408 = vmatpush3.msra.mxu1 %v5160_v1 }
 0x4d8   :  { %14364 = vmatpush3.msra.mxu0 %v15361_v21  ;;  %13327 = vmatmul.mubr.f32.gmra.mxu1 %v20041_v12  ;;  %v12880_v20 = vpop.f32.mrf.mxu1  ;;  %v20044_v12 = vld [vmem:[#allocation78_spill] sm:$0xff] }
 0x4d9   :  { %13409 = vmatprep.subr.mxu1 %v5159_v11  ;;  %14281 = vmatprep.mubr.f32.mxu0 %v9885_v28  ;;  %v18112_v42 = vadd.f32 %v12880_v20, %v17952_v40  ;;  %v9887_v28 = vld [vmem:[%s19786_s3 + $0xad0] sm:$0xff]  ;;  %v20045_v40 = vld [vmem:[#allocation9_spill] sm:$0xff] }
 0x4da   :  { %14365 = vmatprep.subr.mxu0 %v15371_v61  ;;  %13410 = vmatpush3.msra.mxu1 %v5159_v11  ;;  %v18117_v1 = vpop.f32.mrf.mxu1  ;;  %v9888_v11 = vld [vmem:[%s19786_s3 + $0xad8] sm:$0xff] }
 0x4db   :  { %20043 = vst [vmem:[#allocation96_spill] sm:$0xff] %v18117_v1  ;;  %14282 = vmatmul.mubr.f32.gmra.mxu0 %v9886_v35  ;;  %13329 = vmatprep.mubr.f32.mxu1 %v20044_v12  ;;  %v18130_v35 = vpop.f32.mrf.mxu0  ;;  %v5156_v12 = vld [vmem:[#allocation2 + $0x6b0] sm:$0xff] }
 0x4dc   :  { %14366 = vmatpush3.msra.mxu0 %v15371_v61  ;;  %13411 = vmatprep.subr.mxu1 %v5158_v25  ;;  %20046 = vst [vmem:[#allocation78_spill] sm:$0xff] %v18130_v35 }
 0x4dd   :  { %14367 = vmatprep.subr.mxu0 %v15380_v19  ;;  %13412 = vmatpush3.msra.mxu1 %v5158_v25  ;;  %v18143_v35 = vpop.f32.mrf.mxu0 }
 0x4de   :  { %14368 = vmatpush3.msra.mxu0 %v15380_v19  ;;  %13330 = vmatmul.mubr.f32.gmra.mxu1 %v20045_v40  ;;  %v12883_v20 = vpop.f32.mrf.mxu1  ;;  %v20048_v40 = vld [vmem:[#allocation10_spill] sm:$0xff] }
 0x4df   :  { %13413 = vmatprep.subr.mxu1 %v5157_v15  ;;  %14284 = vmatprep.mubr.f32.mxu0 %v9887_v28  ;;  %v18133_v1 = vadd.f32 %v12883_v20, %v17973_v43  ;;  %v9889_v28 = vld [vmem:[%s19786_s3 + $0xae0] sm:$0xff]  ;;  %20049 = vst [vmem:[#allocation10_spill] sm:$0xff] %v18143_v35  ;;  %v20050_v43 = vld [vmem:[#allocation79_spill] sm:$0xff]  ;;  %v5505_v35 = vld [vmem:[#allocation2 + $0x778] sm:$0xff] }
 0x4e0   :  { %14369 = vmatprep.subr.mxu0 %v15390_v59  ;;  %13414 = vmatpush3.msra.mxu1 %v5157_v15  ;;  %v18136_v25 = vpop.f32.mrf.mxu1  ;;  %v9890_v15 = vld [vmem:[%s19786_s3 + $0xae8] sm:$0xff]  ;;  %v5154_v20 = vld [vmem:[#allocation2 + $0x6a0] sm:$0xff] }
 0x4e1   :  { %20047 = vst [vmem:[#allocation9_spill] sm:$0xff] %v18136_v25  ;;  %14285 = vmatmul.mubr.f32.gmra.mxu0 %v9888_v11  ;;  %13332 = vmatprep.mubr.f32.mxu1 %v20048_v40  ;;  %v18155_v25 = vpop.f32.mrf.mxu0 }
 0x4e2   :  { %14370 = vmatpush3.msra.mxu0 %v15390_v59  ;;  %13415 = vmatprep.subr.mxu1 %v5156_v12  ;;  %20051 = vst [vmem:[#allocation79_spill] sm:$0xff] %v18155_v25 }
 0x4e3   :  { %14371 = vmatprep.subr.mxu0 %v15397_v38  ;;  %13416 = vmatpush3.msra.mxu1 %v5156_v12 }
 0x4e4   :  { %14372 = vmatpush3.msra.mxu0 %v15397_v38  ;;  %13333 = vmatmul.mubr.f32.gmra.mxu1 %v20050_v43  ;;  %v12886_v11 = vpop.f32.mrf.mxu1  ;;  %v5153_v43 = vld [vmem:[#allocation2 + $0x698] sm:$0xff] }
 0x4e5   :  { %13417 = vmatprep.subr.mxu1 %v5155_v48  ;;  %14287 = vmatprep.mubr.f32.mxu0 %v9889_v28  ;;  %v18152_v40 = vadd.f32 %v12886_v11, %v17992_v31  ;;  %v9891_v28 = vld [vmem:[%s19786_s3 + $0xaf0] sm:$0xff]  ;;  %v20053_v31 = vld [vmem:[#allocation12_spill] sm:$0xff] }
 0x4e6   :  { %14373 = vmatprep.subr.mxu0 %v15405_v34  ;;  %13418 = vmatpush3.msra.mxu1 %v5155_v48  ;;  %v18157_v12 = vpop.f32.mrf.mxu1  ;;  %v9892_v48 = vld [vmem:[%s19786_s3 + $0xaf8] sm:$0xff]  ;;  %v5152_v11 = vld [vmem:[#allocation2 + $0x690] sm:$0xff] }
 0x4e7   :  { %20052 = vst [vmem:[#allocation97_spill] sm:$0xff] %v18157_v12  ;;  %14288 = vmatmul.mubr.f32.gmra.mxu0 %v9890_v15  ;;  %13335 = vmatprep.mubr.f32.mxu1 %v17477_v53  ;;  %v18170_v53 = vpop.f32.mrf.mxu0 }
 0x4e8   :  { %14374 = vmatpush3.msra.mxu0 %v15405_v34  ;;  %13419 = vmatprep.subr.mxu1 %v5154_v20  ;;  %20054 = vst [vmem:[#allocation12_spill] sm:$0xff] %v18170_v53  ;;  %v5151_v53 = vld [vmem:[#allocation2 + $0x688] sm:$0xff] }
 0x4e9   :  { %14375 = vmatprep.subr.mxu0 %v15412_v60  ;;  %13420 = vmatpush3.msra.mxu1 %v5154_v20  ;;  %v18178_v25 = vpop.f32.mrf.mxu0 }
 0x4ea   :  { %14376 = vmatpush3.msra.mxu0 %v15412_v60  ;;  %13336 = vmatmul.mubr.f32.gmra.mxu1 %v20053_v31  ;;  %v12889_v15 = vpop.f32.mrf.mxu1  ;;  %20056 = vst [vmem:[#allocation99_spill] sm:$0xff] %v18178_v25  ;;  %v20057_v31 = vld [vmem:[#allocation16_spill] sm:$0xff] }
 0x4eb   :  { %13421 = vmatprep.subr.mxu1 %v5153_v43  ;;  %14290 = vmatprep.mubr.f32.mxu0 %v9891_v28  ;;  %v18173_v12 = vadd.f32 %v12889_v15, %v18013_v7  ;;  %v9893_v28 = vld [vmem:[%s19786_s3 + $0xb00] sm:$0xff]  ;;  %v18185_v7 = vpop.f32.mrf.mxu0 }
 0x4ec   :  { %14377 = vmatprep.subr.mxu0 %v15418_v13  ;;  %13422 = vmatpush3.msra.mxu1 %v5153_v43  ;;  %v18176_v20 = vpop.f32.mrf.mxu1  ;;  %20058 = vst [vmem:[#allocation16_spill] sm:$0xff] %v18185_v7  ;;  %v20059_v43 = vld [vmem:[#allocation14_spill] sm:$0xff]  ;;  %v5150_v15 = vld [vmem:[#allocation2 + $0x680] sm:$0xff] }
 0x4ed   :  { %20055 = vst [vmem:[#allocation98_spill] sm:$0xff] %v18176_v20  ;;  %14291 = vmatmul.mubr.f32.gmra.mxu0 %v9892_v48  ;;  %13338 = vmatprep.mubr.f32.mxu1 %v20057_v31  ;;  %v9894_v48 = vld [vmem:[%s19786_s3 + $0xb08] sm:$0xff]  ;;  %v18193_v20 = vpop.f32.mrf.mxu0 }
 0x4ee   :  { %14378 = vmatpush3.msra.mxu0 %v15418_v13  ;;  %13423 = vmatprep.subr.mxu1 %v5152_v11  ;;  %20060 = vst [vmem:[#allocation14_spill] sm:$0xff] %v18193_v20 }
 0x4ef   :  { %14379 = vmatprep.subr.mxu0 %v15424_v10  ;;  %13424 = vmatpush3.msra.mxu1 %v5152_v11  ;;  %v18201_v7 = vpop.f32.mrf.mxu0 }
 0x4f0   :  { %14380 = vmatpush3.msra.mxu0 %v15424_v10  ;;  %13339 = vmatmul.mubr.f32.gmra.mxu1 %v20059_v43  ;;  %v12892_v31 = vpop.f32.mrf.mxu1  ;;  %v20062_v43 = vld [vmem:[#allocation17_spill] sm:$0xff] }
 0x4f1   :  { %13425 = vmatprep.subr.mxu1 %v5151_v53  ;;  %14381 = vmatprep.mubr.f32.mxu0 %v9893_v28  ;;  %v18196_v25 = vadd.f32 %v12892_v31, %v18032_v14  ;;  %v9895_v28 = vld [vmem:[%s19786_s3 + $0xb10] sm:$0xff]  ;;  %v18208_v14 = vpop.f32.mrf.mxu0 }
 0x4f2   :  { %14461 = vmatprep.subr.mxu0 %v15298_v56  ;;  %13426 = vmatpush3.msra.mxu1 %v5151_v53  ;;  %v18199_v11 = vpop.f32.mrf.mxu1  ;;  %20063 = vst [vmem:[#allocation17_spill] sm:$0xff] %v18208_v14  ;;  %v20064_v53 = vld [vmem:[#allocation81_spill] sm:$0xff] }
 0x4f3   :  { %20061 = vst [vmem:[#allocation100_spill] sm:$0xff] %v18199_v11  ;;  %14382 = vmatmul.mubr.f32.vlgmr.msra.gmra.mxu0 %v9894_v48  ;;  %13427 = vmatprep.subr.mxu1 %v5150_v15  ;;  %v9896_v48 = vld [vmem:[%s19786_s3 + $0xb18] sm:$0xff]  ;;  %v5504_v11 = vld [vmem:[#allocation2 + $0x770] sm:$0xff] }
 0x4f4   :  { %14462 = vmatpush3.msra.mxu0 %v15298_v56  ;;  %13429 = vmatprep.mubr.f32.mxu1 %v20062_v43  ;;  %v18216_v43 = vpop.f32.mrf.mxu0 }
 0x4f5   :  { %14463 = vmatprep.subr.mxu0 %v15303_v9  ;;  %13428 = vmatpush3.msra.mxu1 %v5150_v15 }
 0x4f6   :  { %14464 = vmatpush3.msra.mxu0 %v15303_v9  ;;  %13430 = vmatmul.mubr.f32.vlgmr.msra.gmra.mxu1 %v20064_v53  ;;  %v12983_v31 = vpop.f32.mrf.mxu1  ;;  %v18224_v14 = vpop.f32.mrf.mxu0  ;;  %v5503_v53 = vld [vmem:[#allocation2 + $0x768] sm:$0xff] }
 0x4f7   :  { %13509 = vmatprep.subr.mxu1 %v5505_v35  ;;  %14384 = vmatprep.mubr.f32.mxu0 %v9895_v28  ;;  %v18219_v20 = vadd.f32 %v12983_v31, %v18053_v55  ;;  %20066 = vst [vmem:[#allocation101_spill] sm:$0xff] %v18224_v14  ;;  %v9897_v28 = vld [vmem:[%s19786_s3 + $0xb20] sm:$0xff] }
 0x4f8   :  { %14465 = vmatprep.subr.mxu0 %v15315_v50  ;;  %13510 = vmatpush3.msra.mxu1 %v5505_v35  ;;  %v18222_v15 = vpop.f32.mrf.mxu1  ;;  %v18231_v55 = vpop.f32.mrf.mxu0  ;;  %v20068_v35 = vld [vmem:[#allocation18_spill] sm:$0xff] }
 0x4f9   :  { %20065 = vst [vmem:[#allocation81_spill] sm:$0xff] %v18222_v15  ;;  %14385 = vmatmul.mubr.f32.gmra.mxu0 %v9896_v48  ;;  %13432 = vmatprep.mubr.f32.mxu1 %v17557_v22  ;;  %20067 = vst [vmem:[#allocation102_spill] sm:$0xff] %v18231_v55  ;;  %v9898_v22 = vld [vmem:[%s19786_s3 + $0xb28] sm:$0xff]  ;;  %v5502_v15 = vld [vmem:[#allocation2 + $0x760] sm:$0xff] }
 0x4fa   :  { %14466 = vmatpush3.msra.mxu0 %v15315_v50  ;;  %13511 = vmatprep.subr.mxu1 %v5504_v11  ;;  %v18239_v31 = vpop.f32.mrf.mxu0 }
 0x4fb   :  { %14467 = vmatprep.subr.mxu0 %v15324_v24  ;;  %13512 = vmatpush3.msra.mxu1 %v5504_v11  ;;  %20069 = vst [vmem:[#allocation18_spill] sm:$0xff] %v18239_v31  ;;  %v5501_v31 = vld [vmem:[#allocation2 + $0x758] sm:$0xff] }
 0x4fc   :  { %14468 = vmatpush3.msra.mxu0 %v15324_v24  ;;  %13433 = vmatmul.mubr.f32.gmra.mxu1 %v20068_v35  ;;  %v12986_v48 = vpop.f32.mrf.mxu1  ;;  %v18247_v55 = vpop.f32.mrf.mxu0  ;;  %v20072_v35 = vld [vmem:[#allocation19_spill] sm:$0xff] }
 0x4fd   :  { %13513 = vmatprep.subr.mxu1 %v5503_v53  ;;  %14387 = vmatprep.mubr.f32.mxu0 %v9897_v28  ;;  %v18242_v14 = vadd.f32 %v12986_v48, %v18072_v47  ;;  %20071 = vst [vmem:[#allocation104_spill] sm:$0xff] %v18247_v55  ;;  %v9899_v28 = vld [vmem:[%s19786_s3 + $0xb30] sm:$0xff] }
 0x4fe   :  { %14469 = vmatprep.subr.mxu0 %v15333_v2  ;;  %13514 = vmatpush3.msra.mxu1 %v5503_v53  ;;  %v18245_v11 = vpop.f32.mrf.mxu1  ;;  %v18254_v47 = vpop.f32.mrf.mxu0  ;;  %v20074_v53 = vld [vmem:[#allocation45_spill] sm:$0xff] }
 0x4ff   :  { %20070 = vst [vmem:[#allocation103_spill] sm:$0xff] %v18245_v11  ;;  %14388 = vmatmul.mubr.f32.gmra.mxu0 %v9898_v22  ;;  %13435 = vmatprep.mubr.f32.mxu1 %v20072_v35  ;;  %20073 = vst [vmem:[#allocation19_spill] sm:$0xff] %v18254_v47  ;;  %v9900_v22 = vld [vmem:[%s19786_s3 + $0xb38] sm:$0xff]  ;;  %v5500_v11 = vld [vmem:[#allocation2 + $0x750] sm:$0xff] }
 0x500   :  { %14470 = vmatpush3.msra.mxu0 %v15333_v2  ;;  %13515 = vmatprep.subr.mxu1 %v5502_v15  ;;  %v18262_v35 = vpop.f32.mrf.mxu0 }
 0x501   :  { %14471 = vmatprep.subr.mxu0 %v15342_v33  ;;  %13516 = vmatpush3.msra.mxu1 %v5502_v15 }
 0x502   :  { %14472 = vmatpush3.msra.mxu0 %v15342_v33  ;;  %13436 = vmatmul.mubr.f32.gmra.mxu1 %v20074_v53  ;;  %v12989_v48 = vpop.f32.mrf.mxu1  ;;  %v18270_v47 = vpop.f32.mrf.mxu0  ;;  %v5499_v53 = vld [vmem:[#allocation2 + $0x748] sm:$0xff] }
 0x503   :  { %13517 = vmatprep.subr.mxu1 %v5501_v31  ;;  %14390 = vmatprep.mubr.f32.mxu0 %v9899_v28  ;;  %v18265_v55 = vadd.f32 %v12989_v48, %v18093_v26  ;;  %20076 = vst [vmem:[#allocation105_spill] sm:$0xff] %v18270_v47  ;;  %v9901_v28 = vld [vmem:[%s19786_s3 + $0xb40] sm:$0xff] }
 0x504   :  { %14473 = vmatprep.subr.mxu0 %v15352_v63  ;;  %13518 = vmatpush3.msra.mxu1 %v5501_v31  ;;  %v18268_v15 = vpop.f32.mrf.mxu1  ;;  %v18277_v26 = vpop.f32.mrf.mxu0  ;;  %v20078_v31 = vld [vmem:[#allocation83_spill] sm:$0xff] }
 0x505   :  { %20075 = vst [vmem:[#allocation45_spill] sm:$0xff] %v18268_v15  ;;  %14391 = vmatmul.mubr.f32.gmra.mxu0 %v9900_v22  ;;  %13438 = vmatprep.mubr.f32.mxu1 %v17610_v6  ;;  %20077 = vst [vmem:[#allocation106_spill] sm:$0xff] %v18277_v26  ;;  %v9902_v6 = vld [vmem:[%s19786_s3 + $0xb48] sm:$0xff]  ;;  %v5498_v15 = vld [vmem:[#allocation2 + $0x740] sm:$0xff] }
 0x506   :  { %14474 = vmatpush3.msra.mxu0 %v15352_v63  ;;  %13519 = vmatprep.subr.mxu1 %v5500_v11  ;;  %v18285_v48 = vpop.f32.mrf.mxu0 }
 0x507   :  { %14475 = vmatprep.subr.mxu0 %v15361_v21  ;;  %13520 = vmatpush3.msra.mxu1 %v5500_v11  ;;  %20079 = vst [vmem:[#allocation83_spill] sm:$0xff] %v18285_v48  ;;  %v5497_v48 = vld [vmem:[#allocation2 + $0x738] sm:$0xff] }
 0x508   :  { %14476 = vmatpush3.msra.mxu0 %v15361_v21  ;;  %13439 = vmatmul.mubr.f32.gmra.mxu1 %v20078_v31  ;;  %v12992_v22 = vpop.f32.mrf.mxu1  ;;  %v18293_v26 = vpop.f32.mrf.mxu0  ;;  %v20082_v31 = vld [vmem:[#allocation51_spill] sm:$0xff] }
 0x509   :  { %13521 = vmatprep.subr.mxu1 %v5499_v53  ;;  %14393 = vmatprep.mubr.f32.mxu0 %v9901_v28  ;;  %v18288_v47 = vadd.f32 %v12992_v22, %v18112_v42  ;;  %20081 = vst [vmem:[#allocation108_spill] sm:$0xff] %v18293_v26  ;;  %v9903_v28 = vld [vmem:[%s19786_s3 + $0xb50] sm:$0xff] }
 0x50a   :  { %14477 = vmatprep.subr.mxu0 %v15371_v61  ;;  %13522 = vmatpush3.msra.mxu1 %v5499_v53  ;;  %v18291_v11 = vpop.f32.mrf.mxu1  ;;  %v18300_v42 = vpop.f32.mrf.mxu0  ;;  %v20084_v53 = vld [vmem:[#allocation49_spill] sm:$0xff] }
 0x50b   :  { %20080 = vst [vmem:[#allocation107_spill] sm:$0xff] %v18291_v11  ;;  %14394 = vmatmul.mubr.f32.gmra.mxu0 %v9902_v6  ;;  %13441 = vmatprep.mubr.f32.mxu1 %v20082_v31  ;;  %20083 = vst [vmem:[#allocation51_spill] sm:$0xff] %v18300_v42  ;;  %v9904_v6 = vld [vmem:[%s19786_s3 + $0xb58] sm:$0xff]  ;;  %v5496_v11 = vld [vmem:[#allocation2 + $0x730] sm:$0xff] }
 0x50c   :  { %14478 = vmatpush3.msra.mxu0 %v15371_v61  ;;  %13523 = vmatprep.subr.mxu1 %v5498_v15  ;;  %v18308_v31 = vpop.f32.mrf.mxu0 }
 0x50d   :  { %14479 = vmatprep.subr.mxu0 %v15380_v19  ;;  %13524 = vmatpush3.msra.mxu1 %v5498_v15 }
 0x50e   :  { %14480 = vmatpush3.msra.mxu0 %v15380_v19  ;;  %13442 = vmatmul.mubr.f32.gmra.mxu1 %v20084_v53  ;;  %v12995_v22 = vpop.f32.mrf.mxu1  ;;  %v18316_v42 = vpop.f32.mrf.mxu0  ;;  %v5495_v53 = vld [vmem:[#allocation2 + $0x728] sm:$0xff] }
 0x50f   :  { %13525 = vmatprep.subr.mxu1 %v5497_v48  ;;  %14396 = vmatprep.mubr.f32.mxu0 %v9903_v28  ;;  %v18311_v26 = vadd.f32 %v12995_v22, %v18133_v1  ;;  %20086 = vst [vmem:[#allocation109_spill] sm:$0xff] %v18316_v42  ;;  %v9905_v28 = vld [vmem:[%s19786_s3 + $0xb60] sm:$0xff] }
 0x510   :  { %14481 = vmatprep.subr.mxu0 %v15390_v59  ;;  %13526 = vmatpush3.msra.mxu1 %v5497_v48  ;;  %v18314_v15 = vpop.f32.mrf.mxu1  ;;  %v18323_v1 = vpop.f32.mrf.mxu0  ;;  %v20088_v48 = vld [vmem:[#allocation21_spill] sm:$0xff] }
 0x511   :  { %20085 = vst [vmem:[#allocation49_spill] sm:$0xff] %v18314_v15  ;;  %14397 = vmatmul.mubr.f32.gmra.mxu0 %v9904_v6  ;;  %13444 = vmatprep.mubr.f32.mxu1 %v17663_v45  ;;  %20087 = vst [vmem:[#allocation110_spill] sm:$0xff] %v18323_v1  ;;  %v9906_v45 = vld [vmem:[%s19786_s3 + $0xb68] sm:$0xff]  ;;  %v5494_v15 = vld [vmem:[#allocation2 + $0x720] sm:$0xff] }
 0x512   :  { %14482 = vmatpush3.msra.mxu0 %v15390_v59  ;;  %13527 = vmatprep.subr.mxu1 %v5496_v11  ;;  %v18331_v22 = vpop.f32.mrf.mxu0 }
 0x513   :  { %14483 = vmatprep.subr.mxu0 %v15397_v38  ;;  %13528 = vmatpush3.msra.mxu1 %v5496_v11  ;;  %20089 = vst [vmem:[#allocation21_spill] sm:$0xff] %v18331_v22 }
 0x514   :  { %14484 = vmatpush3.msra.mxu0 %v15397_v38  ;;  %13445 = vmatmul.mubr.f32.gmra.mxu1 %v20088_v48  ;;  %v12998_v6 = vpop.f32.mrf.mxu1  ;;  %v18339_v1 = vpop.f32.mrf.mxu0  ;;  %v5493_v48 = vld [vmem:[#allocation2 + $0x718] sm:$0xff] }
 0x515   :  { %13529 = vmatprep.subr.mxu1 %v5495_v53  ;;  %14399 = vmatprep.mubr.f32.mxu0 %v9905_v28  ;;  %v18334_v42 = vadd.f32 %v12998_v6, %v18152_v40  ;;  %v9907_v28 = vld [vmem:[%s19786_s3 + $0xb70] sm:$0xff] }
 0x516   :  { %14485 = vmatprep.subr.mxu0 %v15405_v34  ;;  %13530 = vmatpush3.msra.mxu1 %v5495_v53  ;;  %v18337_v11 = vpop.f32.mrf.mxu1  ;;  %v18346_v40 = vpop.f32.mrf.mxu0  ;;  %v20092_v53 = vld [vmem:[#allocation22_spill] sm:$0xff] }
 0x517   :  { %20090 = vst [vmem:[#allocation111_spill] sm:$0xff] %v18337_v11  ;;  %14400 = vmatmul.mubr.f32.gmra.mxu0 %v9906_v45  ;;  %13447 = vmatprep.mubr.f32.mxu1 %v17690_v39  ;;  %20091 = vst [vmem:[#allocation112_spill] sm:$0xff] %v18346_v40  ;;  %v9908_v39 = vld [vmem:[%s19786_s3 + $0xb78] sm:$0xff]  ;;  %v5492_v11 = vld [vmem:[#allocation2 + $0x710] sm:$0xff] }
 0x518   :  { %14486 = vmatpush3.msra.mxu0 %v15405_v34  ;;  %13531 = vmatprep.subr.mxu1 %v5494_v15  ;;  %v18354_v6 = vpop.f32.mrf.mxu0 }
 0x519   :  { %14487 = vmatprep.subr.mxu0 %v15412_v60  ;;  %13532 = vmatpush3.msra.mxu1 %v5494_v15 }
 0x51a   :  { %14488 = vmatpush3.msra.mxu0 %v15412_v60  ;;  %13448 = vmatmul.mubr.f32.gmra.mxu1 %v20092_v53  ;;  %v13001_v45 = vpop.f32.mrf.mxu1  ;;  %v18362_v40 = vpop.f32.mrf.mxu0  ;;  %v5491_v53 = vld [vmem:[#allocation2 + $0x708] sm:$0xff] }
 0x51b   :  { %13533 = vmatprep.subr.mxu1 %v5493_v48  ;;  %14402 = vmatprep.mubr.f32.mxu0 %v9907_v28  ;;  %v18357_v22 = vadd.f32 %v13001_v45, %v18173_v12  ;;  %20094 = vst [vmem:[#allocation113_spill] sm:$0xff] %v18362_v40  ;;  %v9909_v28 = vld [vmem:[%s19786_s3 + $0xb80] sm:$0xff] }
 0x51c   :  { %14489 = vmatprep.subr.mxu0 %v15418_v13  ;;  %13534 = vmatpush3.msra.mxu1 %v5493_v48  ;;  %v18360_v15 = vpop.f32.mrf.mxu1  ;;  %v18369_v12 = vpop.f32.mrf.mxu0  ;;  %v5490_v48 = vld [vmem:[#allocation2 + $0x700] sm:$0xff] }
 0x51d   :  { %20093 = vst [vmem:[#allocation22_spill] sm:$0xff] %v18360_v15  ;;  %14403 = vmatmul.mubr.f32.gmra.mxu0 %v9908_v39  ;;  %13450 = vmatprep.mubr.f32.mxu1 %v17715_v27  ;;  %v9910_v27 = vld [vmem:[%s19786_s3 + $0xb88] sm:$0xff] }
 0x51e   :  { %14490 = vmatpush3.msra.mxu0 %v15418_v13  ;;  %13535 = vmatprep.subr.mxu1 %v5492_v11  ;;  %v18377_v45 = vpop.f32.mrf.mxu0 }
 0x51f   :  { %14491 = vmatprep.subr.mxu0 %v15424_v10  ;;  %13536 = vmatpush3.msra.mxu1 %v5492_v11  ;;  %20095 = vst [vmem:[#allocation114_spill] sm:$0xff] %v18377_v45 }
 0x520   :  { %14492 = vmatpush3.msra.mxu0 %v15424_v10  ;;  %13451 = vmatmul.mubr.f32.gmra.mxu1 %v17703_v58  ;;  %v13004_v39 = vpop.f32.mrf.mxu1  ;;  %v18385_v40 = vpop.f32.mrf.mxu0  ;;  %v5845_v58 = vld [vmem:[#allocation2 + $0x7f8] sm:$0xff] }
 0x521   :  { %13537 = vmatprep.subr.mxu1 %v5491_v53  ;;  %14493 = vmatprep.mubr.f32.mxu0 %v9909_v28  ;;  %v18380_v15 = vadd.f32 %v13004_v39, %v18196_v25  ;;  %v20096_v25 = vld [vmem:[#allocation60_spill] sm:$0xff] }
 0x522   :  { %14573 = vmatprep.subr.mxu0 %v15298_v56  ;;  %13538 = vmatpush3.msra.mxu1 %v5491_v53  ;;  %v18383_v11 = vpop.f32.mrf.mxu1  ;;  %v18389_v45 = vpop.f32.mrf.mxu0  ;;  %v5844_v53 = vld [vmem:[#allocation2 + $0x7f0] sm:$0xff] }
 0x523   :  { %14494 = vmatmul.mubr.f32.vlgmr.msra.gmra.mxu0 %v9910_v27  ;;  %13539 = vmatprep.subr.mxu1 %v5490_v48 }
 0x524   :  { %14574 = vmatpush3.msra.mxu0 %v15298_v56  ;;  %13541 = vmatprep.mubr.f32.mxu1 %v17743_v3  ;;  %v18394_v39 = vpop.f32.mrf.mxu0 }
 0x525   :  { %14575 = vmatprep.subr.mxu0 %v15303_v9  ;;  %13540 = vmatpush3.msra.mxu1 %v5490_v48 }
 0x526   :  { %14576 = vmatpush3.msra.mxu0 %v15303_v9  ;;  %13542 = vmatmul.mubr.f32.vlgmr.msra.gmra.mxu1 %v20096_v25  ;;  %v13095_v28 = vpop.f32.mrf.mxu1  ;;  %v18403_v27 = vpop.f32.mrf.mxu0  ;;  %v5843_v9 = vld [vmem:[#allocation2 + $0x7e8] sm:$0xff]  ;;  %v5841_v25 = vld [vmem:[#allocation2 + $0x7d8] sm:$0xff] }
 0x527   :  { %13621 = vmatprep.subr.mxu1 %v5845_v58  ;;  %14577 = vmatprep.subr.mxu0 %v15315_v50  ;;  %v18398_v56 = vadd.f32 %v13095_v28, %v18219_v20  ;;  %v5842_v20 = vld [vmem:[#allocation2 + $0x7e0] sm:$0xff]  ;;  %v5839_v28 = vld [vmem:[#allocation2 + $0x7c8] sm:$0xff] }
 0x528   :  { %13622 = vmatpush3.msra.mxu1 %v5845_v58  ;;  %14578 = vmatpush3.msra.mxu0 %v15315_v50  ;;  %v18401_v3 = vpop.f32.mrf.mxu1  ;;  %v18407_v48 = vpop.f32.mrf.mxu0 }
 0x529   :  { %20097 = vst [vmem:[#allocation60_spill] sm:$0xff] %v18401_v3  ;;  %13544 = vmatprep.mubr.f32.mxu1 %v17770_v62  ;;  %13623 = vmatprep.subr.mxu1 %v5844_v53 }
 0x52a   :  { %14579 = vmatprep.subr.mxu0 %v15324_v24  ;;  %13624 = vmatpush3.msra.mxu1 %v5844_v53  ;;  %v18412_v58 = vpop.f32.mrf.mxu0  ;;  %v5840_v53 = vld [vmem:[#allocation2 + $0x7d0] sm:$0xff] }
 0x52b   :  { %14580 = vmatpush3.msra.mxu0 %v15324_v24  ;;  %13545 = vmatmul.mubr.f32.gmra.mxu1 %v17755_v16 }
 0x52c   :  { %13625 = vmatprep.subr.mxu1 %v5843_v9  ;;  %14581 = vmatprep.subr.mxu0 %v15333_v2  ;;  %v13098_v50 = vpop.f32.mrf.mxu1  ;;  %v18421_v16 = vpop.f32.mrf.mxu0 }
 0x52d   :  { %13626 = vmatpush3.msra.mxu1 %v5843_v9  ;;  %14582 = vmatpush3.msra.mxu0 %v15333_v2  ;;  %v18416_v62 = vadd.f32 %v13098_v50, %v18242_v14 }
 0x52e   :  { %13547 = vmatprep.mubr.f32.mxu1 %v17795_v18  ;;  %13627 = vmatprep.subr.mxu1 %v5842_v20  ;;  %v18419_v24 = vpop.f32.mrf.mxu1  ;;  %v18426_v2 = vpop.f32.mrf.mxu0 }
 0x52f   :  { %20098 = vst [vmem:[#allocation115_spill] sm:$0xff] %v18419_v24  ;;  %14583 = vmatprep.subr.mxu0 %v15342_v33  ;;  %13628 = vmatpush3.msra.mxu1 %v5842_v20  ;;  %v5838_v20 = vld [vmem:[#allocation2 + $0x7c0] sm:$0xff]  ;;  %v9920_v24 = vld [vmem:[%s19786_s3 + $0xbd8] sm:$0xff] }
 0x530   :  { %14584 = vmatpush3.msra.mxu0 %v15342_v33  ;;  %13548 = vmatmul.mubr.f32.gmra.mxu1 %v17783_v5  ;;  %v18430_v14 = vpop.f32.mrf.mxu0 }
 0x531   :  { %13629 = vmatprep.subr.mxu1 %v5841_v25  ;;  %14585 = vmatprep.subr.mxu0 %v15352_v63 }
 0x532   :  { %13630 = vmatpush3.msra.mxu1 %v5841_v25  ;;  %14586 = vmatpush3.msra.mxu0 %v15352_v63  ;;  %v13101_v18 = vpop.f32.mrf.mxu1  ;;  %v18439_v9 = vpop.f32.mrf.mxu0  ;;  %v20100_v63 = vld [vmem:[#allocation64_spill] sm:$0xff] }
 0x533   :  { %13550 = vmatprep.mubr.f32.mxu1 %v17823_v49  ;;  %13631 = vmatprep.subr.mxu1 %v5840_v53  ;;  %v18434_v33 = vadd.f32 %v13101_v18, %v18265_v55  ;;  %v5837_v55 = vld [vmem:[#allocation2 + $0x7b8] sm:$0xff] }
 0x534   :  { %14587 = vmatprep.subr.mxu0 %v15361_v21  ;;  %13632 = vmatpush3.msra.mxu1 %v5840_v53  ;;  %v18437_v5 = vpop.f32.mrf.mxu1  ;;  %v18444_v49 = vpop.f32.mrf.mxu0  ;;  %v5836_v53 = vld [vmem:[#allocation2 + $0x7b0] sm:$0xff] }
 0x535   :  { %20099 = vst [vmem:[#allocation116_spill] sm:$0xff] %v18437_v5  ;;  %14588 = vmatpush3.msra.mxu0 %v15361_v21  ;;  %13551 = vmatmul.mubr.f32.gmra.mxu1 %v20100_v63  ;;  %v6178_v5 = vld [vmem:[#allocation2 + $0x840] sm:$0xff] }
 0x536   :  { %13633 = vmatprep.subr.mxu1 %v5839_v28  ;;  %14589 = vmatprep.subr.mxu0 %v15371_v61  ;;  %v18448_v25 = vpop.f32.mrf.mxu0 }
 0x537   :  { %13634 = vmatpush3.msra.mxu1 %v5839_v28  ;;  %14590 = vmatpush3.msra.mxu0 %v15371_v61  ;;  %v5834_v28 = vld [vmem:[#allocation2 + $0x7a0] sm:$0xff] }
 0x538   :  { %13553 = vmatprep.mubr.f32.mxu1 %v17850_v46  ;;  %13635 = vmatprep.subr.mxu1 %v5838_v20  ;;  %v13104_v50 = vpop.f32.mrf.mxu1  ;;  %v18458_v61 = vpop.f32.mrf.mxu0 }
 0x539   :  { %14591 = vmatprep.subr.mxu0 %v15380_v19  ;;  %13636 = vmatpush3.msra.mxu1 %v5838_v20  ;;  %v18452_v21 = vadd.f32 %v13104_v50, %v18288_v47  ;;  %v5835_v47 = vld [vmem:[#allocation2 + $0x7a8] sm:$0xff] }
 0x53a   :  { %14592 = vmatpush3.msra.mxu0 %v15380_v19  ;;  %13554 = vmatmul.mubr.f32.gmra.mxu1 %v17835_v51  ;;  %v18456_v18 = vpop.f32.mrf.mxu1  ;;  %v18462_v46 = vpop.f32.mrf.mxu0 }
 0x53b   :  { %13637 = vmatprep.subr.mxu1 %v5837_v55  ;;  %14593 = vmatprep.subr.mxu0 %v15390_v59 }
 0x53c   :  { %13638 = vmatpush3.msra.mxu1 %v5837_v55  ;;  %14594 = vmatpush3.msra.mxu0 %v15390_v59  ;;  %v18466_v51 = vpop.f32.mrf.mxu0 }
 0x53d   :  { %13556 = vmatprep.mubr.f32.mxu1 %v17875_v54  ;;  %13639 = vmatprep.subr.mxu1 %v5836_v53 }
 0x53e   :  { %14595 = vmatprep.subr.mxu0 %v15397_v38  ;;  %13640 = vmatpush3.msra.mxu1 %v5836_v53  ;;  %v13107_v19 = vpop.f32.mrf.mxu1  ;;  %v18476_v54 = vpop.f32.mrf.mxu0 }
 0x53f   :  { %14596 = vmatpush3.msra.mxu0 %v15397_v38  ;;  %13557 = vmatmul.mubr.f32.gmra.mxu1 %v17863_v52  ;;  %v18471_v63 = vadd.f32 %v13107_v19, %v18311_v26  ;;  %v5833_v38 = vld [vmem:[#allocation2 + $0x798] sm:$0xff]  ;;  %v5832_v52 = vld [vmem:[#allocation2 + $0x790] sm:$0xff] }
 0x540   :  { %13641 = vmatprep.subr.mxu1 %v5835_v47  ;;  %14597 = vmatprep.subr.mxu0 %v15405_v34  ;;  %v18474_v59 = vpop.f32.mrf.mxu1  ;;  %v18480_v20 = vpop.f32.mrf.mxu0 }
 0x541   :  { %13642 = vmatpush3.msra.mxu1 %v5835_v47  ;;  %14598 = vmatpush3.msra.mxu0 %v15405_v34  ;;  %v9913_v47 = vld [vmem:[%s19786_s3 + $0xba0] sm:$0xff] }
 0x542   :  { %13559 = vmatprep.mubr.f32.mxu1 %v17903_v37  ;;  %13643 = vmatprep.subr.mxu1 %v5834_v28  ;;  %v18485_v55 = vpop.f32.mrf.mxu0 }
 0x543   :  { %14599 = vmatprep.subr.mxu0 %v15412_v60  ;;  %13644 = vmatpush3.msra.mxu1 %v5834_v28  ;;  %v6185_v28 = vld [vmem:[#allocation2 + $0x878] sm:$0xff] }
 0x544   :  { %14600 = vmatpush3.msra.mxu0 %v15412_v60  ;;  %13560 = vmatmul.mubr.f32.gmra.mxu1 %v17890_v36  ;;  %v13110_v26 = vpop.f32.mrf.mxu1  ;;  %v18494_v50 = vpop.f32.mrf.mxu0  ;;  %v5831_v60 = vld [vmem:[#allocation2 + $0x788] sm:$0xff]  ;;  %v9911_v36 = vld [vmem:[%s19786_s3 + $0xb90] sm:$0xff] }
 0x545   :  { %13645 = vmatprep.subr.mxu1 %v5833_v38  ;;  %14601 = vmatprep.subr.mxu0 %v15418_v13  ;;  %v18489_v34 = vadd.f32 %v13110_v26, %v18334_v42 }
 0x546   :  { %13646 = vmatpush3.msra.mxu1 %v5833_v38  ;;  %14602 = vmatpush3.msra.mxu0 %v15418_v13  ;;  %v18492_v37 = vpop.f32.mrf.mxu1  ;;  %v18501_v42 = vpop.f32.mrf.mxu0  ;;  %v5830_v13 = vld [vmem:[#allocation2 + $0x780] sm:$0xff] }
 0x547   :  { %13562 = vmatprep.mubr.f32.mxu1 %v17930_v41  ;;  %13647 = vmatprep.subr.mxu1 %v5832_v52  ;;  %v9912_v41 = vld [vmem:[%s19786_s3 + $0xb98] sm:$0xff] }
 0x548   :  { %14603 = vmatprep.subr.mxu0 %v15424_v10  ;;  %13648 = vmatpush3.msra.mxu1 %v5832_v52  ;;  %v18512_v19 = vpop.f32.mrf.mxu0  ;;  %v9914_v52 = vld [vmem:[%s19786_s3 + $0xba8] sm:$0xff] }
 0x549   :  { %14604 = vmatpush3.msra.mxu0 %v15424_v10  ;;  %13563 = vmatmul.mubr.f32.gmra.mxu1 %v17915_v4 }
 0x54a   :  { %13649 = vmatprep.subr.mxu1 %v5831_v60  ;;  %13653 = vmatprep.mubr.f32.mxu1 %v17955_v0  ;;  %v13113_v53 = vpop.f32.mrf.mxu1  ;;  %v18519_v38 = vpop.f32.mrf.mxu0  ;;  %v6184_v0 = vld [vmem:[#allocation2 + $0x870] sm:$0xff] }
 0x54b   :  { %13650 = vmatpush3.msra.mxu1 %v5831_v60  ;;  %v18515_v10 = vadd.f32 %v13113_v53, %v18357_v22  ;;  %14496 = vmatprep.mubr.f32.mxu0 %v9911_v36  ;;  %v9915_v22 = vld [vmem:[%s19786_s3 + $0xbb0] sm:$0xff]  ;;  %v6183_v60 = vld [vmem:[#allocation2 + $0x868] sm:$0xff]  ;;  %v9916_v53 = vld [vmem:[%s19786_s3 + $0xbb8] sm:$0xff] }
 0x54c   :  { %13651 = vmatprep.subr.mxu1 %v5830_v13  ;;  %v18517_v4 = vpop.f32.mrf.mxu1  ;;  %14497 = vmatmul.mubr.f32.gmra.mxu0 %v9912_v41  ;;  %v18528_v26 = vpop.f32.mrf.mxu0  ;;  %v6182_v41 = vld [vmem:[#allocation2 + $0x860] sm:$0xff] }
 0x54d   :  { %13652 = vmatpush3.msra.mxu1 %v5830_v13  ;;  %14499 = vmatprep.mubr.f32.mxu0 %v9913_v47  ;;  %v20101_v47 = vld [vmem:[#allocation72_spill] sm:$0xff] }
 0x54e   :  { %13654 = vmatmul.mubr.f32.vlgmr.msra.gmra.mxu1 %v17943_v23  ;;  %13733 = vmatprep.subr.mxu1 %v6185_v28  ;;  %v18531_v13 = vpop.f32.mrf.mxu0 }
 0x54f   :  { %13734 = vmatpush3.msra.mxu1 %v6185_v28  ;;  %13656 = vmatprep.mubr.f32.mxu1 %v17983_v29  ;;  %v9917_v28 = vld [vmem:[%s19786_s3 + $0xbc0] sm:$0xff] }
 0x550   :  { %13735 = vmatprep.subr.mxu1 %v6184_v0  ;;  %v13116_v36 = vpop.f32.mrf.mxu1  ;;  %14500 = vmatmul.mubr.f32.gmra.mxu0 %v9914_v52  ;;  %v18545_v52 = vpop.f32.mrf.mxu0 }
 0x551   :  { %13736 = vmatpush3.msra.mxu1 %v6184_v0  ;;  %v18534_v23 = vadd.f32 %v13116_v36, %v18380_v15  ;;  %14502 = vmatprep.mubr.f32.mxu0 %v9915_v22  ;;  %v6181_v15 = vld [vmem:[#allocation2 + $0x858] sm:$0xff]  ;;  %v6180_v22 = vld [vmem:[#allocation2 + $0x850] sm:$0xff]  ;;  %v9918_v36 = vld [vmem:[%s19786_s3 + $0xbc8] sm:$0xff] }
 0x552   :  { %13657 = vmatmul.mubr.f32.gmra.mxu1 %v20101_v47  ;;  %13737 = vmatprep.subr.mxu1 %v6183_v60  ;;  %v18540_v29 = vpop.f32.mrf.mxu1  ;;  %v18548_v0 = vpop.f32.mrf.mxu0 }
 0x553   :  { %13738 = vmatpush3.msra.mxu1 %v6183_v60  ;;  %13659 = vmatprep.mubr.f32.mxu1 %v18010_v8  ;;  %v9919_v8 = vld [vmem:[%s19786_s3 + $0xbd0] sm:$0xff] }
 0x554   :  { %13739 = vmatprep.subr.mxu1 %v6182_v41  ;;  %14503 = vmatmul.mubr.f32.gmra.mxu0 %v9916_v53  ;;  %v18557_v60 = vpop.f32.mrf.mxu0 }
 0x555   :  { %13740 = vmatpush3.msra.mxu1 %v6182_v41  ;;  %14505 = vmatprep.mubr.f32.mxu0 %v9917_v28  ;;  %v6179_v41 = vld [vmem:[#allocation2 + $0x848] sm:$0xff] }
 0x556   :  { %13660 = vmatmul.mubr.f32.gmra.mxu1 %v17995_v17  ;;  %13741 = vmatprep.subr.mxu1 %v6181_v15  ;;  %v13207_v47 = vpop.f32.mrf.mxu1  ;;  %v18565_v17 = vpop.f32.mrf.mxu0 }
 0x557   :  { %13742 = vmatpush3.msra.mxu1 %v6181_v15  ;;  %13662 = vmatprep.mubr.f32.mxu1 %v18035_v32  ;;  %v18561_v53 = vadd.f32 %v13207_v47, %v18398_v56  ;;  %v9921_v32 = vld [vmem:[%s19786_s3 + $0xbe0] sm:$0xff]  ;;  %v6177_v15 = vld [vmem:[#allocation2 + $0x838] sm:$0xff]  ;;  %v6176_v47 = vld [vmem:[#allocation2 + $0x830] sm:$0xff] }
 0x558   :  { %13743 = vmatprep.subr.mxu1 %v6180_v22  ;;  %v18563_v28 = vpop.f32.mrf.mxu1  ;;  %14506 = vmatmul.mubr.f32.gmra.mxu0 %v9918_v36  ;;  %v18574_v56 = vpop.f32.mrf.mxu0 }
 0x559   :  { %20102 = vst [vmem:[#allocation64_spill] sm:$0xff] %v18563_v28  ;;  %13744 = vmatpush3.msra.mxu1 %v6180_v22  ;;  %14508 = vmatprep.mubr.f32.mxu0 %v9919_v8  ;;  %v9922_v8 = vld [vmem:[%s19786_s3 + $0xbe8] sm:$0xff] }
 0x55a   :  { %13663 = vmatmul.mubr.f32.gmra.mxu1 %v18023_v30  ;;  %13745 = vmatprep.subr.mxu1 %v6179_v41  ;;  %v18577_v36 = vpop.f32.mrf.mxu0  ;;  %v20104_v28 = vld [vmem:[#allocation94_spill] sm:$0xff] }
 0x55b   :  { %13746 = vmatpush3.msra.mxu1 %v6179_v41  ;;  %13665 = vmatprep.mubr.f32.mxu1 %v18063_v57  ;;  %20103 = vst [vmem:[#allocation72_spill] sm:$0xff] %v18577_v36  ;;  %v6172_v36 = vld [vmem:[#allocation2 + $0x810] sm:$0xff] }
 0x55c   :  { %13747 = vmatprep.subr.mxu1 %v6178_v5  ;;  %v13210_v22 = vpop.f32.mrf.mxu1  ;;  %14509 = vmatmul.mubr.f32.gmra.mxu0 %v9920_v24  ;;  %v9923_v24 = vld [vmem:[%s19786_s3 + $0xbf0] sm:$0xff]  ;;  %v18591_v41 = vpop.f32.mrf.mxu0 }
 0x55d   :  { %13748 = vmatpush3.msra.mxu1 %v6178_v5  ;;  %v18580_v30 = vadd.f32 %v13210_v22, %v18416_v62  ;;  %14511 = vmatprep.mubr.f32.mxu0 %v9921_v32  ;;  %20106 = vst [vmem:[#allocation117_spill] sm:$0xff] %v18591_v41  ;;  %v6175_v62 = vld [vmem:[#allocation2 + $0x828] sm:$0xff]  ;;  %v6174_v32 = vld [vmem:[#allocation2 + $0x820] sm:$0xff]  ;;  %v9940_v41 = vld [vmem:[%s19786_s3 + $0xc78] sm:$0xff] }
 0x55e   :  { %13666 = vmatmul.mubr.f32.gmra.mxu1 %v20104_v28  ;;  %13749 = vmatprep.subr.mxu1 %v6177_v15  ;;  %v18586_v57 = vpop.f32.mrf.mxu1  ;;  %v18594_v5 = vpop.f32.mrf.mxu0  ;;  %v9924_v28 = vld [vmem:[%s19786_s3 + $0xbf8] sm:$0xff]  ;;  %v20108_v22 = vld [vmem:[#allocation38_spill] sm:$0xff] }
 0x55f   :  { %20105 = vst [vmem:[#allocation94_spill] sm:$0xff] %v18586_v57  ;;  %13750 = vmatpush3.msra.mxu1 %v6177_v15  ;;  %13668 = vmatprep.mubr.f32.mxu1 %v18090_v44  ;;  %20107 = vst [vmem:[#allocation118_spill] sm:$0xff] %v18594_v5  ;;  %v9925_v44 = vld [vmem:[%s19786_s3 + $0xc00] sm:$0xff] }
 0x560   :  { %13751 = vmatprep.subr.mxu1 %v6176_v47  ;;  %14512 = vmatmul.mubr.f32.gmra.mxu0 %v9922_v8  ;;  %v18603_v15 = vpop.f32.mrf.mxu0  ;;  %v20110_v8 = vld [vmem:[#allocation6_spill] sm:$0xff] }
 0x561   :  { %13752 = vmatpush3.msra.mxu1 %v6176_v47  ;;  %14514 = vmatprep.mubr.f32.mxu0 %v9923_v24  ;;  %20109 = vst [vmem:[#allocation38_spill] sm:$0xff] %v18603_v15  ;;  %v6173_v47 = vld [vmem:[#allocation2 + $0x818] sm:$0xff]  ;;  %v9926_v15 = vld [vmem:[%s19786_s3 + $0xc08] sm:$0xff] }
 0x562   :  { %13669 = vmatmul.mubr.f32.gmra.mxu1 %v20108_v22  ;;  %13753 = vmatprep.subr.mxu1 %v6175_v62  ;;  %v13213_v57 = vpop.f32.mrf.mxu1  ;;  %v18611_v22 = vpop.f32.mrf.mxu0 }
 0x563   :  { %13754 = vmatpush3.msra.mxu1 %v6175_v62  ;;  %13671 = vmatprep.mubr.f32.mxu1 %v20110_v8  ;;  %v18607_v24 = vadd.f32 %v13213_v57, %v18434_v33  ;;  %20112 = vst [vmem:[#allocation119_spill] sm:$0xff] %v18611_v22  ;;  %v20113_v62 = vld [vmem:[#allocation77_spill] sm:$0xff]  ;;  %v9927_v33 = vld [vmem:[%s19786_s3 + $0xc10] sm:$0xff]  ;;  %v6171_v8 = vld [vmem:[#allocation2 + $0x808] sm:$0xff] }
 0x564   :  { %13755 = vmatprep.subr.mxu1 %v6174_v32  ;;  %v18609_v5 = vpop.f32.mrf.mxu1  ;;  %14515 = vmatmul.mubr.f32.gmra.mxu0 %v9924_v28  ;;  %v18620_v57 = vpop.f32.mrf.mxu0  ;;  %v20115_v28 = vld [vmem:[#allocation10_spill] sm:$0xff]  ;;  %v9928_v22 = vld [vmem:[%s19786_s3 + $0xc18] sm:$0xff] }
 0x565   :  { %20111 = vst [vmem:[#allocation6_spill] sm:$0xff] %v18609_v5  ;;  %13756 = vmatpush3.msra.mxu1 %v6174_v32  ;;  %14605 = vmatprep.mubr.f32.mxu0 %v9925_v44  ;;  %20114 = vst [vmem:[#allocation77_spill] sm:$0xff] %v18620_v57  ;;  %v6170_v5 = vld [vmem:[#allocation2 + $0x800] sm:$0xff]  ;;  %v20117_v57 = vld [vmem:[#allocation78_spill] sm:$0xff] }
 0x566   :  { %13672 = vmatmul.mubr.f32.gmra.mxu1 %v20113_v62  ;;  %13757 = vmatprep.subr.mxu1 %v6173_v47  ;;  %v18623_v44 = vpop.f32.mrf.mxu0 }
 0x567   :  { %13758 = vmatpush3.msra.mxu1 %v6173_v47  ;;  %13674 = vmatprep.mubr.f32.mxu1 %v20115_v28  ;;  %20116 = vst [vmem:[#allocation10_spill] sm:$0xff] %v18623_v44  ;;  %v20121_v44 = vld [vmem:[#allocation79_spill] sm:$0xff] }
 0x568   :  { %13759 = vmatprep.subr.mxu1 %v6172_v36  ;;  %v13216_v32 = vpop.f32.mrf.mxu1  ;;  %14606 = vmatmul.mubr.f32.vlgmr.msra.gmra.mxu0 %v9926_v15  ;;  %v9929_v15 = vld [vmem:[%s19786_s3 + $0xc20] sm:$0xff]  ;;  %v18637_v28 = vpop.f32.mrf.mxu0 }
 0x569   :  { %13760 = vmatpush3.msra.mxu1 %v6172_v36  ;;  %v18626_v62 = vadd.f32 %v13216_v32, %v18452_v21  ;;  %14608 = vmatprep.mubr.f32.mxu0 %v9927_v33  ;;  %20118 = vst [vmem:[#allocation78_spill] sm:$0xff] %v18637_v28  ;;  %v20119_v36 = vld [vmem:[#allocation12_spill] sm:$0xff]  ;;  %v6524_v32 = vld [vmem:[#allocation2 + $0x8f0] sm:$0xff]  ;;  %v6522_v28 = vld [vmem:[#allocation2 + $0x8e0] sm:$0xff] }
 0x56a   :  { %13675 = vmatmul.mubr.f32.gmra.mxu1 %v20117_v57  ;;  %13761 = vmatprep.subr.mxu1 %v6171_v8  ;;  %v18632_v47 = vpop.f32.mrf.mxu1  ;;  %v6525_v21 = vld [vmem:[#allocation2 + $0x8f8] sm:$0xff]  ;;  %v18640_v33 = vpop.f32.mrf.mxu0  ;;  %v9930_v57 = vld [vmem:[%s19786_s3 + $0xc28] sm:$0xff] }
 0x56b   :  { %13762 = vmatpush3.msra.mxu1 %v6171_v8  ;;  %13765 = vmatprep.mubr.f32.mxu1 %v20119_v36  ;;  %20120 = vst [vmem:[#allocation12_spill] sm:$0xff] %v18640_v33  ;;  %v9931_v8 = vld [vmem:[%s19786_s3 + $0xc30] sm:$0xff] }
 0x56c   :  { %13763 = vmatprep.subr.mxu1 %v6170_v5  ;;  %14609 = vmatmul.mubr.f32.gmra.mxu0 %v9928_v22  ;;  %v18649_v36 = vpop.f32.mrf.mxu0  ;;  %v20123_v22 = vld [vmem:[#allocation16_spill] sm:$0xff] }
 0x56d   :  { %13764 = vmatpush3.msra.mxu1 %v6170_v5  ;;  %14611 = vmatprep.mubr.f32.mxu0 %v9929_v15  ;;  %20122 = vst [vmem:[#allocation79_spill] sm:$0xff] %v18649_v36  ;;  %v6523_v5 = vld [vmem:[#allocation2 + $0x8e8] sm:$0xff]  ;;  %v9932_v36 = vld [vmem:[%s19786_s3 + $0xc38] sm:$0xff] }
 0x56e   :  { %13766 = vmatmul.mubr.f32.vlgmr.msra.gmra.mxu1 %v20121_v44  ;;  %13845 = vmatprep.subr.mxu1 %v6525_v21  ;;  %v13219_v3 = vpop.f32.mrf.mxu1  ;;  %v18657_v44 = vpop.f32.mrf.mxu0 }
 0x56f   :  { %13846 = vmatpush3.msra.mxu1 %v6525_v21  ;;  %13768 = vmatprep.mubr.f32.mxu1 %v20123_v22  ;;  %v18653_v15 = vadd.f32 %v13219_v3, %v18471_v63  ;;  %20124 = vst [vmem:[#allocation16_spill] sm:$0xff] %v18657_v44  ;;  %v20125_v21 = vld [vmem:[#allocation99_spill] sm:$0xff]  ;;  %v9933_v3 = vld [vmem:[%s19786_s3 + $0xc40] sm:$0xff]  ;;  %v9934_v44 = vld [vmem:[%s19786_s3 + $0xc48] sm:$0xff] }
 0x570   :  { %13847 = vmatprep.subr.mxu1 %v6524_v32  ;;  %v18655_v33 = vpop.f32.mrf.mxu1  ;;  %14612 = vmatmul.mubr.f32.gmra.mxu0 %v9930_v57  ;;  %v18666_v63 = vpop.f32.mrf.mxu0  ;;  %v6521_v57 = vld [vmem:[#allocation2 + $0x8d8] sm:$0xff]  ;;  %v6520_v22 = vld [vmem:[#allocation2 + $0x8d0] sm:$0xff] }
 0x571   :  { %13848 = vmatpush3.msra.mxu1 %v6524_v32  ;;  %14614 = vmatprep.mubr.f32.mxu0 %v9931_v8  ;;  %20126 = vst [vmem:[#allocation99_spill] sm:$0xff] %v18666_v63  ;;  %v20128_v63 = vld [vmem:[#allocation14_spill] sm:$0xff] }
 0x572   :  { %13769 = vmatmul.mubr.f32.gmra.mxu1 %v20125_v21  ;;  %13849 = vmatprep.subr.mxu1 %v6523_v5  ;;  %v18669_v8 = vpop.f32.mrf.mxu0 }
 0x573   :  { %13850 = vmatpush3.msra.mxu1 %v6523_v5  ;;  %13771 = vmatprep.mubr.f32.mxu1 %v18201_v7  ;;  %20127 = vst [vmem:[#allocation120_spill] sm:$0xff] %v18669_v8 }
 0x574   :  { %13851 = vmatprep.subr.mxu1 %v6522_v28  ;;  %v13222_v32 = vpop.f32.mrf.mxu1  ;;  %14615 = vmatmul.mubr.f32.gmra.mxu0 %v9932_v36  ;;  %v9935_v36 = vld [vmem:[%s19786_s3 + $0xc50] sm:$0xff]  ;;  %v18683_v5 = vpop.f32.mrf.mxu0 }
 0x575   :  { %13852 = vmatpush3.msra.mxu1 %v6522_v28  ;;  %v18672_v21 = vadd.f32 %v13222_v32, %v18489_v34  ;;  %14617 = vmatprep.mubr.f32.mxu0 %v9933_v3  ;;  %20129 = vst [vmem:[#allocation14_spill] sm:$0xff] %v18683_v5  ;;  %v6519_v34 = vld [vmem:[#allocation2 + $0x8c8] sm:$0xff]  ;;  %v6518_v3 = vld [vmem:[#allocation2 + $0x8c0] sm:$0xff]  ;;  %v6516_v5 = vld [vmem:[#allocation2 + $0x8b0] sm:$0xff] }
 0x576   :  { %13772 = vmatmul.mubr.f32.gmra.mxu1 %v20128_v63  ;;  %13853 = vmatprep.subr.mxu1 %v6521_v57  ;;  %v18678_v7 = vpop.f32.mrf.mxu1  ;;  %v18686_v28 = vpop.f32.mrf.mxu0  ;;  %v9936_v63 = vld [vmem:[%s19786_s3 + $0xc58] sm:$0xff]  ;;  %v20131_v32 = vld [vmem:[#allocation17_spill] sm:$0xff] }
 0x577   :  { %13854 = vmatpush3.msra.mxu1 %v6521_v57  ;;  %13774 = vmatprep.mubr.f32.mxu1 %v18216_v43  ;;  %20130 = vst [vmem:[#allocation121_spill] sm:$0xff] %v18686_v28  ;;  %v9937_v43 = vld [vmem:[%s19786_s3 + $0xc60] sm:$0xff] }
 0x578   :  { %13855 = vmatprep.subr.mxu1 %v6520_v22  ;;  %14618 = vmatmul.mubr.f32.gmra.mxu0 %v9934_v44  ;;  %v18695_v57 = vpop.f32.mrf.mxu0  ;;  %v20133_v44 = vld [vmem:[#allocation102_spill] sm:$0xff] }
 0x579   :  { %13856 = vmatpush3.msra.mxu1 %v6520_v22  ;;  %14620 = vmatprep.mubr.f32.mxu0 %v9935_v36  ;;  %20132 = vst [vmem:[#allocation17_spill] sm:$0xff] %v18695_v57  ;;  %v6517_v22 = vld [vmem:[#allocation2 + $0x8b8] sm:$0xff]  ;;  %v9938_v57 = vld [vmem:[%s19786_s3 + $0xc68] sm:$0xff] }
 0x57a   :  { %13775 = vmatmul.mubr.f32.gmra.mxu1 %v20131_v32  ;;  %13857 = vmatprep.subr.mxu1 %v6519_v34  ;;  %v13225_v8 = vpop.f32.mrf.mxu1  ;;  %v18703_v32 = vpop.f32.mrf.mxu0 }
 0x57b   :  { %13858 = vmatpush3.msra.mxu1 %v6519_v34  ;;  %13777 = vmatprep.mubr.f32.mxu1 %v20133_v44  ;;  %v18699_v36 = vadd.f32 %v13225_v8, %v18515_v10  ;;  %20134 = vst [vmem:[#allocation102_spill] sm:$0xff] %v18703_v32  ;;  %v20135_v34 = vld [vmem:[#allocation101_spill] sm:$0xff]  ;;  %v9939_v10 = vld [vmem:[%s19786_s3 + $0xc70] sm:$0xff]  ;;  %v6515_v44 = vld [vmem:[#allocation2 + $0x8a8] sm:$0xff] }
 0x57c   :  { %13859 = vmatprep.subr.mxu1 %v6518_v3  ;;  %v18701_v28 = vpop.f32.mrf.mxu1  ;;  %14621 = vmatmul.mubr.f32.gmra.mxu0 %v9936_v63  ;;  %v18712_v8 = vpop.f32.mrf.mxu0  ;;  %v20137_v63 = vld [vmem:[#allocation104_spill] sm:$0xff]  ;;  %v6514_v32 = vld [vmem:[#allocation2 + $0x8a0] sm:$0xff] }
 0x57d   :  { %13860 = vmatpush3.msra.mxu1 %v6518_v3  ;;  %14623 = vmatprep.mubr.f32.mxu0 %v9937_v43  ;;  %20136 = vst [vmem:[#allocation101_spill] sm:$0xff] %v18712_v8  ;;  %v20139_v8 = vld [vmem:[#allocation18_spill] sm:$0xff] }
 0x57e   :  { %13778 = vmatmul.mubr.f32.gmra.mxu1 %v20135_v34  ;;  %13861 = vmatprep.subr.mxu1 %v6517_v22  ;;  %v18715_v43 = vpop.f32.mrf.mxu0 }
 0x57f   :  { %13862 = vmatpush3.msra.mxu1 %v6517_v22  ;;  %13780 = vmatprep.mubr.f32.mxu1 %v20137_v63  ;;  %20138 = vst [vmem:[#allocation104_spill] sm:$0xff] %v18715_v43  ;;  %v20144_v43 = vld [vmem:[#allocation106_spill] sm:$0xff] }
 0x580   :  { %13863 = vmatprep.subr.mxu1 %v6516_v5  ;;  %v13228_v3 = vpop.f32.mrf.mxu1  ;;  %14624 = vmatmul.mubr.f32.gmra.mxu0 %v9938_v57  ;;  %v18726_v63 = vpop.f32.mrf.mxu0  ;;  %v6512_v57 = vld [vmem:[#allocation2 + $0x890] sm:$0xff] }
 0x581   :  { %13864 = vmatpush3.msra.mxu1 %v6516_v5  ;;  %v18718_v34 = vadd.f32 %v13228_v3, %v18534_v23  ;;  %14626 = vmatprep.mubr.f32.mxu0 %v9939_v10  ;;  %20140 = vst [vmem:[#allocation18_spill] sm:$0xff] %v18726_v63  ;;  %v6513_v5 = vld [vmem:[#allocation2 + $0x898] sm:$0xff]  ;;  %v20142_v10 = vld [vmem:[#allocation19_spill] sm:$0xff]  ;;  %v6511_v63 = vld [vmem:[#allocation2 + $0x888] sm:$0xff] }
 0x582   :  { %13781 = vmatmul.mubr.f32.gmra.mxu1 %v20139_v8  ;;  %13865 = vmatprep.subr.mxu1 %v6515_v44  ;;  %v18724_v22 = vpop.f32.mrf.mxu1  ;;  %v18729_v23 = vpop.f32.mrf.mxu0 }
 0x583   :  { %13866 = vmatpush3.msra.mxu1 %v6515_v44  ;;  %13783 = vmatprep.mubr.f32.mxu1 %v18262_v35  ;;  %20141 = vst [vmem:[#allocation122_spill] sm:$0xff] %v18729_v23  ;;  %v20147_v23 = vld [vmem:[#allocation108_spill] sm:$0xff] }
 0x584   :  { %13867 = vmatprep.subr.mxu1 %v6514_v32  ;;  %14627 = vmatmul.mubr.f32.gmra.mxu0 %v9940_v41  ;;  %v18732_v8 = vpop.f32.mrf.mxu0  ;;  %v6510_v41 = vld [vmem:[#allocation2 + $0x880] sm:$0xff] }
 0x585   :  { %13868 = vmatpush3.msra.mxu1 %v6514_v32  ;;  %20143 = vst [vmem:[#allocation19_spill] sm:$0xff] %v18732_v8  ;;  %v20145_v32 = vld [vmem:[#allocation105_spill] sm:$0xff]  ;;  %v6864_v8 = vld [vmem:[#allocation2 + $0x970] sm:$0xff] }
 0x586   :  { %13784 = vmatmul.mubr.f32.gmra.mxu1 %v20142_v10  ;;  %13869 = vmatprep.subr.mxu1 %v6513_v5  ;;  %v13319_v3 = vpop.f32.mrf.mxu1  ;;  %v18741_v10 = vpop.f32.mrf.mxu0 }
 0x587   :  { %13870 = vmatpush3.msra.mxu1 %v6513_v5  ;;  %13786 = vmatprep.mubr.f32.mxu1 %v20144_v43  ;;  %v18736_v44 = vadd.f32 %v13319_v3, %v18561_v53  ;;  %20146 = vst [vmem:[#allocation106_spill] sm:$0xff] %v18741_v10  ;;  %v6865_v5 = vld [vmem:[#allocation2 + $0x978] sm:$0xff]  ;;  %v20148_v3 = vld [vmem:[#allocation83_spill] sm:$0xff] }
 0x588   :  { %13871 = vmatprep.subr.mxu1 %v6512_v57  ;;  %v18738_v35 = vpop.f32.mrf.mxu1  ;;  %v20151_v10 = vld [vmem:[#allocation51_spill] sm:$0xff] }
 0x589   :  { %13872 = vmatpush3.msra.mxu1 %v6512_v57 }
 0x58a   :  { %13787 = vmatmul.mubr.f32.gmra.mxu1 %v20145_v32  ;;  %13873 = vmatprep.subr.mxu1 %v6511_v63  ;;  %v18750_v32 = vpop.f32.mrf.mxu0 }
 0x58b   :  { %13874 = vmatpush3.msra.mxu1 %v6511_v63  ;;  %13877 = vmatprep.mubr.f32.mxu1 %v20147_v23  ;;  %20150 = vst [vmem:[#allocation108_spill] sm:$0xff] %v18750_v32  ;;  %v6863_v63 = vld [vmem:[#allocation2 + $0x968] sm:$0xff]  ;;  %v6862_v23 = vld [vmem:[#allocation2 + $0x960] sm:$0xff] }
 0x58c   :  { %13875 = vmatprep.subr.mxu1 %v6510_v41  ;;  %v13322_v43 = vpop.f32.mrf.mxu1 }
 0x58d   :  { %13876 = vmatpush3.msra.mxu1 %v6510_v41  ;;  %v18745_v53 = vadd.f32 %v13322_v43, %v18580_v30  ;;  %v18754_v30 = vpop.f32.mrf.mxu0  ;;  %v20153_v43 = vld [vmem:[#allocation110_spill] sm:$0xff] }
 0x58e   :  { %13878 = vmatmul.mubr.f32.vlgmr.msra.gmra.mxu1 %v20148_v3  ;;  %13957 = vmatprep.subr.mxu1 %v6865_v5  ;;  %v18748_v57 = vpop.f32.mrf.mxu1  ;;  %20152 = vst [vmem:[#allocation83_spill] sm:$0xff] %v18754_v30  ;;  %v6861_v3 = vld [vmem:[#allocation2 + $0x958] sm:$0xff]  ;;  %v6858_v30 = vld [vmem:[#allocation2 + $0x940] sm:$0xff] }
 0x58f   :  { %20149 = vst [vmem:[#allocation105_spill] sm:$0xff] %v18748_v57  ;;  %13958 = vmatpush3.msra.mxu1 %v6865_v5  ;;  %13880 = vmatprep.mubr.f32.mxu1 %v18308_v31  ;;  %v6860_v31 = vld [vmem:[#allocation2 + $0x950] sm:$0xff] }
 0x590   :  { %13959 = vmatprep.subr.mxu1 %v6864_v8 }
 0x591   :  { %13960 = vmatpush3.msra.mxu1 %v6864_v8  ;;  %v20154_v8 = vld [vmem:[#allocation109_spill] sm:$0xff] }
 0x592   :  { %13881 = vmatmul.mubr.f32.gmra.mxu1 %v20151_v10  ;;  %13961 = vmatprep.subr.mxu1 %v6863_v63  ;;  %v13325_v41 = vpop.f32.mrf.mxu1  ;;  %v18763_v10 = vpop.f32.mrf.mxu0 }
 0x593   :  { %13962 = vmatpush3.msra.mxu1 %v6863_v63  ;;  %13883 = vmatprep.mubr.f32.mxu1 %v20153_v43  ;;  %v18758_v57 = vadd.f32 %v13325_v41, %v18607_v24  ;;  %20155 = vst [vmem:[#allocation51_spill] sm:$0xff] %v18763_v10  ;;  %v6859_v63 = vld [vmem:[#allocation2 + $0x948] sm:$0xff]  ;;  %v20156_v41 = vld [vmem:[#allocation21_spill] sm:$0xff]  ;;  %v20158_v10 = vld [vmem:[#allocation112_spill] sm:$0xff] }
 0x594   :  { %13963 = vmatprep.subr.mxu1 %v6862_v23  ;;  %v18760_v5 = vpop.f32.mrf.mxu1 }
 0x595   :  { %13964 = vmatpush3.msra.mxu1 %v6862_v23 }
 0x596   :  { %13884 = vmatmul.mubr.f32.gmra.mxu1 %v20154_v8  ;;  %13965 = vmatprep.subr.mxu1 %v6861_v3  ;;  %v18772_v8 = vpop.f32.mrf.mxu0 }
 0x597   :  { %13966 = vmatpush3.msra.mxu1 %v6861_v3  ;;  %13886 = vmatprep.mubr.f32.mxu1 %v18339_v1  ;;  %20157 = vst [vmem:[#allocation110_spill] sm:$0xff] %v18772_v8  ;;  %v6857_v3 = vld [vmem:[#allocation2 + $0x938] sm:$0xff]  ;;  %v6856_v1 = vld [vmem:[#allocation2 + $0x930] sm:$0xff] }
 0x598   :  { %13967 = vmatprep.subr.mxu1 %v6860_v31  ;;  %v13328_v43 = vpop.f32.mrf.mxu1  ;;  %v6852_v8 = vld [vmem:[#allocation2 + $0x910] sm:$0xff] }
 0x599   :  { %13968 = vmatpush3.msra.mxu1 %v6860_v31  ;;  %v18767_v24 = vadd.f32 %v13328_v43, %v18626_v62  ;;  %v18776_v62 = vpop.f32.mrf.mxu0  ;;  %v6855_v43 = vld [vmem:[#allocation2 + $0x928] sm:$0xff] }
 0x59a   :  { %13887 = vmatmul.mubr.f32.gmra.mxu1 %v20156_v41  ;;  %13969 = vmatprep.subr.mxu1 %v6859_v63  ;;  %v18770_v23 = vpop.f32.mrf.mxu1  ;;  %20159 = vst [vmem:[#allocation109_spill] sm:$0xff] %v18776_v62  ;;  %v20181_v62 = vld [vmem:[#allocation26_spill] sm:$0xff] }
 0x59b   :  { %13970 = vmatpush3.msra.mxu1 %v6859_v63  ;;  %13889 = vmatprep.mubr.f32.mxu1 %v18354_v6  ;;  %v6854_v6 = vld [vmem:[#allocation2 + $0x920] sm:$0xff] }
 0x59c   :  { %13971 = vmatprep.subr.mxu1 %v6858_v30 }
 0x59d   :  { %13972 = vmatpush3.msra.mxu1 %v6858_v30  ;;  %v20160_v30 = vld [vmem:[#allocation113_spill] sm:$0xff] }
 0x59e   :  { %13890 = vmatmul.mubr.f32.gmra.mxu1 %v20158_v10  ;;  %13973 = vmatprep.subr.mxu1 %v6857_v3  ;;  %v13331_v31 = vpop.f32.mrf.mxu1  ;;  %v18785_v10 = vpop.f32.mrf.mxu0 }
 0x59f   :  { %13974 = vmatpush3.msra.mxu1 %v6857_v3  ;;  %13892 = vmatprep.mubr.f32.mxu1 %v18369_v12  ;;  %v18780_v41 = vadd.f32 %v13331_v31, %v18653_v15  ;;  %20161 = vst [vmem:[#allocation21_spill] sm:$0xff] %v18785_v10  ;;  %v6853_v3 = vld [vmem:[#allocation2 + $0x918] sm:$0xff]  ;;  %v20162_v31 = vld [vmem:[#allocation114_spill] sm:$0xff]  ;;  %v20171_v10 = vld [vmem:[#allocation75_spill] sm:$0xff] }
 0x5a0   :  { %13975 = vmatprep.subr.mxu1 %v6856_v1  ;;  %v18782_v63 = vpop.f32.mrf.mxu1 }
 0x5a1   :  { %13976 = vmatpush3.msra.mxu1 %v6856_v1 }
 0x5a2   :  { %13893 = vmatmul.mubr.f32.gmra.mxu1 %v20160_v30  ;;  %13977 = vmatprep.subr.mxu1 %v6855_v43  ;;  %v18794_v30 = vpop.f32.mrf.mxu0 }
 0x5a3   :  { %13978 = vmatpush3.msra.mxu1 %v6855_v43  ;;  %13895 = vmatprep.mubr.f32.mxu1 %v18385_v40  ;;  %20163 = vst [vmem:[#allocation112_spill] sm:$0xff] %v18794_v30  ;;  %v6851_v43 = vld [vmem:[#allocation2 + $0x908] sm:$0xff]  ;;  %v6850_v40 = vld [vmem:[#allocation2 + $0x900] sm:$0xff] }
 0x5a4   :  { %13979 = vmatprep.subr.mxu1 %v6854_v6  ;;  %v13334_v12 = vpop.f32.mrf.mxu1  ;;  %v7198_v30 = vld [vmem:[#allocation2 + $0x9c0] sm:$0xff] }
 0x5a5   :  { %13980 = vmatpush3.msra.mxu1 %v6854_v6  ;;  %v18789_v15 = vadd.f32 %v13334_v12, %v18672_v21  ;;  %v18798_v21 = vpop.f32.mrf.mxu0  ;;  %v7205_v12 = vld [vmem:[#allocation2 + $0x9f8] sm:$0xff] }
 0x5a6   :  { %13896 = vmatmul.mubr.f32.gmra.mxu1 %v20162_v31  ;;  %13981 = vmatprep.subr.mxu1 %v6853_v3  ;;  %v18792_v1 = vpop.f32.mrf.mxu1  ;;  %20164 = vst [vmem:[#allocation113_spill] sm:$0xff] %v18798_v21  ;;  %v20168_v21 = vld [vmem:[#allocation61_spill] sm:$0xff] }
 0x5a7   :  { %13982 = vmatpush3.msra.mxu1 %v6853_v3  ;;  %13898 = vmatprep.mubr.f32.mxu1 %v18394_v39  ;;  %v7204_v39 = vld [vmem:[#allocation2 + $0x9f0] sm:$0xff] }
 0x5a8   :  { %13983 = vmatprep.subr.mxu1 %v6852_v8 }
 0x5a9   :  { %13984 = vmatpush3.msra.mxu1 %v6852_v8  ;;  %v7203_v8 = vld [vmem:[#allocation2 + $0x9e8] sm:$0xff] }
 0x5aa   :  { %13899 = vmatmul.mubr.f32.gmra.mxu1 %v18389_v45  ;;  %13985 = vmatprep.subr.mxu1 %v6851_v43  ;;  %v13337_v6 = vpop.f32.mrf.mxu1  ;;  %v18807_v45 = vpop.f32.mrf.mxu0 }
 0x5ab   :  { %13986 = vmatpush3.msra.mxu1 %v6851_v43  ;;  %13989 = vmatprep.mubr.f32.mxu1 %v18407_v48  ;;  %v18802_v31 = vadd.f32 %v13337_v6, %v18699_v36  ;;  %20165 = vst [vmem:[#allocation114_spill] sm:$0xff] %v18807_v45  ;;  %v7202_v43 = vld [vmem:[#allocation2 + $0x9e0] sm:$0xff]  ;;  %v20167_v6 = vld [vmem:[#allocation48_spill] sm:$0xff] }
 0x5ac   :  { %13987 = vmatprep.subr.mxu1 %v6850_v40  ;;  %v18804_v3 = vpop.f32.mrf.mxu1 }
 0x5ad   :  { %13988 = vmatpush3.msra.mxu1 %v6850_v40 }
 0x5ae   :  { %13990 = vmatmul.mubr.f32.vlgmr.msra.gmra.mxu1 %v18403_v27  ;;  %14069 = vmatprep.subr.mxu1 %v7205_v12  ;;  %v18816_v27 = vpop.f32.mrf.mxu0 }
 0x5af   :  { %14070 = vmatpush3.msra.mxu1 %v7205_v12  ;;  %13992 = vmatprep.mubr.f32.mxu1 %v18421_v16  ;;  %20166 = vst [vmem:[#allocation123_spill] sm:$0xff] %v18816_v27  ;;  %v1199_v12 = vadd.f32 %v20168_v21, %v20167_v6  ;;  %v7201_v16 = vld [vmem:[#allocation2 + $0x9d8] sm:$0xff]  ;;  %v7199_v21 = vld [vmem:[#allocation2 + $0x9c8] sm:$0xff]  ;;  %v20173_v6 = vld [vmem:[#allocation25_spill] sm:$0xff] }
 0x5b0   :  { %14071 = vmatprep.subr.mxu1 %v7204_v39  ;;  %v13340_v48 = vpop.f32.mrf.mxu1 }
 0x5b1   :  { %14072 = vmatpush3.msra.mxu1 %v7204_v39  ;;  %v18811_v36 = vadd.f32 %v13340_v48, %v18718_v34  ;;  %v20169_v39 = vld [vmem:[#allocation30_spill] sm:$0xff]  ;;  %v7200_v34 = vld [vmem:[#allocation2 + $0x9d0] sm:$0xff]  ;;  %v18823_v48 = vpop.f32.mrf.mxu0 }
 0x5b2   :  { %13993 = vmatmul.mubr.f32.gmra.mxu1 %v18412_v58  ;;  %14073 = vmatprep.subr.mxu1 %v7203_v8  ;;  %v18814_v40 = vpop.f32.mrf.mxu1  ;;  %v1577_v45 = vadd.f32 %v20169_v39, %v1199_v12  ;;  %20170 = vst [vmem:[#allocation48_spill] sm:$0xff] %v18823_v48 }
 0x5b3   :  { %14074 = vmatpush3.msra.mxu1 %v7203_v8  ;;  %13995 = vmatprep.mubr.f32.mxu1 %v18430_v14 }
 0x5b4   :  { %14075 = vmatprep.subr.mxu1 %v7202_v43  ;;  %v1917_v27 = vadd.f32 %v20171_v10, %v1577_v45  ;;  %v18836_v10 = vpop.f32.mrf.mxu0 }
 0x5b5   :  { %14076 = vmatpush3.msra.mxu1 %v7202_v43  ;;  %v20172_v43 = vld [vmem:[#allocation50_spill] sm:$0xff]  ;;  %20175 = vst [vmem:[#allocation61_spill] sm:$0xff] %v18836_v10  ;;  %v20180_v10 = vld [vmem:[#allocation52_spill] sm:$0xff] }
 0x5b6   :  { %13996 = vmatmul.mubr.f32.gmra.mxu1 %v18426_v2  ;;  %14077 = vmatprep.subr.mxu1 %v7201_v16  ;;  %v13431_v58 = vpop.f32.mrf.mxu1  ;;  %v1209_v12 = vadd.f32 %v20173_v6, %v20172_v43  ;;  %v20174_v2 = vld [vmem:[#allocation41_spill] sm:$0xff]  ;;  %v20178_v43 = vld [vmem:[#allocation76_spill] sm:$0xff] }
 0x5b7   :  { %14078 = vmatpush3.msra.mxu1 %v7201_v16  ;;  %13998 = vmatprep.mubr.f32.mxu1 %v18444_v49  ;;  %v18828_v14 = vadd.f32 %v13431_v58, %v18736_v44  ;;  %v2257_v39 = vadd.f32 %v20174_v2, %v1917_v27  ;;  %v20176_v49 = vld [vmem:[#allocation70_spill] sm:$0xff]  ;;  %v20177_v16 = vld [vmem:[#allocation84_spill] sm:$0xff]  ;;  %v20179_v27 = vld [vmem:[#allocation63_spill] sm:$0xff] }
 0x5b8   :  { %14079 = vmatprep.subr.mxu1 %v7200_v34  ;;  %v18830_v8 = vpop.f32.mrf.mxu1  ;;  %v1579_v45 = vadd.f32 %v20176_v49, %v1209_v12  ;;  %v7197_v58 = vld [vmem:[#allocation2 + $0x9b8] sm:$0xff]  ;;  %v7196_v2 = vld [vmem:[#allocation2 + $0x9b0] sm:$0xff]  ;;  %v1219_v12 = vadd.f32 %v20181_v62, %v20180_v10 }
 0x5b9   :  { %14080 = vmatpush3.msra.mxu1 %v7200_v34  ;;  %v2597_v44 = vadd.f32 %v20177_v16, %v2257_v39  ;;  %v20182_v39 = vld [vmem:[#allocation80_spill] sm:$0xff] }
 0x5ba   :  { %13999 = vmatmul.mubr.f32.gmra.mxu1 %v18439_v9  ;;  %14081 = vmatprep.subr.mxu1 %v7199_v21  ;;  %v1919_v6 = vadd.f32 %v20178_v43, %v1579_v45  ;;  %v20183_v45 = vld [vmem:[#allocation71_spill] sm:$0xff]  ;;  %v20186_v10 = vld [vmem:[#allocation96_spill] sm:$0xff]  ;;  %v7194_v43 = vld [vmem:[#allocation2 + $0x9a0] sm:$0xff] }
 0x5bb   :  { %14082 = vmatpush3.msra.mxu1 %v7199_v21  ;;  %14001 = vmatprep.mubr.f32.mxu1 %v18458_v61  ;;  %v2937_v34 = vadd.f32 %v20179_v27, %v2597_v44  ;;  %v18851_v61 = vpop.f32.mrf.mxu0  ;;  %v20185_v44 = vld [vmem:[#allocation53_spill] sm:$0xff] }
 0x5bc   :  { %14083 = vmatprep.subr.mxu1 %v7198_v30  ;;  %v13434_v48 = vpop.f32.mrf.mxu1  ;;  %v2259_v49 = vadd.f32 %v20182_v39, %v1919_v6  ;;  %v20187_v27 = vld [vmem:[#allocation37_spill] sm:$0xff]  ;;  %v20189_v39 = vld [vmem:[#allocation107_spill] sm:$0xff] }
 0x5bd   :  { %14084 = vmatpush3.msra.mxu1 %v7198_v30  ;;  %v18844_v9 = vadd.f32 %v13434_v48, %v18745_v53  ;;  %v3277_v16 = vadd.f32 %v20183_v45, %v2937_v34  ;;  %v7195_v30 = vld [vmem:[#allocation2 + $0x9a8] sm:$0xff]  ;;  %v20184_v53 = vld [vmem:[#allocation31_spill] sm:$0xff]  ;;  %v18861_v34 = vpop.f32.mrf.mxu0 }
 0x5be   :  { %14002 = vmatmul.mubr.f32.gmra.mxu1 %v18448_v25  ;;  %14085 = vmatprep.subr.mxu1 %v7197_v58  ;;  %v18849_v21 = vpop.f32.mrf.mxu1  ;;  %v1581_v48 = vadd.f32 %v20184_v53, %v1219_v12  ;;  %v2599_v62 = vadd.f32 %v20185_v44, %v2259_v49  ;;  %v7193_v12 = vld [vmem:[#allocation2 + $0x998] sm:$0xff] }
 0x5bf   :  { %14086 = vmatpush3.msra.mxu1 %v7197_v58  ;;  %14004 = vmatprep.mubr.f32.mxu1 %v18466_v51  ;;  %v3617_v25 = vadd.f32 %v20186_v10, %v3277_v16  ;;  %v20188_v58 = vld [vmem:[#allocation87_spill] sm:$0xff] }
 0x5c0   :  { %14087 = vmatprep.subr.mxu1 %v7196_v2  ;;  %v1921_v32 = vadd.f32 %v20187_v27, %v1581_v48  ;;  %v2939_v51 = vadd.f32 %v20188_v58, %v2599_v62  ;;  %v20191_v16 = vld [vmem:[#allocation27_spill] sm:$0xff]  ;;  %v20192_v48 = vld [vmem:[#allocation13_spill] sm:$0xff] }
 0x5c1   :  { %14088 = vmatpush3.msra.mxu1 %v7196_v2  ;;  %v3957_v45 = vadd.f32 %v20189_v39, %v3617_v25  ;;  %v20190_v2 = vld [vmem:[#allocation54_spill] sm:$0xff]  ;;  %v20193_v10 = vld [vmem:[#allocation91_spill] sm:$0xff]  ;;  %v20194_v25 = vld [vmem:[#allocation32_spill] sm:$0xff] }
 0x5c2   :  { %14005 = vmatmul.mubr.f32.gmra.mxu1 %v18462_v46  ;;  %14089 = vmatprep.subr.mxu1 %v7195_v30  ;;  %v13437_v6 = vpop.f32.mrf.mxu1  ;;  %v1229_v53 = vadd.f32 %v20191_v16, %v20190_v2  ;;  %v2261_v44 = vadd.f32 %v20192_v48, %v1921_v32  ;;  %v3279_v27 = vadd.f32 %v20193_v10, %v2939_v51  ;;  %v20196_v39 = vld [vmem:[#allocation9_spill] sm:$0xff]  ;;  %v7191_v32 = vld [vmem:[#allocation2 + $0x988] sm:$0xff] }
 0x5c3   :  { %14090 = vmatpush3.msra.mxu1 %v7195_v30  ;;  %14007 = vmatprep.mubr.f32.mxu1 %v18480_v20  ;;  %v18867_v49 = vadd.f32 %v13437_v6, %v18758_v57  ;;  %v4297_v62 = vadd.f32 %v18456_v18, %v3957_v45  ;;  %v7192_v30 = vld [vmem:[#allocation2 + $0x990] sm:$0xff]  ;;  %v18878_v57 = vpop.f32.mrf.mxu0  ;;  %v20197_v18 = vld [vmem:[#allocation5_spill] sm:$0xff]  ;;  %v20198_v45 = vld [vmem:[#allocation88_spill] sm:$0xff] }
 0x5c4   :  { %14091 = vmatprep.subr.mxu1 %v7194_v43  ;;  %v18871_v46 = vpop.f32.mrf.mxu1  ;;  %v1583_v20 = vadd.f32 %v20194_v25, %v1229_v53  ;;  %v20195_v6 = vld [vmem:[#allocation55_spill] sm:$0xff]  ;;  %v3619_v2 = vadd.f32 %v20196_v39, %v3279_v27 }
 0x5c5   :  { %14092 = vmatpush3.msra.mxu1 %v7194_v43  ;;  %v2601_v58 = vadd.f32 %v20195_v6, %v2261_v44  ;;  %v4637_v16 = vadd.f32 %v18632_v47, %v4297_v62  ;;  %v7190_v44 = vld [vmem:[#allocation2 + $0x980] sm:$0xff]  ;;  %v20200_v47 = vld [vmem:[#allocation56_spill] sm:$0xff]  ;;  %v18895_v6 = vpop.f32.mrf.mxu0 }
 0x5c6   :  { %14008 = vmatmul.mubr.f32.gmra.mxu1 %v18476_v54  ;;  %14093 = vmatprep.subr.mxu1 %v7193_v12  ;;  %v1923_v43 = vadd.f32 %v20197_v18, %v1583_v20  ;;  %v20199_v54 = vld [vmem:[#allocation49_spill] sm:$0xff] }
 0x5c7   :  { %14094 = vmatpush3.msra.mxu1 %v7193_v12  ;;  %14010 = vmatprep.mubr.f32.mxu1 %v18494_v50  ;;  %v2941_v53 = vadd.f32 %v20198_v45, %v2601_v58  ;;  %v3959_v48 = vadd.f32 %v20199_v54, %v3619_v2  ;;  %v4977_v10 = vadd.f32 %v18770_v23, %v4637_v16  ;;  %v20201_v12 = vld [vmem:[#allocation65_spill] sm:$0xff]  ;;  %v20202_v50 = vld [vmem:[#allocation15_spill] sm:$0xff]  ;;  %v20203_v58 = vld [vmem:[#allocation92_spill] sm:$0xff] }
 0x5c8   :  { %14095 = vmatprep.subr.mxu1 %v7192_v30  ;;  %v13440_v51 = vpop.f32.mrf.mxu1  ;;  %v1239_v62 = vadd.f32 %v20201_v12, %v20200_v47  ;;  %v2263_v25 = vadd.f32 %v20202_v50, %v1923_v43  ;;  %v20204_v2 = vld [vmem:[#allocation73_spill] sm:$0xff]  ;;  %v7544_v54 = vld [vmem:[#allocation2 + $0xa70] sm:$0xff]  ;;  %v20208_v47 = vld [vmem:[#allocation58_spill] sm:$0xff] }
 0x5c9   :  { %14096 = vmatpush3.msra.mxu1 %v7192_v30  ;;  %v18889_v27 = vadd.f32 %v13440_v51, %v18767_v24  ;;  %v3281_v39 = vadd.f32 %v20203_v58, %v2941_v53  ;;  %v4299_v23 = vadd.f32 %v18474_v59, %v3959_v48  ;;  %v7545_v24 = vld [vmem:[#allocation2 + $0xa78] sm:$0xff]  ;;  %v20205_v18 = vld [vmem:[#allocation57_spill] sm:$0xff]  ;;  %v20207_v53 = vld [vmem:[#allocation42_spill] sm:$0xff] }
 0x5ca   :  { %14011 = vmatmul.mubr.f32.gmra.mxu1 %v18485_v55  ;;  %14097 = vmatprep.subr.mxu1 %v7191_v32  ;;  %v5262_v20 = vpop.f32.mrf.mxu1  ;;  %v1585_v16 = vadd.f32 %v20204_v2, %v1239_v62  ;;  %v2603_v43 = vadd.f32 %v20205_v18, %v2263_v25  ;;  %v20206_v55 = vld [vmem:[#allocation97_spill] sm:$0xff]  ;;  %v1169_v59 = vadd.f32 %v20208_v47, %v20207_v53  ;;  %v18911_v62 = vpop.f32.mrf.mxu0  ;;  %v20211_v50 = vld [vmem:[#allocation111_spill] sm:$0xff]  ;;  %v20212_v58 = vld [vmem:[#allocation28_spill] sm:$0xff] }
 0x5cb   :  { %14098 = vmatpush3.msra.mxu1 %v7191_v32  ;;  %14101 = vmatprep.mubr.f32.mxu1 %v18512_v19  ;;  %v18900_v30 = vadd.f32 %v5262_v20, %v4977_v10  ;;  %v3621_v51 = vadd.f32 %v20206_v55, %v3281_v39  ;;  %v4639_v45 = vadd.f32 %v18655_v33, %v4299_v23  ;;  %v20209_v32 = vld [vmem:[#allocation7_spill] sm:$0xff]  ;;  %v20210_v19 = vld [vmem:[#allocation66_spill] sm:$0xff]  ;;  %v7542_v55 = vld [vmem:[#allocation2 + $0xa60] sm:$0xff] }
 0x5cc   :  { %14099 = vmatprep.subr.mxu1 %v7190_v44  ;;  %v1925_v48 = vadd.f32 %v20209_v32, %v1585_v16  ;;  %v2943_v12 = vadd.f32 %v20210_v19, %v2603_v43  ;;  %v7543_v33 = vld [vmem:[#allocation2 + $0xa68] sm:$0xff]  ;;  %v1571_v39 = vadd.f32 %v20212_v58, %v1169_v59  ;;  %v20214_v16 = vld [vmem:[#allocation93_spill] sm:$0xff]  ;;  %v20219_v32 = vld [vmem:[#allocation23_spill] sm:$0xff] }
 0x5cd   :  { %14100 = vmatpush3.msra.mxu1 %v7190_v44  ;;  %v3961_v25 = vadd.f32 %v20211_v50, %v3621_v51  ;;  %v4979_v20 = vadd.f32 %v18782_v63, %v4639_v45  ;;  %v20216_v51 = vld [vmem:[#allocation59_spill] sm:$0xff]  ;;  %v20217_v53 = vld [vmem:[#allocation98_spill] sm:$0xff]  ;;  %v20220_v19 = vld [vmem:[#allocation40_spill] sm:$0xff] }
 0x5ce   :  { %14102 = vmatmul.mubr.f32.vlgmr.msra.gmra.mxu1 %v18501_v42  ;;  %14181 = vmatprep.subr.mxu1 %v7545_v24  ;;  %v13443_v10 = vpop.f32.mrf.mxu1  ;;  %v20213_v42 = vld [vmem:[#allocation43_spill] sm:$0xff]  ;;  %v3283_v18 = vadd.f32 %v20214_v16, %v2943_v12 }
 0x5cf   :  { %14182 = vmatpush3.msra.mxu1 %v7545_v24  ;;  %14104 = vmatprep.mubr.f32.mxu1 %v18528_v26  ;;  %v18917_v44 = vadd.f32 %v13443_v10, %v18780_v41  ;;  %v2265_v2 = vadd.f32 %v20213_v42, %v1925_v48  ;;  %v4301_v43 = vadd.f32 %v18492_v37, %v3961_v25  ;;  %v20215_v24 = vld [vmem:[#allocation33_spill] sm:$0xff]  ;;  %v18927_v41 = vpop.f32.mrf.mxu0  ;;  %v7541_v37 = vld [vmem:[#allocation2 + $0xa58] sm:$0xff]  ;;  %v20222_v25 = vld [vmem:[#allocation22_spill] sm:$0xff] }
 0x5d0   :  { %14183 = vmatprep.subr.mxu1 %v7544_v54  ;;  %v5272_v23 = vpop.f32.mrf.mxu1  ;;  %v1911_v26 = vadd.f32 %v20215_v24, %v1571_v39  ;;  %v3623_v47 = vadd.f32 %v20217_v53, %v3283_v18  ;;  %v20221_v10 = vld [vmem:[#allocation89_spill] sm:$0xff]  ;;  %v7540_v39 = vld [vmem:[#allocation2 + $0xa50] sm:$0xff]  ;;  %v20225_v18 = vld [vmem:[#allocation74_spill] sm:$0xff] }
 0x5d1   :  { %14184 = vmatpush3.msra.mxu1 %v7544_v54  ;;  %v18923_v63 = vadd.f32 %v5272_v23, %v4979_v20  ;;  %v2605_v45 = vadd.f32 %v20216_v51, %v2265_v2  ;;  %v4641_v59 = vadd.f32 %v18678_v7, %v4301_v43  ;;  %v20218_v54 = vld [vmem:[#allocation44_spill] sm:$0xff]  ;;  %v20224_v23 = vld [vmem:[#allocation82_spill] sm:$0xff]  ;;  %v18945_v16 = vpop.f32.mrf.mxu0 }
 0x5d2   :  { %14105 = vmatmul.mubr.f32.gmra.mxu1 %v18519_v38  ;;  %14185 = vmatprep.subr.mxu1 %v7543_v33  ;;  %v1179_v48 = vadd.f32 %v20219_v32, %v20218_v54  ;;  %v2251_v12 = vadd.f32 %v20220_v19, %v1911_v26  ;;  %v3963_v20 = vadd.f32 %v20222_v25, %v3623_v47  ;;  %v20227_v26 = vld [vmem:[#allocation24_spill] sm:$0xff] }
 0x5d3   :  { %14186 = vmatpush3.msra.mxu1 %v7543_v33  ;;  %14107 = vmatprep.mubr.f32.mxu1 %v18545_v52  ;;  %v2945_v50 = vadd.f32 %v20221_v10, %v2605_v45  ;;  %v4981_v58 = vadd.f32 %v18792_v1, %v4641_v59  ;;  %v20223_v52 = vld [vmem:[#allocation67_spill] sm:$0xff]  ;;  %v7539_v1 = vld [vmem:[#allocation2 + $0xa48] sm:$0xff]  ;;  %v20230_v59 = vld [vmem:[#allocation100_spill] sm:$0xff] }
 0x5d4   :  { %14187 = vmatprep.subr.mxu1 %v7542_v55  ;;  %v13446_v38 = vpop.f32.mrf.mxu1  ;;  %v1573_v33 = vadd.f32 %v20223_v52, %v1179_v48  ;;  %v2591_v42 = vadd.f32 %v20224_v23, %v2251_v12  ;;  %v4303_v24 = vadd.f32 %v18517_v4, %v3963_v20  ;;  %v20228_v45 = vld [vmem:[#allocation34_spill] sm:$0xff]  ;;  %v7538_v4 = vld [vmem:[#allocation2 + $0xa40] sm:$0xff]  ;;  %v20233_v12 = vld [vmem:[#allocation68_spill] sm:$0xff] }
 0x5d5   :  { %14188 = vmatpush3.msra.mxu1 %v7542_v55  ;;  %v18940_v7 = vadd.f32 %v13446_v38, %v18789_v15  ;;  %v3285_v43 = vadd.f32 %v20225_v18, %v2945_v50  ;;  %v20226_v55 = vld [vmem:[#allocation46_spill] sm:$0xff]  ;;  %v18962_v50 = vpop.f32.mrf.mxu0 }
 0x5d6   :  { %14108 = vmatmul.mubr.f32.gmra.mxu1 %v18531_v13  ;;  %14189 = vmatprep.subr.mxu1 %v7541_v37  ;;  %v5282_v2 = vpop.f32.mrf.mxu1  ;;  %v1189_v51 = vadd.f32 %v20227_v26, %v20226_v55  ;;  %v1913_v53 = vadd.f32 %v20228_v45, %v1573_v33  ;;  %v20229_v13 = vld [vmem:[#allocation85_spill] sm:$0xff]  ;;  %v4643_v32 = vadd.f32 %v18701_v28, %v4303_v24  ;;  %v7537_v28 = vld [vmem:[#allocation2 + $0xa38] sm:$0xff]  ;;  %v20238_v24 = vld [vmem:[#allocation11_spill] sm:$0xff] }
 0x5d7   :  { %14190 = vmatpush3.msra.mxu1 %v7541_v37  ;;  %14110 = vmatprep.mubr.f32.mxu1 %v18557_v60  ;;  %v18950_v15 = vadd.f32 %v5282_v2, %v4981_v58  ;;  %v2931_v47 = vadd.f32 %v20229_v13, %v2591_v42  ;;  %v3625_v54 = vadd.f32 %v20230_v59, %v3285_v43  ;;  %v20231_v37 = vld [vmem:[#allocation29_spill] sm:$0xff]  ;;  %v20232_v60 = vld [vmem:[#allocation8_spill] sm:$0xff]  ;;  %v20236_v42 = vld [vmem:[#allocation95_spill] sm:$0xff] }
 0x5d8   :  { %14191 = vmatprep.subr.mxu1 %v7540_v39  ;;  %v1575_v48 = vadd.f32 %v20231_v37, %v1189_v51  ;;  %v2253_v19 = vadd.f32 %v20232_v60, %v1913_v53  ;;  %v4983_v20 = vadd.f32 %v18804_v3, %v4643_v32  ;;  %v20237_v43 = vld [vmem:[#allocation86_spill] sm:$0xff]  ;;  %v20239_v55 = vld [vmem:[#allocation81_spill] sm:$0xff]  ;;  %v20242_v59 = vld [vmem:[#allocation20_spill] sm:$0xff] }
 0x5d9   :  { %14192 = vmatpush3.msra.mxu1 %v7540_v39  ;;  %v3271_v38 = vadd.f32 %v20233_v12, %v2931_v47  ;;  %v3965_v25 = vadd.f32 %v18383_v11, %v3625_v54  ;;  %v20234_v39 = vld [vmem:[#allocation47_spill] sm:$0xff]  ;;  %v20240_v45 = vld [vmem:[#allocation117_spill] sm:$0xff] }
 0x5da   :  { %14111 = vmatmul.mubr.f32.gmra.mxu1 %v18548_v0  ;;  %14193 = vmatprep.subr.mxu1 %v7539_v1  ;;  %v13449_v10 = vpop.f32.mrf.mxu1  ;;  %v2593_v52 = vadd.f32 %v20234_v39, %v2253_v19  ;;  %v20235_v0 = vld [vmem:[#allocation35_spill] sm:$0xff]  ;;  %v20241_v53 = vld [vmem:[#allocation69_spill] sm:$0xff]  ;;  %v20245_v19 = vld [vmem:[#allocation72_spill] sm:$0xff] }
 0x5db   :  { %14194 = vmatpush3.msra.mxu1 %v7539_v1  ;;  %14113 = vmatprep.mubr.f32.mxu1 %v18574_v56  ;;  %v18968_v58 = vadd.f32 %v13449_v10, %v18802_v31  ;;  %v1915_v23 = vadd.f32 %v20235_v0, %v1575_v48  ;;  %v3611_v2 = vadd.f32 %v20236_v42, %v3271_v38  ;;  %v7536_v11 = vld [vmem:[#allocation2 + $0xa30] sm:$0xff]  ;;  %v18978_v31 = vpop.f32.mrf.mxu0  ;;  %v7534_v37 = vld [vmem:[#allocation2 + $0xa20] sm:$0xff]  ;;  %v20246_v10 = vld [vmem:[#allocation62_spill] sm:$0xff] }
 0x5dc   :  { %14195 = vmatprep.subr.mxu1 %v7538_v4  ;;  %v5292_v33 = vpop.f32.mrf.mxu1  ;;  %v4305_v18 = vadd.f32 %v18540_v29, %v3965_v25  ;;  %v2933_v56 = vadd.f32 %v20237_v43, %v2593_v52  ;;  %v7535_v29 = vld [vmem:[#allocation2 + $0xa28] sm:$0xff] }
 0x5dd   :  { %14196 = vmatpush3.msra.mxu1 %v7538_v4  ;;  %v18974_v3 = vadd.f32 %v5292_v33, %v4983_v20  ;;  %v2255_v1 = vadd.f32 %v20238_v24, %v1915_v23  ;;  %v3951_v26 = vadd.f32 %v20239_v55, %v3611_v2  ;;  %v18993_v38 = vpop.f32.mrf.mxu0  ;;  %v20247_v20 = vld [vmem:[#allocation64_spill] sm:$0xff]  ;;  %v20248_v39 = vld [vmem:[#allocation38_spill] sm:$0xff]  ;;  %v7532_v2 = vld [vmem:[#allocation2 + $0xa10] sm:$0xff] }
 0x5de   :  { %14114 = vmatmul.mubr.f32.gmra.mxu1 %v18565_v17  ;;  %14197 = vmatprep.subr.mxu1 %v7537_v28  ;;  %v4645_v51 = vadd.f32 %v18724_v22, %v4305_v18  ;;  %v3273_v13 = vadd.f32 %v20241_v53, %v2933_v56  ;;  %v20243_v17 = vld [vmem:[#allocation60_spill] sm:$0xff]  ;;  %v20250_v0 = vld [vmem:[#allocation90_spill] sm:$0xff]  ;;  %v20251_v18 = vld [vmem:[#allocation115_spill] sm:$0xff] }
 0x5df   :  { %14198 = vmatpush3.msra.mxu1 %v7537_v28  ;;  %14116 = vmatprep.mubr.f32.mxu1 %v20240_v45  ;;  %v2595_v54 = vadd.f32 %v20242_v59, %v2255_v1  ;;  %v4291_v32 = vadd.f32 %v20243_v17, %v3951_v26  ;;  %v20244_v22 = vld [vmem:[#allocation36_spill] sm:$0xff]  ;;  %v20252_v43 = vld [vmem:[#allocation118_spill] sm:$0xff]  ;;  %v19005_v24 = vpop.f32.mrf.mxu0  ;;  %v20253_v1 = vld [vmem:[#allocation39_spill] sm:$0xff] }
 0x5e0   :  { %14199 = vmatprep.subr.mxu1 %v7536_v11  ;;  %v13452_v47 = vpop.f32.mrf.mxu1  ;;  %v4985_v4 = vadd.f32 %v18814_v40, %v4645_v51  ;;  %v3613_v60 = vadd.f32 %v20244_v22, %v3273_v13  ;;  %v7533_v40 = vld [vmem:[#allocation2 + $0xa18] sm:$0xff]  ;;  %v20254_v51 = vld [vmem:[#allocation77_spill] sm:$0xff]  ;;  %v7531_v45 = vld [vmem:[#allocation2 + $0xa08] sm:$0xff] }
 0x5e1   :  { %14200 = vmatpush3.msra.mxu1 %v7536_v11  ;;  %v18989_v48 = vadd.f32 %v13452_v47, %v18811_v36  ;;  %v2935_v25 = vadd.f32 %v20246_v10, %v2595_v54  ;;  %v4631_v28 = vadd.f32 %v20247_v20, %v4291_v32  ;;  %v20249_v36 = vld [vmem:[#allocation103_spill] sm:$0xff]  ;;  %v20256_v47 = vld [vmem:[#allocation45_spill] sm:$0xff]  ;;  %v20259_v22 = vld [vmem:[#allocation116_spill] sm:$0xff] }
 0x5e2   :  { %14117 = vmatmul.mubr.f32.gmra.mxu1 %v20245_v19  ;;  %14201 = vmatprep.subr.mxu1 %v7535_v29  ;;  %v5302_v12 = vpop.f32.mrf.mxu1  ;;  %v3953_v33 = vadd.f32 %v20249_v36, %v3613_v60  ;;  %v7530_v54 = vld [vmem:[#allocation2 + $0xa00] sm:$0xff]  ;;  %v20260_v60 = vld [vmem:[#allocation78_spill] sm:$0xff]  ;;  %v7885_v19 = vld [vmem:[#allocation2 + $0xaf8] sm:$0xff] }
 0x5e3   :  { %14202 = vmatpush3.msra.mxu1 %v7535_v29  ;;  %14119 = vmatprep.mubr.f32.mxu1 %v20248_v39  ;;  %v18998_v52 = vadd.f32 %v5302_v12, %v4985_v4  ;;  %v3275_v23 = vadd.f32 %v20250_v0, %v2935_v25  ;;  %v4971_v42 = vadd.f32 %v18738_v35, %v4631_v28  ;;  %v20255_v29 = vld [vmem:[#allocation94_spill] sm:$0xff]  ;;  %v20257_v32 = vld [vmem:[#allocation105_spill] sm:$0xff]  ;;  %v7884_v39 = vld [vmem:[#allocation2 + $0xaf0] sm:$0xff] }
 0x5e4   :  { %14203 = vmatprep.subr.mxu1 %v7534_v37  ;;  %v4293_v11 = vadd.f32 %v20251_v18, %v3953_v33  ;;  %v20261_v20 = vld [vmem:[#allocation6_spill] sm:$0xff]  ;;  %v7882_v18 = vld [vmem:[#allocation2 + $0xae0] sm:$0xff] }
 0x5e5   :  { %14204 = vmatpush3.msra.mxu1 %v7534_v37  ;;  %v3615_v55 = vadd.f32 %v20253_v1, %v3275_v23  ;;  %v5311_v26 = vadd.f32 %v18830_v8, %v4971_v42  ;;  %v20258_v8 = vld [vmem:[#allocation119_spill] sm:$0xff]  ;;  %v19019_v37 = vpop.f32.mrf.mxu0  ;;  %v20262_v36 = vld [vmem:[#allocation10_spill] sm:$0xff] }
 0x5e6   :  { %14120 = vmatmul.mubr.f32.gmra.mxu1 %v20252_v43  ;;  %14205 = vmatprep.subr.mxu1 %v7533_v40  ;;  %v13543_v56 = vpop.f32.mrf.mxu1  ;;  %v4633_v53 = vadd.f32 %v20255_v29, %v4293_v11  ;;  %v7883_v42 = vld [vmem:[#allocation2 + $0xae8] sm:$0xff]  ;;  %v20264_v43 = vld [vmem:[#allocation12_spill] sm:$0xff] }
 0x5e7   :  { %14206 = vmatpush3.msra.mxu1 %v7533_v40  ;;  %14122 = vmatprep.mubr.f32.mxu1 %v20254_v51  ;;  %v19011_v35 = vadd.f32 %v13543_v56, %v18828_v14  ;;  %v3955_v59 = vadd.f32 %v20256_v47, %v3615_v55  ;;  %v19031_v0 = vpop.f32.mrf.mxu0  ;;  %v7881_v55 = vld [vmem:[#allocation2 + $0xad8] sm:$0xff] }
 0x5e8   :  { %14207 = vmatprep.subr.mxu1 %v7532_v2  ;;  %v5572_v13 = vpop.f32.mrf.mxu1  ;;  %v4973_v4 = vadd.f32 %v20257_v32, %v4633_v53  ;;  %v20267_v53 = vld [vmem:[#allocation14_spill] sm:$0xff]  ;;  %v20268_v32 = vld [vmem:[#allocation120_spill] sm:$0xff] }
 0x5e9   :  { %14208 = vmatpush3.msra.mxu1 %v7532_v2  ;;  %v19015_v17 = vadd.f32 %v5572_v13, %v5311_v26  ;;  %v4295_v14 = vadd.f32 %v20259_v22, %v3955_v59  ;;  %v19040_v1 = vpop.f32.mrf.mxu0  ;;  %v7879_v13 = vld [vmem:[#allocation2 + $0xac8] sm:$0xff] }
 0x5ea   :  { %14123 = vmatmul.mubr.f32.gmra.mxu1 %v20258_v8  ;;  %14209 = vmatprep.subr.mxu1 %v7531_v45  ;;  %v5313_v10 = vadd.f32 %v18849_v21, %v4973_v4  ;;  %v20263_v21 = vld [vmem:[#allocation79_spill] sm:$0xff] }
 0x5eb   :  { %14210 = vmatpush3.msra.mxu1 %v7531_v45  ;;  %14213 = vmatprep.mubr.f32.mxu1 %v20260_v60  ;;  %v13546_v12 = vpop.f32.mrf.mxu1  ;;  %v4635_v28 = vadd.f32 %v20261_v20, %v4295_v14  ;;  %v20266_v45 = vld [vmem:[#allocation16_spill] sm:$0xff]  ;;  %v19049_v29 = vpop.f32.mrf.mxu0  ;;  %v20271_v20 = vld [vmem:[#allocation101_spill] sm:$0xff] }
 0x5ec   :  { %14211 = vmatprep.subr.mxu1 %v7530_v54  ;;  %v19025_v25 = vadd.f32 %v13546_v12, %v18844_v9  ;;  %v7877_v14 = vld [vmem:[#allocation2 + $0xab8] sm:$0xff]  ;;  %v20270_v12 = vld [vmem:[#allocation121_spill] sm:$0xff] }
 0x5ed   :  { %14212 = vmatpush3.msra.mxu1 %v7530_v54  ;;  %v5582_v40 = vpop.f32.mrf.mxu1  ;;  %v4975_v23 = vadd.f32 %v18760_v5, %v4635_v28  ;;  %v20265_v5 = vld [vmem:[#allocation99_spill] sm:$0xff]  ;;  %v7878_v54 = vld [vmem:[#allocation2 + $0xac0] sm:$0xff]  ;;  %v19056_v8 = vpop.f32.mrf.mxu0 }
 0x5ee   :  { %14214 = vmatmul.mubr.f32.vlgmr.msra.gmra.mxu1 %v20262_v36  ;;  %14293 = vmatprep.subr.mxu1 %v7885_v19  ;;  %v19029_v33 = vadd.f32 %v5582_v40, %v5313_v10  ;;  %v7874_v36 = vld [vmem:[#allocation2 + $0xaa0] sm:$0xff] }
 0x5ef   :  { %14294 = vmatpush3.msra.mxu1 %v7885_v19  ;;  %14216 = vmatprep.mubr.f32.mxu1 %v20263_v21  ;;  %v5315_v2 = vadd.f32 %v18871_v46, %v4975_v23  ;;  %v7880_v46 = vld [vmem:[#allocation2 + $0xad0] sm:$0xff]  ;;  %v19066_v10 = vpop.f32.mrf.mxu0 }
 0x5f0   :  { %14295 = vmatprep.subr.mxu1 %v7884_v39  ;;  %v13549_v9 = vpop.f32.mrf.mxu1  ;;  %v7876_v19 = vld [vmem:[#allocation2 + $0xab0] sm:$0xff] }
 0x5f1   :  { %14296 = vmatpush3.msra.mxu1 %v7884_v39  ;;  %v19037_v11 = vadd.f32 %v13549_v9, %v18867_v49  ;;  %v7875_v39 = vld [vmem:[#allocation2 + $0xaa8] sm:$0xff]  ;;  %v19076_v21 = vpop.f32.mrf.mxu0  ;;  %v7873_v9 = vld [vmem:[#allocation2 + $0xa98] sm:$0xff] }
 0x5f2   :  { %14217 = vmatmul.mubr.f32.gmra.mxu1 %v20264_v43  ;;  %14297 = vmatprep.subr.mxu1 %v7883_v42  ;;  %v5592_v56 = vpop.f32.mrf.mxu1  ;;  %v20274_v43 = vld [vmem:[#allocation104_spill] sm:$0xff] }
 0x5f3   :  { %14298 = vmatpush3.msra.mxu1 %v7883_v42  ;;  %14219 = vmatprep.mubr.f32.mxu1 %v20265_v5  ;;  %v19043_v26 = vadd.f32 %v5592_v56, %v5315_v2  ;;  %v20273_v42 = vld [vmem:[#allocation18_spill] sm:$0xff]  ;;  %v19083_v5 = vpop.f32.mrf.mxu0 }
 0x5f4   :  { %14299 = vmatprep.subr.mxu1 %v7882_v18 }
 0x5f5   :  { %14300 = vmatpush3.msra.mxu1 %v7882_v18  ;;  %v13552_v51 = vpop.f32.mrf.mxu1  ;;  %v7872_v18 = vld [vmem:[#allocation2 + $0xa90] sm:$0xff] }
 0x5f6   :  { %14220 = vmatmul.mubr.f32.gmra.mxu1 %v20266_v45  ;;  %14301 = vmatprep.subr.mxu1 %v7881_v55  ;;  %v19047_v49 = vadd.f32 %v13552_v51, %v18889_v27  ;;  %v20269_v27 = vld [vmem:[#allocation17_spill] sm:$0xff] }
 0x5f7   :  { %14302 = vmatpush3.msra.mxu1 %v7881_v55  ;;  %14222 = vmatprep.mubr.f32.mxu1 %v20267_v53  ;;  %v5602_v47 = vpop.f32.mrf.mxu1  ;;  %v20275_v55 = vld [vmem:[#allocation19_spill] sm:$0xff]  ;;  %v7870_v45 = vld [vmem:[#allocation2 + $0xa80] sm:$0xff]  ;;  %v20276_v53 = vld [vmem:[#allocation122_spill] sm:$0xff] }
 0x5f8   :  { %14303 = vmatprep.subr.mxu1 %v7880_v46  ;;  %v19053_v59 = vadd.f32 %v5602_v47, %v18900_v30 }
 0x5f9   :  { %14304 = vmatpush3.msra.mxu1 %v7880_v46  ;;  %v7871_v46 = vld [vmem:[#allocation2 + $0xa88] sm:$0xff] }
 0x5fa   :  { %14223 = vmatmul.mubr.f32.gmra.mxu1 %v20268_v32  ;;  %14305 = vmatprep.subr.mxu1 %v7879_v13  ;;  %v13555_v4 = vpop.f32.mrf.mxu1 }
 0x5fb   :  { %14306 = vmatpush3.msra.mxu1 %v7879_v13  ;;  %14225 = vmatprep.mubr.f32.mxu1 %v20269_v27  ;;  %v19060_v22 = vadd.f32 %v13555_v4, %v18917_v44  ;;  %v19093_v13 = vpop.f32.mrf.mxu0  ;;  %v8224_v4 = vld [vmem:[#allocation2 + $0xb70] sm:$0xff] }
 0x5fc   :  { %14307 = vmatprep.subr.mxu1 %v7878_v54  ;;  %v5612_v60 = vpop.f32.mrf.mxu1 }
 0x5fd   :  { %14308 = vmatpush3.msra.mxu1 %v7878_v54  ;;  %v19063_v30 = vadd.f32 %v5612_v60, %v18923_v63  ;;  %v20272_v63 = vld [vmem:[#allocation102_spill] sm:$0xff]  ;;  %v20277_v54 = vld [vmem:[#allocation108_spill] sm:$0xff] }
 0x5fe   :  { %14226 = vmatmul.mubr.f32.gmra.mxu1 %v20270_v12  ;;  %14309 = vmatprep.subr.mxu1 %v7877_v14  ;;  %v8223_v12 = vld [vmem:[#allocation2 + $0xb68] sm:$0xff] }
 0x5ff   :  { %14310 = vmatpush3.msra.mxu1 %v7877_v14  ;;  %14228 = vmatprep.mubr.f32.mxu1 %v20271_v20  ;;  %v13558_v28 = vpop.f32.mrf.mxu1  ;;  %v20278_v14 = vld [vmem:[#allocation106_spill] sm:$0xff] }
 0x600   :  { %14311 = vmatprep.subr.mxu1 %v7876_v19  ;;  %v19070_v44 = vadd.f32 %v13558_v28, %v18940_v7  ;;  %v8222_v28 = vld [vmem:[#allocation2 + $0xb60] sm:$0xff] }
 0x601   :  { %14312 = vmatpush3.msra.mxu1 %v7876_v19  ;;  %v5622_v40 = vpop.f32.mrf.mxu1  ;;  %v20279_v19 = vld [vmem:[#allocation51_spill] sm:$0xff] }
 0x602   :  { %14229 = vmatmul.mubr.f32.gmra.mxu1 %v20272_v63  ;;  %14313 = vmatprep.subr.mxu1 %v7875_v39  ;;  %v19074_v23 = vadd.f32 %v5622_v40, %v18950_v15  ;;  %v20280_v40 = vld [vmem:[#allocation83_spill] sm:$0xff]  ;;  %v20281_v63 = vld [vmem:[#allocation109_spill] sm:$0xff] }
 0x603   :  { %14314 = vmatpush3.msra.mxu1 %v7875_v39  ;;  %14231 = vmatprep.mubr.f32.mxu1 %v20273_v42  ;;  %v8221_v42 = vld [vmem:[#allocation2 + $0xb58] sm:$0xff] }
 0x604   :  { %14315 = vmatprep.subr.mxu1 %v7874_v36  ;;  %v13561_v2 = vpop.f32.mrf.mxu1 }
 0x605   :  { %14316 = vmatpush3.msra.mxu1 %v7874_v36  ;;  %v19080_v7 = vadd.f32 %v13561_v2, %v18968_v58  ;;  %v8220_v2 = vld [vmem:[#allocation2 + $0xb50] sm:$0xff] }
 0x606   :  { %14232 = vmatmul.mubr.f32.gmra.mxu1 %v20274_v43  ;;  %14317 = vmatprep.subr.mxu1 %v7873_v9  ;;  %v5632_v56 = vpop.f32.mrf.mxu1  ;;  %v20282_v43 = vld [vmem:[#allocation110_spill] sm:$0xff] }
 0x607   :  { %14318 = vmatpush3.msra.mxu1 %v7873_v9  ;;  %v19086_v15 = vadd.f32 %v5632_v56, %v18974_v3  ;;  %14234 = vmatprep.mubr.f32.mxu1 %v20275_v55  ;;  %v8225_v3 = vld [vmem:[#allocation2 + $0xb78] sm:$0xff] }
 0x608   :  { %14319 = vmatprep.subr.mxu1 %v7872_v18  ;;  %v20283_v55 = vld [vmem:[#allocation112_spill] sm:$0xff] }
 0x609   :  { %14320 = vmatpush3.msra.mxu1 %v7872_v18  ;;  %v13564_v51 = vpop.f32.mrf.mxu1 }
 0x60a   :  { %v19090_v58 = vadd.f32 %v13564_v51, %v18989_v48  ;;  %14235 = vmatmul.mubr.f32.gmra.mxu1 %v20276_v53  ;;  %14321 = vmatprep.subr.mxu1 %v7871_v46  ;;  %v19100_v48 = vpop.f32.mrf.mxu0 }
 0x60b   :  { %14322 = vmatpush3.msra.mxu1 %v7871_v46  ;;  %v5642_v47 = vpop.f32.mrf.mxu1  ;;  %14325 = vmatprep.mubr.f32.mxu1 %v20277_v54  ;;  %v8219_v46 = vld [vmem:[#allocation2 + $0xb48] sm:$0xff] }
 0x60c   :  { %v19097_v32 = vadd.f32 %v5642_v47, %v18998_v52  ;;  %14323 = vmatprep.subr.mxu1 %v7870_v45  ;;  %v19110_v36 = vpop.f32.mrf.mxu0  ;;  %v20284_v47 = vld [vmem:[#allocation21_spill] sm:$0xff] }
 0x60d   :  { %14324 = vmatpush3.msra.mxu1 %v7870_v45  ;;  %v8218_v45 = vld [vmem:[#allocation2 + $0xb40] sm:$0xff] }
 0x60e   :  { %v13655_v27 = vpop.f32.mrf.mxu1  ;;  %14326 = vmatmul.mubr.f32.vlgmr.msra.gmra.mxu1 %v20278_v14  ;;  %14405 = vmatprep.subr.mxu1 %v8225_v3  ;;  %v19120_v56 = vpop.f32.mrf.mxu0  ;;  %v8216_v14 = vld [vmem:[#allocation2 + $0xb30] sm:$0xff] }
 0x60f   :  { %v19103_v60 = vadd.f32 %v13655_v27, %v19011_v35  ;;  %14406 = vmatpush3.msra.mxu1 %v8225_v3  ;;  %14328 = vmatprep.mubr.f32.mxu1 %v20279_v19  ;;  %v20285_v3 = vld [vmem:[#allocation114_spill] sm:$0xff] }
 0x610   :  { %v5912_v20 = vpop.f32.mrf.mxu1  ;;  %14407 = vmatprep.subr.mxu1 %v8224_v4  ;;  %v19130_v54 = vpop.f32.mrf.mxu0 }
 0x611   :  { %v19107_v52 = vadd.f32 %v5912_v20, %v19015_v17  ;;  %14408 = vmatpush3.msra.mxu1 %v8224_v4  ;;  %v8217_v4 = vld [vmem:[#allocation2 + $0xb38] sm:$0xff] }
 0x612   :  { %v13658_v39 = vpop.f32.mrf.mxu1  ;;  %14329 = vmatmul.mubr.f32.gmra.mxu1 %v20280_v40  ;;  %14409 = vmatprep.subr.mxu1 %v8223_v12  ;;  %v19140_v20 = vpop.f32.mrf.mxu0 }
 0x613   :  { %v19113_v35 = vadd.f32 %v13658_v39, %v19025_v25  ;;  %14410 = vmatpush3.msra.mxu1 %v8223_v12  ;;  %14331 = vmatprep.mubr.f32.mxu1 %v20281_v63  ;;  %v20286_v12 = vld [vmem:[#allocation113_spill] sm:$0xff]  ;;  %v8215_v39 = vld [vmem:[#allocation2 + $0xb28] sm:$0xff] }
 0x614   :  { %v5922_v9 = vpop.f32.mrf.mxu1  ;;  %14411 = vmatprep.subr.mxu1 %v8222_v28  ;;  %v8214_v63 = vld [vmem:[#allocation2 + $0xb20] sm:$0xff] }
 0x615   :  { %v19117_v17 = vadd.f32 %v5922_v9, %v19029_v33  ;;  %14412 = vmatpush3.msra.mxu1 %v8222_v28  ;;  %v20287_v28 = vld [vmem:[#allocation48_spill] sm:$0xff]  ;;  %v20288_v9 = vld [vmem:[#allocation123_spill] sm:$0xff] }
 0x616   :  { %v13661_v18 = vpop.f32.mrf.mxu1  ;;  %14332 = vmatmul.mubr.f32.gmra.mxu1 %v20282_v43  ;;  %14413 = vmatprep.subr.mxu1 %v8221_v42 }
 0x617   :  { %v19123_v25 = vadd.f32 %v13661_v18, %v19037_v11  ;;  %14414 = vmatpush3.msra.mxu1 %v8221_v42  ;;  %14334 = vmatprep.mubr.f32.mxu1 %v20283_v55  ;;  %v8213_v18 = vld [vmem:[#allocation2 + $0xb18] sm:$0xff]  ;;  %v8212_v55 = vld [vmem:[#allocation2 + $0xb10] sm:$0xff] }
 0x618   :  { %v5932_v51 = vpop.f32.mrf.mxu1  ;;  %14415 = vmatprep.subr.mxu1 %v8220_v2 }
 0x619   :  { %v19127_v33 = vadd.f32 %v5932_v51, %v19043_v26  ;;  %14416 = vmatpush3.msra.mxu1 %v8220_v2  ;;  %v19150_v2 = vpop.f32.mrf.mxu0  ;;  %v20289_v51 = vld [vmem:[#allocation61_spill] sm:$0xff] }
 0x61a   :  { %v13664_v53 = vpop.f32.mrf.mxu1  ;;  %14335 = vmatmul.mubr.f32.gmra.mxu1 %v20284_v47  ;;  %14417 = vmatprep.subr.mxu1 %v8219_v46  ;;  %v8210_v47 = vld [vmem:[#allocation2 + $0xb00] sm:$0xff] }
 0x61b   :  { %v19133_v11 = vadd.f32 %v13664_v53, %v19047_v49  ;;  %14418 = vmatpush3.msra.mxu1 %v8219_v46  ;;  %14337 = vmatprep.mubr.f32.mxu1 %v20285_v3 }
 0x61c   :  { %v5942_v27 = vpop.f32.mrf.mxu1  ;;  %14419 = vmatprep.subr.mxu1 %v8218_v45 }
 0x61d   :  { %v19137_v26 = vadd.f32 %v5942_v27, %v19053_v59  ;;  %14420 = vmatpush3.msra.mxu1 %v8218_v45  ;;  %v19160_v45 = vpop.f32.mrf.mxu0 }
 0x61e   :  { %v13667_v19 = vpop.f32.mrf.mxu1  ;;  %14338 = vmatmul.mubr.f32.gmra.mxu1 %v20286_v12  ;;  %14421 = vmatprep.subr.mxu1 %v8217_v4 }
 0x61f   :  { %v19143_v49 = vadd.f32 %v13667_v19, %v19060_v22  ;;  %14422 = vmatpush3.msra.mxu1 %v8217_v4  ;;  %14340 = vmatprep.mubr.f32.mxu1 %v20287_v28  ;;  %v19170_v4 = vpop.f32.mrf.mxu0  ;;  %v8562_v28 = vld [vmem:[#allocation2 + $0xbe0] sm:$0xff] }
 0x620   :  { %v5952_v40 = vpop.f32.mrf.mxu1  ;;  %14423 = vmatprep.subr.mxu1 %v8216_v14 }
 0x621   :  { %v19147_v59 = vadd.f32 %v5952_v40, %v19063_v30  ;;  %14424 = vmatpush3.msra.mxu1 %v8216_v14  ;;  %v8564_v14 = vld [vmem:[#allocation2 + $0xbf0] sm:$0xff] }
 0x622   :  { %v13670_v42 = vpop.f32.mrf.mxu1  ;;  %14341 = vmatmul.mubr.f32.gmra.mxu1 %v20288_v9  ;;  %14425 = vmatprep.subr.mxu1 %v8215_v39 }
 0x623   :  { %v19153_v22 = vadd.f32 %v13670_v42, %v19070_v44  ;;  %14426 = vmatpush3.msra.mxu1 %v8215_v39  ;;  %14343 = vmatprep.mubr.f32.mxu1 %v18851_v61  ;;  %v8211_v61 = vld [vmem:[#allocation2 + $0xb08] sm:$0xff] }
 0x624   :  { %v5962_v43 = vpop.f32.mrf.mxu1  ;;  %14427 = vmatprep.subr.mxu1 %v8214_v63 }
 0x625   :  { %v19157_v30 = vadd.f32 %v5962_v43, %v19074_v23  ;;  %14428 = vmatpush3.msra.mxu1 %v8214_v63  ;;  %v8560_v63 = vld [vmem:[#allocation2 + $0xbd0] sm:$0xff] }
 0x626   :  { %v13673_v46 = vpop.f32.mrf.mxu1  ;;  %14344 = vmatmul.mubr.f32.gmra.mxu1 %v20289_v51  ;;  %14429 = vmatprep.subr.mxu1 %v8213_v18 }
 0x627   :  { %v19163_v44 = vadd.f32 %v13673_v46, %v19080_v7  ;;  %14430 = vmatpush3.msra.mxu1 %v8213_v18  ;;  %14346 = vmatprep.mubr.f32.mxu1 %v18878_v57  ;;  %v8565_v57 = vld [vmem:[#allocation2 + $0xbf8] sm:$0xff]  ;;  %v8558_v18 = vld [vmem:[#allocation2 + $0xbc0] sm:$0xff]  ;;  %v8556_v46 = vld [vmem:[#allocation2 + $0xbb0] sm:$0xff] }
 0x628   :  { %v5972_v53 = vpop.f32.mrf.mxu1  ;;  %14431 = vmatprep.subr.mxu1 %v8212_v55 }
 0x629   :  { %v19167_v23 = vadd.f32 %v5972_v53, %v19086_v15  ;;  %14432 = vmatpush3.msra.mxu1 %v8212_v55  ;;  %v8554_v53 = vld [vmem:[#allocation2 + $0xba0] sm:$0xff] }
 0x62a   :  { %v13676_v3 = vpop.f32.mrf.mxu1  ;;  %14347 = vmatmul.mubr.f32.gmra.mxu1 %v18861_v34  ;;  %14433 = vmatprep.subr.mxu1 %v8211_v61  ;;  %v19180_v34 = vpop.f32.mrf.mxu0 }
 0x62b   :  { %v19173_v7 = vadd.f32 %v13676_v3, %v19090_v58  ;;  %14434 = vmatpush3.msra.mxu1 %v8211_v61  ;;  %14437 = vmatprep.mubr.f32.mxu1 %v18911_v62  ;;  %v8563_v62 = vld [vmem:[#allocation2 + $0xbe8] sm:$0xff] }
 0x62c   :  { %v5982_v27 = vpop.f32.mrf.mxu1  ;;  %14435 = vmatprep.subr.mxu1 %v8210_v47 }
 0x62d   :  { %v19177_v15 = vadd.f32 %v5982_v27, %v19097_v32  ;;  %14436 = vmatpush3.msra.mxu1 %v8210_v47 }
 0x62e   :  { %v13767_v19 = vpop.f32.mrf.mxu1  ;;  %14438 = vmatmul.mubr.f32.vlgmr.msra.gmra.mxu1 %v18895_v6  ;;  %14517 = vmatprep.subr.mxu1 %v8565_v57  ;;  %v19190_v6 = vpop.f32.mrf.mxu0 }
 0x62f   :  { %v19183_v58 = vadd.f32 %v13767_v19, %v19103_v60  ;;  %14518 = vmatpush3.msra.mxu1 %v8565_v57  ;;  %14440 = vmatprep.mubr.f32.mxu1 %v18945_v16  ;;  %v8561_v16 = vld [vmem:[#allocation2 + $0xbd8] sm:$0xff]  ;;  %v8552_v57 = vld [vmem:[#allocation2 + $0xb90] sm:$0xff]  ;;  %v8550_v19 = vld [vmem:[#allocation2 + $0xb80] sm:$0xff] }
 0x630   :  { %v6252_v12 = vpop.f32.mrf.mxu1  ;;  %14519 = vmatprep.subr.mxu1 %v8564_v14 }
 0x631   :  { %v19187_v32 = vadd.f32 %v6252_v12, %v19107_v52  ;;  %14520 = vmatpush3.msra.mxu1 %v8564_v14 }
 0x632   :  { %v13770_v39 = vpop.f32.mrf.mxu1  ;;  %14441 = vmatmul.mubr.f32.gmra.mxu1 %v18927_v41  ;;  %14521 = vmatprep.subr.mxu1 %v8563_v62  ;;  %v19200_v41 = vpop.f32.mrf.mxu0 }
 0x633   :  { %v19193_v60 = vadd.f32 %v13770_v39, %v19113_v35  ;;  %14522 = vmatpush3.msra.mxu1 %v8563_v62  ;;  %14443 = vmatprep.mubr.f32.mxu1 %v18978_v31  ;;  %v8559_v31 = vld [vmem:[#allocation2 + $0xbc8] sm:$0xff] }
 0x634   :  { %v6262_v40 = vpop.f32.mrf.mxu1  ;;  %14523 = vmatprep.subr.mxu1 %v8562_v28 }
 0x635   :  { %v19197_v52 = vadd.f32 %v6262_v40, %v19117_v17  ;;  %14524 = vmatpush3.msra.mxu1 %v8562_v28  ;;  %v8904_v28 = vld [vmem:[#allocation2 + $0xc70] sm:$0xff]  ;;  %v8902_v40 = vld [vmem:[#allocation2 + $0xc60] sm:$0xff] }
 0x636   :  { %v13773_v42 = vpop.f32.mrf.mxu1  ;;  %14444 = vmatmul.mubr.f32.gmra.mxu1 %v18962_v50  ;;  %14525 = vmatprep.subr.mxu1 %v8561_v16  ;;  %v19210_v50 = vpop.f32.mrf.mxu0 }
 0x637   :  { %v19203_v35 = vadd.f32 %v13773_v42, %v19123_v25  ;;  %14526 = vmatpush3.msra.mxu1 %v8561_v16  ;;  %14446 = vmatprep.mubr.f32.mxu1 %v19005_v24  ;;  %v8557_v24 = vld [vmem:[#allocation2 + $0xbb8] sm:$0xff] }
 0x638   :  { %v6272_v9 = vpop.f32.mrf.mxu1  ;;  %14527 = vmatprep.subr.mxu1 %v8560_v63 }
 0x639   :  { %v19207_v17 = vadd.f32 %v6272_v9, %v19127_v33  ;;  %14528 = vmatpush3.msra.mxu1 %v8560_v63 }
 0x63a   :  { %v13776_v43 = vpop.f32.mrf.mxu1  ;;  %14447 = vmatmul.mubr.f32.gmra.mxu1 %v18993_v38  ;;  %14529 = vmatprep.subr.mxu1 %v8559_v31  ;;  %v19220_v38 = vpop.f32.mrf.mxu0 }
 0x63b   :  { %v19213_v25 = vadd.f32 %v13776_v43, %v19133_v11  ;;  %14530 = vmatpush3.msra.mxu1 %v8559_v31  ;;  %14449 = vmatprep.mubr.f32.mxu1 %v19031_v0  ;;  %v8555_v0 = vld [vmem:[#allocation2 + $0xba8] sm:$0xff]  ;;  %v8900_v31 = vld [vmem:[#allocation2 + $0xc50] sm:$0xff]  ;;  %v8898_v43 = vld [vmem:[#allocation2 + $0xc40] sm:$0xff] }
 0x63c   :  { %v6282_v55 = vpop.f32.mrf.mxu1  ;;  %14531 = vmatprep.subr.mxu1 %v8558_v18 }
 0x63d   :  { %v19217_v33 = vadd.f32 %v6282_v55, %v19137_v26  ;;  %14532 = vmatpush3.msra.mxu1 %v8558_v18 }
 0x63e   :  { %v13779_v51 = vpop.f32.mrf.mxu1  ;;  %14450 = vmatmul.mubr.f32.gmra.mxu1 %v19019_v37  ;;  %14533 = vmatprep.subr.mxu1 %v8557_v24  ;;  %v19230_v37 = vpop.f32.mrf.mxu0 }
 0x63f   :  { %v19223_v11 = vadd.f32 %v13779_v51, %v19143_v49  ;;  %14534 = vmatpush3.msra.mxu1 %v8557_v24  ;;  %14452 = vmatprep.mubr.f32.mxu1 %v19049_v29  ;;  %v8553_v29 = vld [vmem:[#allocation2 + $0xb98] sm:$0xff] }
 0x640   :  { %v6292_v61 = vpop.f32.mrf.mxu1  ;;  %14535 = vmatprep.subr.mxu1 %v8556_v46 }
 0x641   :  { %v19227_v26 = vadd.f32 %v6292_v61, %v19147_v59  ;;  %14536 = vmatpush3.msra.mxu1 %v8556_v46  ;;  %v8896_v46 = vld [vmem:[#allocation2 + $0xc30] sm:$0xff] }
 0x642   :  { %v13782_v47 = vpop.f32.mrf.mxu1  ;;  %14453 = vmatmul.mubr.f32.gmra.mxu1 %v19040_v1  ;;  %14537 = vmatprep.subr.mxu1 %v8555_v0  ;;  %v19240_v1 = vpop.f32.mrf.mxu0 }
 0x643   :  { %v19233_v49 = vadd.f32 %v13782_v47, %v19153_v22  ;;  %14538 = vmatpush3.msra.mxu1 %v8555_v0  ;;  %14455 = vmatprep.mubr.f32.mxu1 %v19066_v10  ;;  %v8551_v10 = vld [vmem:[#allocation2 + $0xb88] sm:$0xff] }
 0x644   :  { %v6302_v3 = vpop.f32.mrf.mxu1  ;;  %14539 = vmatprep.subr.mxu1 %v8554_v53 }
 0x645   :  { %v19237_v59 = vadd.f32 %v6302_v3, %v19157_v30  ;;  %14540 = vmatpush3.msra.mxu1 %v8554_v53 }
 0x646   :  { %v13785_v27 = vpop.f32.mrf.mxu1  ;;  %14456 = vmatmul.mubr.f32.gmra.mxu1 %v19056_v8  ;;  %14541 = vmatprep.subr.mxu1 %v8553_v29  ;;  %v19250_v8 = vpop.f32.mrf.mxu0 }
 0x647   :  { %v19243_v22 = vadd.f32 %v13785_v27, %v19163_v44  ;;  %14542 = vmatpush3.msra.mxu1 %v8553_v29  ;;  %14458 = vmatprep.mubr.f32.mxu1 %v19083_v5  ;;  %v8905_v5 = vld [vmem:[#allocation2 + $0xc78] sm:$0xff] }
 0x648   :  { %v6312_v14 = vpop.f32.mrf.mxu1  ;;  %14543 = vmatprep.subr.mxu1 %v8552_v57 }
 0x649   :  { %v19247_v30 = vadd.f32 %v6312_v14, %v19167_v23  ;;  %14544 = vmatpush3.msra.mxu1 %v8552_v57 }
 0x64a   :  { %v13788_v62 = vpop.f32.mrf.mxu1  ;;  %14459 = vmatmul.mubr.f32.gmra.mxu1 %v19076_v21  ;;  %14545 = vmatprep.subr.mxu1 %v8551_v10  ;;  %v19260_v21 = vpop.f32.mrf.mxu0 }
 0x64b   :  { %v19253_v44 = vadd.f32 %v13788_v62, %v19173_v7  ;;  %14546 = vmatpush3.msra.mxu1 %v8551_v10  ;;  %14549 = vmatprep.mubr.f32.mxu1 %v19100_v48  ;;  %v8903_v48 = vld [vmem:[#allocation2 + $0xc68] sm:$0xff] }
 0x64c   :  { %v6322_v12 = vpop.f32.mrf.mxu1  ;;  %14547 = vmatprep.subr.mxu1 %v8550_v19 }
 0x64d   :  { %v19257_v23 = vadd.f32 %v6322_v12, %v19177_v15  ;;  %14548 = vmatpush3.msra.mxu1 %v8550_v19 }
 0x64e   :  { %v13879_v39 = vpop.f32.mrf.mxu1  ;;  %14550 = vmatmul.mubr.f32.vlgmr.msra.gmra.mxu1 %v19093_v13  ;;  %14629 = vmatprep.subr.mxu1 %v8905_v5  ;;  %v19270_v13 = vpop.f32.mrf.mxu0 }
 0x64f   :  { %v19263_v7 = vadd.f32 %v13879_v39, %v19183_v58  ;;  %14630 = vmatpush3.msra.mxu1 %v8905_v5  ;;  %14552 = vmatprep.mubr.f32.mxu1 %v19120_v56  ;;  %v8901_v56 = vld [vmem:[#allocation2 + $0xc58] sm:$0xff] }
 0x650   :  { %v6592_v16 = vpop.f32.mrf.mxu1  ;;  %14631 = vmatprep.subr.mxu1 %v8904_v28 }
 0x651   :  { %v19267_v15 = vadd.f32 %v6592_v16, %v19187_v32  ;;  %14632 = vmatpush3.msra.mxu1 %v8904_v28 }
 0x652   :  { %v13882_v63 = vpop.f32.mrf.mxu1  ;;  %14553 = vmatmul.mubr.f32.gmra.mxu1 %v19110_v36  ;;  %14633 = vmatprep.subr.mxu1 %v8903_v48  ;;  %v19280_v36 = vpop.f32.mrf.mxu0 }
 0x653   :  { %v19273_v58 = vadd.f32 %v13882_v63, %v19193_v60  ;;  %14634 = vmatpush3.msra.mxu1 %v8903_v48  ;;  %14555 = vmatprep.mubr.f32.mxu1 %v19140_v20  ;;  %v8899_v20 = vld [vmem:[#allocation2 + $0xc48] sm:$0xff] }
 0x654   :  { %v6602_v42 = vpop.f32.mrf.mxu1  ;;  %14635 = vmatprep.subr.mxu1 %v8902_v40 }
 0x655   :  { %v19277_v32 = vadd.f32 %v6602_v42, %v19197_v52  ;;  %14636 = vmatpush3.msra.mxu1 %v8902_v40 }
 0x656   :  { %v13885_v9 = vpop.f32.mrf.mxu1  ;;  %14556 = vmatmul.mubr.f32.gmra.mxu1 %v19130_v54  ;;  %14637 = vmatprep.subr.mxu1 %v8901_v56  ;;  %v19290_v54 = vpop.f32.mrf.mxu0 }
 0x657   :  { %v19283_v60 = vadd.f32 %v13885_v9, %v19203_v35  ;;  %14638 = vmatpush3.msra.mxu1 %v8901_v56  ;;  %14558 = vmatprep.mubr.f32.mxu1 %v19160_v45  ;;  %v8897_v45 = vld [vmem:[#allocation2 + $0xc38] sm:$0xff] }
 0x658   :  { %v6612_v18 = vpop.f32.mrf.mxu1  ;;  %14639 = vmatprep.subr.mxu1 %v8900_v31 }
 0x659   :  { %v19287_v52 = vadd.f32 %v6612_v18, %v19207_v17  ;;  %14640 = vmatpush3.msra.mxu1 %v8900_v31 }
 0x65a   :  { %v13888_v24 = vpop.f32.mrf.mxu1  ;;  %14559 = vmatmul.mubr.f32.gmra.mxu1 %v19150_v2  ;;  %14641 = vmatprep.subr.mxu1 %v8899_v20  ;;  %v8830_v2 = vpop.f32.mrf.mxu0 }
 0x65b   :  { %v19293_v35 = vadd.f32 %v13888_v24, %v19213_v25  ;;  %14642 = vmatpush3.msra.mxu1 %v8899_v20  ;;  %14561 = vmatprep.mubr.f32.mxu1 %v19180_v34  ;;  %v8895_v34 = vld [vmem:[#allocation2 + $0xc28] sm:$0xff] }
 0x65c   :  { %v6622_v55 = vpop.f32.mrf.mxu1  ;;  %14643 = vmatprep.subr.mxu1 %v8898_v43 }
 0x65d   :  { %v19297_v17 = vadd.f32 %v6622_v55, %v19217_v33  ;;  %14644 = vmatpush3.msra.mxu1 %v8898_v43  ;;  %v8894_v33 = vld [vmem:[#allocation2 + $0xc20] sm:$0xff] }
 0x65e   :  { %v13891_v51 = vpop.f32.mrf.mxu1  ;;  %14562 = vmatmul.mubr.f32.gmra.mxu1 %v19170_v4  ;;  %14645 = vmatprep.subr.mxu1 %v8897_v45  ;;  %v14616_v4 = vpop.f32.mrf.mxu0 }
 0x65f   :  { %v19301_v0 = vadd.f32 %v13891_v51, %v19223_v11  ;;  %14646 = vmatpush3.msra.mxu1 %v8897_v45  ;;  %14564 = vmatprep.mubr.f32.mxu1 %v19200_v41  ;;  %v8893_v41 = vld [vmem:[#allocation2 + $0xc18] sm:$0xff] }
 0x660   :  { %v6632_v25 = vpop.f32.mrf.mxu1  ;;  %14647 = vmatprep.subr.mxu1 %v8896_v46 }
 0x661   :  { %v19305_v61 = vadd.f32 %v6632_v25, %v19227_v26  ;;  %14648 = vmatpush3.msra.mxu1 %v8896_v46  ;;  %v8892_v26 = vld [vmem:[#allocation2 + $0xc10] sm:$0xff] }
 0x662   :  { %v13894_v53 = vpop.f32.mrf.mxu1  ;;  %14565 = vmatmul.mubr.f32.gmra.mxu1 %v19190_v6  ;;  %14649 = vmatprep.subr.mxu1 %v8895_v34  ;;  %v8840_v6 = vpop.f32.mrf.mxu0 }
 0x663   :  { %v19309_v47 = vadd.f32 %v13894_v53, %v19233_v49  ;;  %14650 = vmatpush3.msra.mxu1 %v8895_v34  ;;  %14567 = vmatprep.mubr.f32.mxu1 %v19220_v38  ;;  %v8891_v38 = vld [vmem:[#allocation2 + $0xc08] sm:$0xff] }
 0x664   :  { %v6642_v11 = vpop.f32.mrf.mxu1  ;;  %14651 = vmatprep.subr.mxu1 %v8894_v33 }
 0x665   :  { %v19313_v29 = vadd.f32 %v6642_v11, %v19237_v59  ;;  %14652 = vmatpush3.msra.mxu1 %v8894_v33  ;;  %v8890_v59 = vld [vmem:[#allocation2 + $0xc00] sm:$0xff] }
 0x666   :  { %v13897_v3 = vpop.f32.mrf.mxu1  ;;  %14568 = vmatmul.mubr.f32.gmra.mxu1 %v19210_v50  ;;  %14653 = vmatprep.subr.mxu1 %v8893_v41  ;;  %v14619_v50 = vpop.f32.mrf.mxu0 }
 0x667   :  { %v19317_v57 = vadd.f32 %v13897_v3, %v19243_v22  ;;  %14654 = vmatpush3.msra.mxu1 %v8893_v41  ;;  %14570 = vmatprep.mubr.f32.mxu1 %v19240_v1 }
 0x668   :  { %v6652_v49 = vpop.f32.mrf.mxu1  ;;  %14655 = vmatprep.subr.mxu1 %v8892_v26 }
 0x669   :  { %v6683_v27 = vadd.f32 %v6652_v49, %v19247_v30  ;;  %14656 = vmatpush3.msra.mxu1 %v8892_v26  ;;  %v8850_v30 = vpop.f32.mrf.mxu0 }
 0x66a   :  { %v13900_v10 = vpop.f32.mrf.mxu1  ;;  %14571 = vmatmul.mubr.f32.gmra.mxu1 %v19230_v37  ;;  %14657 = vmatprep.subr.mxu1 %v8891_v38 }
 0x66b   :  { %v6686_v14 = vadd.f32 %v13900_v10, %v19253_v44  ;;  %14658 = vmatpush3.msra.mxu1 %v8891_v38  ;;  %14661 = vmatprep.mubr.f32.mxu1 %v19260_v21  ;;  %v14622_v44 = vpop.f32.mrf.mxu0 }
 0x66c   :  { %v6662_v22 = vpop.f32.mrf.mxu1  ;;  %14659 = vmatprep.subr.mxu1 %v8890_v59 }
 0x66d   :  { %v6685_v1 = vadd.f32 %v6662_v22, %v19257_v23  ;;  %14660 = vmatpush3.msra.mxu1 %v8890_v59  ;;  %v8860_v23 = vpop.f32.mrf.mxu0 }
 0x66e   :  { %v13991_v19 = vpop.f32.mrf.mxu1  ;;  %14662 = vmatmul.mubr.f32.vlgmr.msra.gmra.mxu1 %v19250_v8 }
 0x66f   :  { %v7012_v62 = vadd.f32 %v13991_v19, %v19263_v7  ;;  %14664 = vmatprep.mubr.f32.mxu1 %v19280_v36  ;;  %v14625_v16 = vpop.f32.mrf.mxu0 }
 0x670   :  { %v6932_v37 = vpop.f32.mrf.mxu1 }
 0x671   :  { %v8870_v56 = vpop.f32.mrf.mxu0 }
 0x672   :  { %v13994_v5 = vpop.f32.mrf.mxu1  ;;  %14665 = vmatmul.mubr.f32.gmra.mxu1 %v19270_v13 }
 0x673   :  { %v7014_v12 = vadd.f32 %v13994_v5, %v19273_v58  ;;  %14667 = vmatprep.mubr.f32.mxu1 %v8830_v2  ;;  %v14628_v9 = vpop.f32.mrf.mxu0 }
 0x674   :  { %v6942_v28 = vpop.f32.mrf.mxu1 }
 0x675   :  { %v7013_v53 = vadd.f32 %v6942_v28, %v19277_v32 }
 0x676   :  { %v13997_v39 = vpop.f32.mrf.mxu1  ;;  %14668 = vmatmul.mubr.f32.gmra.mxu1 %v19290_v54 }
 0x677   :  { %v7016_v8 = vadd.f32 %v13997_v39, %v19283_v60  ;;  %14670 = vmatprep.mubr.f32.mxu1 %v8840_v6 }
 0x678   :  { %v6952_v21 = vpop.f32.mrf.mxu1 }
 0x679   :  { %v7015_v7 = vadd.f32 %v6952_v21, %v19287_v52  ;;  %v8880_v52 = vpop.f32.mrf.mxu0  ;;  %v9957_v21 = vld [vmem:[%s19789_s6 + $0xf8] sm:$0xff] }
 0x67a   :  { %v14000_v48 = vpop.f32.mrf.mxu1  ;;  %14671 = vmatmul.mubr.f32.gmra.mxu1 %v14616_v4 }
 0x67b   :  { %v7018_v40 = vadd.f32 %v14000_v48, %v19293_v35  ;;  %14673 = vmatprep.mubr.f32.mxu1 %v8850_v30 }
 0x67c   :  { %v6962_v63 = vpop.f32.mrf.mxu1 }
 0x67d   :  { %v7017_v13 = vadd.f32 %v6962_v63, %v19297_v17 }
 0x67e   :  { %v14003_v58 = vpop.f32.mrf.mxu1  ;;  %14674 = vmatmul.mubr.f32.gmra.mxu1 %v14619_v50 }
 0x67f   :  { %v7020_v42 = vadd.f32 %v14003_v58, %v19301_v0  ;;  %14676 = vmatprep.mubr.f32.mxu1 %v8860_v23  ;;  %v7011_v0 = vadd.f32 %v6932_v37, %v19267_v15  ;;  %v9955_v58 = vld [vmem:[%s19789_s6 + $0xe8] sm:$0xff] }
 0x680   :  { %v6972_v31 = vpop.f32.mrf.mxu1 }
 0x681   :  { %v7019_v36 = vadd.f32 %v6972_v31, %v19305_v61 }
 0x682   :  { %v14006_v60 = vpop.f32.mrf.mxu1  ;;  %14677 = vmatmul.mubr.f32.gmra.mxu1 %v14622_v44 }
 0x683   :  { %v7022_v20 = vadd.f32 %v14006_v60, %v19309_v47  ;;  %14679 = vmatprep.mubr.f32.mxu1 %v8870_v56  ;;  %v9108_v56 = vld [vmem:[%s19789_s6 + $0x70] sm:$0xff] }
 0x684   :  { %v6982_v18 = vpop.f32.mrf.mxu1 }
 0x685   :  { %v7021_v43 = vadd.f32 %v6982_v18, %v19313_v29  ;;  %v9953_v18 = vld [vmem:[%s19789_s6 + $0xd8] sm:$0xff] }
 0x686   :  { %v14009_v24 = vpop.f32.mrf.mxu1  ;;  %14680 = vmatmul.mubr.f32.gmra.mxu1 %v14625_v16  ;;  %v9956_v16 = vld [vmem:[%s19789_s6 + $0xf0] sm:$0xff] }
 0x687   :  { %v7024_v54 = vadd.f32 %v14009_v24, %v19317_v57  ;;  %14682 = vmatprep.mubr.f32.mxu1 %v8880_v52  ;;  %v9106_v52 = vld [vmem:[%s19789_s6 + $0x60] sm:$0xff] }
 0x688   :  { %v6992_v35 = vpop.f32.mrf.mxu1 }
 0x689   :  { %v7023_v45 = vadd.f32 %v6992_v35, %v6683_v27  ;;  %v9105_v35 = vld [vmem:[%s19789_s6 + $0x58] sm:$0xff] }
 0x68a   :  { %v14012_v55 = vpop.f32.mrf.mxu1  ;;  %14683 = vmatmul.mubr.f32.gmra.mxu1 %v14628_v9  ;;  %v9954_v9 = vld [vmem:[%s19789_s6 + $0xe0] sm:$0xff] }
 0x68b   :  { %v7026_v17 = vadd.f32 %v14012_v55, %v6686_v14 }
 0x68c   :  { %v7002_v46 = vpop.f32.mrf.mxu1 }
 0x68d   :  { %v7025_v51 = vadd.f32 %v7002_v46, %v6685_v1  ;;  %v9104_v46 = vld [vmem:[%s19789_s6 + $0x50] sm:$0xff] }
 0x68e   :  { %v14103_v2 = vpop.f32.mrf.mxu1 }
 0x68f   :  { %v7352_v34 = vadd.f32 %v14103_v2, %v7012_v62 }
 0x690   :  { %v7272_v25 = vpop.f32.mrf.mxu1 }
 0x691   :  { %v7351_v61 = vadd.f32 %v7272_v25, %v7011_v0  ;;  %v9950_v0 = vld [vmem:[%s19789_s6 + $0xc0] sm:$0xff] }
 0x692   :  { %v14106_v33 = vpop.f32.mrf.mxu1 }
 0x693   :  { %v7354_v4 = vadd.f32 %v14106_v33, %v7014_v12  ;;  %v9949_v33 = vld [vmem:[%s19789_s6 + $0xb8] sm:$0xff] }
 0x694   :  { %v7282_v47 = vpop.f32.mrf.mxu1 }
 0x695   :  { %v7353_v41 = vadd.f32 %v7282_v47, %v7013_v53  ;;  %v9102_v53 = vld [vmem:[%s19789_s6 + $0x40] sm:$0xff] }
 0x696   :  { %v14109_v11 = vpop.f32.mrf.mxu1 }
 0x697   :  { %v7356_v29 = vadd.f32 %v14109_v11, %v7016_v8  ;;  %v14894_v8 = vmov 0.0   ;;  %v9101_v11 = vld [vmem:[%s19789_s6 + $0x38] sm:$0xff] }
 0x698   :  { %v7292_v26 = vpop.f32.mrf.mxu1  ;;  %14685 = vmatprep.subr.mxu0 %v14894_v8  ;;  %14720 = vmatprep.subr.mxu1 %v14894_v8 }
 0x699   :  { %v7355_v3 = vadd.f32 %v7292_v26, %v7015_v7  ;;  %14686 = vmatpush3.msra.mxu0 %v9957_v21  ;;  %14717 = vmatprep.mubr.msk.f32.mxu0 %vm14895_vm0, %v14894_v8 }
 0x69a   :  { %v14112_v6 = vpop.f32.mrf.mxu1  ;;  %14687 = vmatprep.subr.mxu0 %v14894_v8  ;;  %14752 = vmatprep.mubr.msk.f32.mxu1 %vm14895_vm0, %v14894_v8 }
 0x69b   :  { %v19342_v57 = vadd.f32 %v14112_v6, %v7018_v40  ;;  %v9109_v40 = vld [vmem:[%s19789_s6 + $0x78] sm:$0xff]  ;;  %14688 = vmatpush3.msra.mxu0 %v9956_v16  ;;  %v9100_v6 = vld [vmem:[%s19789_s6 + $0x30] sm:$0xff] }
 0x69c   :  { %v7302_v38 = vpop.f32.mrf.mxu1  ;;  %14721 = vmatpush3.msra.mxu1 %v9109_v40  ;;  %14689 = vmatprep.subr.mxu0 %v14894_v8 }
 0x69d   :  { %v19344_v49 = vadd.f32 %v7302_v38, %v7017_v13  ;;  %14722 = vmatprep.subr.mxu1 %v14894_v8  ;;  %14690 = vmatpush3.msra.mxu0 %v9955_v58 }
 0x69e   :  { %v14115_v15 = vpop.f32.mrf.mxu1  ;;  %14723 = vmatpush3.msra.mxu1 %v9108_v56  ;;  %14691 = vmatprep.subr.mxu0 %v14894_v8 }
 0x69f   :  { %v19346_v27 = vadd.f32 %v14115_v15, %v7020_v42  ;;  %14724 = vmatprep.subr.mxu1 %v14894_v8  ;;  %14692 = vmatpush3.msra.mxu0 %v9954_v9  ;;  %v9099_v15 = vld [vmem:[%s19789_s6 + $0x28] sm:$0xff] }
 0x6a0   :  { %v7312_v59 = vpop.f32.mrf.mxu1  ;;  %14693 = vmatprep.subr.mxu0 %v14894_v8 }
 0x6a1   :  { %v19348_v10 = vadd.f32 %v7312_v59, %v7019_v36  ;;  %v9107_v36 = vld [vmem:[%s19789_s6 + $0x68] sm:$0xff]  ;;  %14694 = vmatpush3.msra.mxu0 %v9953_v18 }
 0x6a2   :  { %v14118_v32 = vpop.f32.mrf.mxu1  ;;  %14725 = vmatpush3.msra.mxu1 %v9107_v36  ;;  %14695 = vmatprep.subr.mxu0 %v14894_v8 }
 0x6a3   :  { %v19350_v50 = vadd.f32 %v14118_v32, %v7022_v20  ;;  %14726 = vmatprep.subr.mxu1 %v14894_v8  ;;  %v9098_v32 = vld [vmem:[%s19789_s6 + $0x20] sm:$0xff] }
 0x6a4   :  { %v7322_v14 = vpop.f32.mrf.mxu1  ;;  %14727 = vmatpush3.msra.mxu1 %v9106_v52 }
 0x6a5   :  { %v19352_v22 = vadd.f32 %v7322_v14, %v7021_v43  ;;  %14728 = vmatprep.subr.mxu1 %v14894_v8 }
 0x6a6   :  { %v14121_v1 = vpop.f32.mrf.mxu1  ;;  %14729 = vmatpush3.msra.mxu1 %v9105_v35 }
 0x6a7   :  { %v19354_v19 = vadd.f32 %v14121_v1, %v7024_v54  ;;  %v9952_v54 = vld [vmem:[%s19789_s6 + $0xd0] sm:$0xff]  ;;  %14730 = vmatprep.subr.mxu1 %v14894_v8  ;;  %v9097_v1 = vld [vmem:[%s19789_s6 + $0x18] sm:$0xff] }
 0x6a8   :  { %v7332_v30 = vpop.f32.mrf.mxu1  ;;  %14696 = vmatpush3.msra.mxu0 %v9952_v54  ;;  %14731 = vmatpush3.msra.mxu1 %v9104_v46 }
 0x6a9   :  { %v19356_v62 = vadd.f32 %v7332_v30, %v7023_v45  ;;  %14697 = vmatprep.subr.mxu0 %v14894_v8  ;;  %14732 = vmatprep.subr.mxu1 %v14894_v8 }
 0x6aa   :  { %v14124_v37 = vpop.f32.mrf.mxu1 }
 0x6ab   :  { %v19358_v5 = vadd.f32 %v14124_v37, %v7026_v17  ;;  %v9951_v17 = vld [vmem:[%s19789_s6 + $0xc8] sm:$0xff]  ;;  %v9096_v37 = vld [vmem:[%s19789_s6 + $0x10] sm:$0xff] }
 0x6ac   :  { %v7342_v44 = vpop.f32.mrf.mxu1  ;;  %14698 = vmatpush3.msra.mxu0 %v9951_v17 }
 0x6ad   :  { %v19360_v12 = vadd.f32 %v7342_v44, %v7025_v51  ;;  %14699 = vmatprep.subr.mxu0 %v14894_v8 }
 0x6ae   :  { %v14215_v28 = vpop.f32.mrf.mxu1  ;;  %14700 = vmatpush3.msra.mxu0 %v9950_v0 }
 0x6af   :  { %v19362_v39 = vadd.f32 %v14215_v28, %v7352_v34  ;;  %v9103_v34 = vld [vmem:[%s19789_s6 + $0x48] sm:$0xff]  ;;  %14701 = vmatprep.subr.mxu0 %v14894_v8  ;;  %v9942_v28 = vld [vmem:[%s19789_s6 + $0x80] sm:$0xff] }
 0x6b0   :  { %v7612_v23 = vpop.f32.mrf.mxu1  ;;  %14733 = vmatpush3.msra.mxu1 %v9103_v34  ;;  %14702 = vmatpush3.msra.mxu0 %v9949_v33 }
 0x6b1   :  { %v19369_v7 = vadd.f32 %v7612_v23, %v7351_v61  ;;  %14734 = vmatprep.subr.mxu1 %v14894_v8  ;;  %14703 = vmatprep.subr.mxu0 %v14894_v8  ;;  %v9095_v23 = vld [vmem:[%s19789_s6 + $0x8] sm:$0xff] }
 0x6b2   :  { %v14218_v48 = vpop.f32.mrf.mxu1  ;;  %14735 = vmatpush3.msra.mxu1 %v9102_v53 }
 0x6b3   :  { %v19378_v63 = vadd.f32 %v14218_v48, %v7354_v4  ;;  %14736 = vmatprep.subr.mxu1 %v14894_v8  ;;  %v9094_v48 = vld [vmem:[%s19789_s6] sm:$0xff] }
 0x6b4   :  { %v7622_v13 = vpop.f32.mrf.mxu1  ;;  %14737 = vmatpush3.msra.mxu1 %v9101_v11 }
 0x6b5   :  { %v19388_v42 = vadd.f32 %v7622_v13, %v7353_v41  ;;  %v9948_v41 = vld [vmem:[%s19789_s6 + $0xb0] sm:$0xff]  ;;  %14738 = vmatprep.subr.mxu1 %v14894_v8 }
 0x6b6   :  { %v14221_v31 = vpop.f32.mrf.mxu1  ;;  %14704 = vmatpush3.msra.mxu0 %v9948_v41  ;;  %14739 = vmatpush3.msra.mxu1 %v9100_v6 }
 0x6b7   :  { %v19398_v60 = vadd.f32 %v14221_v31, %v7356_v29  ;;  %14705 = vmatprep.subr.mxu0 %v14894_v8  ;;  %14740 = vmatprep.subr.mxu1 %v14894_v8 }
 0x6b8   :  { %v7632_v20 = vpop.f32.mrf.mxu1  ;;  %14741 = vmatpush3.msra.mxu1 %v9099_v15 }
 0x6b9   :  { %v19408_v43 = vadd.f32 %v7632_v20, %v7355_v3  ;;  %v9947_v3 = vld [vmem:[%s19789_s6 + $0xa8] sm:$0xff]  ;;  %14742 = vmatprep.subr.mxu1 %v14894_v8 }
 0x6ba   :  { %v14224_v24 = vpop.f32.mrf.mxu1  ;;  %14706 = vmatpush3.msra.mxu0 %v9947_v3  ;;  %14743 = vmatpush3.msra.mxu1 %v9098_v32 }
 0x6bb   :  { %v19419_v45 = vadd.f32 %v14224_v24, %v19342_v57  ;;  %14707 = vmatprep.subr.mxu0 %v14894_v8  ;;  %14744 = vmatprep.subr.mxu1 %v14894_v8 }
 0x6bc   :  { %v7642_v55 = vpop.f32.mrf.mxu1  ;;  %14745 = vmatpush3.msra.mxu1 %v9097_v1 }
 0x6bd   :  { %v19430_v51 = vadd.f32 %v7642_v55, %v19344_v49  ;;  %v9946_v49 = vld [vmem:[%s19789_s6 + $0xa0] sm:$0xff]  ;;  %14746 = vmatprep.subr.mxu1 %v14894_v8 }
 0x6be   :  { %v14227_v2 = vpop.f32.mrf.mxu1  ;;  %14708 = vmatpush3.msra.mxu0 %v9946_v49  ;;  %14747 = vmatpush3.msra.mxu1 %v9096_v37 }
 0x6bf   :  { %v19441_v25 = vadd.f32 %v14227_v2, %v19346_v27  ;;  %14709 = vmatprep.subr.mxu0 %v14894_v8  ;;  %14748 = vmatprep.subr.mxu1 %v14894_v8 }
 0x6c0   :  { %v7652_v61 = vpop.f32.mrf.mxu1  ;;  %14749 = vmatpush3.msra.mxu1 %v9095_v23 }
 0x6c1   :  { %v19452_v4 = vadd.f32 %v7652_v61, %v19348_v10  ;;  %v9945_v10 = vld [vmem:[%s19789_s6 + $0x98] sm:$0xff]  ;;  %14750 = vmatprep.subr.mxu1 %v14894_v8 }
 0x6c2   :  { %v14230_v47 = vpop.f32.mrf.mxu1  ;;  %14710 = vmatpush3.msra.mxu0 %v9945_v10  ;;  %14751 = vmatpush3.msra.mxu1 %v9094_v48 }
 0x6c3   :  { %v19463_v29 = vadd.f32 %v14230_v47, %v19350_v50  ;;  %14711 = vmatprep.subr.mxu0 %v14894_v8  ;;  %14790 = vmatprep.subr.mxu1 %v14894_v8 }
 0x6c4   :  { %v7662_v26 = vpop.f32.mrf.mxu1 }
 0x6c5   :  { %v19474_v57 = vadd.f32 %v7662_v26, %v19352_v22  ;;  %v9944_v22 = vld [vmem:[%s19789_s6 + $0x90] sm:$0xff] }
 0x6c6   :  { %v14233_v38 = vpop.f32.mrf.mxu1  ;;  %14712 = vmatpush3.msra.mxu0 %v9944_v22 }
 0x6c7   :  { %v19485_v27 = vadd.f32 %v14233_v38, %v19354_v19  ;;  %14713 = vmatprep.subr.mxu0 %v14894_v8 }
 0x6c8   :  { %v7672_v59 = vpop.f32.mrf.mxu1 }
 0x6c9   :  { %v7703_v50 = vadd.f32 %v7672_v59, %v19356_v62  ;;  %v9943_v62 = vld [vmem:[%s19789_s6 + $0x88] sm:$0xff] }
 0x6ca   :  { %v14236_v14 = vpop.f32.mrf.mxu1  ;;  %14714 = vmatpush3.msra.mxu0 %v9943_v62 }
 0x6cb   :  { %v7706_v19 = vadd.f32 %v14236_v14, %v19358_v5  ;;  %14715 = vmatprep.subr.mxu0 %v14894_v8 }
 0x6cc   :  { %v7682_v30 = vpop.f32.mrf.mxu1  ;;  %14716 = vmatpush3.msra.mxu0 %v9942_v28 }
 0x6cd   :  { %v7705_v44 = vadd.f32 %v7682_v30, %v19360_v12  ;;  %14755 = vmatprep.subr.mxu0 %v14894_v8 }
 0x6ce   :  { %v14327_v5 = vpop.f32.mrf.mxu1 }
 0x6cf   :  { %v8032_v21 = vadd.f32 %v14327_v5, %v19362_v39 }
 0x6d0   :  { %v7952_v12 = vpop.f32.mrf.mxu1 }
 0x6d1   :  { %v8031_v16 = vadd.f32 %v7952_v12, %v19369_v7 }
 0x6d2   :  { %v14330_v40 = vpop.f32.mrf.mxu1 }
 0x6d3   :  { %v8034_v39 = vadd.f32 %v14330_v40, %v19378_v63 }
 0x6d4   :  { %v7962_v13 = vpop.f32.mrf.mxu1 }
 0x6d5   :  { %v8033_v58 = vadd.f32 %v7962_v13, %v19388_v42 }
 0x6d6   :  { %v14333_v56 = vpop.f32.mrf.mxu1 }
 0x6d7   :  { %v8036_v31 = vadd.f32 %v14333_v56, %v19398_v60 }
 0x6d8   :  { %v7972_v9 = vpop.f32.mrf.mxu1 }
 0x6d9   :  { %v8035_v7 = vadd.f32 %v7972_v9, %v19408_v43 }
 0x6da   :  { %v14336_v36 = vpop.f32.mrf.mxu1 }
 0x6db   :  { %v8038_v20 = vadd.f32 %v14336_v36, %v19419_v45 }
 0x6dc   :  { %v7982_v18 = vpop.f32.mrf.mxu1 }
 0x6dd   :  { %v8037_v52 = vadd.f32 %v7982_v18, %v19430_v51 }
 0x6de   :  { %v14339_v24 = vpop.f32.mrf.mxu1 }
 0x6df   :  { %v8040_v54 = vadd.f32 %v14339_v24, %v19441_v25 }
 0x6e0   :  { %v7992_v35 = vpop.f32.mrf.mxu1 }
 0x6e1   :  { %v8039_v63 = vadd.f32 %v7992_v35, %v19452_v4 }
 0x6e2   :  { %v14342_v55 = vpop.f32.mrf.mxu1 }
 0x6e3   :  { %v8042_v42 = vadd.f32 %v14342_v55, %v19463_v29 }
 0x6e4   :  { %v8002_v17 = vpop.f32.mrf.mxu1 }
 0x6e5   :  { %v8041_v60 = vadd.f32 %v8002_v17, %v19474_v57 }
 0x6e6   :  { %v14345_v46 = vpop.f32.mrf.mxu1 }
 0x6e7   :  { %v19545_v43 = vadd.f32 %v14345_v46, %v19485_v27 }
 0x6e8   :  { %v8012_v45 = vpop.f32.mrf.mxu1 }
 0x6e9   :  { %v19547_v2 = vadd.f32 %v8012_v45, %v7703_v50 }
 0x6ea   :  { %v14348_v51 = vpop.f32.mrf.mxu1 }
 0x6eb   :  { %v8046_v0 = vadd.f32 %v14348_v51, %v7706_v19 }
 0x6ec   :  { %v8022_v34 = vpop.f32.mrf.mxu1 }
 0x6ed   :  { %v8045_v25 = vadd.f32 %v8022_v34, %v7705_v44 }
 0x6ee   :  { %v14439_v61 = vpop.f32.mrf.mxu1 }
 0x6ef   :  { %v8372_v33 = vadd.f32 %v14439_v61, %v8032_v21 }
 0x6f0   :  { %v8292_v53 = vpop.f32.mrf.mxu1 }
 0x6f1   :  { %v8371_v4 = vadd.f32 %v8292_v53, %v8031_v16 }
 0x6f2   :  { %v14442_v47 = vpop.f32.mrf.mxu1 }
 0x6f3   :  { %v8374_v41 = vadd.f32 %v14442_v47, %v8034_v39 }
 0x6f4   :  { %v8302_v11 = vpop.f32.mrf.mxu1 }
 0x6f5   :  { %v8373_v29 = vadd.f32 %v8302_v11, %v8033_v58 }
 0x6f6   :  { %v14445_v26 = vpop.f32.mrf.mxu1 }
 0x6f7   :  { %v8376_v3 = vadd.f32 %v14445_v26, %v8036_v31 }
 0x6f8   :  { %v8312_v6 = vpop.f32.mrf.mxu1 }
 0x6f9   :  { %v8375_v57 = vadd.f32 %v8312_v6, %v8035_v7 }
 0x6fa   :  { %v14448_v38 = vpop.f32.mrf.mxu1 }
 0x6fb   :  { %v8378_v49 = vadd.f32 %v14448_v38, %v8038_v20 }
 0x6fc   :  { %v8322_v15 = vpop.f32.mrf.mxu1 }
 0x6fd   :  { %v8377_v27 = vadd.f32 %v8322_v15, %v8037_v52 }
 0x6fe   :  { %v14451_v59 = vpop.f32.mrf.mxu1 }
 0x6ff   :  { %v19549_v10 = vadd.f32 %v14451_v59, %v8040_v54 }
 0x700   :  { %v8332_v32 = vpop.f32.mrf.mxu1 }
 0x701   :  { %v19551_v50 = vadd.f32 %v8332_v32, %v8039_v63 }
 0x702   :  { %v14454_v14 = vpop.f32.mrf.mxu1 }
 0x703   :  { %v8382_v22 = vadd.f32 %v14454_v14, %v8042_v42 }
 0x704   :  { %v8342_v1 = vpop.f32.mrf.mxu1 }
 0x705   :  { %v8381_v19 = vadd.f32 %v8342_v1, %v8041_v60 }
 0x706   :  { %v14457_v30 = vpop.f32.mrf.mxu1 }
 0x708   :  { %v8352_v62 = vpop.f32.mrf.mxu1 }
 0x709   :  { %v8383_v1 = vadd.f32 %v8352_v62, %v19547_v2  ;;  %v19566_v2 = vld [vmem:[%s19788_s5] ss:$0 sm:$0xff] }
 0x70a   :  { %v14460_v37 = vpop.f32.mrf.mxu1 }
 0x70b   :  { %v19553_v44 = vadd.f32 %v14460_v37, %v8046_v0 }
 0x70c   :  { %v8362_v5 = vpop.f32.mrf.mxu1 }
 0x70d   :  { %v19555_v28 = vadd.f32 %v8362_v5, %v8045_v25 }
 0x70e   :  { %v14551_v23 = vpop.f32.mrf.mxu1 }
 0x70f   :  { %v8712_v45 = vadd.f32 %v14551_v23, %v8372_v33 }
 0x710   :  { %v8632_v21 = vpop.f32.mrf.mxu1 }
 0x711   :  { %v8711_v34 = vadd.f32 %v8632_v21, %v8371_v4  ;;  %v8384_v4 = vadd.f32 %v14457_v30, %v19545_v43 }
 0x712   :  { %v14554_v12 = vpop.f32.mrf.mxu1 }
 0x713   :  { %v8714_v48 = vadd.f32 %v14554_v12, %v8374_v41 }
 0x714   :  { %v8642_v16 = vpop.f32.mrf.mxu1 }
 0x715   :  { %v8713_v40 = vadd.f32 %v8642_v16, %v8373_v29 }
 0x716   :  { %v14557_v39 = vpop.f32.mrf.mxu1 }
 0x717   :  { %v8716_v51 = vadd.f32 %v14557_v39, %v8376_v3 }
 0x718   :  { %v8652_v13 = vpop.f32.mrf.mxu1 }
 0x719   :  { %v8715_v25 = vadd.f32 %v8652_v13, %v8375_v57 }
 0x71a   :  { %v14560_v58 = vpop.f32.mrf.mxu1 }
 0x71b   :  { %v8718_v56 = vadd.f32 %v14560_v58, %v8378_v49 }
 0x71c   :  { %v8662_v31 = vpop.f32.mrf.mxu1 }
 0x71d   :  { %v8717_v9 = vadd.f32 %v8662_v31, %v8377_v27 }
 0x71e   :  { %v14563_v7 = vpop.f32.mrf.mxu1 }
 0x720   :  { %v8672_v36 = vpop.f32.mrf.mxu1 }
 0x721   :  { %v8719_v23 = vadd.f32 %v8672_v36, %v19551_v50 }
 0x722   :  { %v14566_v20 = vpop.f32.mrf.mxu1 }
 0x723   :  { %v8722_v18 = vadd.f32 %v14566_v20, %v8382_v22 }
 0x724   :  { %v8682_v52 = vpop.f32.mrf.mxu1 }
 0x725   :  { %v8721_v24 = vadd.f32 %v8682_v52, %v8381_v19  ;;  %v8720_v19 = vadd.f32 %v14563_v7, %v19549_v10 }
 0x726   :  { %v14569_v54 = vpop.f32.mrf.mxu1 }
 0x727   :  { %v8724_v37 = vadd.f32 %v14569_v54, %v8384_v4  ;;  %v9976_v4 = vld [vmem:[%s19789_s6 + $0x190] sm:$0xff] }
 0x728   :  { %v8692_v35 = vpop.f32.mrf.mxu1 }
 0x729   :  { %v8723_v21 = vadd.f32 %v8692_v35, %v8383_v1  ;;  %v9958_v1 = vld [vmem:[%s19789_s6 + $0x100] sm:$0xff] }
 0x72a   :  { %v14572_v63 = vpop.f32.mrf.mxu1 }
 0x72c   :  { %v8702_v55 = vpop.f32.mrf.mxu1 }
 0x72d   :  { %v8725_v43 = vadd.f32 %v8702_v55, %v19555_v28 }
 0x72e   :  { %v14663_v42 = vpop.f32.mrf.mxu1 }
 0x72f   :  { %v9052_v61 = vadd.f32 %v14663_v42, %v8712_v45  ;;  %v9989_v42 = vld [vmem:[%s19789_s6 + $0x1f8] sm:$0xff]  ;;  %v9987_v45 = vld [vmem:[%s19789_s6 + $0x1e8] sm:$0xff] }
 0x730   :  { %v8972_v17 = vpop.f32.mrf.mxu1 }
 0x731   :  { %v9051_v41 = vadd.f32 %v8972_v17, %v8711_v34  ;;  %v9971_v17 = vld [vmem:[%s19789_s6 + $0x168] sm:$0xff]  ;;  %v9968_v34 = vld [vmem:[%s19789_s6 + $0x150] sm:$0xff] }
 0x732   :  { %v14666_v60 = vpop.f32.mrf.mxu1 }
 0x733   :  { %v9054_v6 = vadd.f32 %v14666_v60, %v8714_v48  ;;  %v9988_v60 = vld [vmem:[%s19789_s6 + $0x1f0] sm:$0xff] }
 0x734   :  { %v8982_v46 = vpop.f32.mrf.mxu1 }
 0x735   :  { %v9053_v27 = vadd.f32 %v8982_v46, %v8713_v40  ;;  %v8726_v40 = vadd.f32 %v14572_v63, %v19553_v44  ;;  %v9970_v46 = vld [vmem:[%s19789_s6 + $0x160] sm:$0xff] }
 0x736   :  { %v14669_v0 = vpop.f32.mrf.mxu1 }
 0x737   :  { %v9056_v53 = vadd.f32 %v14669_v0, %v8716_v51  ;;  %v9969_v51 = vld [vmem:[%s19789_s6 + $0x158] sm:$0xff]  ;;  %v9986_v0 = vld [vmem:[%s19789_s6 + $0x1e0] sm:$0xff] }
 0x738   :  { %v8992_v47 = vpop.f32.mrf.mxu1 }
 0x739   :  { %v9068_v11 = vmax.f32 %v9052_v61, %v9056_v53  ;;  %v9055_v29 = vadd.f32 %v8992_v47, %v8715_v25  ;;  %v9985_v25 = vld [vmem:[%s19789_s6 + $0x1d8] sm:$0xff]  ;;  %v9967_v61 = vld [vmem:[%s19789_s6 + $0x148] sm:$0xff]  ;;  %v9984_v53 = vld [vmem:[%s19789_s6 + $0x1d0] sm:$0xff] }
 0x73a   :  { %v14672_v26 = vpop.f32.mrf.mxu1  ;;  %v9966_v47 = vld [vmem:[%s19789_s6 + $0x140] sm:$0xff] }
 0x73b   :  { %v9067_v38 = vmax.f32 %v9051_v41, %v9055_v29  ;;  %v9058_v49 = vadd.f32 %v14672_v26, %v8718_v56  ;;  %v9983_v41 = vld [vmem:[%s19789_s6 + $0x1c8] sm:$0xff]  ;;  %v9982_v29 = vld [vmem:[%s19789_s6 + $0x1c0] sm:$0xff]  ;;  %v9964_v26 = vld [vmem:[%s19789_s6 + $0x130] sm:$0xff] }
 0x73c   :  { %v9002_v15 = vpop.f32.mrf.mxu1 }
 0x73d   :  { %v9070_v59 = vmax.f32 %v9054_v6, %v9058_v49  ;;  %v9057_v32 = vadd.f32 %v9002_v15, %v8717_v9  ;;  %v9981_v6 = vld [vmem:[%s19789_s6 + $0x1b8] sm:$0xff]  ;;  %v9980_v49 = vld [vmem:[%s19789_s6 + $0x1b0] sm:$0xff]  ;;  %v9962_v15 = vld [vmem:[%s19789_s6 + $0x120] sm:$0xff] }
 0x73e   :  { %v14675_v14 = vpop.f32.mrf.mxu1 }
 0x73f   :  { %v9069_v33 = vmax.f32 %v9053_v27, %v9057_v32  ;;  %v9060_v12 = vadd.f32 %v14675_v14, %v8720_v19  ;;  %v9979_v27 = vld [vmem:[%s19789_s6 + $0x1a8] sm:$0xff]  ;;  %v9978_v32 = vld [vmem:[%s19789_s6 + $0x1a0] sm:$0xff]  ;;  %v9960_v14 = vld [vmem:[%s19789_s6 + $0x110] sm:$0xff] }
 0x740   :  { %v9012_v3 = vpop.f32.mrf.mxu1  ;;  %v9975_v19 = vld [vmem:[%s19789_s6 + $0x188] sm:$0xff] }
 0x741   :  { %v9059_v39 = vadd.f32 %v9012_v3, %v8719_v23 }
 0x742   :  { %v14678_v22 = vpop.f32.mrf.mxu1 }
 0x743   :  { %v9062_v30 = vadd.f32 %v14678_v22, %v8722_v18  ;;  %v9973_v18 = vld [vmem:[%s19789_s6 + $0x178] sm:$0xff]  ;;  %v9959_v22 = vld [vmem:[%s19789_s6 + $0x108] sm:$0xff] }
 0x744   :  { %v9022_v57 = vpop.f32.mrf.mxu1 }
 0x745   :  { %v9061_v31 = vadd.f32 %v9022_v57, %v8721_v24  ;;  %v9972_v24 = vld [vmem:[%s19789_s6 + $0x170] sm:$0xff] }
 0x746   :  { %v14681_v5 = vpop.f32.mrf.mxu1 }
 0x747   :  { %v9064_v48 = vadd.f32 %v14681_v5, %v8724_v37  ;;  %v9974_v5 = vld [vmem:[%s19789_s6 + $0x180] sm:$0xff] }
 0x748   :  { %v9032_v16 = vpop.f32.mrf.mxu1 }
 0x749   :  { %v9072_v13 = vmax.f32 %v9060_v12, %v9064_v48  ;;  %v9063_v58 = vadd.f32 %v9032_v16, %v8723_v21  ;;  %v9467_v21 = vld [vmem:[%s19791_s8 + $0x78] sm:$0xff]  ;;  %v9466_v12 = vld [vmem:[%s19791_s8 + $0x70] sm:$0xff]  ;;  %v9465_v48 = vld [vmem:[%s19791_s8 + $0x68] sm:$0xff] }
 0x74a   :  { %v14684_v10 = vpop.f32.mrf.mxu1  ;;  %v9464_v16 = vld [vmem:[%s19791_s8 + $0x60] sm:$0xff] }
 0x74b   :  { %v9076_v62 = vmax.f32 %v9068_v11, %v9072_v13  ;;  %v9071_v50 = vmax.f32 %v9059_v39, %v9063_v58  ;;  %v9066_v56 = vadd.f32 %v14684_v10, %v8726_v40  ;;  %v9965_v11 = vld [vmem:[%s19789_s6 + $0x138] sm:$0xff]  ;;  %v9462_v39 = vld [vmem:[%s19791_s8 + $0x50] sm:$0xff]  ;;  %v9461_v13 = vld [vmem:[%s19791_s8 + $0x48] sm:$0xff] }
 0x74c   :  { %v9042_v9 = vpop.f32.mrf.mxu1  ;;  %v9463_v40 = vld [vmem:[%s19791_s8 + $0x58] sm:$0xff]  ;;  %v9460_v58 = vld [vmem:[%s19791_s8 + $0x40] sm:$0xff]  ;;  %v9457_v10 = vld [vmem:[%s19791_s8 + $0x28] sm:$0xff] }
 0x74d   :  { %v9087_v7 = vadd.f32 %v19566_v2, %v9076_v62  ;;  %v9075_v44 = vmax.f32 %v9067_v38, %v9071_v50  ;;  %v9074_v36 = vmax.f32 %v9062_v30, %v9066_v56  ;;  %v9065_v20 = vadd.f32 %v9042_v9, %v8725_v43  ;;  %v9963_v38 = vld [vmem:[%s19789_s6 + $0x128] sm:$0xff]  ;;  %v9459_v43 = vld [vmem:[%s19791_s8 + $0x38] sm:$0xff]  ;;  %v9456_v30 = vld [vmem:[%s19791_s8 + $0x20] sm:$0xff] }
 0x74e   :  { %v9455_v62 = vld [vmem:[%s19791_s8 + $0x18] sm:$0xff]  ;;  %v9454_v50 = vld [vmem:[%s19791_s8 + $0x10] sm:$0xff]  ;;  %v9453_v56 = vld [vmem:[%s19791_s8 + $0x8] sm:$0xff] }
 0x74f   :  { %v9091_v52 = vmax.f32 %v9087_v7, 0.0  ;;  %v9086_v28 = vadd.f32 %v19566_v2, %v9075_v44  ;;  %v19570_v54 = vmax.f32 %v9070_v59, %v9074_v36  ;;  %v9073_v35 = vmax.f32 %v9061_v31, %v9065_v20  ;;  %v9961_v59 = vld [vmem:[%s19789_s6 + $0x118] sm:$0xff]  ;;  %v9452_v31 = vld [vmem:[%s19791_s8] sm:$0xff] }
 0x751   :  { %v9090_v63 = vmax.f32 %v9086_v28, 0.0  ;;  %v19575_v55 = vmax.f32 %v9069_v33, %v9073_v35  ;;  %14718 = vmatmul.mubr.f32.vlgmr.msra.gmra.mxu0 %v9091_v52  ;;  %v9977_v33 = vld [vmem:[%s19789_s6 + $0x198] sm:$0xff]  ;;  %v9089_v57 = vadd.f32 %v19566_v2, %v19570_v54 }
 0x752   :  { %14756 = vmatpush3.msra.mxu0 %v9973_v18  ;;  %14787 = vmatprep.mubr.msk.f32.mxu0 %vm14895_vm0, %v14894_v8  ;;  %v9990_v18 = vld [vmem:[%s19790_s7] ss:$0 sm:$0xff] }
 0x753   :  { %14757 = vmatprep.subr.mxu0 %v14894_v8  ;;  %14753 = vmatmul.mubr.f32.vlgmr.msra.gmra.mxu1 %v9090_v63  ;;  %v9088_v3 = vadd.f32 %v19566_v2, %v19575_v55  ;;  %v9093_v23 = vmax.f32 %v9089_v57, 0.0  ;;  %v9458_v2 = vld [vmem:[%s19791_s8 + $0x30] sm:$0xff] }
 0x754   :  { %14758 = vmatpush3.msra.mxu0 %v9972_v24  ;;  %14791 = vmatpush3.msra.mxu1 %v9989_v42  ;;  %v9991_v42 = vld [vmem:[%s19792_s9] ss:$0 sm:$0xff] }
 0x755   :  { %14759 = vmatprep.subr.mxu0 %v14894_v8  ;;  %14792 = vmatprep.subr.mxu1 %v14894_v8  ;;  %v9092_v37 = vmax.f32 %v9088_v3, 0.0 }
 0x756   :  { %14760 = vmatpush3.msra.mxu0 %v9971_v17  ;;  %14793 = vmatpush3.msra.mxu1 %v9988_v60 }
 0x757   :  { %14761 = vmatprep.subr.mxu0 %v14894_v8  ;;  %14794 = vmatprep.subr.mxu1 %v14894_v8 }
 0x758   :  { %14762 = vmatpush3.msra.mxu0 %v9970_v46  ;;  %14795 = vmatpush3.msra.mxu1 %v9987_v45 }
 0x759   :  { %14763 = vmatprep.subr.mxu0 %v14894_v8  ;;  %14796 = vmatprep.subr.mxu1 %v14894_v8 }
 0x75a   :  { %14764 = vmatpush3.msra.mxu0 %v9969_v51  ;;  %14797 = vmatpush3.msra.mxu1 %v9986_v0 }
 0x75b   :  { %14765 = vmatprep.subr.mxu0 %v14894_v8  ;;  %14798 = vmatprep.subr.mxu1 %v14894_v8 }
 0x75c   :  { %14766 = vmatpush3.msra.mxu0 %v9968_v34  ;;  %14799 = vmatpush3.msra.mxu1 %v9985_v25 }
 0x75d   :  { %14767 = vmatprep.subr.mxu0 %v14894_v8  ;;  %14800 = vmatprep.subr.mxu1 %v14894_v8 }
 0x75e   :  { %14768 = vmatpush3.msra.mxu0 %v9967_v61  ;;  %14801 = vmatpush3.msra.mxu1 %v9984_v53 }
 0x75f   :  { %14769 = vmatprep.subr.mxu0 %v14894_v8  ;;  %14802 = vmatprep.subr.mxu1 %v14894_v8 }
 0x760   :  { %14770 = vmatpush3.msra.mxu0 %v9966_v47  ;;  %14803 = vmatpush3.msra.mxu1 %v9983_v41 }
 0x761   :  { %14771 = vmatprep.subr.mxu0 %v14894_v8  ;;  %14804 = vmatprep.subr.mxu1 %v14894_v8 }
 0x762   :  { %14772 = vmatpush3.msra.mxu0 %v9965_v11  ;;  %14805 = vmatpush3.msra.mxu1 %v9982_v29 }
 0x763   :  { %14773 = vmatprep.subr.mxu0 %v14894_v8  ;;  %14806 = vmatprep.subr.mxu1 %v14894_v8 }
 0x764   :  { %14774 = vmatpush3.msra.mxu0 %v9964_v26  ;;  %14807 = vmatpush3.msra.mxu1 %v9981_v6 }
 0x765   :  { %14775 = vmatprep.subr.mxu0 %v14894_v8  ;;  %14808 = vmatprep.subr.mxu1 %v14894_v8 }
 0x766   :  { %14776 = vmatpush3.msra.mxu0 %v9963_v38  ;;  %14809 = vmatpush3.msra.mxu1 %v9980_v49 }
 0x767   :  { %14777 = vmatprep.subr.mxu0 %v14894_v8  ;;  %14810 = vmatprep.subr.mxu1 %v14894_v8 }
 0x768   :  { %14778 = vmatpush3.msra.mxu0 %v9962_v15  ;;  %14811 = vmatpush3.msra.mxu1 %v9979_v27 }
 0x769   :  { %14779 = vmatprep.subr.mxu0 %v14894_v8  ;;  %14812 = vmatprep.subr.mxu1 %v14894_v8 }
 0x76a   :  { %14780 = vmatpush3.msra.mxu0 %v9961_v59  ;;  %14813 = vmatpush3.msra.mxu1 %v9978_v32 }
 0x76b   :  { %14781 = vmatprep.subr.mxu0 %v14894_v8  ;;  %14814 = vmatprep.subr.mxu1 %v14894_v8 }
 0x76c   :  { %14782 = vmatpush3.msra.mxu0 %v9960_v14  ;;  %14815 = vmatpush3.msra.mxu1 %v9977_v33 }
 0x76d   :  { %14783 = vmatprep.subr.mxu0 %v14894_v8  ;;  %14816 = vmatprep.subr.mxu1 %v14894_v8 }
 0x76e   :  { %14784 = vmatpush3.msra.mxu0 %v9959_v22  ;;  %14817 = vmatpush3.msra.mxu1 %v9976_v4 }
 0x76f   :  { %14785 = vmatprep.subr.mxu0 %v14894_v8  ;;  %14818 = vmatprep.subr.mxu1 %v14894_v8 }
 0x770   :  { %14786 = vmatpush3.msra.mxu0 %v9958_v1  ;;  %14819 = vmatpush3.msra.mxu1 %v9975_v19 }
 0x771   :  { %14788 = vmatmul.mubr.f32.vlgmr.msra.gmra.mxu0 %v9092_v37  ;;  %14820 = vmatprep.subr.mxu1 %v14894_v8 }
 0x772   :  { %14821 = vmatpush3.msra.mxu1 %v9974_v5  ;;  %14822 = vmatprep.mubr.msk.f32.mxu1 %vm14895_vm0, %v14894_v8 }
 0x773   :  { %14823 = vmatmul.mubr.f32.vlgmr.msra.gmra.mxu1 %v9093_v23  ;;  %14825 = vmatprep.subr.mxu0 %v14894_v8 }
 0x774   :  { %14857 = vmatprep.mubr.msk.f32.mxu0 %vm14895_vm0, %v14894_v8  ;;  %14826 = vmatpush3.msra.mxu0 %v9467_v21 }
 0x775   :  { %14827 = vmatprep.subr.mxu0 %v14894_v8 }
 0x776   :  { %14828 = vmatpush3.msra.mxu0 %v9466_v12 }
 0x777   :  { %14829 = vmatprep.subr.mxu0 %v14894_v8 }
 0x778   :  { %14830 = vmatpush3.msra.mxu0 %v9465_v48 }
 0x779   :  { %14831 = vmatprep.subr.mxu0 %v14894_v8 }
 0x77a   :  { %14832 = vmatpush3.msra.mxu0 %v9464_v16 }
 0x77b   :  { %14833 = vmatprep.subr.mxu0 %v14894_v8 }
 0x77c   :  { %14834 = vmatpush3.msra.mxu0 %v9463_v40 }
 0x77d   :  { %14835 = vmatprep.subr.mxu0 %v14894_v8 }
 0x77e   :  { %14836 = vmatpush3.msra.mxu0 %v9462_v39 }
 0x77f   :  { %14837 = vmatprep.subr.mxu0 %v14894_v8 }
 0x780   :  { %14838 = vmatpush3.msra.mxu0 %v9461_v13 }
 0x781   :  { %14839 = vmatprep.subr.mxu0 %v14894_v8 }
 0x782   :  { %14840 = vmatpush3.msra.mxu0 %v9460_v58 }
 0x783   :  { %14841 = vmatprep.subr.mxu0 %v14894_v8 }
 0x784   :  { %14842 = vmatpush3.msra.mxu0 %v9459_v43 }
 0x785   :  { %14843 = vmatprep.subr.mxu0 %v14894_v8 }
 0x786   :  { %14844 = vmatpush3.msra.mxu0 %v9458_v2 }
 0x787   :  { %14845 = vmatprep.subr.mxu0 %v14894_v8 }
 0x788   :  { %14846 = vmatpush3.msra.mxu0 %v9457_v10 }
 0x789   :  { %14847 = vmatprep.subr.mxu0 %v14894_v8 }
 0x78a   :  { %14848 = vmatpush3.msra.mxu0 %v9456_v30 }
 0x78b   :  { %14849 = vmatprep.subr.mxu0 %v14894_v8 }
 0x78c   :  { %14850 = vmatpush3.msra.mxu0 %v9455_v62 }
 0x78d   :  { %14851 = vmatprep.subr.mxu0 %v14894_v8 }
 0x78e   :  { %14852 = vmatpush3.msra.mxu0 %v9454_v50 }
 0x78f   :  { %14853 = vmatprep.subr.mxu0 %v14894_v8 }
 0x790   :  { %14854 = vmatpush3.msra.mxu0 %v9453_v56 }
 0x791   :  { %14855 = vmatprep.subr.mxu0 %v14894_v8 }
 0x792   :  { %14856 = vmatpush3.msra.mxu0 %v9452_v31 }
 0x811   :  { %v9193_v9 = vpop.f32.mrf.mxu0 }
 0x813   :  { %v14719_v7 = vpop.f32.mrf.mxu0  ;;  %v9263_v44 = vpop.f32.mrf.mxu1 }
 0x814   :  { %v9264_v20 = vadd.f32 %v9263_v44, %v9193_v9 }
 0x815   :  { %v14754_v36 = vpop.f32.mrf.mxu1 }
 0x831   :  { %v9350_v52 = vpop.f32.mrf.mxu0 }
 0x832   :  { %v9354_v28 = vadd.f32 %v9350_v52, %v9264_v20 }
 0x833   :  { %v14789_v54 = vpop.f32.mrf.mxu0  ;;  %v9438_v35 = vpop.f32.mrf.mxu1 }
 0x834   :  { %v9442_v63 = vadd.f32 %v9438_v35, %v9354_v28 }
 0x835   :  { %v14824_v8 = vpop.f32.mrf.mxu1 }
 0x836   :  { %v9450_v55 = vadd.f32 %v9990_v18, %v9442_v63 }
 0x838   :  { %v9451_v24 = vmax.f32 %v9450_v55, 0.0 }
 0x83a   :  { %14858 = vmatmul.mubr.f32.vlgmr.msra.gmra.mxu0 %v9451_v24 }
 0x8fa   :  { %v9541_v17 = vpop.f32.mrf.mxu0 }
 0x8fb   :  { %v9542_v60 = vadd.f32 %v9991_v42, %v9541_v17 }
 0x8fc   :  { %v14859_v46 = vpop.f32.mrf.mxu0 }
 0x8fd   :  { %v9545_v45 = vsub.f32 0.0, %v9542_v60 }
 0x8ff   :  { %v9546_v51 = vmul.f32 1.442695, %v9545_v45 }
 0x901   :  { %14865 = vpow2.f32 %v9546_v51 }
 0x90e   :  { %v14866_v0 = vpop.eup %14865 }
 0x90f   :  { %v9548_v34 = vadd.f32 1.0, %v14866_v0 }
 0x911   :  { %14867 = vrcp.f32 %v9548_v34 }
 0x91e   :  { %v14868_v25 = vpop.eup %14867 }
 0x91f   :  { %9550 = vst [vmem:[%s19793_s10] sm:$0xff] %v14868_v25 }
 0x920   :  { %9555 = vsyncpa [#allocation3], 1 }

</bundles_post_ra>
